<compile_context>
chip_gen: v7x
topology: tpu7x:2x2x1
jax: 0.10.0
libtpu: 0.0.40
codegen_flags: <defaults>
</compile_context>

<pallas_src>
import functools

import numpy as np
import jax
import jax.numpy as jnp
from jax.experimental import pallas as pl
from jax.experimental.pallas import tpu as pltpu

PATCH_SIZES = (4, 2, 2, 2)          # stage strides -> total strides 4, 8, 16, 32
EMBED_DIMS = (16, 32, 64, 128)
NUM_STAGES = 4
MLP_RATIO = 4
LN_EPS = 1e-6
PAD = 128                           # every channel axis is padded to one full vreg lane width

# packed per-stage operand ordering (flat list passed to pallas_call)
STAGE0_KEYS = ('pe_w', 'wqkv', 'wproj', 'w1', 'w2', 'vec', 'bm1')
STAGEN_KEYS = ('gmat',) + STAGE0_KEYS

# rows of the packed per-stage [13, 128] "vec" operand
VEC_ROWS = ('cmask', 'pe_b', 'pe_g', 'pe_beta', 'g1', 'b1',
            'bq', 'bk', 'bv', 'bproj', 'g2', 'b2', 'bm2')
VEC_I = {k: i for i, k in enumerate(VEC_ROWS)}


# ----------------------------- in-kernel helpers ----------------------------


def _bf16(x):
    return x.astype(jnp.bfloat16)


def _vrow(vec, name):
    i = VEC_I[name]
    return vec[i:i + 1, :]


def _layernorm(x, vec, gk, bk, c_true):
    """LayerNorm over the true (unpadded) channel count; padded lanes stay 0."""
    inv_c = 1.0 / c_true
    cmask = _vrow(vec, 'cmask')
    mu = jnp.sum(x, axis=-1, keepdims=True) * inv_c          # padded lanes are 0
    xc = (x - mu) * cmask
    var = jnp.sum(xc * xc, axis=-1, keepdims=True) * inv_c
    return xc * jax.lax.rsqrt(var + LN_EPS) * _vrow(vec, gk) + _vrow(vec, bk)


def _serial_block(x, w, vec, c_true, n_tok_img, bpg):
    """One CoaT serial block (single head) on tokens x: [bpg*n_tok_img, 128] f32."""
    scale = c_true ** -0.5

    # --- factorized attention (CoaT FactorAttConvRelPosEnc, simplified) ---
    h = _bf16(_layernorm(x, vec, 'g1', 'b1', c_true))
    qkv = jnp.dot(h, w['wqkv'][...], preferred_element_type=jnp.float32)   # fused q/k/v
    q = qkv[:, 0 * PAD:1 * PAD] + _vrow(vec, 'bq')
    k = qkv[:, 1 * PAD:2 * PAD] + _vrow(vec, 'bk')
    v = qkv[:, 2 * PAD:3 * PAD] + _vrow(vec, 'bv')

    # token-axis softmax + (k^T v) factor are per-image -> short static loop over the
    # images folded into this grid step.
    att = []
    for i in range(bpg):
        sl = slice(i * n_tok_img, (i + 1) * n_tok_img)
        ks = jax.nn.softmax(k[sl, :], axis=0)                 # softmax over tokens (f32)
        factor = jax.lax.dot_general(                          # k_softmax^T @ v -> [128,128]
            _bf16(ks), _bf16(v[sl, :]), (((0,), (0,)), ((), ())),
            preferred_element_type=jnp.float32)
        att.append(jnp.dot(_bf16(q[sl, :]), _bf16(factor),
                           preferred_element_type=jnp.float32))
    attn = att[0] if bpg == 1 else jnp.concatenate(att, axis=0)
    # TODO(synk): CoaT ConvRelPosEnc (q * depthwise_conv(v)), ConvPosEnc and cls token omitted.
    out = jnp.dot(_bf16(scale * attn), w['wproj'][...],
                  preferred_element_type=jnp.float32) + _vrow(vec, 'bproj')
    x = x + out

    # --- MLP ---
    h2 = _bf16(_layernorm(x, vec, 'g2', 'b2', c_true))
    m = jnp.dot(h2, w['w1'][...], preferred_element_type=jnp.float32) + w['bm1'][...]
    m = jax.nn.gelu(m, approximate=True)   # TODO(synk): PyTorch nn.GELU default is exact erf.
    m = jnp.dot(_bf16(m), w['w2'][...], preferred_element_type=jnp.float32) + _vrow(vec, 'bm2')
    return x + m


def _patch_embed(tok, w, vec, c_true, r_out):
    """2x2/stride-2 patch embed, fully on the MXU in 2 matmuls.

    gathered = G @ tok   with G a stacked block-diagonal 0/1 selection matrix
    y        = [g0|g1|g2|g3] @ [W0;W1;W2;W3]   (lane-concat LHS, row-stacked RHS)
    """
    gathered = jnp.dot(w['gmat'][...], _bf16(tok),
                       preferred_element_type=jnp.float32)        # [4*r_out, 128]
    g_cat = jnp.concatenate(
        [_bf16(gathered[a * r_out:(a + 1) * r_out, :]) for a in range(4)], axis=1)
    y = jnp.dot(g_cat, w['pe_w'][...], preferred_element_type=jnp.float32)
    y = y + _vrow(vec, 'pe_b')
    return _layernorm(y, vec, 'pe_g', 'pe_beta', c_true)


def _make_kernel(bpg, n_img):
    """Whole 4-stage forward for `bpg` images folded into the token axis."""
    n_weight_refs = len(STAGE0_KEYS) + (NUM_STAGES - 1) * len(STAGEN_KEYS)

    def kernel(patches_ref, *refs):
        w_refs = refs[:n_weight_refs]
        out_refs = refs[n_weight_refs:]

        # re-bundle the flat weight refs into per-stage dicts
        stages, idx = [], 0
        for s in range(NUM_STAGES):
            keys = STAGE0_KEYS if s == 0 else STAGEN_KEYS
            stages.append({k: w_refs[idx + i] for i, k in enumerate(keys)})
            idx += len(keys)

        # ---- stage 1: dense patch embed (one matmul) + LN + serial block ----
        w0 = stages[0]
        vec0 = w0['vec'][...]
        y = jnp.dot(patches_ref[0], w0['pe_w'][...],
                    preferred_element_type=jnp.float32) + _vrow(vec0, 'pe_b')
        tok = _layernorm(y, vec0, 'pe_g', 'pe_beta', EMBED_DIMS[0])
        tok = _serial_block(tok, w0, vec0, EMBED_DIMS[0], n_img[0], bpg)
        out_refs[0][0] = tok                                   # lane-dense (R, 128) store

        # ---- stages 2..4: in-kernel 2x2/stride-2 patch embed + serial block ----
        for s in range(1, NUM_STAGES):
            w = stages[s]
            vec = w['vec'][...]
            r_out = bpg * n_img[s]
            tok = _patch_embed(tok, w, vec, EMBED_DIMS[s], r_out)
            tok = _serial_block(tok, w, vec, EMBED_DIMS[s], n_img[s], bpg)
            out_refs[s][0] = tok

    return kernel


# ----------------------------- wrappers ------------------------------------


def patchify_nhwc(x_nchw, patch):
    """NCHW input -> [B, Hs*Ws, patch*patch*C] channels-last patches (one-time XLA prep)."""
    B, C, H, W = x_nchw.shape
    Hs, Ws = H // patch, W // patch
    x = jnp.transpose(x_nchw, (0, 2, 3, 1))                           # NHWC
    p = x.reshape(B, Hs, patch, Ws, patch, C)
    p = p.transpose(0, 1, 3, 2, 4, 5)                                 # [B, Hs, Ws, ph, pw, C]
    return p.reshape(B, Hs * Ws, patch * patch * C), (Hs, Ws)


def _gather_mat(h, w, bpg):
    """Stacked block-diagonal 0/1 selection matrix for the 2x2/stride-2 patchify.

    Shape [4 * bpg * (h//2)*(w//2), bpg * h*w], bf16.  Built with numpy so it becomes
    a compile-time constant under jit.
    """
    ho, wo = h // 2, w // 2
    n_in, n_out = h * w, ho * wo
    ii, jj = np.meshgrid(np.arange(ho), np.arange(wo), indexing='ij')
    blocks = []
    for a in range(2):
        for b in range(2):
            src = ((2 * ii + a) * w + (2 * jj + b)).reshape(-1)
            s = np.zeros((n_out, n_in), np.float32)
            s[np.arange(n_out), src] = 1.0
            blocks.append(np.kron(np.eye(bpg, dtype=np.float32), s))
    return jnp.asarray(np.concatenate(blocks, axis=0), dtype=jnp.bfloat16)


def init_params(key, in_chans=3):
    """True-size (unpadded) parameters for the synthetic 4-stage CoaT-lite backbone."""
    f32 = jnp.float32
    params = []
    for s, C in enumerate(EMBED_DIMS):
        ks = jax.random.split(jax.random.fold_in(key, s), 7)
        hid = C * MLP_RATIO
        c_prev = in_chans if s == 0 else EMBED_DIMS[s - 1]
        if s == 0:
            K = in_chans * PATCH_SIZES[0] ** 2
            pe_w = 0.02 * jax.random.normal(ks[0], (K, C), f32)
        else:
            pe_w = 0.02 * jax.random.normal(ks[0], (4, c_prev, C), f32)
        params.append(dict(
            pe_w=pe_w,
            pe_b=jnp.zeros((C,), f32), pe_g=jnp.ones((C,), f32), pe_beta=jnp.zeros((C,), f32),
            g1=jnp.ones((C,), f32), b1=jnp.zeros((C,), f32),
            wq=0.02 * jax.random.normal(ks[1], (C, C), f32),
            wk=0.02 * jax.random.normal(ks[2], (C, C), f32),
            wv=0.02 * jax.random.normal(ks[3], (C, C), f32),
            bq=jnp.zeros((C,), f32), bk=jnp.zeros((C,), f32), bv=jnp.zeros((C,), f32),
            wproj=0.02 * jax.random.normal(ks[4], (C, C), f32),
            bproj=jnp.zeros((C,), f32),
            g2=jnp.ones((C,), f32), b2=jnp.zeros((C,), f32),
            w1=0.02 * jax.random.normal(ks[5], (C, hid), f32),
            bm1=jnp.zeros((hid,), f32),
            w2=0.02 * jax.random.normal(ks[6], (hid, C), f32),
            bm2=jnp.zeros((C,), f32),
        ))
    return params


def _pack_stage(stage, s):
    """Pad to 128 channels, fuse q/k/v, row-stack patchify sub-weights, pack small vectors."""
    C = EMBED_DIMS[s]
    hid = C * MLP_RATIO
    hid_p = ((hid + 127) // 128) * 128
    f32, bf16 = jnp.float32, jnp.bfloat16

    def pad2(a, r, c):
        return jnp.pad(a, ((0, r - a.shape[0]), (0, c - a.shape[1])))

    def vrow(name):
        if name == 'cmask':
            return (jnp.arange(PAD) < C).astype(f32)
        return jnp.pad(stage[name].astype(f32), (0, PAD - C))

    vec = jnp.stack([vrow(n) for n in VEC_ROWS], axis=0)                       # [13,128] f32
    if s == 0:
        pe_w = pad2(stage['pe_w'].astype(bf16), PAD, PAD)                      # [128,128]
    else:
        pe_w = jnp.concatenate([pad2(stage['pe_w'][a].astype(bf16), PAD, PAD)
                                for a in range(4)], axis=0)                    # [512,128]
    wqkv = jnp.concatenate([pad2(stage[n].astype(bf16), PAD, PAD)
                            for n in ('wq', 'wk', 'wv')], axis=1)              # [128,384]
    return dict(
        pe_w=pe_w, wqkv=wqkv,
        wproj=pad2(stage['wproj'].astype(bf16), PAD, PAD),
        w1=pad2(stage['w1'].astype(bf16), PAD, hid_p),
        w2=pad2(stage['w2'].astype(bf16), hid_p, PAD),
        vec=vec,
        bm1=jnp.pad(stage['bm1'].astype(f32), (0, hid_p - hid)).reshape(1, hid_p),
    )


def coat_flat_forward(x, params, grid_steps=None):
    """Returns [x1_nocls, x2_nocls, x3_nocls, x4_nocls], each NCHW."""
    B, _, H, W = x.shape
    assert H % 32 == 0 and W % 32 == 0, "input spatial dims must be divisible by 32"
    if grid_steps is None:
        grid_steps = 2 if (B >= 2 and B % 2 == 0) else 1      # keep both v7x TCs busy
    assert B % grid_steps == 0
    bpg = B // grid_steps                                     # images folded per grid step

    patches, (H1, W1) = patchify_nhwc(x, PATCH_SIZES[0])      # [B, N1, 48]
    n1 = H1 * W1
    patches = jnp.pad(patches, ((0, 0), (0, 0), (0, PAD - patches.shape[-1])))
    patches = patches.astype(jnp.bfloat16).reshape(grid_steps, bpg * n1, PAD)

    # per-stage per-image token counts / spatial sizes
    hw = [(H1, W1)]
    for _ in range(1, NUM_STAGES):
        hw.append((hw[-1][0] // 2, hw[-1][1] // 2))
    n_img = [h * w for h, w in hw]

    # flatten packed weights; every weight is a full, grid-constant block -> DMA'd once.
    flat, w_specs = [], []

    def add(a):
        flat.append(a)
        w_specs.append(pl.BlockSpec(a.shape, lambda g: (0, 0)))

    for s in range(NUM_STAGES):
        packed = _pack_stage(params[s], s)
        if s > 0:
            add(_gather_mat(hw[s - 1][0], hw[s - 1][1], bpg))
        for k in STAGE0_KEYS:
            add(packed[k])

    patches_spec = pl.BlockSpec((1, bpg * n1, PAD), lambda g: (g, 0, 0))
    out_shape = tuple(jax.ShapeDtypeStruct((grid_steps, bpg * n, PAD), jnp.float32)
                      for n in n_img)
    out_specs = tuple(pl.BlockSpec((1, bpg * n, PAD), lambda g: (g, 0, 0)) for n in n_img)

    toks = pl.pallas_call(
        _make_kernel(bpg, tuple(n_img)),
        out_shape=out_shape,
        grid=(grid_steps,),
        in_specs=[patches_spec] + w_specs,
        out_specs=out_specs,
        compiler_params=pltpu.CompilerParams(dimension_semantics=("parallel",)),
    )(patches, *flat)

    # epilogue: slice true channels off the lane-dense slabs, build NCHW once.
    outs = []
    for s, t in enumerate(toks):
        C = EMBED_DIMS[s]
        h_, w_ = hw[s]
        t = t.reshape(B, n_img[s], PAD)[:, :, :C]
        outs.append(t.reshape(B, h_, w_, C).transpose(0, 3, 1, 2))
    return outs


if __name__ == "__main__":
    key = jax.random.PRNGKey(0)
    x = jax.random.normal(jax.random.fold_in(key, 123), (2, 3, 64, 64), jnp.float32)
    params = init_params(key, in_chans=3)

    # grid_steps=2: one image per step (both TensorCores busy on v7x)
    fwd2 = jax.jit(functools.partial(coat_flat_forward, grid_steps=2))
    outs = jax.block_until_ready(fwd2(x, params))
    expected = [(2, 16, 16, 16), (2, 32, 8, 8), (2, 64, 4, 4), (2, 128, 2, 2)]
    assert [tuple(o.shape) for o in outs] == expected, [o.shape for o in outs]
    assert all(bool(jnp.all(jnp.isfinite(o))) for o in outs)

    # grid_steps=1: whole batch folded into the token axis (best on single-TC v5e/v6e)
    # must produce the same features.
    fwd1 = jax.jit(functools.partial(coat_flat_forward, grid_steps=1))
    outs1 = jax.block_until_ready(fwd1(x, params))
    for a, b in zip(outs, outs1):
        assert bool(jnp.allclose(a, b, atol=5e-2, rtol=5e-2)), \
            float(jnp.max(jnp.abs(a - b)))

    print("KERNEL_OK")
</pallas_src>

<mosaic_0001>
module attributes {stable_mosaic.version = 11 : i64} {
  func.func @kernel(%arg0: i32, %arg1: memref<1x256x128xbf16, #tpu.memory_space<vmem>>, %arg2: memref<128x128xbf16, #tpu.memory_space<vmem>>, %arg3: memref<128x384xbf16, #tpu.memory_space<vmem>>, %arg4: memref<128x128xbf16, #tpu.memory_space<vmem>>, %arg5: memref<128x128xbf16, #tpu.memory_space<vmem>>, %arg6: memref<128x128xbf16, #tpu.memory_space<vmem>>, %arg7: memref<13x128xf32, #tpu.memory_space<vmem>>, %arg8: memref<1x128xf32, #tpu.memory_space<vmem>>, %arg9: memref<256x256xbf16, #tpu.memory_space<vmem>>, %arg10: memref<512x128xbf16, #tpu.memory_space<vmem>>, %arg11: memref<128x384xbf16, #tpu.memory_space<vmem>>, %arg12: memref<128x128xbf16, #tpu.memory_space<vmem>>, %arg13: memref<128x128xbf16, #tpu.memory_space<vmem>>, %arg14: memref<128x128xbf16, #tpu.memory_space<vmem>>, %arg15: memref<13x128xf32, #tpu.memory_space<vmem>>, %arg16: memref<1x128xf32, #tpu.memory_space<vmem>>, %arg17: memref<64x64xbf16, #tpu.memory_space<vmem>>, %arg18: memref<512x128xbf16, #tpu.memory_space<vmem>>, %arg19: memref<128x384xbf16, #tpu.memory_space<vmem>>, %arg20: memref<128x128xbf16, #tpu.memory_space<vmem>>, %arg21: memref<128x256xbf16, #tpu.memory_space<vmem>>, %arg22: memref<256x128xbf16, #tpu.memory_space<vmem>>, %arg23: memref<13x128xf32, #tpu.memory_space<vmem>>, %arg24: memref<1x256xf32, #tpu.memory_space<vmem>>, %arg25: memref<16x16xbf16, #tpu.memory_space<vmem>>, %arg26: memref<512x128xbf16, #tpu.memory_space<vmem>>, %arg27: memref<128x384xbf16, #tpu.memory_space<vmem>>, %arg28: memref<128x128xbf16, #tpu.memory_space<vmem>>, %arg29: memref<128x512xbf16, #tpu.memory_space<vmem>>, %arg30: memref<512x128xbf16, #tpu.memory_space<vmem>>, %arg31: memref<13x128xf32, #tpu.memory_space<vmem>>, %arg32: memref<1x512xf32, #tpu.memory_space<vmem>>, %arg33: memref<1x256x128xf32, #tpu.memory_space<vmem>>, %arg34: memref<1x64x128xf32, #tpu.memory_space<vmem>>, %arg35: memref<1x16x128xf32, #tpu.memory_space<vmem>>, %arg36: memref<1x4x128xf32, #tpu.memory_space<vmem>>) attributes {dimension_semantics = [#tpu.dimension_semantics<parallel>], iteration_bounds = array<i64: 2>, scalar_prefetch = 0 : i64, scratch_operands = 0 : i64, tpu.core_type = #tpu.core_type<tc>, window_params = [{transform_indices = @transform_0, window_bounds = array<i64: 1, 256, 128>}, {pipeline_mode = #tpu.pipeline_mode<synchronous>, transform_indices = @transform_1, window_bounds = array<i64: 128, 128>}, {pipeline_mode = #tpu.pipeline_mode<synchronous>, transform_indices = @transform_2, window_bounds = array<i64: 128, 384>}, {pipeline_mode = #tpu.pipeline_mode<synchronous>, transform_indices = @transform_3, window_bounds = array<i64: 128, 128>}, {pipeline_mode = #tpu.pipeline_mode<synchronous>, transform_indices = @transform_4, window_bounds = array<i64: 128, 128>}, {pipeline_mode = #tpu.pipeline_mode<synchronous>, transform_indices = @transform_5, window_bounds = array<i64: 128, 128>}, {pipeline_mode = #tpu.pipeline_mode<synchronous>, transform_indices = @transform_6, window_bounds = array<i64: 13, 128>}, {pipeline_mode = #tpu.pipeline_mode<synchronous>, transform_indices = @transform_7, window_bounds = array<i64: 1, 128>}, {pipeline_mode = #tpu.pipeline_mode<synchronous>, transform_indices = @transform_8, window_bounds = array<i64: 256, 256>}, {pipeline_mode = #tpu.pipeline_mode<synchronous>, transform_indices = @transform_9, window_bounds = array<i64: 512, 128>}, {pipeline_mode = #tpu.pipeline_mode<synchronous>, transform_indices = @transform_10, window_bounds = array<i64: 128, 384>}, {pipeline_mode = #tpu.pipeline_mode<synchronous>, transform_indices = @transform_11, window_bounds = array<i64: 128, 128>}, {pipeline_mode = #tpu.pipeline_mode<synchronous>, transform_indices = @transform_12, window_bounds = array<i64: 128, 128>}, {pipeline_mode = #tpu.pipeline_mode<synchronous>, transform_indices = @transform_13, window_bounds = array<i64: 128, 128>}, {pipeline_mode = #tpu.pipeline_mode<synchronous>, transform_indices = @transform_14, window_bounds = array<i64: 13, 128>}, {pipeline_mode = #tpu.pipeline_mode<synchronous>, transform_indices = @transform_15, window_bounds = array<i64: 1, 128>}, {pipeline_mode = #tpu.pipeline_mode<synchronous>, transform_indices = @transform_16, window_bounds = array<i64: 64, 64>}, {pipeline_mode = #tpu.pipeline_mode<synchronous>, transform_indices = @transform_17, window_bounds = array<i64: 512, 128>}, {pipeline_mode = #tpu.pipeline_mode<synchronous>, transform_indices = @transform_18, window_bounds = array<i64: 128, 384>}, {pipeline_mode = #tpu.pipeline_mode<synchronous>, transform_indices = @transform_19, window_bounds = array<i64: 128, 128>}, {pipeline_mode = #tpu.pipeline_mode<synchronous>, transform_indices = @transform_20, window_bounds = array<i64: 128, 256>}, {pipeline_mode = #tpu.pipeline_mode<synchronous>, transform_indices = @transform_21, window_bounds = array<i64: 256, 128>}, {pipeline_mode = #tpu.pipeline_mode<synchronous>, transform_indices = @transform_22, window_bounds = array<i64: 13, 128>}, {pipeline_mode = #tpu.pipeline_mode<synchronous>, transform_indices = @transform_23, window_bounds = array<i64: 1, 256>}, {pipeline_mode = #tpu.pipeline_mode<synchronous>, transform_indices = @transform_24, window_bounds = array<i64: 16, 16>}, {pipeline_mode = #tpu.pipeline_mode<synchronous>, transform_indices = @transform_25, window_bounds = array<i64: 512, 128>}, {pipeline_mode = #tpu.pipeline_mode<synchronous>, transform_indices = @transform_26, window_bounds = array<i64: 128, 384>}, {pipeline_mode = #tpu.pipeline_mode<synchronous>, transform_indices = @transform_27, window_bounds = array<i64: 128, 128>}, {pipeline_mode = #tpu.pipeline_mode<synchronous>, transform_indices = @transform_28, window_bounds = array<i64: 128, 512>}, {pipeline_mode = #tpu.pipeline_mode<synchronous>, transform_indices = @transform_29, window_bounds = array<i64: 512, 128>}, {pipeline_mode = #tpu.pipeline_mode<synchronous>, transform_indices = @transform_30, window_bounds = array<i64: 13, 128>}, {pipeline_mode = #tpu.pipeline_mode<synchronous>, transform_indices = @transform_31, window_bounds = array<i64: 1, 512>}, {transform_indices = @transform_32, window_bounds = array<i64: 1, 256, 128>}, {transform_indices = @transform_33, window_bounds = array<i64: 1, 64, 128>}, {transform_indices = @transform_34, window_bounds = array<i64: 1, 16, 128>}, {transform_indices = @transform_35, window_bounds = array<i64: 1, 4, 128>}]} {
    %c0 = arith.constant 0 : index
    %c0_0 = arith.constant 0 : index
    %0 = vector.load %arg7[%c0, %c0_0] : memref<13x128xf32, #tpu.memory_space<vmem>>, vector<13x128xf32>
    %c0_1 = arith.constant 0 : index
    %c0_2 = arith.constant 0 : index
    %c0_3 = arith.constant 0 : index
    %1 = vector.load %arg1[%c0_1, %c0_2, %c0_3] : memref<1x256x128xbf16, #tpu.memory_space<vmem>>, vector<1x256x128xbf16>
    %2 = vector.shape_cast %1 : vector<1x256x128xbf16> to vector<256x128xbf16>
    %c0_4 = arith.constant 0 : index
    %c0_5 = arith.constant 0 : index
    %3 = vector.load %arg2[%c0_4, %c0_5] : memref<128x128xbf16, #tpu.memory_space<vmem>>, vector<128x128xbf16>
    %cst = arith.constant dense<0.000000e+00> : vector<256x128xf32>
    %4 = tpu.matmul %2, %3, %cst {dimension_numbers = #tpu.dot_dimension_numbers<[1], [0], [0], [1], [0, 0, 1, 1], [], []>} : vector<256x128xbf16>, vector<128x128xbf16>, vector<256x128xf32> -> vector<256x128xf32>
    %5 = vector.extract_strided_slice %0 {offsets = [1, 0], sizes = [1, 128], strides = [1, 1]} : vector<13x128xf32> to vector<1x128xf32>
    %6 = vector.broadcast %5 : vector<1x128xf32> to vector<256x128xf32>
    %7 = arith.addf %4, %6 : vector<256x128xf32>
    %8 = vector.extract_strided_slice %0 {offsets = [0, 0], sizes = [1, 128], strides = [1, 1]} : vector<13x128xf32> to vector<1x128xf32>
    %cst_6 = arith.constant dense<0.000000e+00> : vector<256xf32>
    %9 = vector.multi_reduction <add>, %7, %cst_6 [1] : vector<256x128xf32> to vector<256xf32>
    %10 = vector.shape_cast %9 : vector<256xf32> to vector<256x1xf32>
    %cst_7 = arith.constant 6.250000e-02 : f32
    %11 = vector.broadcast %cst_7 : f32 to vector<256x1xf32>
    %12 = arith.mulf %10, %11 : vector<256x1xf32>
    %13 = vector.broadcast %12 : vector<256x1xf32> to vector<256x128xf32>
    %14 = arith.subf %7, %13 : vector<256x128xf32>
    %15 = vector.broadcast %8 : vector<1x128xf32> to vector<256x128xf32>
    %16 = arith.mulf %14, %15 : vector<256x128xf32>
    %17 = arith.mulf %16, %16 : vector<256x128xf32>
    %cst_8 = arith.constant dense<0.000000e+00> : vector<256xf32>
    %18 = vector.multi_reduction <add>, %17, %cst_8 [1] : vector<256x128xf32> to vector<256xf32>
    %19 = vector.shape_cast %18 : vector<256xf32> to vector<256x1xf32>
    %cst_9 = arith.constant 6.250000e-02 : f32
    %20 = vector.broadcast %cst_9 : f32 to vector<256x1xf32>
    %21 = arith.mulf %19, %20 : vector<256x1xf32>
    %cst_10 = arith.constant 9.99999997E-7 : f32
    %22 = vector.broadcast %cst_10 : f32 to vector<256x1xf32>
    %23 = arith.addf %21, %22 : vector<256x1xf32>
    %24 = math.rsqrt %23 : vector<256x1xf32>
    %25 = vector.broadcast %24 : vector<256x1xf32> to vector<256x128xf32>
    %26 = arith.mulf %16, %25 : vector<256x128xf32>
    %27 = vector.extract_strided_slice %0 {offsets = [2, 0], sizes = [1, 128], strides = [1, 1]} : vector<13x128xf32> to vector<1x128xf32>
    %28 = vector.broadcast %27 : vector<1x128xf32> to vector<256x128xf32>
    %29 = arith.mulf %26, %28 : vector<256x128xf32>
    %30 = vector.extract_strided_slice %0 {offsets = [3, 0], sizes = [1, 128], strides = [1, 1]} : vector<13x128xf32> to vector<1x128xf32>
    %31 = vector.broadcast %30 : vector<1x128xf32> to vector<256x128xf32>
    %32 = arith.addf %29, %31 : vector<256x128xf32>
    %33 = vector.extract_strided_slice %0 {offsets = [0, 0], sizes = [1, 128], strides = [1, 1]} : vector<13x128xf32> to vector<1x128xf32>
    %cst_11 = arith.constant dense<0.000000e+00> : vector<256xf32>
    %34 = vector.multi_reduction <add>, %32, %cst_11 [1] : vector<256x128xf32> to vector<256xf32>
    %35 = vector.shape_cast %34 : vector<256xf32> to vector<256x1xf32>
    %cst_12 = arith.constant 6.250000e-02 : f32
    %36 = vector.broadcast %cst_12 : f32 to vector<256x1xf32>
    %37 = arith.mulf %35, %36 : vector<256x1xf32>
    %38 = vector.broadcast %37 : vector<256x1xf32> to vector<256x128xf32>
    %39 = arith.subf %32, %38 : vector<256x128xf32>
    %40 = vector.broadcast %33 : vector<1x128xf32> to vector<256x128xf32>
    %41 = arith.mulf %39, %40 : vector<256x128xf32>
    %42 = arith.mulf %41, %41 : vector<256x128xf32>
    %cst_13 = arith.constant dense<0.000000e+00> : vector<256xf32>
    %43 = vector.multi_reduction <add>, %42, %cst_13 [1] : vector<256x128xf32> to vector<256xf32>
    %44 = vector.shape_cast %43 : vector<256xf32> to vector<256x1xf32>
    %cst_14 = arith.constant 6.250000e-02 : f32
    %45 = vector.broadcast %cst_14 : f32 to vector<256x1xf32>
    %46 = arith.mulf %44, %45 : vector<256x1xf32>
    %cst_15 = arith.constant 9.99999997E-7 : f32
    %47 = vector.broadcast %cst_15 : f32 to vector<256x1xf32>
    %48 = arith.addf %46, %47 : vector<256x1xf32>
    %49 = math.rsqrt %48 : vector<256x1xf32>
    %50 = vector.broadcast %49 : vector<256x1xf32> to vector<256x128xf32>
    %51 = arith.mulf %41, %50 : vector<256x128xf32>
    %52 = vector.extract_strided_slice %0 {offsets = [4, 0], sizes = [1, 128], strides = [1, 1]} : vector<13x128xf32> to vector<1x128xf32>
    %53 = vector.broadcast %52 : vector<1x128xf32> to vector<256x128xf32>
    %54 = arith.mulf %51, %53 : vector<256x128xf32>
    %55 = vector.extract_strided_slice %0 {offsets = [5, 0], sizes = [1, 128], strides = [1, 1]} : vector<13x128xf32> to vector<1x128xf32>
    %56 = vector.broadcast %55 : vector<1x128xf32> to vector<256x128xf32>
    %57 = arith.addf %54, %56 : vector<256x128xf32>
    %58 = arith.truncf %57 : vector<256x128xf32> to vector<256x128xbf16>
    %c0_16 = arith.constant 0 : index
    %c0_17 = arith.constant 0 : index
    %59 = vector.load %arg3[%c0_16, %c0_17] : memref<128x384xbf16, #tpu.memory_space<vmem>>, vector<128x384xbf16>
    %cst_18 = arith.constant dense<0.000000e+00> : vector<256x384xf32>
    %60 = tpu.matmul %58, %59, %cst_18 {dimension_numbers = #tpu.dot_dimension_numbers<[1], [0], [0], [1], [0, 0, 1, 1], [], []>} : vector<256x128xbf16>, vector<128x384xbf16>, vector<256x384xf32> -> vector<256x384xf32>
    %61 = vector.extract_strided_slice %60 {offsets = [0, 0], sizes = [256, 128], strides = [1, 1]} : vector<256x384xf32> to vector<256x128xf32>
    %62 = vector.extract_strided_slice %0 {offsets = [6, 0], sizes = [1, 128], strides = [1, 1]} : vector<13x128xf32> to vector<1x128xf32>
    %63 = vector.broadcast %62 : vector<1x128xf32> to vector<256x128xf32>
    %64 = arith.addf %61, %63 : vector<256x128xf32>
    %65 = vector.extract_strided_slice %60 {offsets = [0, 128], sizes = [256, 128], strides = [1, 1]} : vector<256x384xf32> to vector<256x128xf32>
    %66 = vector.extract_strided_slice %0 {offsets = [7, 0], sizes = [1, 128], strides = [1, 1]} : vector<13x128xf32> to vector<1x128xf32>
    %67 = vector.broadcast %66 : vector<1x128xf32> to vector<256x128xf32>
    %68 = arith.addf %65, %67 : vector<256x128xf32>
    %69 = vector.extract_strided_slice %60 {offsets = [0, 256], sizes = [256, 128], strides = [1, 1]} : vector<256x384xf32> to vector<256x128xf32>
    %70 = vector.extract_strided_slice %0 {offsets = [8, 0], sizes = [1, 128], strides = [1, 1]} : vector<13x128xf32> to vector<1x128xf32>
    %71 = vector.broadcast %70 : vector<1x128xf32> to vector<256x128xf32>
    %72 = arith.addf %69, %71 : vector<256x128xf32>
    %cst_19 = arith.constant dense<0xFF800000> : vector<128xf32>
    %73 = vector.multi_reduction <maximumf>, %68, %cst_19 [0] : vector<256x128xf32> to vector<128xf32>
    %cst_20 = arith.constant 0xFF800000 : f32
    %74 = vector.broadcast %cst_20 : f32 to vector<128xf32>
    %75 = arith.maximumf %74, %73 : vector<128xf32>
    %76 = vector.shape_cast %75 : vector<128xf32> to vector<1x128xf32>
    %77 = vector.broadcast %76 : vector<1x128xf32> to vector<256x128xf32>
    %78 = arith.subf %68, %77 : vector<256x128xf32>
    %79 = math.exp %78 : vector<256x128xf32>
    %cst_21 = arith.constant dense<0.000000e+00> : vector<128xf32>
    %80 = vector.multi_reduction <add>, %79, %cst_21 [0] : vector<256x128xf32> to vector<128xf32>
    %81 = vector.shape_cast %80 : vector<128xf32> to vector<1x128xf32>
    %82 = vector.broadcast %81 : vector<1x128xf32> to vector<256x128xf32>
    %83 = arith.divf %79, %82 : vector<256x128xf32>
    %84 = arith.truncf %83 : vector<256x128xf32> to vector<256x128xbf16>
    %85 = arith.truncf %72 : vector<256x128xf32> to vector<256x128xbf16>
    %cst_22 = arith.constant dense<0.000000e+00> : vector<128x128xf32>
    %86 = tpu.matmul %84, %85, %cst_22 {dimension_numbers = #tpu.dot_dimension_numbers<[0], [0], [1], [1], [0, 1, 1, 1], [], []>} : vector<256x128xbf16>, vector<256x128xbf16>, vector<128x128xf32> -> vector<128x128xf32>
    %87 = arith.truncf %64 : vector<256x128xf32> to vector<256x128xbf16>
    %88 = arith.truncf %86 : vector<128x128xf32> to vector<128x128xbf16>
    %cst_23 = arith.constant dense<0.000000e+00> : vector<256x128xf32>
    %89 = tpu.matmul %87, %88, %cst_23 {dimension_numbers = #tpu.dot_dimension_numbers<[1], [0], [0], [1], [0, 0, 1, 1], [], []>} : vector<256x128xbf16>, vector<128x128xbf16>, vector<256x128xf32> -> vector<256x128xf32>
    %cst_24 = arith.constant 2.500000e-01 : f32
    %90 = vector.broadcast %cst_24 : f32 to vector<256x128xf32>
    %91 = arith.mulf %90, %89 : vector<256x128xf32>
    %92 = arith.truncf %91 : vector<256x128xf32> to vector<256x128xbf16>
    %c0_25 = arith.constant 0 : index
    %c0_26 = arith.constant 0 : index
    %93 = vector.load %arg4[%c0_25, %c0_26] : memref<128x128xbf16, #tpu.memory_space<vmem>>, vector<128x128xbf16>
    %cst_27 = arith.constant dense<0.000000e+00> : vector<256x128xf32>
    %94 = tpu.matmul %92, %93, %cst_27 {dimension_numbers = #tpu.dot_dimension_numbers<[1], [0], [0], [1], [0, 0, 1, 1], [], []>} : vector<256x128xbf16>, vector<128x128xbf16>, vector<256x128xf32> -> vector<256x128xf32>
    %95 = vector.extract_strided_slice %0 {offsets = [9, 0], sizes = [1, 128], strides = [1, 1]} : vector<13x128xf32> to vector<1x128xf32>
    %96 = vector.broadcast %95 : vector<1x128xf32> to vector<256x128xf32>
    %97 = arith.addf %94, %96 : vector<256x128xf32>
    %98 = arith.addf %32, %97 : vector<256x128xf32>
    %99 = vector.extract_strided_slice %0 {offsets = [0, 0], sizes = [1, 128], strides = [1, 1]} : vector<13x128xf32> to vector<1x128xf32>
    %cst_28 = arith.constant dense<0.000000e+00> : vector<256xf32>
    %100 = vector.multi_reduction <add>, %98, %cst_28 [1] : vector<256x128xf32> to vector<256xf32>
    %101 = vector.shape_cast %100 : vector<256xf32> to vector<256x1xf32>
    %cst_29 = arith.constant 6.250000e-02 : f32
    %102 = vector.broadcast %cst_29 : f32 to vector<256x1xf32>
    %103 = arith.mulf %101, %102 : vector<256x1xf32>
    %104 = vector.broadcast %103 : vector<256x1xf32> to vector<256x128xf32>
    %105 = arith.subf %98, %104 : vector<256x128xf32>
    %106 = vector.broadcast %99 : vector<1x128xf32> to vector<256x128xf32>
    %107 = arith.mulf %105, %106 : vector<256x128xf32>
    %108 = arith.mulf %107, %107 : vector<256x128xf32>
    %cst_30 = arith.constant dense<0.000000e+00> : vector<256xf32>
    %109 = vector.multi_reduction <add>, %108, %cst_30 [1] : vector<256x128xf32> to vector<256xf32>
    %110 = vector.shape_cast %109 : vector<256xf32> to vector<256x1xf32>
    %cst_31 = arith.constant 6.250000e-02 : f32
    %111 = vector.broadcast %cst_31 : f32 to vector<256x1xf32>
    %112 = arith.mulf %110, %111 : vector<256x1xf32>
    %cst_32 = arith.constant 9.99999997E-7 : f32
    %113 = vector.broadcast %cst_32 : f32 to vector<256x1xf32>
    %114 = arith.addf %112, %113 : vector<256x1xf32>
    %115 = math.rsqrt %114 : vector<256x1xf32>
    %116 = vector.broadcast %115 : vector<256x1xf32> to vector<256x128xf32>
    %117 = arith.mulf %107, %116 : vector<256x128xf32>
    %118 = vector.extract_strided_slice %0 {offsets = [10, 0], sizes = [1, 128], strides = [1, 1]} : vector<13x128xf32> to vector<1x128xf32>
    %119 = vector.broadcast %118 : vector<1x128xf32> to vector<256x128xf32>
    %120 = arith.mulf %117, %119 : vector<256x128xf32>
    %121 = vector.extract_strided_slice %0 {offsets = [11, 0], sizes = [1, 128], strides = [1, 1]} : vector<13x128xf32> to vector<1x128xf32>
    %122 = vector.broadcast %121 : vector<1x128xf32> to vector<256x128xf32>
    %123 = arith.addf %120, %122 : vector<256x128xf32>
    %124 = arith.truncf %123 : vector<256x128xf32> to vector<256x128xbf16>
    %c0_33 = arith.constant 0 : index
    %c0_34 = arith.constant 0 : index
    %125 = vector.load %arg5[%c0_33, %c0_34] : memref<128x128xbf16, #tpu.memory_space<vmem>>, vector<128x128xbf16>
    %cst_35 = arith.constant dense<0.000000e+00> : vector<256x128xf32>
    %126 = tpu.matmul %124, %125, %cst_35 {dimension_numbers = #tpu.dot_dimension_numbers<[1], [0], [0], [1], [0, 0, 1, 1], [], []>} : vector<256x128xbf16>, vector<128x128xbf16>, vector<256x128xf32> -> vector<256x128xf32>
    %c0_36 = arith.constant 0 : index
    %c0_37 = arith.constant 0 : index
    %127 = vector.load %arg8[%c0_36, %c0_37] : memref<1x128xf32, #tpu.memory_space<vmem>>, vector<1x128xf32>
    %128 = vector.broadcast %127 : vector<1x128xf32> to vector<256x128xf32>
    %129 = arith.addf %126, %128 : vector<256x128xf32>
    %130 = arith.mulf %129, %129 : vector<256x128xf32>
    %131 = arith.mulf %129, %130 : vector<256x128xf32>
    %cst_38 = arith.constant 4.471500e-02 : f32
    %132 = vector.broadcast %cst_38 : f32 to vector<256x128xf32>
    %133 = arith.mulf %132, %131 : vector<256x128xf32>
    %134 = arith.addf %129, %133 : vector<256x128xf32>
    %cst_39 = arith.constant 0.797884583 : f32
    %135 = vector.broadcast %cst_39 : f32 to vector<256x128xf32>
    %136 = arith.mulf %135, %134 : vector<256x128xf32>
    %137 = math.tanh %136 : vector<256x128xf32>
    %cst_40 = arith.constant 1.000000e+00 : f32
    %138 = vector.broadcast %cst_40 : f32 to vector<256x128xf32>
    %139 = arith.addf %138, %137 : vector<256x128xf32>
    %cst_41 = arith.constant 5.000000e-01 : f32
    %140 = vector.broadcast %cst_41 : f32 to vector<256x128xf32>
    %141 = arith.mulf %140, %139 : vector<256x128xf32>
    %142 = arith.mulf %129, %141 : vector<256x128xf32>
    %143 = arith.truncf %142 : vector<256x128xf32> to vector<256x128xbf16>
    %c0_42 = arith.constant 0 : index
    %c0_43 = arith.constant 0 : index
    %144 = vector.load %arg6[%c0_42, %c0_43] : memref<128x128xbf16, #tpu.memory_space<vmem>>, vector<128x128xbf16>
    %cst_44 = arith.constant dense<0.000000e+00> : vector<256x128xf32>
    %145 = tpu.matmul %143, %144, %cst_44 {dimension_numbers = #tpu.dot_dimension_numbers<[1], [0], [0], [1], [0, 0, 1, 1], [], []>} : vector<256x128xbf16>, vector<128x128xbf16>, vector<256x128xf32> -> vector<256x128xf32>
    %146 = vector.extract_strided_slice %0 {offsets = [12, 0], sizes = [1, 128], strides = [1, 1]} : vector<13x128xf32> to vector<1x128xf32>
    %147 = vector.broadcast %146 : vector<1x128xf32> to vector<256x128xf32>
    %148 = arith.addf %145, %147 : vector<256x128xf32>
    %149 = arith.addf %98, %148 : vector<256x128xf32>
    %c0_45 = arith.constant 0 : index
    %c0_46 = arith.constant 0 : index
    %c0_47 = arith.constant 0 : index
    %150 = vector.load %arg33[%c0_45, %c0_46, %c0_47] : memref<1x256x128xf32, #tpu.memory_space<vmem>>, vector<1x256x128xf32>
    %151 = vector.shape_cast %150 : vector<1x256x128xf32> to vector<256x128xf32>
    %152 = vector.shape_cast %149 : vector<256x128xf32> to vector<1x256x128xf32>
    tpu.vector_store %arg33[%c0_45, %c0_46, %c0_47], %152 {strides = array<i32>} : memref<1x256x128xf32, #tpu.memory_space<vmem>>, vector<1x256x128xf32>,
    %c0_48 = arith.constant 0 : index
    %c0_49 = arith.constant 0 : index
    %153 = vector.load %arg15[%c0_48, %c0_49] : memref<13x128xf32, #tpu.memory_space<vmem>>, vector<13x128xf32>
    %c0_50 = arith.constant 0 : index
    %c0_51 = arith.constant 0 : index
    %154 = vector.load %arg9[%c0_50, %c0_51] : memref<256x256xbf16, #tpu.memory_space<vmem>>, vector<256x256xbf16>
    %155 = arith.truncf %149 : vector<256x128xf32> to vector<256x128xbf16>
    %cst_52 = arith.constant dense<0.000000e+00> : vector<256x128xf32>
    %156 = tpu.matmul %154, %155, %cst_52 {dimension_numbers = #tpu.dot_dimension_numbers<[1], [0], [0], [1], [0, 0, 1, 1], [], []>} : vector<256x256xbf16>, vector<256x128xbf16>, vector<256x128xf32> -> vector<256x128xf32>
    %157 = vector.extract_strided_slice %156 {offsets = [0, 0], sizes = [64, 128], strides = [1, 1]} : vector<256x128xf32> to vector<64x128xf32>
    %158 = arith.truncf %157 : vector<64x128xf32> to vector<64x128xbf16>
    %159 = vector.extract_strided_slice %156 {offsets = [64, 0], sizes = [64, 128], strides = [1, 1]} : vector<256x128xf32> to vector<64x128xf32>
    %160 = arith.truncf %159 : vector<64x128xf32> to vector<64x128xbf16>
    %161 = vector.extract_strided_slice %156 {offsets = [128, 0], sizes = [64, 128], strides = [1, 1]} : vector<256x128xf32> to vector<64x128xf32>
    %162 = arith.truncf %161 : vector<64x128xf32> to vector<64x128xbf16>
    %163 = vector.extract_strided_slice %156 {offsets = [192, 0], sizes = [64, 128], strides = [1, 1]} : vector<256x128xf32> to vector<64x128xf32>
    %164 = arith.truncf %163 : vector<64x128xf32> to vector<64x128xbf16>
    %165 = tpu.concatenate %158, %160, %162, %164 in 1 : vector<64x128xbf16>, vector<64x128xbf16>, vector<64x128xbf16>, vector<64x128xbf16> -> vector<64x512xbf16>
    %c0_53 = arith.constant 0 : index
    %c0_54 = arith.constant 0 : index
    %166 = vector.load %arg10[%c0_53, %c0_54] : memref<512x128xbf16, #tpu.memory_space<vmem>>, vector<512x128xbf16>
    %cst_55 = arith.constant dense<0.000000e+00> : vector<64x128xf32>
    %167 = tpu.matmul %165, %166, %cst_55 {dimension_numbers = #tpu.dot_dimension_numbers<[1], [0], [0], [1], [0, 0, 1, 1], [], []>} : vector<64x512xbf16>, vector<512x128xbf16>, vector<64x128xf32> -> vector<64x128xf32>
    %168 = vector.extract_strided_slice %153 {offsets = [1, 0], sizes = [1, 128], strides = [1, 1]} : vector<13x128xf32> to vector<1x128xf32>
    %169 = vector.broadcast %168 : vector<1x128xf32> to vector<64x128xf32>
    %170 = arith.addf %167, %169 : vector<64x128xf32>
    %171 = vector.extract_strided_slice %153 {offsets = [0, 0], sizes = [1, 128], strides = [1, 1]} : vector<13x128xf32> to vector<1x128xf32>
    %cst_56 = arith.constant dense<0.000000e+00> : vector<64xf32>
    %172 = vector.multi_reduction <add>, %170, %cst_56 [1] : vector<64x128xf32> to vector<64xf32>
    %173 = vector.shape_cast %172 : vector<64xf32> to vector<64x1xf32>
    %cst_57 = arith.constant 3.125000e-02 : f32
    %174 = vector.broadcast %cst_57 : f32 to vector<64x1xf32>
    %175 = arith.mulf %173, %174 : vector<64x1xf32>
    %176 = vector.broadcast %175 : vector<64x1xf32> to vector<64x128xf32>
    %177 = arith.subf %170, %176 : vector<64x128xf32>
    %178 = vector.broadcast %171 : vector<1x128xf32> to vector<64x128xf32>
    %179 = arith.mulf %177, %178 : vector<64x128xf32>
    %180 = arith.mulf %179, %179 : vector<64x128xf32>
    %cst_58 = arith.constant dense<0.000000e+00> : vector<64xf32>
    %181 = vector.multi_reduction <add>, %180, %cst_58 [1] : vector<64x128xf32> to vector<64xf32>
    %182 = vector.shape_cast %181 : vector<64xf32> to vector<64x1xf32>
    %cst_59 = arith.constant 3.125000e-02 : f32
    %183 = vector.broadcast %cst_59 : f32 to vector<64x1xf32>
    %184 = arith.mulf %182, %183 : vector<64x1xf32>
    %cst_60 = arith.constant 9.99999997E-7 : f32
    %185 = vector.broadcast %cst_60 : f32 to vector<64x1xf32>
    %186 = arith.addf %184, %185 : vector<64x1xf32>
    %187 = math.rsqrt %186 : vector<64x1xf32>
    %188 = vector.broadcast %187 : vector<64x1xf32> to vector<64x128xf32>
    %189 = arith.mulf %179, %188 : vector<64x128xf32>
    %190 = vector.extract_strided_slice %153 {offsets = [2, 0], sizes = [1, 128], strides = [1, 1]} : vector<13x128xf32> to vector<1x128xf32>
    %191 = vector.broadcast %190 : vector<1x128xf32> to vector<64x128xf32>
    %192 = arith.mulf %189, %191 : vector<64x128xf32>
    %193 = vector.extract_strided_slice %153 {offsets = [3, 0], sizes = [1, 128], strides = [1, 1]} : vector<13x128xf32> to vector<1x128xf32>
    %194 = vector.broadcast %193 : vector<1x128xf32> to vector<64x128xf32>
    %195 = arith.addf %192, %194 : vector<64x128xf32>
    %196 = vector.extract_strided_slice %153 {offsets = [0, 0], sizes = [1, 128], strides = [1, 1]} : vector<13x128xf32> to vector<1x128xf32>
    %cst_61 = arith.constant dense<0.000000e+00> : vector<64xf32>
    %197 = vector.multi_reduction <add>, %195, %cst_61 [1] : vector<64x128xf32> to vector<64xf32>
    %198 = vector.shape_cast %197 : vector<64xf32> to vector<64x1xf32>
    %cst_62 = arith.constant 3.125000e-02 : f32
    %199 = vector.broadcast %cst_62 : f32 to vector<64x1xf32>
    %200 = arith.mulf %198, %199 : vector<64x1xf32>
    %201 = vector.broadcast %200 : vector<64x1xf32> to vector<64x128xf32>
    %202 = arith.subf %195, %201 : vector<64x128xf32>
    %203 = vector.broadcast %196 : vector<1x128xf32> to vector<64x128xf32>
    %204 = arith.mulf %202, %203 : vector<64x128xf32>
    %205 = arith.mulf %204, %204 : vector<64x128xf32>
    %cst_63 = arith.constant dense<0.000000e+00> : vector<64xf32>
    %206 = vector.multi_reduction <add>, %205, %cst_63 [1] : vector<64x128xf32> to vector<64xf32>
    %207 = vector.shape_cast %206 : vector<64xf32> to vector<64x1xf32>
    %cst_64 = arith.constant 3.125000e-02 : f32
    %208 = vector.broadcast %cst_64 : f32 to vector<64x1xf32>
    %209 = arith.mulf %207, %208 : vector<64x1xf32>
    %cst_65 = arith.constant 9.99999997E-7 : f32
    %210 = vector.broadcast %cst_65 : f32 to vector<64x1xf32>
    %211 = arith.addf %209, %210 : vector<64x1xf32>
    %212 = math.rsqrt %211 : vector<64x1xf32>
    %213 = vector.broadcast %212 : vector<64x1xf32> to vector<64x128xf32>
    %214 = arith.mulf %204, %213 : vector<64x128xf32>
    %215 = vector.extract_strided_slice %153 {offsets = [4, 0], sizes = [1, 128], strides = [1, 1]} : vector<13x128xf32> to vector<1x128xf32>
    %216 = vector.broadcast %215 : vector<1x128xf32> to vector<64x128xf32>
    %217 = arith.mulf %214, %216 : vector<64x128xf32>
    %218 = vector.extract_strided_slice %153 {offsets = [5, 0], sizes = [1, 128], strides = [1, 1]} : vector<13x128xf32> to vector<1x128xf32>
    %219 = vector.broadcast %218 : vector<1x128xf32> to vector<64x128xf32>
    %220 = arith.addf %217, %219 : vector<64x128xf32>
    %221 = arith.truncf %220 : vector<64x128xf32> to vector<64x128xbf16>
    %c0_66 = arith.constant 0 : index
    %c0_67 = arith.constant 0 : index
    %222 = vector.load %arg11[%c0_66, %c0_67] : memref<128x384xbf16, #tpu.memory_space<vmem>>, vector<128x384xbf16>
    %cst_68 = arith.constant dense<0.000000e+00> : vector<64x384xf32>
    %223 = tpu.matmul %221, %222, %cst_68 {dimension_numbers = #tpu.dot_dimension_numbers<[1], [0], [0], [1], [0, 0, 1, 1], [], []>} : vector<64x128xbf16>, vector<128x384xbf16>, vector<64x384xf32> -> vector<64x384xf32>
    %224 = vector.extract_strided_slice %223 {offsets = [0, 0], sizes = [64, 128], strides = [1, 1]} : vector<64x384xf32> to vector<64x128xf32>
    %225 = vector.extract_strided_slice %153 {offsets = [6, 0], sizes = [1, 128], strides = [1, 1]} : vector<13x128xf32> to vector<1x128xf32>
    %226 = vector.broadcast %225 : vector<1x128xf32> to vector<64x128xf32>
    %227 = arith.addf %224, %226 : vector<64x128xf32>
    %228 = vector.extract_strided_slice %223 {offsets = [0, 128], sizes = [64, 128], strides = [1, 1]} : vector<64x384xf32> to vector<64x128xf32>
    %229 = vector.extract_strided_slice %153 {offsets = [7, 0], sizes = [1, 128], strides = [1, 1]} : vector<13x128xf32> to vector<1x128xf32>
    %230 = vector.broadcast %229 : vector<1x128xf32> to vector<64x128xf32>
    %231 = arith.addf %228, %230 : vector<64x128xf32>
    %232 = vector.extract_strided_slice %223 {offsets = [0, 256], sizes = [64, 128], strides = [1, 1]} : vector<64x384xf32> to vector<64x128xf32>
    %233 = vector.extract_strided_slice %153 {offsets = [8, 0], sizes = [1, 128], strides = [1, 1]} : vector<13x128xf32> to vector<1x128xf32>
    %234 = vector.broadcast %233 : vector<1x128xf32> to vector<64x128xf32>
    %235 = arith.addf %232, %234 : vector<64x128xf32>
    %cst_69 = arith.constant dense<0xFF800000> : vector<128xf32>
    %236 = vector.multi_reduction <maximumf>, %231, %cst_69 [0] : vector<64x128xf32> to vector<128xf32>
    %cst_70 = arith.constant 0xFF800000 : f32
    %237 = vector.broadcast %cst_70 : f32 to vector<128xf32>
    %238 = arith.maximumf %237, %236 : vector<128xf32>
    %239 = vector.shape_cast %238 : vector<128xf32> to vector<1x128xf32>
    %240 = vector.broadcast %239 : vector<1x128xf32> to vector<64x128xf32>
    %241 = arith.subf %231, %240 : vector<64x128xf32>
    %242 = math.exp %241 : vector<64x128xf32>
    %cst_71 = arith.constant dense<0.000000e+00> : vector<128xf32>
    %243 = vector.multi_reduction <add>, %242, %cst_71 [0] : vector<64x128xf32> to vector<128xf32>
    %244 = vector.shape_cast %243 : vector<128xf32> to vector<1x128xf32>
    %245 = vector.broadcast %244 : vector<1x128xf32> to vector<64x128xf32>
    %246 = arith.divf %242, %245 : vector<64x128xf32>
    %247 = arith.truncf %246 : vector<64x128xf32> to vector<64x128xbf16>
    %248 = arith.truncf %235 : vector<64x128xf32> to vector<64x128xbf16>
    %cst_72 = arith.constant dense<0.000000e+00> : vector<128x128xf32>
    %249 = tpu.matmul %247, %248, %cst_72 {dimension_numbers = #tpu.dot_dimension_numbers<[0], [0], [1], [1], [0, 1, 1, 1], [], []>} : vector<64x128xbf16>, vector<64x128xbf16>, vector<128x128xf32> -> vector<128x128xf32>
    %250 = arith.truncf %227 : vector<64x128xf32> to vector<64x128xbf16>
    %251 = arith.truncf %249 : vector<128x128xf32> to vector<128x128xbf16>
    %cst_73 = arith.constant dense<0.000000e+00> : vector<64x128xf32>
    %252 = tpu.matmul %250, %251, %cst_73 {dimension_numbers = #tpu.dot_dimension_numbers<[1], [0], [0], [1], [0, 0, 1, 1], [], []>} : vector<64x128xbf16>, vector<128x128xbf16>, vector<64x128xf32> -> vector<64x128xf32>
    %cst_74 = arith.constant 0.176776692 : f32
    %253 = vector.broadcast %cst_74 : f32 to vector<64x128xf32>
    %254 = arith.mulf %253, %252 : vector<64x128xf32>
    %255 = arith.truncf %254 : vector<64x128xf32> to vector<64x128xbf16>
    %c0_75 = arith.constant 0 : index
    %c0_76 = arith.constant 0 : index
    %256 = vector.load %arg12[%c0_75, %c0_76] : memref<128x128xbf16, #tpu.memory_space<vmem>>, vector<128x128xbf16>
    %cst_77 = arith.constant dense<0.000000e+00> : vector<64x128xf32>
    %257 = tpu.matmul %255, %256, %cst_77 {dimension_numbers = #tpu.dot_dimension_numbers<[1], [0], [0], [1], [0, 0, 1, 1], [], []>} : vector<64x128xbf16>, vector<128x128xbf16>, vector<64x128xf32> -> vector<64x128xf32>
    %258 = vector.extract_strided_slice %153 {offsets = [9, 0], sizes = [1, 128], strides = [1, 1]} : vector<13x128xf32> to vector<1x128xf32>
    %259 = vector.broadcast %258 : vector<1x128xf32> to vector<64x128xf32>
    %260 = arith.addf %257, %259 : vector<64x128xf32>
    %261 = arith.addf %195, %260 : vector<64x128xf32>
    %262 = vector.extract_strided_slice %153 {offsets = [0, 0], sizes = [1, 128], strides = [1, 1]} : vector<13x128xf32> to vector<1x128xf32>
    %cst_78 = arith.constant dense<0.000000e+00> : vector<64xf32>
    %263 = vector.multi_reduction <add>, %261, %cst_78 [1] : vector<64x128xf32> to vector<64xf32>
    %264 = vector.shape_cast %263 : vector<64xf32> to vector<64x1xf32>
    %cst_79 = arith.constant 3.125000e-02 : f32
    %265 = vector.broadcast %cst_79 : f32 to vector<64x1xf32>
    %266 = arith.mulf %264, %265 : vector<64x1xf32>
    %267 = vector.broadcast %266 : vector<64x1xf32> to vector<64x128xf32>
    %268 = arith.subf %261, %267 : vector<64x128xf32>
    %269 = vector.broadcast %262 : vector<1x128xf32> to vector<64x128xf32>
    %270 = arith.mulf %268, %269 : vector<64x128xf32>
    %271 = arith.mulf %270, %270 : vector<64x128xf32>
    %cst_80 = arith.constant dense<0.000000e+00> : vector<64xf32>
    %272 = vector.multi_reduction <add>, %271, %cst_80 [1] : vector<64x128xf32> to vector<64xf32>
    %273 = vector.shape_cast %272 : vector<64xf32> to vector<64x1xf32>
    %cst_81 = arith.constant 3.125000e-02 : f32
    %274 = vector.broadcast %cst_81 : f32 to vector<64x1xf32>
    %275 = arith.mulf %273, %274 : vector<64x1xf32>
    %cst_82 = arith.constant 9.99999997E-7 : f32
    %276 = vector.broadcast %cst_82 : f32 to vector<64x1xf32>
    %277 = arith.addf %275, %276 : vector<64x1xf32>
    %278 = math.rsqrt %277 : vector<64x1xf32>
    %279 = vector.broadcast %278 : vector<64x1xf32> to vector<64x128xf32>
    %280 = arith.mulf %270, %279 : vector<64x128xf32>
    %281 = vector.extract_strided_slice %153 {offsets = [10, 0], sizes = [1, 128], strides = [1, 1]} : vector<13x128xf32> to vector<1x128xf32>
    %282 = vector.broadcast %281 : vector<1x128xf32> to vector<64x128xf32>
    %283 = arith.mulf %280, %282 : vector<64x128xf32>
    %284 = vector.extract_strided_slice %153 {offsets = [11, 0], sizes = [1, 128], strides = [1, 1]} : vector<13x128xf32> to vector<1x128xf32>
    %285 = vector.broadcast %284 : vector<1x128xf32> to vector<64x128xf32>
    %286 = arith.addf %283, %285 : vector<64x128xf32>
    %287 = arith.truncf %286 : vector<64x128xf32> to vector<64x128xbf16>
    %c0_83 = arith.constant 0 : index
    %c0_84 = arith.constant 0 : index
    %288 = vector.load %arg13[%c0_83, %c0_84] : memref<128x128xbf16, #tpu.memory_space<vmem>>, vector<128x128xbf16>
    %cst_85 = arith.constant dense<0.000000e+00> : vector<64x128xf32>
    %289 = tpu.matmul %287, %288, %cst_85 {dimension_numbers = #tpu.dot_dimension_numbers<[1], [0], [0], [1], [0, 0, 1, 1], [], []>} : vector<64x128xbf16>, vector<128x128xbf16>, vector<64x128xf32> -> vector<64x128xf32>
    %c0_86 = arith.constant 0 : index
    %c0_87 = arith.constant 0 : index
    %290 = vector.load %arg16[%c0_86, %c0_87] : memref<1x128xf32, #tpu.memory_space<vmem>>, vector<1x128xf32>
    %291 = vector.broadcast %290 : vector<1x128xf32> to vector<64x128xf32>
    %292 = arith.addf %289, %291 : vector<64x128xf32>
    %293 = arith.mulf %292, %292 : vector<64x128xf32>
    %294 = arith.mulf %292, %293 : vector<64x128xf32>
    %cst_88 = arith.constant 4.471500e-02 : f32
    %295 = vector.broadcast %cst_88 : f32 to vector<64x128xf32>
    %296 = arith.mulf %295, %294 : vector<64x128xf32>
    %297 = arith.addf %292, %296 : vector<64x128xf32>
    %cst_89 = arith.constant 0.797884583 : f32
    %298 = vector.broadcast %cst_89 : f32 to vector<64x128xf32>
    %299 = arith.mulf %298, %297 : vector<64x128xf32>
    %300 = math.tanh %299 : vector<64x128xf32>
    %cst_90 = arith.constant 1.000000e+00 : f32
    %301 = vector.broadcast %cst_90 : f32 to vector<64x128xf32>
    %302 = arith.addf %301, %300 : vector<64x128xf32>
    %cst_91 = arith.constant 5.000000e-01 : f32
    %303 = vector.broadcast %cst_91 : f32 to vector<64x128xf32>
    %304 = arith.mulf %303, %302 : vector<64x128xf32>
    %305 = arith.mulf %292, %304 : vector<64x128xf32>
    %306 = arith.truncf %305 : vector<64x128xf32> to vector<64x128xbf16>
    %c0_92 = arith.constant 0 : index
    %c0_93 = arith.constant 0 : index
    %307 = vector.load %arg14[%c0_92, %c0_93] : memref<128x128xbf16, #tpu.memory_space<vmem>>, vector<128x128xbf16>
    %cst_94 = arith.constant dense<0.000000e+00> : vector<64x128xf32>
    %308 = tpu.matmul %306, %307, %cst_94 {dimension_numbers = #tpu.dot_dimension_numbers<[1], [0], [0], [1], [0, 0, 1, 1], [], []>} : vector<64x128xbf16>, vector<128x128xbf16>, vector<64x128xf32> -> vector<64x128xf32>
    %309 = vector.extract_strided_slice %153 {offsets = [12, 0], sizes = [1, 128], strides = [1, 1]} : vector<13x128xf32> to vector<1x128xf32>
    %310 = vector.broadcast %309 : vector<1x128xf32> to vector<64x128xf32>
    %311 = arith.addf %308, %310 : vector<64x128xf32>
    %312 = arith.addf %261, %311 : vector<64x128xf32>
    %c0_95 = arith.constant 0 : index
    %c0_96 = arith.constant 0 : index
    %c0_97 = arith.constant 0 : index
    %313 = vector.load %arg34[%c0_95, %c0_96, %c0_97] : memref<1x64x128xf32, #tpu.memory_space<vmem>>, vector<1x64x128xf32>
    %314 = vector.shape_cast %313 : vector<1x64x128xf32> to vector<64x128xf32>
    %315 = vector.shape_cast %312 : vector<64x128xf32> to vector<1x64x128xf32>
    tpu.vector_store %arg34[%c0_95, %c0_96, %c0_97], %315 {strides = array<i32>} : memref<1x64x128xf32, #tpu.memory_space<vmem>>, vector<1x64x128xf32>,
    %c0_98 = arith.constant 0 : index
    %c0_99 = arith.constant 0 : index
    %316 = vector.load %arg23[%c0_98, %c0_99] : memref<13x128xf32, #tpu.memory_space<vmem>>, vector<13x128xf32>
    %c0_100 = arith.constant 0 : index
    %c0_101 = arith.constant 0 : index
    %317 = vector.load %arg17[%c0_100, %c0_101] : memref<64x64xbf16, #tpu.memory_space<vmem>>, vector<64x64xbf16>
    %318 = arith.truncf %312 : vector<64x128xf32> to vector<64x128xbf16>
    %cst_102 = arith.constant dense<0.000000e+00> : vector<64x128xf32>
    %319 = tpu.matmul %317, %318, %cst_102 {dimension_numbers = #tpu.dot_dimension_numbers<[1], [0], [0], [1], [0, 0, 1, 1], [], []>} : vector<64x64xbf16>, vector<64x128xbf16>, vector<64x128xf32> -> vector<64x128xf32>
    %320 = vector.extract_strided_slice %319 {offsets = [0, 0], sizes = [16, 128], strides = [1, 1]} : vector<64x128xf32> to vector<16x128xf32>
    %321 = arith.truncf %320 : vector<16x128xf32> to vector<16x128xbf16>
    %322 = vector.extract_strided_slice %319 {offsets = [16, 0], sizes = [16, 128], strides = [1, 1]} : vector<64x128xf32> to vector<16x128xf32>
    %323 = arith.truncf %322 : vector<16x128xf32> to vector<16x128xbf16>
    %324 = vector.extract_strided_slice %319 {offsets = [32, 0], sizes = [16, 128], strides = [1, 1]} : vector<64x128xf32> to vector<16x128xf32>
    %325 = arith.truncf %324 : vector<16x128xf32> to vector<16x128xbf16>
    %326 = vector.extract_strided_slice %319 {offsets = [48, 0], sizes = [16, 128], strides = [1, 1]} : vector<64x128xf32> to vector<16x128xf32>
    %327 = arith.truncf %326 : vector<16x128xf32> to vector<16x128xbf16>
    %328 = tpu.concatenate %321, %323, %325, %327 in 1 : vector<16x128xbf16>, vector<16x128xbf16>, vector<16x128xbf16>, vector<16x128xbf16> -> vector<16x512xbf16>
    %c0_103 = arith.constant 0 : index
    %c0_104 = arith.constant 0 : index
    %329 = vector.load %arg18[%c0_103, %c0_104] : memref<512x128xbf16, #tpu.memory_space<vmem>>, vector<512x128xbf16>
    %cst_105 = arith.constant dense<0.000000e+00> : vector<16x128xf32>
    %330 = tpu.matmul %328, %329, %cst_105 {dimension_numbers = #tpu.dot_dimension_numbers<[1], [0], [0], [1], [0, 0, 1, 1], [], []>} : vector<16x512xbf16>, vector<512x128xbf16>, vector<16x128xf32> -> vector<16x128xf32>
    %331 = vector.extract_strided_slice %316 {offsets = [1, 0], sizes = [1, 128], strides = [1, 1]} : vector<13x128xf32> to vector<1x128xf32>
    %332 = vector.broadcast %331 : vector<1x128xf32> to vector<16x128xf32>
    %333 = arith.addf %330, %332 : vector<16x128xf32>
    %334 = vector.extract_strided_slice %316 {offsets = [0, 0], sizes = [1, 128], strides = [1, 1]} : vector<13x128xf32> to vector<1x128xf32>
    %cst_106 = arith.constant dense<0.000000e+00> : vector<16xf32>
    %335 = vector.multi_reduction <add>, %333, %cst_106 [1] : vector<16x128xf32> to vector<16xf32>
    %336 = vector.shape_cast %335 : vector<16xf32> to vector<16x1xf32>
    %cst_107 = arith.constant 1.562500e-02 : f32
    %337 = vector.broadcast %cst_107 : f32 to vector<16x1xf32>
    %338 = arith.mulf %336, %337 : vector<16x1xf32>
    %339 = vector.broadcast %338 : vector<16x1xf32> to vector<16x128xf32>
    %340 = arith.subf %333, %339 : vector<16x128xf32>
    %341 = vector.broadcast %334 : vector<1x128xf32> to vector<16x128xf32>
    %342 = arith.mulf %340, %341 : vector<16x128xf32>
    %343 = arith.mulf %342, %342 : vector<16x128xf32>
    %cst_108 = arith.constant dense<0.000000e+00> : vector<16xf32>
    %344 = vector.multi_reduction <add>, %343, %cst_108 [1] : vector<16x128xf32> to vector<16xf32>
    %345 = vector.shape_cast %344 : vector<16xf32> to vector<16x1xf32>
    %cst_109 = arith.constant 1.562500e-02 : f32
    %346 = vector.broadcast %cst_109 : f32 to vector<16x1xf32>
    %347 = arith.mulf %345, %346 : vector<16x1xf32>
    %cst_110 = arith.constant 9.99999997E-7 : f32
    %348 = vector.broadcast %cst_110 : f32 to vector<16x1xf32>
    %349 = arith.addf %347, %348 : vector<16x1xf32>
    %350 = math.rsqrt %349 : vector<16x1xf32>
    %351 = vector.broadcast %350 : vector<16x1xf32> to vector<16x128xf32>
    %352 = arith.mulf %342, %351 : vector<16x128xf32>
    %353 = vector.extract_strided_slice %316 {offsets = [2, 0], sizes = [1, 128], strides = [1, 1]} : vector<13x128xf32> to vector<1x128xf32>
    %354 = vector.broadcast %353 : vector<1x128xf32> to vector<16x128xf32>
    %355 = arith.mulf %352, %354 : vector<16x128xf32>
    %356 = vector.extract_strided_slice %316 {offsets = [3, 0], sizes = [1, 128], strides = [1, 1]} : vector<13x128xf32> to vector<1x128xf32>
    %357 = vector.broadcast %356 : vector<1x128xf32> to vector<16x128xf32>
    %358 = arith.addf %355, %357 : vector<16x128xf32>
    %359 = vector.extract_strided_slice %316 {offsets = [0, 0], sizes = [1, 128], strides = [1, 1]} : vector<13x128xf32> to vector<1x128xf32>
    %cst_111 = arith.constant dense<0.000000e+00> : vector<16xf32>
    %360 = vector.multi_reduction <add>, %358, %cst_111 [1] : vector<16x128xf32> to vector<16xf32>
    %361 = vector.shape_cast %360 : vector<16xf32> to vector<16x1xf32>
    %cst_112 = arith.constant 1.562500e-02 : f32
    %362 = vector.broadcast %cst_112 : f32 to vector<16x1xf32>
    %363 = arith.mulf %361, %362 : vector<16x1xf32>
    %364 = vector.broadcast %363 : vector<16x1xf32> to vector<16x128xf32>
    %365 = arith.subf %358, %364 : vector<16x128xf32>
    %366 = vector.broadcast %359 : vector<1x128xf32> to vector<16x128xf32>
    %367 = arith.mulf %365, %366 : vector<16x128xf32>
    %368 = arith.mulf %367, %367 : vector<16x128xf32>
    %cst_113 = arith.constant dense<0.000000e+00> : vector<16xf32>
    %369 = vector.multi_reduction <add>, %368, %cst_113 [1] : vector<16x128xf32> to vector<16xf32>
    %370 = vector.shape_cast %369 : vector<16xf32> to vector<16x1xf32>
    %cst_114 = arith.constant 1.562500e-02 : f32
    %371 = vector.broadcast %cst_114 : f32 to vector<16x1xf32>
    %372 = arith.mulf %370, %371 : vector<16x1xf32>
    %cst_115 = arith.constant 9.99999997E-7 : f32
    %373 = vector.broadcast %cst_115 : f32 to vector<16x1xf32>
    %374 = arith.addf %372, %373 : vector<16x1xf32>
    %375 = math.rsqrt %374 : vector<16x1xf32>
    %376 = vector.broadcast %375 : vector<16x1xf32> to vector<16x128xf32>
    %377 = arith.mulf %367, %376 : vector<16x128xf32>
    %378 = vector.extract_strided_slice %316 {offsets = [4, 0], sizes = [1, 128], strides = [1, 1]} : vector<13x128xf32> to vector<1x128xf32>
    %379 = vector.broadcast %378 : vector<1x128xf32> to vector<16x128xf32>
    %380 = arith.mulf %377, %379 : vector<16x128xf32>
    %381 = vector.extract_strided_slice %316 {offsets = [5, 0], sizes = [1, 128], strides = [1, 1]} : vector<13x128xf32> to vector<1x128xf32>
    %382 = vector.broadcast %381 : vector<1x128xf32> to vector<16x128xf32>
    %383 = arith.addf %380, %382 : vector<16x128xf32>
    %384 = arith.truncf %383 : vector<16x128xf32> to vector<16x128xbf16>
    %c0_116 = arith.constant 0 : index
    %c0_117 = arith.constant 0 : index
    %385 = vector.load %arg19[%c0_116, %c0_117] : memref<128x384xbf16, #tpu.memory_space<vmem>>, vector<128x384xbf16>
    %cst_118 = arith.constant dense<0.000000e+00> : vector<16x384xf32>
    %386 = tpu.matmul %384, %385, %cst_118 {dimension_numbers = #tpu.dot_dimension_numbers<[1], [0], [0], [1], [0, 0, 1, 1], [], []>} : vector<16x128xbf16>, vector<128x384xbf16>, vector<16x384xf32> -> vector<16x384xf32>
    %387 = vector.extract_strided_slice %386 {offsets = [0, 0], sizes = [16, 128], strides = [1, 1]} : vector<16x384xf32> to vector<16x128xf32>
    %388 = vector.extract_strided_slice %316 {offsets = [6, 0], sizes = [1, 128], strides = [1, 1]} : vector<13x128xf32> to vector<1x128xf32>
    %389 = vector.broadcast %388 : vector<1x128xf32> to vector<16x128xf32>
    %390 = arith.addf %387, %389 : vector<16x128xf32>
    %391 = vector.extract_strided_slice %386 {offsets = [0, 128], sizes = [16, 128], strides = [1, 1]} : vector<16x384xf32> to vector<16x128xf32>
    %392 = vector.extract_strided_slice %316 {offsets = [7, 0], sizes = [1, 128], strides = [1, 1]} : vector<13x128xf32> to vector<1x128xf32>
    %393 = vector.broadcast %392 : vector<1x128xf32> to vector<16x128xf32>
    %394 = arith.addf %391, %393 : vector<16x128xf32>
    %395 = vector.extract_strided_slice %386 {offsets = [0, 256], sizes = [16, 128], strides = [1, 1]} : vector<16x384xf32> to vector<16x128xf32>
    %396 = vector.extract_strided_slice %316 {offsets = [8, 0], sizes = [1, 128], strides = [1, 1]} : vector<13x128xf32> to vector<1x128xf32>
    %397 = vector.broadcast %396 : vector<1x128xf32> to vector<16x128xf32>
    %398 = arith.addf %395, %397 : vector<16x128xf32>
    %cst_119 = arith.constant dense<0xFF800000> : vector<128xf32>
    %399 = vector.multi_reduction <maximumf>, %394, %cst_119 [0] : vector<16x128xf32> to vector<128xf32>
    %cst_120 = arith.constant 0xFF800000 : f32
    %400 = vector.broadcast %cst_120 : f32 to vector<128xf32>
    %401 = arith.maximumf %400, %399 : vector<128xf32>
    %402 = vector.shape_cast %401 : vector<128xf32> to vector<1x128xf32>
    %403 = vector.broadcast %402 : vector<1x128xf32> to vector<16x128xf32>
    %404 = arith.subf %394, %403 : vector<16x128xf32>
    %405 = math.exp %404 : vector<16x128xf32>
    %cst_121 = arith.constant dense<0.000000e+00> : vector<128xf32>
    %406 = vector.multi_reduction <add>, %405, %cst_121 [0] : vector<16x128xf32> to vector<128xf32>
    %407 = vector.shape_cast %406 : vector<128xf32> to vector<1x128xf32>
    %408 = vector.broadcast %407 : vector<1x128xf32> to vector<16x128xf32>
    %409 = arith.divf %405, %408 : vector<16x128xf32>
    %410 = arith.truncf %409 : vector<16x128xf32> to vector<16x128xbf16>
    %411 = arith.truncf %398 : vector<16x128xf32> to vector<16x128xbf16>
    %cst_122 = arith.constant dense<0.000000e+00> : vector<128x128xf32>
    %412 = tpu.matmul %410, %411, %cst_122 {dimension_numbers = #tpu.dot_dimension_numbers<[0], [0], [1], [1], [0, 1, 1, 1], [], []>} : vector<16x128xbf16>, vector<16x128xbf16>, vector<128x128xf32> -> vector<128x128xf32>
    %413 = arith.truncf %390 : vector<16x128xf32> to vector<16x128xbf16>
    %414 = arith.truncf %412 : vector<128x128xf32> to vector<128x128xbf16>
    %cst_123 = arith.constant dense<0.000000e+00> : vector<16x128xf32>
    %415 = tpu.matmul %413, %414, %cst_123 {dimension_numbers = #tpu.dot_dimension_numbers<[1], [0], [0], [1], [0, 0, 1, 1], [], []>} : vector<16x128xbf16>, vector<128x128xbf16>, vector<16x128xf32> -> vector<16x128xf32>
    %cst_124 = arith.constant 1.250000e-01 : f32
    %416 = vector.broadcast %cst_124 : f32 to vector<16x128xf32>
    %417 = arith.mulf %416, %415 : vector<16x128xf32>
    %418 = arith.truncf %417 : vector<16x128xf32> to vector<16x128xbf16>
    %c0_125 = arith.constant 0 : index
    %c0_126 = arith.constant 0 : index
    %419 = vector.load %arg20[%c0_125, %c0_126] : memref<128x128xbf16, #tpu.memory_space<vmem>>, vector<128x128xbf16>
    %cst_127 = arith.constant dense<0.000000e+00> : vector<16x128xf32>
    %420 = tpu.matmul %418, %419, %cst_127 {dimension_numbers = #tpu.dot_dimension_numbers<[1], [0], [0], [1], [0, 0, 1, 1], [], []>} : vector<16x128xbf16>, vector<128x128xbf16>, vector<16x128xf32> -> vector<16x128xf32>
    %421 = vector.extract_strided_slice %316 {offsets = [9, 0], sizes = [1, 128], strides = [1, 1]} : vector<13x128xf32> to vector<1x128xf32>
    %422 = vector.broadcast %421 : vector<1x128xf32> to vector<16x128xf32>
    %423 = arith.addf %420, %422 : vector<16x128xf32>
    %424 = arith.addf %358, %423 : vector<16x128xf32>
    %425 = vector.extract_strided_slice %316 {offsets = [0, 0], sizes = [1, 128], strides = [1, 1]} : vector<13x128xf32> to vector<1x128xf32>
    %cst_128 = arith.constant dense<0.000000e+00> : vector<16xf32>
    %426 = vector.multi_reduction <add>, %424, %cst_128 [1] : vector<16x128xf32> to vector<16xf32>
    %427 = vector.shape_cast %426 : vector<16xf32> to vector<16x1xf32>
    %cst_129 = arith.constant 1.562500e-02 : f32
    %428 = vector.broadcast %cst_129 : f32 to vector<16x1xf32>
    %429 = arith.mulf %427, %428 : vector<16x1xf32>
    %430 = vector.broadcast %429 : vector<16x1xf32> to vector<16x128xf32>
    %431 = arith.subf %424, %430 : vector<16x128xf32>
    %432 = vector.broadcast %425 : vector<1x128xf32> to vector<16x128xf32>
    %433 = arith.mulf %431, %432 : vector<16x128xf32>
    %434 = arith.mulf %433, %433 : vector<16x128xf32>
    %cst_130 = arith.constant dense<0.000000e+00> : vector<16xf32>
    %435 = vector.multi_reduction <add>, %434, %cst_130 [1] : vector<16x128xf32> to vector<16xf32>
    %436 = vector.shape_cast %435 : vector<16xf32> to vector<16x1xf32>
    %cst_131 = arith.constant 1.562500e-02 : f32
    %437 = vector.broadcast %cst_131 : f32 to vector<16x1xf32>
    %438 = arith.mulf %436, %437 : vector<16x1xf32>
    %cst_132 = arith.constant 9.99999997E-7 : f32
    %439 = vector.broadcast %cst_132 : f32 to vector<16x1xf32>
    %440 = arith.addf %438, %439 : vector<16x1xf32>
    %441 = math.rsqrt %440 : vector<16x1xf32>
    %442 = vector.broadcast %441 : vector<16x1xf32> to vector<16x128xf32>
    %443 = arith.mulf %433, %442 : vector<16x128xf32>
    %444 = vector.extract_strided_slice %316 {offsets = [10, 0], sizes = [1, 128], strides = [1, 1]} : vector<13x128xf32> to vector<1x128xf32>
    %445 = vector.broadcast %444 : vector<1x128xf32> to vector<16x128xf32>
    %446 = arith.mulf %443, %445 : vector<16x128xf32>
    %447 = vector.extract_strided_slice %316 {offsets = [11, 0], sizes = [1, 128], strides = [1, 1]} : vector<13x128xf32> to vector<1x128xf32>
    %448 = vector.broadcast %447 : vector<1x128xf32> to vector<16x128xf32>
    %449 = arith.addf %446, %448 : vector<16x128xf32>
    %450 = arith.truncf %449 : vector<16x128xf32> to vector<16x128xbf16>
    %c0_133 = arith.constant 0 : index
    %c0_134 = arith.constant 0 : index
    %451 = vector.load %arg21[%c0_133, %c0_134] : memref<128x256xbf16, #tpu.memory_space<vmem>>, vector<128x256xbf16>
    %cst_135 = arith.constant dense<0.000000e+00> : vector<16x256xf32>
    %452 = tpu.matmul %450, %451, %cst_135 {dimension_numbers = #tpu.dot_dimension_numbers<[1], [0], [0], [1], [0, 0, 1, 1], [], []>} : vector<16x128xbf16>, vector<128x256xbf16>, vector<16x256xf32> -> vector<16x256xf32>
    %c0_136 = arith.constant 0 : index
    %c0_137 = arith.constant 0 : index
    %453 = vector.load %arg24[%c0_136, %c0_137] : memref<1x256xf32, #tpu.memory_space<vmem>>, vector<1x256xf32>
    %454 = vector.broadcast %453 : vector<1x256xf32> to vector<16x256xf32>
    %455 = arith.addf %452, %454 : vector<16x256xf32>
    %456 = arith.mulf %455, %455 : vector<16x256xf32>
    %457 = arith.mulf %455, %456 : vector<16x256xf32>
    %cst_138 = arith.constant 4.471500e-02 : f32
    %458 = vector.broadcast %cst_138 : f32 to vector<16x256xf32>
    %459 = arith.mulf %458, %457 : vector<16x256xf32>
    %460 = arith.addf %455, %459 : vector<16x256xf32>
    %cst_139 = arith.constant 0.797884583 : f32
    %461 = vector.broadcast %cst_139 : f32 to vector<16x256xf32>
    %462 = arith.mulf %461, %460 : vector<16x256xf32>
    %463 = math.tanh %462 : vector<16x256xf32>
    %cst_140 = arith.constant 1.000000e+00 : f32
    %464 = vector.broadcast %cst_140 : f32 to vector<16x256xf32>
    %465 = arith.addf %464, %463 : vector<16x256xf32>
    %cst_141 = arith.constant 5.000000e-01 : f32
    %466 = vector.broadcast %cst_141 : f32 to vector<16x256xf32>
    %467 = arith.mulf %466, %465 : vector<16x256xf32>
    %468 = arith.mulf %455, %467 : vector<16x256xf32>
    %469 = arith.truncf %468 : vector<16x256xf32> to vector<16x256xbf16>
    %c0_142 = arith.constant 0 : index
    %c0_143 = arith.constant 0 : index
    %470 = vector.load %arg22[%c0_142, %c0_143] : memref<256x128xbf16, #tpu.memory_space<vmem>>, vector<256x128xbf16>
    %cst_144 = arith.constant dense<0.000000e+00> : vector<16x128xf32>
    %471 = tpu.matmul %469, %470, %cst_144 {dimension_numbers = #tpu.dot_dimension_numbers<[1], [0], [0], [1], [0, 0, 1, 1], [], []>} : vector<16x256xbf16>, vector<256x128xbf16>, vector<16x128xf32> -> vector<16x128xf32>
    %472 = vector.extract_strided_slice %316 {offsets = [12, 0], sizes = [1, 128], strides = [1, 1]} : vector<13x128xf32> to vector<1x128xf32>
    %473 = vector.broadcast %472 : vector<1x128xf32> to vector<16x128xf32>
    %474 = arith.addf %471, %473 : vector<16x128xf32>
    %475 = arith.addf %424, %474 : vector<16x128xf32>
    %c0_145 = arith.constant 0 : index
    %c0_146 = arith.constant 0 : index
    %c0_147 = arith.constant 0 : index
    %476 = vector.load %arg35[%c0_145, %c0_146, %c0_147] : memref<1x16x128xf32, #tpu.memory_space<vmem>>, vector<1x16x128xf32>
    %477 = vector.shape_cast %476 : vector<1x16x128xf32> to vector<16x128xf32>
    %478 = vector.shape_cast %475 : vector<16x128xf32> to vector<1x16x128xf32>
    tpu.vector_store %arg35[%c0_145, %c0_146, %c0_147], %478 {strides = array<i32>} : memref<1x16x128xf32, #tpu.memory_space<vmem>>, vector<1x16x128xf32>,
    %c0_148 = arith.constant 0 : index
    %c0_149 = arith.constant 0 : index
    %479 = vector.load %arg31[%c0_148, %c0_149] : memref<13x128xf32, #tpu.memory_space<vmem>>, vector<13x128xf32>
    %c0_150 = arith.constant 0 : index
    %c0_151 = arith.constant 0 : index
    %480 = vector.load %arg25[%c0_150, %c0_151] : memref<16x16xbf16, #tpu.memory_space<vmem>>, vector<16x16xbf16>
    %481 = arith.truncf %475 : vector<16x128xf32> to vector<16x128xbf16>
    %cst_152 = arith.constant dense<0.000000e+00> : vector<16x128xf32>
    %482 = tpu.matmul %480, %481, %cst_152 {dimension_numbers = #tpu.dot_dimension_numbers<[1], [0], [0], [1], [0, 0, 1, 1], [], []>} : vector<16x16xbf16>, vector<16x128xbf16>, vector<16x128xf32> -> vector<16x128xf32>
    %483 = vector.extract_strided_slice %482 {offsets = [0, 0], sizes = [4, 128], strides = [1, 1]} : vector<16x128xf32> to vector<4x128xf32>
    %484 = arith.truncf %483 : vector<4x128xf32> to vector<4x128xbf16>
    %485 = vector.extract_strided_slice %482 {offsets = [4, 0], sizes = [4, 128], strides = [1, 1]} : vector<16x128xf32> to vector<4x128xf32>
    %486 = arith.truncf %485 : vector<4x128xf32> to vector<4x128xbf16>
    %487 = vector.extract_strided_slice %482 {offsets = [8, 0], sizes = [4, 128], strides = [1, 1]} : vector<16x128xf32> to vector<4x128xf32>
    %488 = arith.truncf %487 : vector<4x128xf32> to vector<4x128xbf16>
    %489 = vector.extract_strided_slice %482 {offsets = [12, 0], sizes = [4, 128], strides = [1, 1]} : vector<16x128xf32> to vector<4x128xf32>
    %490 = arith.truncf %489 : vector<4x128xf32> to vector<4x128xbf16>
    %491 = tpu.concatenate %484, %486, %488, %490 in 1 : vector<4x128xbf16>, vector<4x128xbf16>, vector<4x128xbf16>, vector<4x128xbf16> -> vector<4x512xbf16>
    %c0_153 = arith.constant 0 : index
    %c0_154 = arith.constant 0 : index
    %492 = vector.load %arg26[%c0_153, %c0_154] : memref<512x128xbf16, #tpu.memory_space<vmem>>, vector<512x128xbf16>
    %cst_155 = arith.constant dense<0.000000e+00> : vector<4x128xf32>
    %493 = tpu.matmul %491, %492, %cst_155 {dimension_numbers = #tpu.dot_dimension_numbers<[1], [0], [0], [1], [0, 0, 1, 1], [], []>} : vector<4x512xbf16>, vector<512x128xbf16>, vector<4x128xf32> -> vector<4x128xf32>
    %494 = vector.extract_strided_slice %479 {offsets = [1, 0], sizes = [1, 128], strides = [1, 1]} : vector<13x128xf32> to vector<1x128xf32>
    %495 = vector.broadcast %494 : vector<1x128xf32> to vector<4x128xf32>
    %496 = arith.addf %493, %495 : vector<4x128xf32>
    %497 = vector.extract_strided_slice %479 {offsets = [0, 0], sizes = [1, 128], strides = [1, 1]} : vector<13x128xf32> to vector<1x128xf32>
    %cst_156 = arith.constant dense<0.000000e+00> : vector<4xf32>
    %498 = vector.multi_reduction <add>, %496, %cst_156 [1] : vector<4x128xf32> to vector<4xf32>
    %499 = vector.shape_cast %498 : vector<4xf32> to vector<4x1xf32>
    %cst_157 = arith.constant 7.812500e-03 : f32
    %500 = vector.broadcast %cst_157 : f32 to vector<4x1xf32>
    %501 = arith.mulf %499, %500 : vector<4x1xf32>
    %502 = vector.broadcast %501 : vector<4x1xf32> to vector<4x128xf32>
    %503 = arith.subf %496, %502 : vector<4x128xf32>
    %504 = vector.broadcast %497 : vector<1x128xf32> to vector<4x128xf32>
    %505 = arith.mulf %503, %504 : vector<4x128xf32>
    %506 = arith.mulf %505, %505 : vector<4x128xf32>
    %cst_158 = arith.constant dense<0.000000e+00> : vector<4xf32>
    %507 = vector.multi_reduction <add>, %506, %cst_158 [1] : vector<4x128xf32> to vector<4xf32>
    %508 = vector.shape_cast %507 : vector<4xf32> to vector<4x1xf32>
    %cst_159 = arith.constant 7.812500e-03 : f32
    %509 = vector.broadcast %cst_159 : f32 to vector<4x1xf32>
    %510 = arith.mulf %508, %509 : vector<4x1xf32>
    %cst_160 = arith.constant 9.99999997E-7 : f32
    %511 = vector.broadcast %cst_160 : f32 to vector<4x1xf32>
    %512 = arith.addf %510, %511 : vector<4x1xf32>
    %513 = math.rsqrt %512 : vector<4x1xf32>
    %514 = vector.broadcast %513 : vector<4x1xf32> to vector<4x128xf32>
    %515 = arith.mulf %505, %514 : vector<4x128xf32>
    %516 = vector.extract_strided_slice %479 {offsets = [2, 0], sizes = [1, 128], strides = [1, 1]} : vector<13x128xf32> to vector<1x128xf32>
    %517 = vector.broadcast %516 : vector<1x128xf32> to vector<4x128xf32>
    %518 = arith.mulf %515, %517 : vector<4x128xf32>
    %519 = vector.extract_strided_slice %479 {offsets = [3, 0], sizes = [1, 128], strides = [1, 1]} : vector<13x128xf32> to vector<1x128xf32>
    %520 = vector.broadcast %519 : vector<1x128xf32> to vector<4x128xf32>
    %521 = arith.addf %518, %520 : vector<4x128xf32>
    %522 = vector.extract_strided_slice %479 {offsets = [0, 0], sizes = [1, 128], strides = [1, 1]} : vector<13x128xf32> to vector<1x128xf32>
    %cst_161 = arith.constant dense<0.000000e+00> : vector<4xf32>
    %523 = vector.multi_reduction <add>, %521, %cst_161 [1] : vector<4x128xf32> to vector<4xf32>
    %524 = vector.shape_cast %523 : vector<4xf32> to vector<4x1xf32>
    %cst_162 = arith.constant 7.812500e-03 : f32
    %525 = vector.broadcast %cst_162 : f32 to vector<4x1xf32>
    %526 = arith.mulf %524, %525 : vector<4x1xf32>
    %527 = vector.broadcast %526 : vector<4x1xf32> to vector<4x128xf32>
    %528 = arith.subf %521, %527 : vector<4x128xf32>
    %529 = vector.broadcast %522 : vector<1x128xf32> to vector<4x128xf32>
    %530 = arith.mulf %528, %529 : vector<4x128xf32>
    %531 = arith.mulf %530, %530 : vector<4x128xf32>
    %cst_163 = arith.constant dense<0.000000e+00> : vector<4xf32>
    %532 = vector.multi_reduction <add>, %531, %cst_163 [1] : vector<4x128xf32> to vector<4xf32>
    %533 = vector.shape_cast %532 : vector<4xf32> to vector<4x1xf32>
    %cst_164 = arith.constant 7.812500e-03 : f32
    %534 = vector.broadcast %cst_164 : f32 to vector<4x1xf32>
    %535 = arith.mulf %533, %534 : vector<4x1xf32>
    %cst_165 = arith.constant 9.99999997E-7 : f32
    %536 = vector.broadcast %cst_165 : f32 to vector<4x1xf32>
    %537 = arith.addf %535, %536 : vector<4x1xf32>
    %538 = math.rsqrt %537 : vector<4x1xf32>
    %539 = vector.broadcast %538 : vector<4x1xf32> to vector<4x128xf32>
    %540 = arith.mulf %530, %539 : vector<4x128xf32>
    %541 = vector.extract_strided_slice %479 {offsets = [4, 0], sizes = [1, 128], strides = [1, 1]} : vector<13x128xf32> to vector<1x128xf32>
    %542 = vector.broadcast %541 : vector<1x128xf32> to vector<4x128xf32>
    %543 = arith.mulf %540, %542 : vector<4x128xf32>
    %544 = vector.extract_strided_slice %479 {offsets = [5, 0], sizes = [1, 128], strides = [1, 1]} : vector<13x128xf32> to vector<1x128xf32>
    %545 = vector.broadcast %544 : vector<1x128xf32> to vector<4x128xf32>
    %546 = arith.addf %543, %545 : vector<4x128xf32>
    %547 = arith.truncf %546 : vector<4x128xf32> to vector<4x128xbf16>
    %c0_166 = arith.constant 0 : index
    %c0_167 = arith.constant 0 : index
    %548 = vector.load %arg27[%c0_166, %c0_167] : memref<128x384xbf16, #tpu.memory_space<vmem>>, vector<128x384xbf16>
    %cst_168 = arith.constant dense<0.000000e+00> : vector<4x384xf32>
    %549 = tpu.matmul %547, %548, %cst_168 {dimension_numbers = #tpu.dot_dimension_numbers<[1], [0], [0], [1], [0, 0, 1, 1], [], []>} : vector<4x128xbf16>, vector<128x384xbf16>, vector<4x384xf32> -> vector<4x384xf32>
    %550 = vector.extract_strided_slice %549 {offsets = [0, 0], sizes = [4, 128], strides = [1, 1]} : vector<4x384xf32> to vector<4x128xf32>
    %551 = vector.extract_strided_slice %479 {offsets = [6, 0], sizes = [1, 128], strides = [1, 1]} : vector<13x128xf32> to vector<1x128xf32>
    %552 = vector.broadcast %551 : vector<1x128xf32> to vector<4x128xf32>
    %553 = arith.addf %550, %552 : vector<4x128xf32>
    %554 = vector.extract_strided_slice %549 {offsets = [0, 128], sizes = [4, 128], strides = [1, 1]} : vector<4x384xf32> to vector<4x128xf32>
    %555 = vector.extract_strided_slice %479 {offsets = [7, 0], sizes = [1, 128], strides = [1, 1]} : vector<13x128xf32> to vector<1x128xf32>
    %556 = vector.broadcast %555 : vector<1x128xf32> to vector<4x128xf32>
    %557 = arith.addf %554, %556 : vector<4x128xf32>
    %558 = vector.extract_strided_slice %549 {offsets = [0, 256], sizes = [4, 128], strides = [1, 1]} : vector<4x384xf32> to vector<4x128xf32>
    %559 = vector.extract_strided_slice %479 {offsets = [8, 0], sizes = [1, 128], strides = [1, 1]} : vector<13x128xf32> to vector<1x128xf32>
    %560 = vector.broadcast %559 : vector<1x128xf32> to vector<4x128xf32>
    %561 = arith.addf %558, %560 : vector<4x128xf32>
    %cst_169 = arith.constant dense<0xFF800000> : vector<128xf32>
    %562 = vector.multi_reduction <maximumf>, %557, %cst_169 [0] : vector<4x128xf32> to vector<128xf32>
    %cst_170 = arith.constant 0xFF800000 : f32
    %563 = vector.broadcast %cst_170 : f32 to vector<128xf32>
    %564 = arith.maximumf %563, %562 : vector<128xf32>
    %565 = vector.shape_cast %564 : vector<128xf32> to vector<1x128xf32>
    %566 = vector.broadcast %565 : vector<1x128xf32> to vector<4x128xf32>
    %567 = arith.subf %557, %566 : vector<4x128xf32>
    %568 = math.exp %567 : vector<4x128xf32>
    %cst_171 = arith.constant dense<0.000000e+00> : vector<128xf32>
    %569 = vector.multi_reduction <add>, %568, %cst_171 [0] : vector<4x128xf32> to vector<128xf32>
    %570 = vector.shape_cast %569 : vector<128xf32> to vector<1x128xf32>
    %571 = vector.broadcast %570 : vector<1x128xf32> to vector<4x128xf32>
    %572 = arith.divf %568, %571 : vector<4x128xf32>
    %573 = arith.truncf %572 : vector<4x128xf32> to vector<4x128xbf16>
    %574 = arith.truncf %561 : vector<4x128xf32> to vector<4x128xbf16>
    %cst_172 = arith.constant dense<0.000000e+00> : vector<128x128xf32>
    %575 = tpu.matmul %573, %574, %cst_172 {dimension_numbers = #tpu.dot_dimension_numbers<[0], [0], [1], [1], [0, 1, 1, 1], [], []>} : vector<4x128xbf16>, vector<4x128xbf16>, vector<128x128xf32> -> vector<128x128xf32>
    %576 = arith.truncf %553 : vector<4x128xf32> to vector<4x128xbf16>
    %577 = arith.truncf %575 : vector<128x128xf32> to vector<128x128xbf16>
    %cst_173 = arith.constant dense<0.000000e+00> : vector<4x128xf32>
    %578 = tpu.matmul %576, %577, %cst_173 {dimension_numbers = #tpu.dot_dimension_numbers<[1], [0], [0], [1], [0, 0, 1, 1], [], []>} : vector<4x128xbf16>, vector<128x128xbf16>, vector<4x128xf32> -> vector<4x128xf32>
    %cst_174 = arith.constant 0.0883883461 : f32
    %579 = vector.broadcast %cst_174 : f32 to vector<4x128xf32>
    %580 = arith.mulf %579, %578 : vector<4x128xf32>
    %581 = arith.truncf %580 : vector<4x128xf32> to vector<4x128xbf16>
    %c0_175 = arith.constant 0 : index
    %c0_176 = arith.constant 0 : index
    %582 = vector.load %arg28[%c0_175, %c0_176] : memref<128x128xbf16, #tpu.memory_space<vmem>>, vector<128x128xbf16>
    %cst_177 = arith.constant dense<0.000000e+00> : vector<4x128xf32>
    %583 = tpu.matmul %581, %582, %cst_177 {dimension_numbers = #tpu.dot_dimension_numbers<[1], [0], [0], [1], [0, 0, 1, 1], [], []>} : vector<4x128xbf16>, vector<128x128xbf16>, vector<4x128xf32> -> vector<4x128xf32>
    %584 = vector.extract_strided_slice %479 {offsets = [9, 0], sizes = [1, 128], strides = [1, 1]} : vector<13x128xf32> to vector<1x128xf32>
    %585 = vector.broadcast %584 : vector<1x128xf32> to vector<4x128xf32>
    %586 = arith.addf %583, %585 : vector<4x128xf32>
    %587 = arith.addf %521, %586 : vector<4x128xf32>
    %588 = vector.extract_strided_slice %479 {offsets = [0, 0], sizes = [1, 128], strides = [1, 1]} : vector<13x128xf32> to vector<1x128xf32>
    %cst_178 = arith.constant dense<0.000000e+00> : vector<4xf32>
    %589 = vector.multi_reduction <add>, %587, %cst_178 [1] : vector<4x128xf32> to vector<4xf32>
    %590 = vector.shape_cast %589 : vector<4xf32> to vector<4x1xf32>
    %cst_179 = arith.constant 7.812500e-03 : f32
    %591 = vector.broadcast %cst_179 : f32 to vector<4x1xf32>
    %592 = arith.mulf %590, %591 : vector<4x1xf32>
    %593 = vector.broadcast %592 : vector<4x1xf32> to vector<4x128xf32>
    %594 = arith.subf %587, %593 : vector<4x128xf32>
    %595 = vector.broadcast %588 : vector<1x128xf32> to vector<4x128xf32>
    %596 = arith.mulf %594, %595 : vector<4x128xf32>
    %597 = arith.mulf %596, %596 : vector<4x128xf32>
    %cst_180 = arith.constant dense<0.000000e+00> : vector<4xf32>
    %598 = vector.multi_reduction <add>, %597, %cst_180 [1] : vector<4x128xf32> to vector<4xf32>
    %599 = vector.shape_cast %598 : vector<4xf32> to vector<4x1xf32>
    %cst_181 = arith.constant 7.812500e-03 : f32
    %600 = vector.broadcast %cst_181 : f32 to vector<4x1xf32>
    %601 = arith.mulf %599, %600 : vector<4x1xf32>
    %cst_182 = arith.constant 9.99999997E-7 : f32
    %602 = vector.broadcast %cst_182 : f32 to vector<4x1xf32>
    %603 = arith.addf %601, %602 : vector<4x1xf32>
    %604 = math.rsqrt %603 : vector<4x1xf32>
    %605 = vector.broadcast %604 : vector<4x1xf32> to vector<4x128xf32>
    %606 = arith.mulf %596, %605 : vector<4x128xf32>
    %607 = vector.extract_strided_slice %479 {offsets = [10, 0], sizes = [1, 128], strides = [1, 1]} : vector<13x128xf32> to vector<1x128xf32>
    %608 = vector.broadcast %607 : vector<1x128xf32> to vector<4x128xf32>
    %609 = arith.mulf %606, %608 : vector<4x128xf32>
    %610 = vector.extract_strided_slice %479 {offsets = [11, 0], sizes = [1, 128], strides = [1, 1]} : vector<13x128xf32> to vector<1x128xf32>
    %611 = vector.broadcast %610 : vector<1x128xf32> to vector<4x128xf32>
    %612 = arith.addf %609, %611 : vector<4x128xf32>
    %613 = arith.truncf %612 : vector<4x128xf32> to vector<4x128xbf16>
    %c0_183 = arith.constant 0 : index
    %c0_184 = arith.constant 0 : index
    %614 = vector.load %arg29[%c0_183, %c0_184] : memref<128x512xbf16, #tpu.memory_space<vmem>>, vector<128x512xbf16>
    %cst_185 = arith.constant dense<0.000000e+00> : vector<4x512xf32>
    %615 = tpu.matmul %613, %614, %cst_185 {dimension_numbers = #tpu.dot_dimension_numbers<[1], [0], [0], [1], [0, 0, 1, 1], [], []>} : vector<4x128xbf16>, vector<128x512xbf16>, vector<4x512xf32> -> vector<4x512xf32>
    %c0_186 = arith.constant 0 : index
    %c0_187 = arith.constant 0 : index
    %616 = vector.load %arg32[%c0_186, %c0_187] : memref<1x512xf32, #tpu.memory_space<vmem>>, vector<1x512xf32>
    %617 = vector.broadcast %616 : vector<1x512xf32> to vector<4x512xf32>
    %618 = arith.addf %615, %617 : vector<4x512xf32>
    %619 = arith.mulf %618, %618 : vector<4x512xf32>
    %620 = arith.mulf %618, %619 : vector<4x512xf32>
    %cst_188 = arith.constant 4.471500e-02 : f32
    %621 = vector.broadcast %cst_188 : f32 to vector<4x512xf32>
    %622 = arith.mulf %621, %620 : vector<4x512xf32>
    %623 = arith.addf %618, %622 : vector<4x512xf32>
    %cst_189 = arith.constant 0.797884583 : f32
    %624 = vector.broadcast %cst_189 : f32 to vector<4x512xf32>
    %625 = arith.mulf %624, %623 : vector<4x512xf32>
    %626 = math.tanh %625 : vector<4x512xf32>
    %cst_190 = arith.constant 1.000000e+00 : f32
    %627 = vector.broadcast %cst_190 : f32 to vector<4x512xf32>
    %628 = arith.addf %627, %626 : vector<4x512xf32>
    %cst_191 = arith.constant 5.000000e-01 : f32
    %629 = vector.broadcast %cst_191 : f32 to vector<4x512xf32>
    %630 = arith.mulf %629, %628 : vector<4x512xf32>
    %631 = arith.mulf %618, %630 : vector<4x512xf32>
    %632 = arith.truncf %631 : vector<4x512xf32> to vector<4x512xbf16>
    %c0_192 = arith.constant 0 : index
    %c0_193 = arith.constant 0 : index
    %633 = vector.load %arg30[%c0_192, %c0_193] : memref<512x128xbf16, #tpu.memory_space<vmem>>, vector<512x128xbf16>
    %cst_194 = arith.constant dense<0.000000e+00> : vector<4x128xf32>
    %634 = tpu.matmul %632, %633, %cst_194 {dimension_numbers = #tpu.dot_dimension_numbers<[1], [0], [0], [1], [0, 0, 1, 1], [], []>} : vector<4x512xbf16>, vector<512x128xbf16>, vector<4x128xf32> -> vector<4x128xf32>
    %635 = vector.extract_strided_slice %479 {offsets = [12, 0], sizes = [1, 128], strides = [1, 1]} : vector<13x128xf32> to vector<1x128xf32>
    %636 = vector.broadcast %635 : vector<1x128xf32> to vector<4x128xf32>
    %637 = arith.addf %634, %636 : vector<4x128xf32>
    %638 = arith.addf %587, %637 : vector<4x128xf32>
    %c0_195 = arith.constant 0 : index
    %c0_196 = arith.constant 0 : index
    %c0_197 = arith.constant 0 : index
    %639 = vector.load %arg36[%c0_195, %c0_196, %c0_197] : memref<1x4x128xf32, #tpu.memory_space<vmem>>, vector<1x4x128xf32>
    %640 = vector.shape_cast %639 : vector<1x4x128xf32> to vector<4x128xf32>
    %641 = vector.shape_cast %638 : vector<4x128xf32> to vector<1x4x128xf32>
    tpu.vector_store %arg36[%c0_195, %c0_196, %c0_197], %641 {strides = array<i32>} : memref<1x4x128xf32, #tpu.memory_space<vmem>>, vector<1x4x128xf32>,
    return
  }
  func.func @transform_0(%arg0: i32) -> (i32, i32, i32) {
    %c0_i32 = arith.constant 0 : i32
    %c0_i32_0 = arith.constant 0 : i32
    %c0_i32_1 = arith.constant 0 : i32
    return %arg0, %c0_i32, %c0_i32_0 : i32, i32, i32
  }
  func.func @transform_1(%arg0: i32) -> (i32, i32) {
    %c0_i32 = arith.constant 0 : i32
    %c0_i32_0 = arith.constant 0 : i32
    %c0_i32_1 = arith.constant 0 : i32
    return %c0_i32, %c0_i32_0 : i32, i32
  }
  func.func @transform_2(%arg0: i32) -> (i32, i32) {
    %c0_i32 = arith.constant 0 : i32
    %c0_i32_0 = arith.constant 0 : i32
    %c0_i32_1 = arith.constant 0 : i32
    return %c0_i32, %c0_i32_0 : i32, i32
  }
  func.func @transform_3(%arg0: i32) -> (i32, i32) {
    %c0_i32 = arith.constant 0 : i32
    %c0_i32_0 = arith.constant 0 : i32
    %c0_i32_1 = arith.constant 0 : i32
    return %c0_i32, %c0_i32_0 : i32, i32
  }
  func.func @transform_4(%arg0: i32) -> (i32, i32) {
    %c0_i32 = arith.constant 0 : i32
    %c0_i32_0 = arith.constant 0 : i32
    %c0_i32_1 = arith.constant 0 : i32
    return %c0_i32, %c0_i32_0 : i32, i32
  }
  func.func @transform_5(%arg0: i32) -> (i32, i32) {
    %c0_i32 = arith.constant 0 : i32
    %c0_i32_0 = arith.constant 0 : i32
    %c0_i32_1 = arith.constant 0 : i32
    return %c0_i32, %c0_i32_0 : i32, i32
  }
  func.func @transform_6(%arg0: i32) -> (i32, i32) {
    %c0_i32 = arith.constant 0 : i32
    %c0_i32_0 = arith.constant 0 : i32
    %c0_i32_1 = arith.constant 0 : i32
    return %c0_i32, %c0_i32_0 : i32, i32
  }
  func.func @transform_7(%arg0: i32) -> (i32, i32) {
    %c0_i32 = arith.constant 0 : i32
    %c0_i32_0 = arith.constant 0 : i32
    %c0_i32_1 = arith.constant 0 : i32
    return %c0_i32, %c0_i32_0 : i32, i32
  }
  func.func @transform_8(%arg0: i32) -> (i32, i32) {
    %c0_i32 = arith.constant 0 : i32
    %c0_i32_0 = arith.constant 0 : i32
    %c0_i32_1 = arith.constant 0 : i32
    return %c0_i32, %c0_i32_0 : i32, i32
  }
  func.func @transform_9(%arg0: i32) -> (i32, i32) {
    %c0_i32 = arith.constant 0 : i32
    %c0_i32_0 = arith.constant 0 : i32
    %c0_i32_1 = arith.constant 0 : i32
    return %c0_i32, %c0_i32_0 : i32, i32
  }
  func.func @transform_10(%arg0: i32) -> (i32, i32) {
    %c0_i32 = arith.constant 0 : i32
    %c0_i32_0 = arith.constant 0 : i32
    %c0_i32_1 = arith.constant 0 : i32
    return %c0_i32, %c0_i32_0 : i32, i32
  }
  func.func @transform_11(%arg0: i32) -> (i32, i32) {
    %c0_i32 = arith.constant 0 : i32
    %c0_i32_0 = arith.constant 0 : i32
    %c0_i32_1 = arith.constant 0 : i32
    return %c0_i32, %c0_i32_0 : i32, i32
  }
  func.func @transform_12(%arg0: i32) -> (i32, i32) {
    %c0_i32 = arith.constant 0 : i32
    %c0_i32_0 = arith.constant 0 : i32
    %c0_i32_1 = arith.constant 0 : i32
    return %c0_i32, %c0_i32_0 : i32, i32
  }
  func.func @transform_13(%arg0: i32) -> (i32, i32) {
    %c0_i32 = arith.constant 0 : i32
    %c0_i32_0 = arith.constant 0 : i32
    %c0_i32_1 = arith.constant 0 : i32
    return %c0_i32, %c0_i32_0 : i32, i32
  }
  func.func @transform_14(%arg0: i32) -> (i32, i32) {
    %c0_i32 = arith.constant 0 : i32
    %c0_i32_0 = arith.constant 0 : i32
    %c0_i32_1 = arith.constant 0 : i32
    return %c0_i32, %c0_i32_0 : i32, i32
  }
  func.func @transform_15(%arg0: i32) -> (i32, i32) {
    %c0_i32 = arith.constant 0 : i32
    %c0_i32_0 = arith.constant 0 : i32
    %c0_i32_1 = arith.constant 0 : i32
    return %c0_i32, %c0_i32_0 : i32, i32
  }
  func.func @transform_16(%arg0: i32) -> (i32, i32) {
    %c0_i32 = arith.constant 0 : i32
    %c0_i32_0 = arith.constant 0 : i32
    %c0_i32_1 = arith.constant 0 : i32
    return %c0_i32, %c0_i32_0 : i32, i32
  }
  func.func @transform_17(%arg0: i32) -> (i32, i32) {
    %c0_i32 = arith.constant 0 : i32
    %c0_i32_0 = arith.constant 0 : i32
    %c0_i32_1 = arith.constant 0 : i32
    return %c0_i32, %c0_i32_0 : i32, i32
  }
  func.func @transform_18(%arg0: i32) -> (i32, i32) {
    %c0_i32 = arith.constant 0 : i32
    %c0_i32_0 = arith.constant 0 : i32
    %c0_i32_1 = arith.constant 0 : i32
    return %c0_i32, %c0_i32_0 : i32, i32
  }
  func.func @transform_19(%arg0: i32) -> (i32, i32) {
    %c0_i32 = arith.constant 0 : i32
    %c0_i32_0 = arith.constant 0 : i32
    %c0_i32_1 = arith.constant 0 : i32
    return %c0_i32, %c0_i32_0 : i32, i32
  }
  func.func @transform_20(%arg0: i32) -> (i32, i32) {
    %c0_i32 = arith.constant 0 : i32
    %c0_i32_0 = arith.constant 0 : i32
    %c0_i32_1 = arith.constant 0 : i32
    return %c0_i32, %c0_i32_0 : i32, i32
  }
  func.func @transform_21(%arg0: i32) -> (i32, i32) {
    %c0_i32 = arith.constant 0 : i32
    %c0_i32_0 = arith.constant 0 : i32
    %c0_i32_1 = arith.constant 0 : i32
    return %c0_i32, %c0_i32_0 : i32, i32
  }
  func.func @transform_22(%arg0: i32) -> (i32, i32) {
    %c0_i32 = arith.constant 0 : i32
    %c0_i32_0 = arith.constant 0 : i32
    %c0_i32_1 = arith.constant 0 : i32
    return %c0_i32, %c0_i32_0 : i32, i32
  }
  func.func @transform_23(%arg0: i32) -> (i32, i32) {
    %c0_i32 = arith.constant 0 : i32
    %c0_i32_0 = arith.constant 0 : i32
    %c0_i32_1 = arith.constant 0 : i32
    return %c0_i32, %c0_i32_0 : i32, i32
  }
  func.func @transform_24(%arg0: i32) -> (i32, i32) {
    %c0_i32 = arith.constant 0 : i32
    %c0_i32_0 = arith.constant 0 : i32
    %c0_i32_1 = arith.constant 0 : i32
    return %c0_i32, %c0_i32_0 : i32, i32
  }
  func.func @transform_25(%arg0: i32) -> (i32, i32) {
    %c0_i32 = arith.constant 0 : i32
    %c0_i32_0 = arith.constant 0 : i32
    %c0_i32_1 = arith.constant 0 : i32
    return %c0_i32, %c0_i32_0 : i32, i32
  }
  func.func @transform_26(%arg0: i32) -> (i32, i32) {
    %c0_i32 = arith.constant 0 : i32
    %c0_i32_0 = arith.constant 0 : i32
    %c0_i32_1 = arith.constant 0 : i32
    return %c0_i32, %c0_i32_0 : i32, i32
  }
  func.func @transform_27(%arg0: i32) -> (i32, i32) {
    %c0_i32 = arith.constant 0 : i32
    %c0_i32_0 = arith.constant 0 : i32
    %c0_i32_1 = arith.constant 0 : i32
    return %c0_i32, %c0_i32_0 : i32, i32
  }
  func.func @transform_28(%arg0: i32) -> (i32, i32) {
    %c0_i32 = arith.constant 0 : i32
    %c0_i32_0 = arith.constant 0 : i32
    %c0_i32_1 = arith.constant 0 : i32
    return %c0_i32, %c0_i32_0 : i32, i32
  }
  func.func @transform_29(%arg0: i32) -> (i32, i32) {
    %c0_i32 = arith.constant 0 : i32
    %c0_i32_0 = arith.constant 0 : i32
    %c0_i32_1 = arith.constant 0 : i32
    return %c0_i32, %c0_i32_0 : i32, i32
  }
  func.func @transform_30(%arg0: i32) -> (i32, i32) {
    %c0_i32 = arith.constant 0 : i32
    %c0_i32_0 = arith.constant 0 : i32
    %c0_i32_1 = arith.constant 0 : i32
    return %c0_i32, %c0_i32_0 : i32, i32
  }
  func.func @transform_31(%arg0: i32) -> (i32, i32) {
    %c0_i32 = arith.constant 0 : i32
    %c0_i32_0 = arith.constant 0 : i32
    %c0_i32_1 = arith.constant 0 : i32
    return %c0_i32, %c0_i32_0 : i32, i32
  }
  func.func @transform_32(%arg0: i32) -> (i32, i32, i32) {
    %c0_i32 = arith.constant 0 : i32
    %c0_i32_0 = arith.constant 0 : i32
    %c0_i32_1 = arith.constant 0 : i32
    return %arg0, %c0_i32, %c0_i32_0 : i32, i32, i32
  }
  func.func @transform_33(%arg0: i32) -> (i32, i32, i32) {
    %c0_i32 = arith.constant 0 : i32
    %c0_i32_0 = arith.constant 0 : i32
    %c0_i32_1 = arith.constant 0 : i32
    return %arg0, %c0_i32, %c0_i32_0 : i32, i32, i32
  }
  func.func @transform_34(%arg0: i32) -> (i32, i32, i32) {
    %c0_i32 = arith.constant 0 : i32
    %c0_i32_0 = arith.constant 0 : i32
    %c0_i32_1 = arith.constant 0 : i32
    return %arg0, %c0_i32, %c0_i32_0 : i32, i32, i32
  }
  func.func @transform_35(%arg0: i32) -> (i32, i32, i32) {
    %c0_i32 = arith.constant 0 : i32
    %c0_i32_0 = arith.constant 0 : i32
    %c0_i32_1 = arith.constant 0 : i32
    return %arg0, %c0_i32, %c0_i32_0 : i32, i32, i32
  }
}

</mosaic_0001>

<bundles_post_ra>
// kernel: coat_flat_forward.1
= control target key start
LH: loop header
LB: loop body
LE: loop exit
PB: predicated region body
PF: predicated region fallthrough
CT: control target
= control target key end

     0   :  { %s13850_s6 = smov 1   ;;  %s13851_s10 = smov 2   ;;  %s17672_s0 = inlined_call_operand.smem [shape: u32[36], index: -1, kind: input, shape index: {}] }
   0x1   :  { %s13900_s5 = sld [smem:[%s17672_s0]]   ;;  %s13852_s14 = smov 3  }
   0x2   :  { %s13905_s9 = sld [smem:[%s17672_s0 + %s13850_s6]]   ;;  %s13853_s18 = smov 4  }
   0x3   :  { %s13910_s13 = sld [smem:[%s17672_s0 + %s13851_s10]]   ;;  %s13854_s22 = smov 5  }
   0x4   :  { %s13915_s17 = sld [smem:[%s17672_s0 + %s13852_s14]]   ;;  %s13855_s26 = smov 6  }
   0x5   :  { %s13920_s21 = sld [smem:[%s17672_s0 + %s13853_s18]]   ;;  %s13856_s30 = smov 7  }
   0x6   :  { %s13925_s25 = sld [smem:[%s17672_s0 + %s13854_s22]]   ;;  %s13857_s4 = smov 8  }
   0x7   :  { %17800 = sst [smem:[#allocation8_spill]] %s13900_s5  ;;  %s13858_s10 = smov 9  }
   0x8   :  { %17801 = sst [smem:[#allocation9_spill]] %s13905_s9  ;;  %s13859_s15 = smov 10  }
   0x9   :  { %17802 = sst [smem:[#allocation10_spill]] %s13910_s13  ;;  %s13860_s20 = smov 11  }
   0xa   :  { %s13930_s29 = sld [smem:[%s17672_s0 + %s13855_s26]]   ;;  %s13861_s26 = smov 12  }
   0xb   :  { %s13935_s3 = sld [smem:[%s17672_s0 + %s13856_s30]]   ;;  %s13862_s1 = smov 13  }
   0xc   :  { %s13940_s8 = sld [smem:[%s17672_s0 + %s13857_s4]]   ;;  %s13863_s7 = smov 14  }
   0xd   :  { %s13945_s14 = sld [smem:[%s17672_s0 + %s13858_s10]]   ;;  %s13865_s22 = smov 16  }
   0xe   :  { %s13950_s19 = sld [smem:[%s17672_s0 + %s13859_s15]]   ;;  %s13864_s15 = smov 15  }
   0xf   :  { %s13955_s24 = sld [smem:[%s17672_s0 + %s13860_s20]]   ;;  %s13866_s28 = smov 17  }
  0x10   :  { %s13960_s30 = sld [smem:[%s17672_s0 + %s13861_s26]]  }
  0x11   :  { %17803 = sst [smem:[#allocation11_spill]] %s13935_s3 }
  0x12   :  { %17804 = sst [smem:[#allocation12_spill]] %s13940_s8 }
  0x13   :  { %s13965_s6 = sld [smem:[%s17672_s0 + %s13862_s1]]  }
  0x14   :  { %s13970_s12 = sld [smem:[%s17672_s0 + %s13863_s7]]   ;;  %s13867_s7 = smov 18  }
  0x15   :  { %s13975_s20 = sld [smem:[%s17672_s0 + %s13864_s15]]   ;;  %s13868_s15 = smov 19  }
  0x16   :  { %s13980_s27 = sld [smem:[%s17672_s0 + %s13865_s22]]   ;;  %s13869_s22 = smov 20  }
  0x17   :  { %s13985_s4 = sld [smem:[%s17672_s0 + %s13866_s28]]   ;;  %s13870_s28 = smov 21  }
  0x19   :  { %17805 = sst [smem:[#allocation13_spill]] %s13965_s6 }
  0x1a   :  { %17806 = sst [smem:[#allocation14_spill]] %s13970_s12 }
  0x1b   :  { %17807 = sst [smem:[#allocation15_spill]] %s13975_s20 }
  0x1c   :  { %17808 = sst [smem:[#allocation16_spill]] %s13980_s27 }
  0x1d   :  { %17809 = sst [smem:[#allocation17_spill]] %s13985_s4 }
  0x1e   :  { %s13990_s6 = sld [smem:[%s17672_s0 + %s13867_s7]]   ;;  %s13871_s7 = smov 22  }
  0x1f   :  { %s13995_s20 = sld [smem:[%s17672_s0 + %s13868_s15]]   ;;  %s13872_s15 = smov 23  }
  0x20   :  { %s14000_s27 = sld [smem:[%s17672_s0 + %s13869_s22]]   ;;  %s13873_s22 = smov 24  }
  0x21   :  { %s14005_s4 = sld [smem:[%s17672_s0 + %s13870_s28]]   ;;  %s13874_s28 = smov 25  }
  0x24   :  { %17810 = sst [smem:[#allocation18_spill]] %s13990_s6 }
  0x25   :  { %17811 = sst [smem:[#allocation19_spill]] %s13995_s20 }
  0x26   :  { %17812 = sst [smem:[#allocation20_spill]] %s14000_s27 }
  0x27   :  { %17813 = sst [smem:[#allocation21_spill]] %s14005_s4 }
  0x28   :  { %s14010_s6 = sld [smem:[%s17672_s0 + %s13871_s7]]   ;;  %s13875_s7 = smov 26  }
  0x29   :  { %s14015_s20 = sld [smem:[%s17672_s0 + %s13872_s15]]   ;;  %s13876_s15 = smov 27  }
  0x2a   :  { %s14020_s27 = sld [smem:[%s17672_s0 + %s13873_s22]]   ;;  %s13877_s22 = smov 28  }
  0x2b   :  { %s14025_s4 = sld [smem:[%s17672_s0 + %s13874_s28]]   ;;  %s13878_s28 = smov 29  }
  0x2e   :  { %17814 = sst [smem:[#allocation22_spill]] %s14010_s6 }
  0x2f   :  { %17815 = sst [smem:[#allocation23_spill]] %s14015_s20 }
  0x30   :  { %17816 = sst [smem:[#allocation24_spill]] %s14020_s27 }
  0x31   :  { %17817 = sst [smem:[#allocation25_spill]] %s14025_s4 }
  0x32   :  { %s14030_s6 = sld [smem:[%s17672_s0 + %s13875_s7]]   ;;  %s13879_s7 = smov 30  }
  0x33   :  { %s14035_s20 = sld [smem:[%s17672_s0 + %s13876_s15]]   ;;  %s13880_s15 = smov 31  }
  0x34   :  { %s14040_s27 = sld [smem:[%s17672_s0 + %s13877_s22]]   ;;  %s13881_s22 = smov 32  }
  0x35   :  { %s14045_s4 = sld [smem:[%s17672_s0 + %s13878_s28]]   ;;  %s13882_s28 = smov 33  }
  0x38   :  { %17818 = sst [smem:[#allocation26_spill]] %s14030_s6 }
  0x39   :  { %17819 = sst [smem:[#allocation27_spill]] %s14035_s20 }
  0x3a   :  { %17820 = sst [smem:[#allocation28_spill]] %s14040_s27 }
  0x3b   :  { %17821 = sst [smem:[#allocation29_spill]] %s14045_s4 }
  0x3c   :  { %s14050_s6 = sld [smem:[%s17672_s0 + %s13879_s7]]   ;;  %s13883_s7 = smov 34  }
  0x3d   :  { %s14055_s20 = sld [smem:[%s17672_s0 + %s13880_s15]]   ;;  %s13884_s15 = smov 35  }
  0x3e   :  { %s14060_s27 = sld [smem:[%s17672_s0 + %s13881_s22]]  }
  0x3f   :  { %s14065_s4 = sld [smem:[%s17672_s0 + %s13882_s28]]  }
  0x42   :  { %17822 = sst [smem:[#allocation30_spill]] %s14050_s6 }
  0x43   :  { %17823 = sst [smem:[#allocation31_spill]] %s14055_s20 }
  0x44   :  { %s14070_s6 = sld [smem:[%s17672_s0 + %s13883_s7]]  }
  0x45   :  { %17824 = sst [smem:[#allocation32_spill]] %s14065_s4 }
  0x46   :  { %s14075_s20 = sld [smem:[%s17672_s0 + %s13884_s15]]  }
  0x47   :  { %77 = vsyncpa [#allocation3], 0 }
  0x48   :  { %79 = vsyncpa [#allocation3 + $0x1], 0 }
  0x49   :  { %80 = vsyncpa [#allocation5], 0 }
  0x4a   :  { %82 = vsyncpa [#allocation5 + $0x1], 0  ;;  %s14077_s22 = smov 0   ;;  %s14079_s23 = smov 0  }
  0x4b   :  { %s14081_s26 = smov 0   ;;  %s14083_s28 = smov 0  }
  0x4c LB: > { %s17825_s13 = sld [smem:[#allocation10_spill]]  ;;  %s17826_s12 = sld [smem:[#allocation14_spill]]  ;;  %s13848_s28 = sphi %s14083_s28, %s18056_s28   ;;  %s13844_s26 = sphi %s14081_s26, %s18055_s26   ;;  %s13840_s23 = sphi %s14079_s23, %s18054_s23   ;;  %s13836_s22 = sphi %s14077_s22, %s18053_s22  }
  0x4d   : > { %s17827_s9 = sld [smem:[#allocation9_spill]]  ;;  %s17828_s8 = sld [smem:[#allocation12_spill]] }
  0x4e   : > { %s14098_s0 = sadd.s32 4294967295, %s13848_s28   ;;  %s10947_s1 = sadd.s32 4294967294, %s13848_s28  }
  0x4f   : > { %s14102_s2 = sadd.s32 1, %s13848_s28   ;;  %s824_s7 = sadd.s32 1, %s13844_s26 }
  0x50   : > { %s821_s10 = ssub.s32 %s13848_s28, %s14102_s2  ;;  %p834_p0 = scmp.ne.s32.totalorder %s13844_s26, %s13840_s23 }
  0x51   : > { %p822_p1 = scmp.eq.s32.totalorder %s821_s10, 0  ;;  %p835_p2 = scmp.eq.s32.totalorder %s14098_s0, 1 }
  0x52   : > { %p840_p3 = scmp.ne.s32.totalorder %s13840_s23, %s13836_s22  ;;  %p841_p4 = scmp.eq.s32.totalorder %s10947_s1, 1 }
  0x53   : > { %s14113_s11 = scalar_select %p822_p1, %s13844_s26, %s824_s7  }
  0x54   : > { %p14115_p5 = por %p835_p2, %p834_p0  ;;  %p14119_p6 = por %p841_p4, %p840_p3 }
  0x55   : > { %p10950_p7 = scmp.ge.s32.totalorder %s13848_s28, 1  ;;  %p986_p8 = scmp.lt.s32.totalorder %s13848_s28, 3 }
  0x57   : > { %p987_p9 = pnand %p10950_p7, %p986_p8 }
  0x59   : > { %990 = sbr.rel (%p987_p9) target bundleno = 12149 (0x2f75), region = 148 }
  0x60   : > { %s17831_s5 = sld [smem:[#allocation8_spill]]  ;;  %v12817_v0 = vld [vmem:[%s17827_s9] sm:$0xff]   ;;  %p1089_p10 = scmp.lt.s32.totalorder %s14098_s0, 1  ;;  %v12818_v1 = vld [vmem:[%s17827_s9 + $0x8] sm:$0xff]   ;;  %v12819_v2 = vld [vmem:[%s17827_s9 + $0x10] sm:$0xff]   ;;  %v1155_v24 = vlaneseq  ;;  %vm6619_vm0 = vcmask 523264  }
  0x61   : > { %12122 = vmatprep.subr.bf16.mxu0 %v12817_v0  ;;  %v12820_v3 = vld [vmem:[%s17827_s9 + $0x18] sm:$0xff]   ;;  %v12821_v5 = vld [vmem:[%s17827_s9 + $0x20] sm:$0xff]   ;;  %v12822_v6 = vld [vmem:[%s17827_s9 + $0x28] sm:$0xff]   ;;  %s18002_s3 = sld [smem:[#allocation11_spill]]  ;;  %s18038_s4 = sld [smem:[#allocation32_spill]]  ;;  %vm13887_vm1 = vmmov 0  }
  0x62   : > { %s14129_s18 = scalar_select %p1089_p10, %s14098_s0, 1  ;;  %12123 = vmatpush3.bf16.msra.mxu0 %v12817_v0  ;;  %v12823_v7 = vld [vmem:[%s17827_s9 + $0x30] sm:$0xff]   ;;  %v12824_v8 = vld [vmem:[%s17827_s9 + $0x38] sm:$0xff]   ;;  %v14157_v25 = vshrl.u32 %v1155_v24, 7  ;;  %v14163_v27 = vld [vmem:[%s13930_s29] sm:$0xff]  ;;  %vm8293_vm2 = vcmask 130048  }
  0x63   : > { %12124 = vmatprep.subr.bf16.mxu0 %v12818_v1  ;;  %vm9384_vm3 = vcmask 1043456   ;;  %vm9756_vm4 = vcmask 1041408   ;;  %vm9731_vm5 = vcmask 31744  }
  0x64   : > { %s11410_s1 = sshll.u32 %s14129_s18, 7  ;;  %v14160_v26 = vsub.s32 1, %v14157_v25  ;;  %s11411_s10 = sshll.u32 %s14129_s18, 8 }
  0x66   : > { %s14134_s7 = scalar_lea.vmem %s17831_s5, %s11410_s1  ;;  %12125 = vmatpush3.bf16.msra.mxu0 %v12818_v1  ;;  %17832 = vst [vmem:[#allocation33_spill] sm:$0xff] %v14160_v26  ;;  %v14167_v28 = vrot.slane %v14163_v27, %v14160_v26  ;;  %s16480_s1 = scalar_lea.vmem %s14060_s27, %s11411_s10 }
  0x67   : > { %12126 = vmatprep.subr.bf16.mxu0 %v12819_v2  ;;  %v12825_v4 = vld [vmem:[%s14134_s7] sm:$0xff]   ;;  %v12826_v9 = vld [vmem:[%s14134_s7 + $0x8] sm:$0xff]   ;;  %v12827_v10 = vld [vmem:[%s14134_s7 + $0x10] sm:$0xff]   ;;  %s18035_s10 = sld [smem:[#allocation15_spill]] }
  0x68   : > { %12138 = vmatprep.mubr.bf16.mxu0 %v12825_v4  ;;  %v12828_v11 = vld [vmem:[%s14134_s7 + $0x18] sm:$0xff]   ;;  %v12829_v12 = vld [vmem:[%s14134_s7 + $0x20] sm:$0xff]   ;;  %v12830_v13 = vld [vmem:[%s14134_s7 + $0x28] sm:$0xff]  }
  0x69   : > { %v12831_v14 = vld [vmem:[%s14134_s7 + $0x30] sm:$0xff]   ;;  %v12832_v15 = vld [vmem:[%s14134_s7 + $0x38] sm:$0xff]   ;;  %v12833_v16 = vld [vmem:[%s14134_s7 + $0x40] sm:$0xff]  }
  0x6a   : > { %12127 = vmatpush3.bf16.msra.mxu0 %v12819_v2  ;;  %v12834_v17 = vld [vmem:[%s14134_s7 + $0x48] sm:$0xff]   ;;  %v12835_v18 = vld [vmem:[%s14134_s7 + $0x50] sm:$0xff]   ;;  %v12836_v19 = vld [vmem:[%s14134_s7 + $0x58] sm:$0xff]  }
  0x6b   : > { %12128 = vmatprep.subr.bf16.mxu0 %v12820_v3  ;;  %v12837_v20 = vld [vmem:[%s14134_s7 + $0x60] sm:$0xff]   ;;  %v12838_v21 = vld [vmem:[%s14134_s7 + $0x68] sm:$0xff]   ;;  %v12839_v22 = vld [vmem:[%s14134_s7 + $0x70] sm:$0xff]  }
  0x6c   : > { %v12840_v23 = vld [vmem:[%s14134_s7 + $0x78] sm:$0xff]   ;;  %s18034_s7 = sld [smem:[#allocation13_spill]] }
  0x6e   : > { %12129 = vmatpush3.bf16.msra.mxu0 %v12820_v3 }
  0x6f   : > { %12130 = vmatprep.subr.bf16.mxu0 %v12821_v5 }
  0x72   : > { %12131 = vmatpush3.bf16.msra.mxu0 %v12821_v5 }
  0x73   : > { %12132 = vmatprep.subr.bf16.mxu0 %v12822_v6 }
  0x76   : > { %12133 = vmatpush3.bf16.msra.mxu0 %v12822_v6 }
  0x77   : > { %12134 = vmatprep.subr.bf16.mxu0 %v12823_v7 }
  0x7a   : > { %12135 = vmatpush3.bf16.msra.mxu0 %v12823_v7 }
  0x7b   : > { %12136 = vmatprep.subr.bf16.mxu0 %v12824_v8 }
  0x7e   : > { %12137 = vmatpush3.bf16.msra.mxu0 %v12824_v8 }
  0x81   : > { %12139 = vmatmul.mubr.bf16.vlgmr.msra.gmra.mrb[0].mxu0 %v12826_v9 }
  0x82   : > { %12142 = vmatprep.mubr.bf16.mxu0 %v12827_v10 }
  0x89   : > { %12143 = vmatmul.mubr.bf16.gmra.mrb[4].mxu0 %v12828_v11 }
  0x8a   : > { %12146 = vmatprep.mubr.bf16.mxu0 %v12829_v12 }
  0x91   : > { %12147 = vmatmul.mubr.bf16.gmra.mrb[8].mxu0 %v12830_v13 }
  0x92   : > { %12150 = vmatprep.mubr.bf16.mxu0 %v12831_v14 }
  0x99   : > { %12151 = vmatmul.mubr.bf16.gmra.mrb[12].mxu0 %v12832_v15 }
  0x9a   : > { %12154 = vmatprep.mubr.bf16.mxu0 %v12833_v16 }
  0xa1   : > { %12155 = vmatmul.mubr.bf16.gmra.mrb[16].mxu0 %v12834_v17 }
  0xa2   : > { %12158 = vmatprep.mubr.bf16.mxu0 %v12835_v18 }
  0xa9   : > { %12159 = vmatmul.mubr.bf16.gmra.mrb[20].mxu0 %v12836_v19 }
  0xaa   : > { %12162 = vmatprep.mubr.bf16.mxu0 %v12837_v20 }
  0xb1   : > { %12163 = vmatmul.mubr.bf16.gmra.mrb[24].mxu0 %v12838_v21 }
  0xb2   : > { %12166 = vmatprep.mubr.bf16.mxu0 %v12839_v22 }
  0xb9   : > { %12167 = vmatmul.mubr.bf16.gmra.mrb[28].mxu0 %v12840_v23 }
 0x154   : > { %v12140_v29 = vpop.f32.mrb[0].mxu0 }
 0x155   : > { %v1337_v30 = vpop.f32.mrb[1].mxu0  ;;  %v14170_v31 = vadd.f32 %v12140_v29, %v14167_v28 }
 0x156   : > { %v12141_v32 = vpop.f32.mrb[2].mxu0  ;;  %v14173_v33 = vadd.f32 %v1337_v30, %v14167_v28 }
 0x157   : > { %1468 = vadd.xlane.f32.xlu1 %v14170_v31  ;;  %v1340_v34 = vpop.f32.mrb[3].mxu0  ;;  %v14178_v35 = vadd.f32 %v12141_v32, %v14167_v28 }
 0x158   : > { %1464 = vadd.xlane.f32.xlu0 %v14173_v33  ;;  %v14181_v36 = vadd.f32 %v1340_v34, %v14167_v28 }
 0x15b   : > { %1470 = vadd.xlane.f32.xlu1 %v14178_v35 }
 0x15c   : > { %v12144_v37 = vpop.f32.mrb[4].mxu0  ;;  %1466 = vadd.xlane.f32.xlu0 %v14181_v36 }
 0x15d   : > { %v1353_v38 = vpop.f32.mrb[5].mxu0  ;;  %v14193_v43 = vadd.f32 %v12144_v37, %v14167_v28  ;;  %v14288_v37 = vsub.s32 0, %v14157_v25 }
 0x15e   : > { %v12145_v39 = vpop.f32.mrb[6].mxu0  ;;  %v14186_v40 = vadd.f32 %v1353_v38, %v14167_v28 }
 0x15f   : > { %v1356_v41 = vpop.f32.mrb[7].mxu0  ;;  %v14197_v44 = vadd.f32 %v12145_v39, %v14167_v28  ;;  %17833 = vst [vmem:[#allocation34_spill] sm:$0xff] %v14288_v37 }
 0x160   : > { %1472 = vadd.xlane.f32.xlu0 %v14186_v40  ;;  %v14190_v42 = vadd.f32 %v1356_v41, %v14167_v28  ;;  %v14292_v41 = vrot.slane %v14163_v27, %v14288_v37 }
 0x162   : > { %1474 = vadd.xlane.f32.xlu1 %v14190_v42  ;;  %17834 = vst [vmem:[#allocation35_spill] sm:$0xff] %v14292_v41 }
 0x164   : > { %v12148_v45 = vpop.f32.mrb[8].mxu0  ;;  %1476 = vadd.xlane.f32.xlu0 %v14193_v43 }
 0x165   : > { %v1369_v46 = vpop.f32.mrb[9].mxu0  ;;  %v14209_v51 = vadd.f32 %v12148_v45, %v14167_v28 }
 0x166   : > { %v12149_v47 = vpop.f32.mrb[10].mxu0  ;;  %1478 = vadd.xlane.f32.xlu1 %v14197_v44  ;;  %v14202_v48 = vadd.f32 %v1369_v46, %v14167_v28 }
 0x167   : > { %v1372_v49 = vpop.f32.mrb[11].mxu0  ;;  %v14213_v52 = vadd.f32 %v12149_v47, %v14167_v28 }
 0x168   : > { %1480 = vadd.xlane.f32.xlu0 %v14202_v48  ;;  %v14206_v50 = vadd.f32 %v1372_v49, %v14167_v28 }
 0x16a   : > { %1482 = vadd.xlane.f32.xlu1 %v14206_v50 }
 0x16c   : > { %v12152_v53 = vpop.f32.mrb[12].mxu0  ;;  %1484 = vadd.xlane.f32.xlu0 %v14209_v51 }
 0x16d   : > { %v1385_v54 = vpop.f32.mrb[13].mxu0  ;;  %v14225_v59 = vadd.f32 %v12152_v53, %v14167_v28 }
 0x16e   : > { %v12153_v55 = vpop.f32.mrb[14].mxu0  ;;  %1486 = vadd.xlane.f32.xlu1 %v14213_v52  ;;  %v14218_v56 = vadd.f32 %v1385_v54, %v14167_v28 }
 0x16f   : > { %v1388_v57 = vpop.f32.mrb[15].mxu0  ;;  %v14229_v60 = vadd.f32 %v12153_v55, %v14167_v28 }
 0x170   : > { %1488 = vadd.xlane.f32.xlu0 %v14218_v56  ;;  %v14222_v58 = vadd.f32 %v1388_v57, %v14167_v28 }
 0x172   : > { %1490 = vadd.xlane.f32.xlu1 %v14222_v58 }
 0x174   : > { %v12156_v61 = vpop.f32.mrb[16].mxu0  ;;  %1492 = vadd.xlane.f32.xlu0 %v14225_v59 }
 0x175   : > { %v1401_v62 = vpop.f32.mrb[17].mxu0  ;;  %v14241_v3 = vadd.f32 %v12156_v61, %v14167_v28 }
 0x176   : > { %v12157_v63 = vpop.f32.mrb[18].mxu0  ;;  %1494 = vadd.xlane.f32.xlu1 %v14229_v60  ;;  %v14234_v0 = vadd.f32 %v1401_v62, %v14167_v28 }
 0x177   : > { %v1404_v1 = vpop.f32.mrb[19].mxu0  ;;  %v14245_v4 = vadd.f32 %v12157_v63, %v14167_v28 }
 0x178   : > { %1496 = vadd.xlane.f32.xlu0 %v14234_v0  ;;  %v14238_v2 = vadd.f32 %v1404_v1, %v14167_v28 }
 0x17a   : > { %1498 = vadd.xlane.f32.xlu1 %v14238_v2 }
 0x17c   : > { %v12160_v5 = vpop.f32.mrb[20].mxu0  ;;  %1500 = vadd.xlane.f32.xlu0 %v14241_v3 }
 0x17d   : > { %v1417_v6 = vpop.f32.mrb[21].mxu0  ;;  %v14249_v7 = vadd.f32 %v12160_v5, %v14167_v28 }
 0x17e   : > { %v12161_v8 = vpop.f32.mrb[22].mxu0  ;;  %1502 = vadd.xlane.f32.xlu1 %v14245_v4  ;;  %v14253_v9 = vadd.f32 %v1417_v6, %v14167_v28 }
 0x17f   : > { %v1420_v10 = vpop.f32.mrb[23].mxu0  ;;  %v14256_v11 = vadd.f32 %v12161_v8, %v14167_v28 }
 0x180   : > { %1504 = vadd.xlane.f32.xlu0 %v14253_v9  ;;  %v14260_v12 = vadd.f32 %v1420_v10, %v14167_v28 }
 0x182   : > { %1506 = vadd.xlane.f32.xlu1 %v14260_v12 }
 0x184   : > { %v12164_v13 = vpop.f32.mrb[24].mxu0 }
 0x185   : > { %v1433_v14 = vpop.f32.mrb[25].mxu0  ;;  %v14264_v15 = vadd.f32 %v12164_v13, %v14167_v28 }
 0x186   : > { %v12165_v16 = vpop.f32.mrb[26].mxu0  ;;  %v14267_v17 = vadd.f32 %v1433_v14, %v14167_v28 }
 0x187   : > { %v1436_v18 = vpop.f32.mrb[27].mxu0  ;;  %v14270_v19 = vadd.f32 %v12165_v16, %v14167_v28 }
 0x188   : > { %v14273_v20 = vadd.f32 %v1436_v18, %v14167_v28 }
 0x18c   : > { %v12168_v21 = vpop.f32.mrb[28].mxu0 }
 0x18d   : > { %v1449_v22 = vpop.f32.mrb[29].mxu0  ;;  %v14279_v29 = vadd.f32 %v12168_v21, %v14167_v28 }
 0x18e   : > { %v12169_v23 = vpop.f32.mrb[30].mxu0  ;;  %v14276_v24 = vadd.f32 %v1449_v22, %v14167_v28 }
 0x18f   : > { %v1452_v30 = vpop.f32.mrb[31].mxu0  ;;  %v14282_v32 = vadd.f32 %v12169_v23, %v14167_v28 }
 0x190   : > { %v14285_v34 = vadd.f32 %v1452_v30, %v14167_v28 }
 0x1e4   : > { %v1469_v38 = vpop.xlane.xlu1 %1468 }
 0x1e5   : > { %v1465_v39 = vpop.xlane.xlu0 %1464  ;;  %v1530_v46 = vmul.f32 0.0625, %v1469_v38 }
 0x1e6   : > { %v1528_v45 = vmul.f32 0.0625, %v1465_v39 }
 0x1e7   : > { %v1562_v28 = vsub.f32 %v14170_v31, %v1530_v46 }
 0x1e8   : > { %v1560_v47 = vsub.f32 %v14173_v33, %v1528_v45  ;;  %v1471_v49 = vpop.xlane.xlu1 %1470 }
 0x1e9   : > { %v1467_v53 = vpop.xlane.xlu0 %1466  ;;  %v1531_v57 = vmul.f32 0.0625, %v1471_v49  ;;  %v14309_v31 = vmul.f32 %v14292_v41, %v1562_v28 }
 0x1ea   : > { %v1529_v54 = vmul.f32 0.0625, %v1467_v53  ;;  %v14296_v55 = vmul.f32 %v14292_v41, %v1560_v47 }
 0x1eb   : > { %v1563_v5 = vsub.f32 %v14178_v35, %v1531_v57  ;;  %v1630_v16 = vmul.f32 %v14309_v31, %v14309_v31 }
 0x1ec   : > { %v1561_v61 = vsub.f32 %v14181_v36, %v1529_v54  ;;  %v1628_v62 = vmul.f32 %v14296_v55, %v14296_v55 }
 0x1ed   : > { %v1473_v63 = vpop.xlane.xlu0 %1472  ;;  %v14316_v35 = vmul.f32 %v14292_v41, %v1563_v5 }
 0x1ee   : > { %1660 = vadd.xlane.f32.xlu0 %v1628_v62  ;;  %v14303_v1 = vmul.f32 %v14292_v41, %v1561_v61  ;;  %v1532_v6 = vmul.f32 0.0625, %v1473_v63 }
 0x1ef   : > { %v1475_v33 = vpop.xlane.xlu1 %1474  ;;  %v1631_v23 = vmul.f32 %v14316_v35, %v14316_v35 }
 0x1f0   : > { %v1629_v8 = vmul.f32 %v14303_v1, %v14303_v1  ;;  %v1564_v13 = vsub.f32 %v14186_v40, %v1532_v6  ;;  %v1533_v14 = vmul.f32 0.0625, %v1475_v33 }
 0x1f1   : > { %v1477_v10 = vpop.xlane.xlu0 %1476 }
 0x1f2   : > { %1508 = vadd.xlane.f32.xlu0 %v14249_v7  ;;  %1662 = vadd.xlane.f32.xlu1 %v1629_v8  ;;  %v1565_v21 = vsub.f32 %v14190_v42, %v1533_v14  ;;  %v1534_v22 = vmul.f32 0.0625, %v1477_v10  ;;  %v14323_v30 = vmul.f32 %v14292_v41, %v1564_v13 }
 0x1f3   : > { %v1479_v36 = vpop.xlane.xlu1 %1478 }
 0x1f4   : > { %v1566_v39 = vsub.f32 %v14193_v43, %v1534_v22  ;;  %v1535_v45 = vmul.f32 0.0625, %v1479_v36  ;;  %v1632_v46 = vmul.f32 %v14323_v30, %v14323_v30  ;;  %v14330_v42 = vmul.f32 %v14292_v41, %v1565_v21 }
 0x1f5   : > { %v1481_v18 = vpop.xlane.xlu0 %1480 }
 0x1f6   : > { %1664 = vadd.xlane.f32.xlu0 %v1630_v16  ;;  %1510 = vadd.xlane.f32.xlu1 %v14256_v11  ;;  %v1567_v49 = vsub.f32 %v14197_v44, %v1535_v45  ;;  %v1536_v53 = vmul.f32 0.0625, %v1481_v18  ;;  %v1633_v54 = vmul.f32 %v14330_v42, %v14330_v42  ;;  %v14337_v28 = vmul.f32 %v14292_v41, %v1566_v39 }
 0x1f7   : > { %v1483_v40 = vpop.xlane.xlu1 %1482 }
 0x1f8   : > { %v1568_v57 = vsub.f32 %v14202_v48, %v1536_v53  ;;  %v1537_v61 = vmul.f32 0.0625, %v1483_v40  ;;  %v1634_v62 = vmul.f32 %v14337_v28, %v14337_v28  ;;  %v14344_v63 = vmul.f32 %v14292_v41, %v1567_v49 }
 0x1f9   : > { %v1485_v38 = vpop.xlane.xlu0 %1484 }
 0x1fa   : > { %1512 = vadd.xlane.f32.xlu0 %v14267_v17  ;;  %1666 = vadd.xlane.f32.xlu1 %v1631_v23  ;;  %v1569_v5 = vsub.f32 %v14206_v50, %v1537_v61  ;;  %v1538_v6 = vmul.f32 0.0625, %v1485_v38  ;;  %v1635_v8 = vmul.f32 %v14344_v63, %v14344_v63  ;;  %v14351_v48 = vmul.f32 %v14292_v41, %v1568_v57 }
 0x1fb   : > { %v1487_v47 = vpop.xlane.xlu1 %1486 }
 0x1fc   : > { %v1539_v10 = vmul.f32 0.0625, %v1487_v47  ;;  %v1570_v13 = vsub.f32 %v14209_v51, %v1538_v6  ;;  %v1636_v16 = vmul.f32 %v14351_v48, %v14351_v48  ;;  %v14358_v50 = vmul.f32 %v14292_v41, %v1569_v5 }
 0x1fd   : > { %v1489_v43 = vpop.xlane.xlu0 %1488 }
 0x1fe   : > { %1514 = vadd.xlane.f32.xlu1 %v14273_v20  ;;  %1668 = vadd.xlane.f32.xlu0 %v1632_v46  ;;  %v1540_v14 = vmul.f32 0.0625, %v1489_v43  ;;  %v1571_v21 = vsub.f32 %v14213_v52, %v1539_v10  ;;  %v1637_v51 = vmul.f32 %v14358_v50, %v14358_v50  ;;  %v14366_v38 = vmul.f32 %v14292_v41, %v1570_v13 }
 0x1ff   : > { %v1491_v44 = vpop.xlane.xlu1 %1490 }
 0x200   : > { %v1541_v22 = vmul.f32 0.0625, %v1491_v44  ;;  %v1572_v23 = vsub.f32 %v14218_v56, %v1540_v14  ;;  %v1638_v56 = vmul.f32 %v14366_v38, %v14366_v38  ;;  %v14374_v53 = vmul.f32 %v14292_v41, %v1571_v21 }
 0x201   : > { %v1493_v33 = vpop.xlane.xlu0 %1492 }
 0x202   : > { %1670 = vadd.xlane.f32.xlu1 %v1633_v54  ;;  %1516 = vadd.xlane.f32.xlu0 %v14264_v15  ;;  %v1542_v40 = vmul.f32 0.0625, %v1493_v33  ;;  %v1573_v45 = vsub.f32 %v14222_v58, %v1541_v22  ;;  %v14377_v54 = vmul.f32 %v14292_v41, %v1572_v23  ;;  %v1639_v44 = vmul.f32 %v14374_v53, %v14374_v53 }
 0x203   : > { %v1495_v36 = vpop.xlane.xlu1 %1494 }
 0x204   : > { %v1543_v46 = vmul.f32 0.0625, %v1495_v36  ;;  %v1574_v52 = vsub.f32 %v14225_v59, %v1542_v40  ;;  %v14383_v59 = vmul.f32 %v14292_v41, %v1573_v45  ;;  %v1640_v33 = vmul.f32 %v14377_v54, %v14377_v54 }
 0x205   : > { %v1497_v18 = vpop.xlane.xlu0 %1496 }
 0x206   : > { %1518 = vadd.xlane.f32.xlu1 %v14270_v19  ;;  %1672 = vadd.xlane.f32.xlu0 %v1634_v62  ;;  %v1544_v47 = vmul.f32 0.0625, %v1497_v18  ;;  %v1575_v43 = vsub.f32 %v14229_v60, %v1543_v46  ;;  %v14390_v5 = vmul.f32 %v14292_v41, %v1574_v52 }
 0x207   : > { %v1499_v39 = vpop.xlane.xlu1 %1498 }
 0x208   : > { %v1576_v58 = vsub.f32 %v14234_v0, %v1544_v47  ;;  %v1545_v57 = vmul.f32 0.0625, %v1499_v39  ;;  %v1641_v0 = vmul.f32 %v14383_v59, %v14383_v59 }
 0x209   : > { %v1501_v49 = vpop.xlane.xlu0 %1500 }
 0x20a   : > { %1674 = vadd.xlane.f32.xlu1 %v1635_v8  ;;  %1520 = vadd.xlane.f32.xlu0 %v14276_v24  ;;  %v1546_v62 = vmul.f32 0.0625, %v1501_v49  ;;  %v1577_v60 = vsub.f32 %v14238_v2, %v1545_v57  ;;  %v14396_v8 = vmul.f32 %v14292_v41, %v1575_v43  ;;  %v14399_v10 = vmul.f32 %v14292_v41, %v1576_v58 }
 0x20b   : > { %v1503_v61 = vpop.xlane.xlu1 %1502 }
 0x20c   : > { %v1578_v36 = vsub.f32 %v14241_v3, %v1546_v62  ;;  %v1547_v13 = vmul.f32 0.0625, %v1503_v61  ;;  %v1643_v2 = vmul.f32 %v14396_v8, %v14396_v8  ;;  %v1644_v21 = vmul.f32 %v14399_v10, %v14399_v10 }
 0x20d   : > { %v1505_v6 = vpop.xlane.xlu0 %1504  ;;  %v14409_v22 = vmul.f32 %v14292_v41, %v1577_v60 }
 0x20e   : > { %1522 = vadd.xlane.f32.xlu1 %v14285_v34  ;;  %1676 = vadd.xlane.f32.xlu0 %v1636_v16  ;;  %v1548_v14 = vmul.f32 0.0625, %v1505_v6  ;;  %v1642_v16 = vmul.f32 %v14390_v5, %v14390_v5  ;;  %v1579_v23 = vsub.f32 %v14245_v4, %v1547_v13 }
 0x20f   : > { %v1507_v18 = vpop.xlane.xlu1 %1506  ;;  %v1645_v39 = vmul.f32 %v14409_v22, %v14409_v22 }
 0x210   : > { %v1580_v3 = vsub.f32 %v14253_v9, %v1548_v14  ;;  %v1549_v40 = vmul.f32 0.0625, %v1507_v18  ;;  %v14422_v47 = vmul.f32 %v14292_v41, %v1579_v23 }
 0x212   : > { %1678 = vadd.xlane.f32.xlu1 %v1637_v51  ;;  %1524 = vadd.xlane.f32.xlu0 %v14279_v29  ;;  %v14414_v51 = vmul.f32 %v14292_v41, %v1578_v36  ;;  %v1581_v45 = vsub.f32 %v14260_v12, %v1549_v40  ;;  %v14425_v4 = vmul.f32 %v14292_v41, %v1580_v3 }
 0x213   : > { %v1647_v9 = vmul.f32 %v14422_v47, %v14422_v47 }
 0x214   : > { %v1646_v46 = vmul.f32 %v14414_v51, %v14414_v51  ;;  %v1648_v49 = vmul.f32 %v14425_v4, %v14425_v4  ;;  %v14432_v52 = vmul.f32 %v14292_v41, %v1581_v45 }
 0x216   : > { %1526 = vadd.xlane.f32.xlu1 %v14282_v32  ;;  %1680 = vadd.xlane.f32.xlu0 %v1638_v56  ;;  %v1649_v12 = vmul.f32 %v14432_v52, %v14432_v52 }
 0x21a   : > { %1682 = vadd.xlane.f32.xlu1 %v1639_v44  ;;  %1684 = vadd.xlane.f32.xlu0 %v1640_v33 }
 0x21e   : > { %1686 = vadd.xlane.f32.xlu1 %v1641_v0  ;;  %1688 = vadd.xlane.f32.xlu0 %v1642_v16  ;;  %v14441_v16 = vsub.s32 2, %v14157_v25 }
 0x220   : > { %17835 = vst [vmem:[#allocation36_spill] sm:$0xff] %v14441_v16 }
 0x222   : > { %1690 = vadd.xlane.f32.xlu1 %v1643_v2  ;;  %1692 = vadd.xlane.f32.xlu0 %v1644_v21 }
 0x226   : > { %1694 = vadd.xlane.f32.xlu1 %v1645_v39  ;;  %1696 = vadd.xlane.f32.xlu0 %v1646_v46  ;;  %v14454_v46 = vrot.slane %v14163_v27, %v14441_v16 }
 0x22a   : > { %1698 = vadd.xlane.f32.xlu1 %v1647_v9  ;;  %1700 = vadd.xlane.f32.xlu0 %v1648_v49 }
 0x22e   : > { %1702 = vadd.xlane.f32.xlu1 %v1649_v12 }
 0x27b   : > { %v1661_v56 = vpop.xlane.xlu0 %1660 }
 0x27c   : > { %v1724_v43 = vmul.f32 0.0625, %v1661_v56 }
 0x27e   : > { %v1756_v58 = vadd.f32 1e-06, %v1724_v43 }
 0x27f   : > { %v1663_v57 = vpop.xlane.xlu1 %1662  ;;  %v1509_v61 = vpop.xlane.xlu0 %1508 }
 0x280   : > { %13302 = vrsqrt.f32 %v1756_v58  ;;  %v1725_v62 = vmul.f32 0.0625, %v1663_v57  ;;  %v1550_v44 = vmul.f32 0.0625, %v1509_v61 }
 0x282   : > { %v1757_v33 = vadd.f32 1e-06, %v1725_v62  ;;  %v1582_v6 = vsub.f32 %v14249_v7, %v1550_v44  ;;  %v14447_v7 = vsub.s32 3, %v14157_v25 }
 0x283   : > { %v1511_v60 = vpop.xlane.xlu1 %1510  ;;  %v1665_v0 = vpop.xlane.xlu0 %1664 }
 0x284   : > { %13304 = vrsqrt.f32 %v1757_v33  ;;  %v1551_v36 = vmul.f32 0.0625, %v1511_v60  ;;  %v1726_v13 = vmul.f32 0.0625, %v1665_v0  ;;  %v14438_v14 = vmul.f32 %v14292_v41, %v1582_v6  ;;  %17836 = vst [vmem:[#allocation37_spill] sm:$0xff] %v14447_v7 }
 0x285   : > { %v14462_v57 = vrot.slane %v14163_v27, %v14447_v7 }
 0x286   : > { %v1583_v18 = vsub.f32 %v14256_v11, %v1551_v36  ;;  %v1758_v2 = vadd.f32 1e-06, %v1726_v13  ;;  %v1650_v21 = vmul.f32 %v14438_v14, %v14438_v14 }
 0x287   : > { %v1667_v23 = vpop.xlane.xlu1 %1666  ;;  %v1513_v3 = vpop.xlane.xlu0 %1512 }
 0x288   : > { %13306 = vrsqrt.f32 %v1758_v2  ;;  %v1727_v40 = vmul.f32 0.0625, %v1667_v23  ;;  %v1552_v39 = vmul.f32 0.0625, %v1513_v3  ;;  %1704 = vadd.xlane.f32.xlu0 %v1650_v21  ;;  %v14450_v45 = vmul.f32 %v14292_v41, %v1583_v18 }
 0x28a   : > { %v13303_v11 = vpop.eup %13302  ;;  %v1759_v9 = vadd.f32 1e-06, %v1727_v40  ;;  %v1651_v49 = vmul.f32 %v14450_v45, %v14450_v45  ;;  %v1584_v12 = vsub.f32 %v14267_v17, %v1552_v39 }
 0x28b   : > { %v1515_v56 = vpop.xlane.xlu1 %1514  ;;  %v1669_v43 = vpop.xlane.xlu0 %1668  ;;  %v1820_v58 = vmul.f32 %v13303_v11, %v14296_v55 }
 0x28c   : > { %13308 = vrsqrt.f32 %v1759_v9  ;;  %v1553_v61 = vmul.f32 0.0625, %v1515_v56  ;;  %v1728_v62 = vmul.f32 0.0625, %v1669_v43  ;;  %1706 = vadd.xlane.f32.xlu1 %v1651_v49  ;;  %v14471_v27 = vmul.f32 %v14292_v41, %v1584_v12 }
 0x28d   : > { %v1856_v44 = vmul.f32 %v14454_v46, %v1820_v58 }
 0x28e   : > { %v13305_v33 = vpop.eup %13304  ;;  %v1760_v6 = vadd.f32 1e-06, %v1728_v62  ;;  %v1585_v60 = vsub.f32 %v14273_v20, %v1553_v61 }
 0x28f   : > { %v1671_v0 = vpop.xlane.xlu1 %1670  ;;  %v1517_v17 = vpop.xlane.xlu0 %1516  ;;  %v14467_v36 = vadd.f32 %v14462_v57, %v1856_v44  ;;  %v1821_v55 = vmul.f32 %v13305_v33, %v14303_v1  ;;  %v1652_v1 = vmul.f32 %v14471_v27, %v14471_v27 }
 0x290   : > { %13310 = vrsqrt.f32 %v1760_v6  ;;  %v1729_v13 = vmul.f32 0.0625, %v1671_v0  ;;  %v1554_v18 = vmul.f32 0.0625, %v1517_v17  ;;  %v14482_v11 = vmul.f32 %v14292_v41, %v1585_v60 }
 0x291   : > { %17837 = vst [vmem:[#allocation38_spill] sm:$0xff] %v14467_v36  ;;  %1924 = vadd.xlane.f32.xlu0 %v14467_v36  ;;  %v1857_v2 = vmul.f32 %v14454_v46, %v1821_v55 }
 0x292   : > { %v13307_v21 = vpop.eup %13306  ;;  %v1761_v23 = vadd.f32 1e-06, %v1729_v13  ;;  %v1586_v20 = vsub.f32 %v14264_v15, %v1554_v18 }
 0x293   : > { %v1519_v3 = vpop.xlane.xlu1 %1518  ;;  %v1673_v40 = vpop.xlane.xlu0 %1672  ;;  %v14477_v39 = vadd.f32 %v14462_v57, %v1857_v2  ;;  %v1822_v9 = vmul.f32 %v13307_v21, %v14309_v31  ;;  %v1653_v31 = vmul.f32 %v14482_v11, %v14482_v11 }
 0x294   : > { %13312 = vrsqrt.f32 %v1761_v23  ;;  %v1555_v49 = vmul.f32 0.0625, %v1519_v3  ;;  %v1730_v12 = vmul.f32 0.0625, %v1673_v40  ;;  %v14488_v58 = vmul.f32 %v14292_v41, %v1586_v20 }
 0x295   : > { %17838 = vst [vmem:[#allocation39_spill] sm:$0xff] %v14477_v39  ;;  %1926 = vadd.xlane.f32.xlu1 %v14477_v39  ;;  %1708 = vadd.xlane.f32.xlu0 %v1652_v1  ;;  %v1858_v15 = vmul.f32 %v14454_v46, %v1822_v9 }
 0x296   : > { %v13309_v56 = vpop.eup %13308  ;;  %v1762_v43 = vadd.f32 1e-06, %v1730_v12  ;;  %v1587_v61 = vsub.f32 %v14270_v19, %v1555_v49  ;;  %v1654_v13 = vmul.f32 %v14488_v58, %v14488_v58 }
 0x297   : > { %v1675_v62 = vpop.xlane.xlu1 %1674  ;;  %v1521_v44 = vpop.xlane.xlu0 %1520  ;;  %v14494_v33 = vadd.f32 %v14462_v57, %v1858_v15  ;;  %v1823_v6 = vmul.f32 %v13309_v56, %v14316_v35 }
 0x298   : > { %13314 = vrsqrt.f32 %v1762_v43  ;;  %v1731_v60 = vmul.f32 0.0625, %v1675_v62  ;;  %v1556_v0 = vmul.f32 0.0625, %v1521_v44  ;;  %v14506_v35 = vmul.f32 %v14292_v41, %v1587_v61 }
 0x299   : > { %17839 = vst [vmem:[#allocation40_spill] sm:$0xff] %v14494_v33  ;;  %1710 = vadd.xlane.f32.xlu1 %v1653_v31  ;;  %1928 = vadd.xlane.f32.xlu0 %v14494_v33  ;;  %v1859_v17 = vmul.f32 %v14454_v46, %v1823_v6 }
 0x29a   : > { %v13311_v55 = vpop.eup %13310  ;;  %v1763_v19 = vadd.f32 1e-06, %v1731_v60  ;;  %v1588_v18 = vsub.f32 %v14276_v24, %v1556_v0  ;;  %v1655_v56 = vmul.f32 %v14506_v35, %v14506_v35 }
 0x29b   : > { %v1523_v2 = vpop.xlane.xlu1 %1522  ;;  %v1677_v21 = vpop.xlane.xlu0 %1676  ;;  %v14503_v23 = vadd.f32 %v14462_v57, %v1859_v17  ;;  %v1824_v20 = vmul.f32 %v13311_v55, %v14323_v30 }
 0x29c   : > { %13316 = vrsqrt.f32 %v1763_v19  ;;  %v1557_v3 = vmul.f32 0.0625, %v1523_v2  ;;  %v1732_v40 = vmul.f32 0.0625, %v1677_v21  ;;  %v14519_v61 = vmul.f32 %v14292_v41, %v1588_v18 }
 0x29d   : > { %17840 = vst [vmem:[#allocation41_spill] sm:$0xff] %v14503_v23  ;;  %1930 = vadd.xlane.f32.xlu1 %v14503_v23  ;;  %1712 = vadd.xlane.f32.xlu0 %v1654_v13  ;;  %v1860_v1 = vmul.f32 %v14454_v46, %v1824_v20 }
 0x29e   : > { %v13313_v9 = vpop.eup %13312  ;;  %v1589_v24 = vsub.f32 %v14285_v34, %v1557_v3  ;;  %v1764_v49 = vadd.f32 1e-06, %v1732_v40  ;;  %v1656_v19 = vmul.f32 %v14519_v61, %v14519_v61 }
 0x29f   : > { %v1679_v12 = vpop.xlane.xlu1 %1678  ;;  %v1525_v15 = vpop.xlane.xlu0 %1524  ;;  %v14515_v43 = vadd.f32 %v14462_v57, %v1860_v1  ;;  %v1825_v30 = vmul.f32 %v13313_v9, %v14330_v42 }
 0x2a0   : > { %13318 = vrsqrt.f32 %v1764_v49  ;;  %v1733_v62 = vmul.f32 0.0625, %v1679_v12  ;;  %v1558_v44 = vmul.f32 0.0625, %v1525_v15  ;;  %v14524_v60 = vmul.f32 %v14292_v41, %v1589_v24 }
 0x2a1   : > { %17841 = vst [vmem:[#allocation42_spill] sm:$0xff] %v14515_v43  ;;  %1714 = vadd.xlane.f32.xlu1 %v1655_v56  ;;  %1932 = vadd.xlane.f32.xlu0 %v14515_v43  ;;  %v1861_v34 = vmul.f32 %v14454_v46, %v1825_v30 }
 0x2a2   : > { %v13315_v31 = vpop.eup %13314  ;;  %v1765_v6 = vadd.f32 1e-06, %v1733_v62  ;;  %v1590_v0 = vsub.f32 %v14279_v29, %v1558_v44  ;;  %v1657_v3 = vmul.f32 %v14524_v60, %v14524_v60 }
 0x2a3   : > { %v1527_v17 = vpop.xlane.xlu1 %1526  ;;  %v1681_v42 = vpop.xlane.xlu0 %1680  ;;  %v14528_v55 = vadd.f32 %v14462_v57, %v1861_v34  ;;  %v1826_v13 = vmul.f32 %v13315_v31, %v14337_v28 }
 0x2a4   : > { %13320 = vrsqrt.f32 %v1765_v6  ;;  %v1559_v18 = vmul.f32 0.0625, %v1527_v17  ;;  %v1734_v2 = vmul.f32 0.0625, %v1681_v42  ;;  %v14543_v49 = vmul.f32 %v14292_v41, %v1590_v0 }
 0x2a5   : > { %17842 = vst [vmem:[#allocation43_spill] sm:$0xff] %v14528_v55  ;;  %1934 = vadd.xlane.f32.xlu1 %v14528_v55  ;;  %1716 = vadd.xlane.f32.xlu0 %v1656_v19  ;;  %v1862_v21 = vmul.f32 %v14454_v46, %v1826_v13 }
 0x2a6   : > { %v13317_v20 = vpop.eup %13316  ;;  %v1766_v29 = vadd.f32 1e-06, %v1734_v2  ;;  %v1591_v40 = vsub.f32 %v14282_v32, %v1559_v18 }
 0x2a7   : > { %v1683_v1 = vpop.xlane.xlu1 %1682  ;;  %v1685_v9 = vpop.xlane.xlu0 %1684  ;;  %v14539_v24 = vadd.f32 %v14462_v57, %v1862_v21  ;;  %v1827_v28 = vmul.f32 %v13317_v20, %v14344_v63  ;;  %v1658_v63 = vmul.f32 %v14543_v49, %v14543_v49 }
 0x2a8   : > { %13322 = vrsqrt.f32 %v1766_v29  ;;  %v1735_v12 = vmul.f32 0.0625, %v1683_v1  ;;  %v1736_v15 = vmul.f32 0.0625, %v1685_v9  ;;  %v14553_v6 = vmul.f32 %v14292_v41, %v1591_v40 }
 0x2a9   : > { %17843 = vst [vmem:[#allocation44_spill] sm:$0xff] %v14539_v24  ;;  %1718 = vadd.xlane.f32.xlu1 %v1657_v3  ;;  %1936 = vadd.xlane.f32.xlu0 %v14539_v24  ;;  %v1863_v56 = vmul.f32 %v14454_v46, %v1827_v28 }
 0x2aa   : > { %v13319_v30 = vpop.eup %13318  ;;  %v1767_v32 = vadd.f32 1e-06, %v1735_v12  ;;  %v1768_v62 = vadd.f32 1e-06, %v1736_v15  ;;  %v1659_v29 = vmul.f32 %v14553_v6, %v14553_v6 }
 0x2ab   : > { %v1687_v44 = vpop.xlane.xlu1 %1686  ;;  %v1689_v34 = vpop.xlane.xlu0 %1688  ;;  %v14548_v31 = vadd.f32 %v14462_v57, %v1863_v56  ;;  %v1828_v0 = vmul.f32 %v13319_v30, %v14351_v48 }
 0x2ac   : > { %13324 = vrsqrt.f32 %v1767_v32  ;;  %v1737_v17 = vmul.f32 0.0625, %v1687_v44  ;;  %v1738_v42 = vmul.f32 0.0625, %v1689_v34 }
 0x2ad   : > { %17844 = vst [vmem:[#allocation45_spill] sm:$0xff] %v14548_v31  ;;  %13326 = vrsqrt.f32 %v1768_v62  ;;  %1938 = vadd.xlane.f32.xlu1 %v14548_v31  ;;  %1720 = vadd.xlane.f32.xlu0 %v1658_v63  ;;  %v1864_v19 = vmul.f32 %v14454_v46, %v1828_v0 }
 0x2ae   : > { %v13321_v13 = vpop.eup %13320  ;;  %v1769_v18 = vadd.f32 1e-06, %v1737_v17  ;;  %v1770_v2 = vadd.f32 1e-06, %v1738_v42 }
 0x2af   : > { %v1691_v21 = vpop.xlane.xlu1 %1690  ;;  %v1693_v20 = vpop.xlane.xlu0 %1692  ;;  %v14561_v3 = vadd.f32 %v14462_v57, %v1864_v19  ;;  %v1829_v48 = vmul.f32 %v13321_v13, %v14358_v50 }
 0x2b0   : > { %13328 = vrsqrt.f32 %v1769_v18  ;;  %v1739_v40 = vmul.f32 0.0625, %v1691_v21  ;;  %v1740_v1 = vmul.f32 0.0625, %v1693_v20 }
 0x2b1   : > { %17845 = vst [vmem:[#allocation46_spill] sm:$0xff] %v14561_v3  ;;  %13330 = vrsqrt.f32 %v1770_v2  ;;  %1722 = vadd.xlane.f32.xlu1 %v1659_v29  ;;  %1940 = vadd.xlane.f32.xlu0 %v14561_v3  ;;  %v1865_v9 = vmul.f32 %v14454_v46, %v1829_v48 }
 0x2b2   : > { %v13323_v28 = vpop.eup %13322  ;;  %v1771_v12 = vadd.f32 1e-06, %v1739_v40  ;;  %v1772_v15 = vadd.f32 1e-06, %v1740_v1 }
 0x2b3   : > { %v1695_v56 = vpop.xlane.xlu1 %1694  ;;  %v1697_v30 = vpop.xlane.xlu0 %1696  ;;  %v14567_v32 = vadd.f32 %v14462_v57, %v1865_v9  ;;  %v1830_v62 = vmul.f32 %v13323_v28, %v14366_v38 }
 0x2b4   : > { %13332 = vrsqrt.f32 %v1771_v12  ;;  %v1741_v50 = vmul.f32 0.0625, %v1695_v56  ;;  %v1742_v44 = vmul.f32 0.0625, %v1697_v30 }
 0x2b5   : > { %17846 = vst [vmem:[#allocation47_spill] sm:$0xff] %v14567_v32  ;;  %13334 = vrsqrt.f32 %v1772_v15  ;;  %1942 = vadd.xlane.f32.xlu1 %v14567_v32  ;;  %v1866_v34 = vmul.f32 %v14454_v46, %v1830_v62 }
 0x2b6   : > { %v13325_v63 = vpop.eup %13324  ;;  %v1773_v0 = vadd.f32 1e-06, %v1741_v50  ;;  %v1774_v17 = vadd.f32 1e-06, %v1742_v44 }
 0x2b7   : > { %v13327_v42 = vpop.eup %13326  ;;  %v1699_v19 = vpop.xlane.xlu1 %1698  ;;  %v14573_v18 = vadd.f32 %v14462_v57, %v1866_v34  ;;  %v1831_v2 = vmul.f32 %v13325_v63, %v14374_v53 }
 0x2b8   : > { %v1701_v13 = vpop.xlane.xlu0 %1700  ;;  %13336 = vrsqrt.f32 %v1773_v0  ;;  %v1743_v38 = vmul.f32 0.0625, %v1699_v19  ;;  %v1832_v20 = vmul.f32 %v13327_v42, %v14377_v54 }
 0x2b9   : > { %17847 = vst [vmem:[#allocation48_spill] sm:$0xff] %v14573_v18  ;;  %v1744_v21 = vmul.f32 0.0625, %v1701_v13  ;;  %13338 = vrsqrt.f32 %v1774_v17  ;;  %1944 = vadd.xlane.f32.xlu0 %v14573_v18  ;;  %v1867_v29 = vmul.f32 %v14454_v46, %v1831_v2 }
 0x2ba   : > { %v13329_v48 = vpop.eup %13328  ;;  %v1775_v40 = vadd.f32 1e-06, %v1743_v38  ;;  %v1868_v9 = vmul.f32 %v14454_v46, %v1832_v20 }
 0x2bb   : > { %v1776_v1 = vadd.f32 1e-06, %v1744_v21  ;;  %v13331_v28 = vpop.eup %13330  ;;  %v1703_v12 = vpop.xlane.xlu1 %1702  ;;  %v14581_v15 = vadd.f32 %v14462_v57, %v1867_v29  ;;  %v1833_v53 = vmul.f32 %v13329_v48, %v14383_v59 }
 0x2bc   : > { %13340 = vrsqrt.f32 %v1775_v40  ;;  %v1745_v56 = vmul.f32 0.0625, %v1703_v12  ;;  %v14585_v54 = vadd.f32 %v14462_v57, %v1868_v9  ;;  %v1834_v30 = vmul.f32 %v13331_v28, %v14390_v5 }
 0x2bd   : > { %17848 = vst [vmem:[#allocation49_spill] sm:$0xff] %v14581_v15  ;;  %13342 = vrsqrt.f32 %v1776_v1  ;;  %1946 = vadd.xlane.f32.xlu1 %v14581_v15  ;;  %v1869_v62 = vmul.f32 %v14454_v46, %v1833_v53 }
 0x2be   : > { %17849 = vst [vmem:[#allocation50_spill] sm:$0xff] %v14585_v54  ;;  %v13333_v50 = vpop.eup %13332  ;;  %v1777_v44 = vadd.f32 1e-06, %v1745_v56  ;;  %1948 = vadd.xlane.f32.xlu0 %v14585_v54  ;;  %v1870_v34 = vmul.f32 %v14454_v46, %v1834_v30 }
 0x2bf   : > { %v13335_v63 = vpop.eup %13334  ;;  %v14593_v59 = vadd.f32 %v14462_v57, %v1869_v62  ;;  %v1835_v0 = vmul.f32 %v13333_v50, %v14396_v8  ;;  %v12841_v50 = vld [vmem:[%s17825_s13 + $0x4] ss:$12 sps:$4 sm:$0xff]  }
 0x2c0   : > { %13344 = vrsqrt.f32 %v1777_v44  ;;  %v14597_v5 = vadd.f32 %v14462_v57, %v1870_v34  ;;  %v1836_v17 = vmul.f32 %v13335_v63, %v14399_v10  ;;  %v12843_v44 = vld [vmem:[%s17825_s13] ss:$12 sps:$4 sm:$0xff]   ;;  %v12844_v34 = vld [vmem:[%s17825_s13 + $0x1c] ss:$12 sps:$4 sm:$0xff]   ;;  %2556 = vmatprep.subr.bf16.mxu1 %v12841_v50 }
 0x2c1   : > { %17850 = vst [vmem:[#allocation51_spill] sm:$0xff] %v14593_v59  ;;  %1950 = vadd.xlane.f32.xlu1 %v14593_v59  ;;  %v1871_v42 = vmul.f32 %v14454_v46, %v1835_v0  ;;  %2557 = vmatpush1.bf16.msra.mxu1 %v12843_v44 }
 0x2c2   : > { %17851 = vst [vmem:[#allocation52_spill] sm:$0xff] %v14597_v5  ;;  %v13337_v19 = vpop.eup %13336  ;;  %1952 = vadd.xlane.f32.xlu0 %v14597_v5  ;;  %v1872_v13 = vmul.f32 %v14454_v46, %v1836_v17  ;;  %2558 = vmatprep.subr.bf16.mxu1 %v12844_v34 }
 0x2c3   : > { %v13339_v2 = vpop.eup %13338  ;;  %v14605_v38 = vadd.f32 %v14462_v57, %v1871_v42  ;;  %v1837_v8 = vmul.f32 %v13337_v19, %v14409_v22 }
 0x2c4   : > { %v14609_v21 = vadd.f32 %v14462_v57, %v1872_v13  ;;  %v1838_v10 = vmul.f32 %v13339_v2, %v14414_v51 }
 0x2c5   : > { %17852 = vst [vmem:[#allocation53_spill] sm:$0xff] %v14605_v38  ;;  %1954 = vadd.xlane.f32.xlu1 %v14605_v38  ;;  %v1873_v20 = vmul.f32 %v14454_v46, %v1837_v8 }
 0x2c6   : > { %17853 = vst [vmem:[#allocation54_spill] sm:$0xff] %v14609_v21  ;;  %v13341_v29 = vpop.eup %13340  ;;  %1956 = vadd.xlane.f32.xlu0 %v14609_v21  ;;  %v1874_v48 = vmul.f32 %v14454_v46, %v1838_v10 }
 0x2c7   : > { %v13343_v40 = vpop.eup %13342  ;;  %v14617_v1 = vadd.f32 %v14462_v57, %v1873_v20  ;;  %v1839_v22 = vmul.f32 %v13341_v29, %v14422_v47 }
 0x2c8   : > { %v14621_v9 = vadd.f32 %v14462_v57, %v1874_v48  ;;  %v1840_v51 = vmul.f32 %v13343_v40, %v14425_v4 }
 0x2c9   : > { %17854 = vst [vmem:[#allocation55_spill] sm:$0xff] %v14617_v1  ;;  %1958 = vadd.xlane.f32.xlu1 %v14617_v1  ;;  %v1875_v28 = vmul.f32 %v14454_v46, %v1839_v22 }
 0x2ca   : > { %17855 = vst [vmem:[#allocation56_spill] sm:$0xff] %v14621_v9  ;;  %v13345_v12 = vpop.eup %13344  ;;  %1960 = vadd.xlane.f32.xlu0 %v14621_v9  ;;  %v1876_v53 = vmul.f32 %v14454_v46, %v1840_v51 }
 0x2cb   : > { %v14629_v56 = vadd.f32 %v14462_v57, %v1875_v28  ;;  %v1841_v47 = vmul.f32 %v13345_v12, %v14432_v52 }
 0x2cc   : > { %v14633_v30 = vadd.f32 %v14462_v57, %v1876_v53 }
 0x2cd   : > { %17856 = vst [vmem:[#allocation57_spill] sm:$0xff] %v14629_v56  ;;  %1962 = vadd.xlane.f32.xlu1 %v14629_v56  ;;  %v1877_v4 = vmul.f32 %v14454_v46, %v1841_v47 }
 0x2ce   : > { %17857 = vst [vmem:[#allocation58_spill] sm:$0xff] %v14633_v30  ;;  %1964 = vadd.xlane.f32.xlu0 %v14633_v30 }
 0x2cf   : > { %v14639_v62 = vadd.f32 %v14462_v57, %v1877_v4 }
 0x2d1   : > { %17858 = vst [vmem:[#allocation59_spill] sm:$0xff] %v14639_v62  ;;  %1966 = vadd.xlane.f32.xlu1 %v14639_v62 }
 0x315   : > { %v1705_v52 = vpop.xlane.xlu0 %1704 }
 0x316   : > { %v1746_v63 = vmul.f32 0.0625, %v1705_v52 }
 0x318   : > { %v1778_v0 = vadd.f32 1e-06, %v1746_v63 }
 0x319   : > { %v1707_v17 = vpop.xlane.xlu1 %1706 }
 0x31a   : > { %13346 = vrsqrt.f32 %v1778_v0  ;;  %v1747_v42 = vmul.f32 0.0625, %v1707_v17 }
 0x31c   : > { %v1779_v19 = vadd.f32 1e-06, %v1747_v42 }
 0x31e   : > { %13348 = vrsqrt.f32 %v1779_v19  ;;  %v1925_v13 = vpop.xlane.xlu0 %1924 }
 0x31f   : > { %v1988_v2 = vmul.f32 0.0625, %v1925_v13 }
 0x321   : > { %v2020_v8 = vsub.f32 %v14467_v36, %v1988_v2 }
 0x322   : > { %v1927_v10 = vpop.xlane.xlu1 %1926  ;;  %v1709_v20 = vpop.xlane.xlu0 %1708 }
 0x323   : > { %v1989_v29 = vmul.f32 0.0625, %v1927_v10  ;;  %v1748_v48 = vmul.f32 0.0625, %v1709_v20  ;;  %v14647_v40 = vmul.f32 %v2020_v8, %v14292_v41 }
 0x324   : > { %v13347_v22 = vpop.eup %13346 }
 0x325   : > { %v2021_v51 = vsub.f32 %v14477_v39, %v1989_v29  ;;  %v1780_v28 = vadd.f32 1e-06, %v1748_v48  ;;  %v2084_v12 = vmul.f32 %v14647_v40, %v14647_v40  ;;  %v1842_v53 = vmul.f32 %v13347_v22, %v14438_v14 }
 0x326   : > { %v1711_v47 = vpop.xlane.xlu1 %1710  ;;  %v1929_v4 = vpop.xlane.xlu0 %1928 }
 0x327   : > { %13350 = vrsqrt.f32 %v1780_v28  ;;  %v1749_v50 = vmul.f32 0.0625, %v1711_v47  ;;  %v1990_v44 = vmul.f32 0.0625, %v1929_v4  ;;  %2116 = vadd.xlane.f32.xlu0 %v2084_v12  ;;  %v14654_v34 = vmul.f32 %v2021_v51, %v14292_v41 }
 0x328   : > { %v13349_v52 = vpop.eup %13348  ;;  %v1878_v63 = vmul.f32 %v14454_v46, %v1842_v53 }
 0x329   : > { %v1781_v0 = vadd.f32 1e-06, %v1749_v50  ;;  %v2022_v17 = vsub.f32 %v14494_v33, %v1990_v44  ;;  %v2085_v42 = vmul.f32 %v14654_v34, %v14654_v34  ;;  %v1843_v14 = vmul.f32 %v13349_v52, %v14450_v45 }
 0x32a   : > { %v1931_v19 = vpop.xlane.xlu1 %1930  ;;  %v1713_v13 = vpop.xlane.xlu0 %1712  ;;  %v14662_v2 = vadd.f32 %v14462_v57, %v1878_v63 }
 0x32b   : > { %13352 = vrsqrt.f32 %v1781_v0  ;;  %v1991_v8 = vmul.f32 0.0625, %v1931_v19  ;;  %v1750_v10 = vmul.f32 0.0625, %v1713_v13  ;;  %2118 = vadd.xlane.f32.xlu1 %v2085_v42  ;;  %v1879_v20 = vmul.f32 %v14454_v46, %v1843_v14 }
 0x32c   : > { %17859 = vst [vmem:[#allocation60_spill] sm:$0xff] %v14662_v2  ;;  %1968 = vadd.xlane.f32.xlu0 %v14662_v2  ;;  %v14667_v29 = vmul.f32 %v2022_v17, %v14292_v41 }
 0x32d   : > { %v2023_v48 = vsub.f32 %v14503_v23, %v1991_v8  ;;  %v1782_v22 = vadd.f32 1e-06, %v1750_v10  ;;  %v14671_v45 = vadd.f32 %v14462_v57, %v1879_v20  ;;  %v12846_v8 = vld [vmem:[%s17825_s13 + $0x18] ss:$12 sps:$4 sm:$0xff]  }
 0x32e   : > { %v1715_v51 = vpop.xlane.xlu1 %1714  ;;  %v1933_v28 = vpop.xlane.xlu0 %1932  ;;  %v2086_v12 = vmul.f32 %v14667_v29, %v14667_v29  ;;  %2559 = vmatpush1.bf16.msra.mxu1 %v12846_v8 }
 0x32f   : > { %17860 = vst [vmem:[#allocation61_spill] sm:$0xff] %v14671_v45  ;;  %13354 = vrsqrt.f32 %v1782_v22  ;;  %v1751_v53 = vmul.f32 0.0625, %v1715_v51  ;;  %v1992_v47 = vmul.f32 0.0625, %v1933_v28  ;;  %1970 = vadd.xlane.f32.xlu1 %v14671_v45  ;;  %v14677_v4 = vmul.f32 %v2023_v48, %v14292_v41 }
 0x330   : > { %2120 = vadd.xlane.f32.xlu0 %v2086_v12 }
 0x331   : > { %v13351_v50 = vpop.eup %13350  ;;  %v1783_v44 = vadd.f32 1e-06, %v1751_v53  ;;  %v2024_v52 = vsub.f32 %v14515_v43, %v1992_v47  ;;  %v2087_v63 = vmul.f32 %v14677_v4, %v14677_v4 }
 0x332   : > { %v1935_v0 = vpop.xlane.xlu1 %1934  ;;  %v1717_v17 = vpop.xlane.xlu0 %1716  ;;  %v1844_v42 = vmul.f32 %v13351_v50, %v14471_v27  ;;  %v12847_v50 = vld [vmem:[%s17825_s13 + $0x34] ss:$12 sps:$4 sm:$0xff]  }
 0x333   : > { %13356 = vrsqrt.f32 %v1783_v44  ;;  %v1993_v14 = vmul.f32 0.0625, %v1935_v0  ;;  %v1752_v19 = vmul.f32 0.0625, %v1717_v17  ;;  %2122 = vadd.xlane.f32.xlu1 %v2087_v63  ;;  %v14686_v48 = vmul.f32 %v2024_v52, %v14292_v41  ;;  %v12849_v44 = vld [vmem:[%s17825_s13 + $0x8] ss:$12 sps:$4 sm:$0xff]   ;;  %v12850_v63 = vld [vmem:[%s17825_s13 + $0x30] ss:$12 sps:$4 sm:$0xff]   ;;  %2560 = vmatprep.subr.bf16.mxu1 %v12847_v50 }
 0x334   : > { %v1880_v13 = vmul.f32 %v14454_v46, %v1844_v42  ;;  %12170 = vmatprep.subr.bf16.mxu0 %v12849_v44  ;;  %2561 = vmatpush1.bf16.msra.mxu1 %v12850_v63 }
 0x335   : > { %v13353_v10 = vpop.eup %13352  ;;  %v1784_v20 = vadd.f32 1e-06, %v1752_v19  ;;  %v2025_v22 = vsub.f32 %v14528_v55, %v1993_v14  ;;  %12171 = vmatpush3.bf16.msra.mxu0 %v12849_v44 }
 0x336   : > { %v1719_v51 = vpop.xlane.xlu1 %1718  ;;  %v1937_v28 = vpop.xlane.xlu0 %1936  ;;  %v14690_v27 = vadd.f32 %v14462_v57, %v1880_v13  ;;  %v1845_v12 = vmul.f32 %v13353_v10, %v14482_v11  ;;  %v2088_v11 = vmul.f32 %v14686_v48, %v14686_v48 }
 0x337   : > { %13358 = vrsqrt.f32 %v1784_v20  ;;  %v1753_v53 = vmul.f32 0.0625, %v1719_v51  ;;  %v1994_v47 = vmul.f32 0.0625, %v1937_v28  ;;  %v14705_v8 = vmul.f32 %v2025_v22, %v14292_v41  ;;  %v12851_v28 = vld [vmem:[%s17825_s13 + $0x4c] ss:$12 sps:$4 sm:$0xff]  }
 0x338   : > { %17861 = vst [vmem:[#allocation62_spill] sm:$0xff] %v14690_v27  ;;  %1972 = vadd.xlane.f32.xlu0 %v14690_v27  ;;  %v1881_v52 = vmul.f32 %v14454_v46, %v1845_v12  ;;  %v12853_v12 = vld [vmem:[%s17825_s13 + $0x20] ss:$12 sps:$4 sm:$0xff]   ;;  %2562 = vmatprep.subr.bf16.mxu1 %v12851_v28 }
 0x339   : > { %v13355_v0 = vpop.eup %13354  ;;  %v1785_v17 = vadd.f32 1e-06, %v1753_v53  ;;  %v2026_v42 = vsub.f32 %v14539_v24, %v1994_v47  ;;  %v12854_v47 = vld [vmem:[%s17825_s13 + $0x48] ss:$12 sps:$4 sm:$0xff]   ;;  %12172 = vmatprep.subr.bf16.mxu0 %v12853_v12 }
 0x33a   : > { %v1939_v14 = vpop.xlane.xlu1 %1938  ;;  %v1721_v19 = vpop.xlane.xlu0 %1720  ;;  %v14702_v13 = vadd.f32 %v14462_v57, %v1881_v52  ;;  %v1846_v10 = vmul.f32 %v13355_v0, %v14488_v58  ;;  %v2089_v0 = vmul.f32 %v14705_v8, %v14705_v8  ;;  %2563 = vmatpush1.bf16.msra.mxu1 %v12854_v47  ;;  %12173 = vmatpush3.bf16.msra.mxu0 %v12853_v12 }
 0x33b   : > { %13360 = vrsqrt.f32 %v1785_v17  ;;  %v1995_v20 = vmul.f32 0.0625, %v1939_v14  ;;  %v1754_v51 = vmul.f32 0.0625, %v1721_v19  ;;  %v14714_v22 = vmul.f32 %v2026_v42, %v14292_v41  ;;  %v12855_v19 = vld [vmem:[%s17825_s13 + $0x64] ss:$12 sps:$4 sm:$0xff]  }
 0x33c   : > { %17862 = vst [vmem:[#allocation63_spill] sm:$0xff] %v14702_v13  ;;  %1974 = vadd.xlane.f32.xlu1 %v14702_v13  ;;  %2124 = vadd.xlane.f32.xlu0 %v2088_v11  ;;  %v1882_v53 = vmul.f32 %v14454_v46, %v1846_v10  ;;  %v12857_v10 = vld [vmem:[%s17825_s13 + $0x38] ss:$12 sps:$4 sm:$0xff]  }
 0x33d   : > { %v13357_v50 = vpop.eup %13356  ;;  %v2027_v58 = vsub.f32 %v14548_v31, %v1995_v20  ;;  %v1786_v44 = vadd.f32 1e-06, %v1754_v51  ;;  %v12858_v51 = vld [vmem:[%s17825_s13 + $0x60] ss:$12 sps:$4 sm:$0xff]   ;;  %v2090_v12 = vmul.f32 %v14714_v22, %v14714_v22  ;;  %2564 = vmatprep.subr.bf16.mxu1 %v12855_v19  ;;  %12174 = vmatprep.subr.bf16.mxu0 %v12857_v10 }
 0x33e   : > { %v1723_v52 = vpop.xlane.xlu1 %1722  ;;  %v1941_v63 = vpop.xlane.xlu0 %1940  ;;  %v14720_v17 = vadd.f32 %v14462_v57, %v1882_v53  ;;  %v1847_v11 = vmul.f32 %v13357_v50, %v14506_v35  ;;  %2565 = vmatpush1.bf16.msra.mxu1 %v12858_v51  ;;  %12175 = vmatpush3.bf16.msra.mxu0 %v12857_v10 }
 0x33f   : > { %13362 = vrsqrt.f32 %v1786_v44  ;;  %v1755_v42 = vmul.f32 0.0625, %v1723_v52  ;;  %v1996_v14 = vmul.f32 0.0625, %v1941_v63  ;;  %v14729_v53 = vmul.f32 %v2027_v58, %v14292_v41  ;;  %v12859_v63 = vld [vmem:[%s17825_s13 + $0x7c] ss:$12 sps:$4 sm:$0xff]  }
 0x340   : > { %17863 = vst [vmem:[#allocation64_spill] sm:$0xff] %v14720_v17  ;;  %2126 = vadd.xlane.f32.xlu1 %v2089_v0  ;;  %1976 = vadd.xlane.f32.xlu0 %v14720_v17  ;;  %v1883_v20 = vmul.f32 %v14454_v46, %v1847_v11  ;;  %v12861_v0 = vld [vmem:[%s17825_s13 + $0x50] ss:$12 sps:$4 sm:$0xff]  }
 0x341   : > { %v13359_v28 = vpop.eup %13358  ;;  %v1787_v35 = vadd.f32 1e-06, %v1755_v42  ;;  %v2028_v47 = vsub.f32 %v14561_v3, %v1996_v14  ;;  %v12862_v42 = vld [vmem:[%s17825_s13 + $0x78] ss:$12 sps:$4 sm:$0xff]   ;;  %2566 = vmatprep.subr.bf16.mxu1 %v12859_v63  ;;  %12176 = vmatprep.subr.bf16.mxu0 %v12861_v0 }
 0x342   : > { %v1943_v50 = vpop.xlane.xlu1 %1942  ;;  %v14735_v44 = vadd.f32 %v14462_v57, %v1883_v20  ;;  %v1848_v52 = vmul.f32 %v13359_v28, %v14519_v61  ;;  %v2091_v61 = vmul.f32 %v14729_v53, %v14729_v53  ;;  %2567 = vmatpush1.bf16.msra.mxu1 %v12862_v42  ;;  %12177 = vmatpush3.bf16.msra.mxu0 %v12861_v0 }
 0x343   : > { %13364 = vrsqrt.f32 %v1787_v35  ;;  %v1997_v58 = vmul.f32 0.0625, %v1943_v50  ;;  %v14747_v10 = vmul.f32 %v2028_v47, %v14292_v41  ;;  %v12865_v50 = vld [vmem:[%s17825_s13 + $0x68] ss:$12 sps:$4 sm:$0xff]   ;;  %v12866_v47 = vld [vmem:[%s17825_s13 + $0x90] ss:$12 sps:$4 sm:$0xff]  }
 0x344   : > { %17864 = vst [vmem:[#allocation65_spill] sm:$0xff] %v14735_v44  ;;  %1978 = vadd.xlane.f32.xlu1 %v14735_v44  ;;  %2128 = vadd.xlane.f32.xlu0 %v2090_v12  ;;  %v1884_v11 = vmul.f32 %v14454_v46, %v1848_v52  ;;  %v12863_v12 = vld [vmem:[%s17825_s13 + $0x94] ss:$12 sps:$4 sm:$0xff]  }
 0x345   : > { %v13361_v14 = vpop.eup %13360  ;;  %v2029_v19 = vsub.f32 %v14567_v32, %v1997_v58  ;;  %2568 = vmatprep.subr.bf16.mxu1 %v12863_v12  ;;  %12178 = vmatprep.subr.bf16.mxu0 %v12865_v50  ;;  %v2092_v42 = vmul.f32 %v14747_v10, %v14747_v10  ;;  %v12870_v12 = vld [vmem:[%s17825_s13 + $0xa8] ss:$12 sps:$4 sm:$0xff]  }
 0x346   : > { %v1945_v20 = vpop.xlane.xlu0 %1944  ;;  %v14750_v51 = vadd.f32 %v14462_v57, %v1884_v11  ;;  %v1849_v28 = vmul.f32 %v13361_v14, %v14524_v60  ;;  %2569 = vmatpush1.bf16.msra.mxu1 %v12866_v47  ;;  %12179 = vmatpush3.bf16.msra.mxu0 %v12865_v50 }
 0x347   : > { %v1998_v35 = vmul.f32 0.0625, %v1945_v20  ;;  %v14759_v63 = vmul.f32 %v2029_v19, %v14292_v41  ;;  %v12867_v19 = vld [vmem:[%s17825_s13 + $0xac] ss:$12 sps:$4 sm:$0xff]  }
 0x348   : > { %17865 = vst [vmem:[#allocation66_spill] sm:$0xff] %v14750_v51  ;;  %2130 = vadd.xlane.f32.xlu1 %v2091_v61  ;;  %1980 = vadd.xlane.f32.xlu0 %v14750_v51  ;;  %v1885_v52 = vmul.f32 %v14454_v46, %v1849_v28  ;;  %v12869_v28 = vld [vmem:[%s17825_s13 + $0x80] ss:$12 sps:$4 sm:$0xff]  }
 0x349   : > { %v13363_v58 = vpop.eup %13362  ;;  %v2030_v11 = vsub.f32 %v14573_v18, %v1998_v35  ;;  %v2093_v50 = vmul.f32 %v14759_v63, %v14759_v63  ;;  %2570 = vmatprep.subr.bf16.mxu1 %v12867_v19  ;;  %12180 = vmatprep.subr.bf16.mxu0 %v12869_v28 }
 0x34a   : > { %v1947_v60 = vpop.xlane.xlu1 %1946  ;;  %v14763_v0 = vadd.f32 %v14462_v57, %v1885_v52  ;;  %v1850_v14 = vmul.f32 %v13363_v58, %v14543_v49  ;;  %2571 = vmatpush1.bf16.msra.mxu1 %v12870_v12  ;;  %12181 = vmatpush3.bf16.msra.mxu0 %v12869_v28 }
 0x34b   : > { %v1999_v61 = vmul.f32 0.0625, %v1947_v60  ;;  %v1949_v20 = vpop.xlane.xlu0 %1948  ;;  %v14774_v16 = vmul.f32 %v2030_v11, %v14292_v41 }
 0x34c   : > { %17866 = vst [vmem:[#allocation67_spill] sm:$0xff] %v14763_v0  ;;  %v2000_v7 = vmul.f32 0.0625, %v1949_v20  ;;  %1982 = vadd.xlane.f32.xlu1 %v14763_v0  ;;  %2132 = vadd.xlane.f32.xlu0 %v2092_v42  ;;  %v1886_v35 = vmul.f32 %v14454_v46, %v1850_v14  ;;  %v12871_v20 = vld [vmem:[%s17825_s13 + $0x98] ss:$12 sps:$4 sm:$0xff]  }
 0x34d   : > { %v13365_v52 = vpop.eup %13364  ;;  %v2031_v49 = vsub.f32 %v14581_v15, %v1999_v61  ;;  %v2094_v19 = vmul.f32 %v14774_v16, %v14774_v16  ;;  %12182 = vmatprep.subr.bf16.mxu0 %v12871_v20 }
 0x34e   : > { %v2032_v47 = vsub.f32 %v14585_v54, %v2000_v7  ;;  %v1951_v58 = vpop.xlane.xlu1 %1950  ;;  %v14781_v60 = vadd.f32 %v14462_v57, %v1886_v35  ;;  %v1851_v42 = vmul.f32 %v13365_v52, %v14553_v6  ;;  %v17692_v35 = vmov 0   ;;  %12183 = vmatpush3.bf16.msra.mxu0 %v12871_v20 }
 0x34f   : > { %v2001_v14 = vmul.f32 0.0625, %v1951_v58  ;;  %v1953_v11 = vpop.xlane.xlu0 %1952  ;;  %v14788_v7 = vmul.f32 %v2031_v49, %v14292_v41  ;;  %2588 = vmatprep.mubr.bf16.mxu1 %v17692_v35  ;;  %v12872_v58 = vld [vmem:[%s17825_s13 + $0xb0] ss:$12 sps:$4 sm:$0xff]  }
 0x350   : > { %17867 = vst [vmem:[#allocation68_spill] sm:$0xff] %v14781_v60  ;;  %v2002_v18 = vmul.f32 0.0625, %v1953_v11  ;;  %2134 = vadd.xlane.f32.xlu1 %v2093_v50  ;;  %1984 = vadd.xlane.f32.xlu0 %v14781_v60  ;;  %v1887_v61 = vmul.f32 %v14454_v46, %v1851_v42  ;;  %v14794_v6 = vmul.f32 %v2032_v47, %v14292_v41 }
 0x351   : > { %v2033_v28 = vsub.f32 %v14593_v59, %v2001_v14  ;;  %v2095_v47 = vmul.f32 %v14788_v7, %v14788_v7  ;;  %12184 = vmatprep.subr.bf16.mxu0 %v12872_v58 }
 0x352   : > { %v2034_v12 = vsub.f32 %v14597_v5, %v2002_v18  ;;  %v1955_v52 = vpop.xlane.xlu1 %1954  ;;  %v14799_v46 = vadd.f32 %v14462_v57, %v1887_v61  ;;  %v2096_v61 = vmul.f32 %v14794_v6, %v14794_v6  ;;  %12185 = vmatpush3.bf16.msra.mxu0 %v12872_v58 }
 0x353   : > { %v2003_v49 = vmul.f32 0.0625, %v1955_v52  ;;  %v1957_v50 = vpop.xlane.xlu0 %1956  ;;  %v14807_v18 = vmul.f32 %v2033_v28, %v14292_v41 }
 0x354   : > { %17868 = vst [vmem:[#allocation69_spill] sm:$0xff] %v14799_v46  ;;  %v2004_v42 = vmul.f32 0.0625, %v1957_v50  ;;  %1986 = vadd.xlane.f32.xlu1 %v14799_v46  ;;  %2136 = vadd.xlane.f32.xlu0 %v2094_v19  ;;  %v14810_v57 = vmul.f32 %v2034_v12, %v14292_v41 }
 0x355   : > { %v2035_v11 = vsub.f32 %v14605_v38, %v2003_v49 }
 0x356   : > { %v2036_v14 = vsub.f32 %v14609_v21, %v2004_v42  ;;  %v1959_v20 = vpop.xlane.xlu1 %1958  ;;  %v2097_v21 = vmul.f32 %v14807_v18, %v14807_v18  ;;  %v2098_v58 = vmul.f32 %v14810_v57, %v14810_v57 }
 0x357   : > { %v2005_v19 = vmul.f32 0.0625, %v1959_v20  ;;  %v1961_v52 = vpop.xlane.xlu0 %1960  ;;  %v14816_v50 = vmul.f32 %v2035_v11, %v14292_v41 }
 0x358   : > { %v2006_v49 = vmul.f32 0.0625, %v1961_v52  ;;  %2138 = vadd.xlane.f32.xlu1 %v2095_v47  ;;  %2140 = vadd.xlane.f32.xlu0 %v2096_v61  ;;  %v14820_v12 = vmul.f32 %v2036_v14, %v14292_v41 }
 0x359   : > { %v2037_v28 = vsub.f32 %v14617_v1, %v2005_v19  ;;  %v2099_v14 = vmul.f32 %v14816_v50, %v14816_v50 }
 0x35a   : > { %v2038_v42 = vsub.f32 %v14621_v9, %v2006_v49  ;;  %v1963_v35 = vpop.xlane.xlu1 %1962 }
 0x35b   : > { %v2007_v20 = vmul.f32 0.0625, %v1963_v35  ;;  %v1965_v47 = vpop.xlane.xlu0 %1964  ;;  %v14828_v11 = vmul.f32 %v2037_v28, %v14292_v41  ;;  %v2100_v35 = vmul.f32 %v14820_v12, %v14820_v12 }
 0x35c   : > { %v2008_v61 = vmul.f32 0.0625, %v1965_v47  ;;  %2142 = vadd.xlane.f32.xlu1 %v2097_v21  ;;  %2144 = vadd.xlane.f32.xlu0 %v2098_v58  ;;  %v14833_v19 = vmul.f32 %v2038_v42, %v14292_v41 }
 0x35d   : > { %v2039_v52 = vsub.f32 %v14629_v56, %v2007_v20  ;;  %v2101_v21 = vmul.f32 %v14828_v11, %v14828_v11 }
 0x35e   : > { %v2040_v49 = vsub.f32 %v14633_v30, %v2008_v61  ;;  %v1967_v9 = vpop.xlane.xlu1 %1966  ;;  %v2102_v20 = vmul.f32 %v14833_v19, %v14833_v19 }
 0x35f   : > { %v2009_v47 = vmul.f32 0.0625, %v1967_v9  ;;  %v14842_v28 = vmul.f32 %v2039_v52, %v14292_v41 }
 0x360   : > { %2146 = vadd.xlane.f32.xlu1 %v2099_v14  ;;  %2148 = vadd.xlane.f32.xlu0 %v2100_v35  ;;  %v14845_v42 = vmul.f32 %v2040_v49, %v14292_v41 }
 0x361   : > { %v2041_v58 = vsub.f32 %v14639_v62, %v2009_v47  ;;  %v2103_v61 = vmul.f32 %v14842_v28, %v14842_v28 }
 0x362   : > { %v2104_v14 = vmul.f32 %v14845_v42, %v14845_v42 }
 0x363   : > { %v14851_v9 = vmul.f32 %v2041_v58, %v14292_v41 }
 0x364   : > { %2150 = vadd.xlane.f32.xlu1 %v2101_v21  ;;  %2152 = vadd.xlane.f32.xlu0 %v2102_v20 }
 0x365   : > { %v2105_v52 = vmul.f32 %v14851_v9, %v14851_v9 }
 0x368   : > { %2154 = vadd.xlane.f32.xlu1 %v2103_v61  ;;  %2156 = vadd.xlane.f32.xlu0 %v2104_v14 }
 0x36c   : > { %2158 = vadd.xlane.f32.xlu1 %v2105_v52 }
 0x3b4   : > { %v2117_v49 = vpop.xlane.xlu0 %2116 }
 0x3b5   : > { %v2180_v35 = vmul.f32 0.0625, %v2117_v49 }
 0x3b7   : > { %v2212_v47 = vadd.f32 1e-06, %v2180_v35 }
 0x3b8   : > { %v2119_v21 = vpop.xlane.xlu1 %2118 }
 0x3b9   : > { %13366 = vrsqrt.f32 %v2212_v47  ;;  %v2181_v20 = vmul.f32 0.0625, %v2119_v21  ;;  %v1969_v58 = vpop.xlane.xlu0 %1968 }
 0x3ba   : > { %v2010_v62 = vmul.f32 0.0625, %v1969_v58  ;;  %v14876_v58 = vld [vmem:[%s13930_s29] sm:$0xff] }
 0x3bb   : > { %v2213_v30 = vadd.f32 1e-06, %v2181_v20 }
 0x3bc   : > { %v2042_v56 = vsub.f32 %v14662_v2, %v2010_v62  ;;  %v1971_v1 = vpop.xlane.xlu1 %1970 }
 0x3bd   : > { %13368 = vrsqrt.f32 %v2213_v30  ;;  %v2011_v38 = vmul.f32 0.0625, %v1971_v1  ;;  %v2121_v61 = vpop.xlane.xlu0 %2120  ;;  %v14870_v30 = vsub.s32 4, %v14157_v25 }
 0x3be   : > { %v14861_v14 = vmul.f32 %v2042_v56, %v14292_v41  ;;  %v2182_v5 = vmul.f32 0.0625, %v2121_v61 }
 0x3bf   : > { %v2043_v52 = vsub.f32 %v14671_v45, %v2011_v38  ;;  %17869 = vst [vmem:[#allocation70_spill] sm:$0xff] %v14870_v30  ;;  %v14880_v61 = vrot.slane %v14876_v58, %v14870_v30 }
 0x3c0   : > { %v2214_v49 = vadd.f32 1e-06, %v2182_v5  ;;  %v2123_v35 = vpop.xlane.xlu1 %2122  ;;  %v2106_v47 = vmul.f32 %v14861_v14, %v14861_v14 }
 0x3c1   : > { %v14867_v21 = vmul.f32 %v2043_v52, %v14292_v41  ;;  %v2183_v62 = vmul.f32 0.0625, %v2123_v35  ;;  %v14883_v52 = vsub.s32 5, %v14157_v25 }
 0x3c2   : > { %13370 = vrsqrt.f32 %v2214_v49  ;;  %2160 = vadd.xlane.f32.xlu0 %v2106_v47 }
 0x3c3   : > { %v13367_v1 = vpop.eup %13366  ;;  %v2215_v56 = vadd.f32 1e-06, %v2183_v62  ;;  %v2107_v38 = vmul.f32 %v14867_v21, %v14867_v21  ;;  %17870 = vst [vmem:[#allocation71_spill] sm:$0xff] %v14883_v52 }
 0x3c4   : > { %v2276_v20 = vmul.f32 %v13367_v1, %v14647_v40  ;;  %v14890_v40 = vrot.slane %v14876_v58, %v14883_v52 }
 0x3c5   : > { %13372 = vrsqrt.f32 %v2215_v56  ;;  %2162 = vadd.xlane.f32.xlu1 %v2107_v38  ;;  %v1973_v5 = vpop.xlane.xlu0 %1972 }
 0x3c6   : > { %v2012_v49 = vmul.f32 0.0625, %v1973_v5  ;;  %v2312_v45 = vmul.f32 %v14880_v61, %v2276_v20 }
 0x3c7   : > { %v13369_v35 = vpop.eup %13368 }
 0x3c8   : > { %v2044_v47 = vsub.f32 %v14690_v27, %v2012_v49  ;;  %v2277_v62 = vmul.f32 %v13369_v35, %v14654_v34  ;;  %v2348_v52 = vadd.f32 %v14890_v40, %v2312_v45 }
 0x3c9   : > { %v1975_v56 = vpop.xlane.xlu1 %1974  ;;  %v2125_v38 = vpop.xlane.xlu0 %2124 }
 0x3ca   : > { %v14893_v1 = vmul.f32 %v2044_v47, %v14292_v41  ;;  %v2013_v30 = vmul.f32 0.0625, %v1975_v56  ;;  %v2184_v2 = vmul.f32 0.0625, %v2125_v38  ;;  %v2313_v5 = vmul.f32 %v14880_v61, %v2277_v62 }
 0x3cc   : > { %v13371_v59 = vpop.eup %13370  ;;  %v2045_v49 = vsub.f32 %v14702_v13, %v2013_v30  ;;  %v2216_v27 = vadd.f32 1e-06, %v2184_v2  ;;  %v2108_v34 = vmul.f32 %v14893_v1, %v14893_v1  ;;  %v2349_v20 = vadd.f32 %v14890_v40, %v2313_v5 }
 0x3cd   : > { %v2127_v35 = vpop.xlane.xlu1 %2126  ;;  %v1977_v54 = vpop.xlane.xlu0 %1976  ;;  %v2278_v47 = vmul.f32 %v13371_v59, %v14667_v29 }
 0x3ce   : > { %v14903_v56 = vmul.f32 %v2045_v49, %v14292_v41  ;;  %13374 = vrsqrt.f32 %v2216_v27  ;;  %v2185_v62 = vmul.f32 0.0625, %v2127_v35  ;;  %v2014_v38 = vmul.f32 0.0625, %v1977_v54  ;;  %2164 = vadd.xlane.f32.xlu0 %v2108_v34 }
 0x3cf   : > { %v13373_v30 = vpop.eup %13372  ;;  %v2380_v2 = vpack.c.bf16 %v2349_v20, %v2348_v52  ;;  %v2314_v45 = vmul.f32 %v14880_v61, %v2278_v47  ;;  %v17871_v49 = vmov 0  }
 0x3d0   : > { %v2217_v13 = vadd.f32 1e-06, %v2185_v62  ;;  %v2046_v15 = vsub.f32 %v14720_v17, %v2014_v38  ;;  %v2109_v5 = vmul.f32 %v14903_v56, %v14903_v56  ;;  %v2279_v32 = vmul.f32 %v13373_v30, %v14677_v4 }
 0x3d1   : > { %2589 = vmatmul.mubr.bf16.vlgmr.msra.gmra.mrb[0].mxu1 %v2380_v2  ;;  %12186 = vmatprep.mubr.bf16.mxu0 %v2380_v2  ;;  %v1979_v59 = vpop.xlane.xlu1 %1978  ;;  %v2129_v29 = vpop.xlane.xlu0 %2128 }
 0x3d2   : > { %13376 = vrsqrt.f32 %v2217_v13  ;;  %v14911_v54 = vmul.f32 %v2046_v15, %v14292_v41  ;;  %v2015_v27 = vmul.f32 0.0625, %v1979_v59  ;;  %v2186_v52 = vmul.f32 0.0625, %v2129_v29  ;;  %2166 = vadd.xlane.f32.xlu1 %v2109_v5  ;;  %2598 = vmatprep.mubr.bf16.mxu1 %v17871_v49 }
 0x3d3   : > { %v2315_v34 = vmul.f32 %v14880_v61, %v2279_v32  ;;  %v2350_v13 = vadd.f32 %v14890_v40, %v2314_v45 }
 0x3d4   : > { %v2047_v20 = vsub.f32 %v14735_v44, %v2015_v27  ;;  %v2218_v4 = vadd.f32 1e-06, %v2186_v52  ;;  %v2110_v35 = vmul.f32 %v14911_v54, %v14911_v54 }
 0x3d5   : > { %v2131_v62 = vpop.xlane.xlu1 %2130  ;;  %v1981_v38 = vpop.xlane.xlu0 %1980  ;;  %v2351_v15 = vadd.f32 %v14890_v40, %v2315_v34 }
 0x3d6   : > { %v14921_v47 = vmul.f32 %v2047_v20, %v14292_v41  ;;  %13378 = vrsqrt.f32 %v2218_v4  ;;  %v2187_v30 = vmul.f32 0.0625, %v2131_v62  ;;  %v2016_v2 = vmul.f32 0.0625, %v1981_v38  ;;  %2168 = vadd.xlane.f32.xlu0 %v2110_v35 }
 0x3d7   : > { %v2381_v32 = vpack.c.bf16 %v2351_v15, %v2350_v13 }
 0x3d8   : > { %v13375_v5 = vpop.eup %13374  ;;  %v2219_v59 = vadd.f32 1e-06, %v2187_v30  ;;  %v2048_v29 = vsub.f32 %v14750_v51, %v2016_v2  ;;  %v2111_v27 = vmul.f32 %v14921_v47, %v14921_v47 }
 0x3d9   : > { %2599 = vmatmul.mubr.bf16.gmra.mrb[4].mxu1 %v2381_v32  ;;  %12187 = vmatmul.mubr.bf16.vlgmr.msra.gmra.mrb[32].mxu0 %v2381_v32  ;;  %v1983_v45 = vpop.xlane.xlu1 %1982  ;;  %v2133_v52 = vpop.xlane.xlu0 %2132  ;;  %v2280_v34 = vmul.f32 %v13375_v5, %v14686_v48 }
 0x3da   : > { %13380 = vrsqrt.f32 %v2219_v59  ;;  %v14928_v20 = vmul.f32 %v2048_v29, %v14292_v41  ;;  %v2017_v4 = vmul.f32 0.0625, %v1983_v45  ;;  %v2188_v35 = vmul.f32 0.0625, %v2133_v52  ;;  %2170 = vadd.xlane.f32.xlu1 %v2111_v27  ;;  %2608 = vmatprep.mubr.bf16.mxu1 %v17871_v49 }
 0x3db   : > { %v2316_v32 = vmul.f32 %v14880_v61, %v2280_v34 }
 0x3dc   : > { %v13377_v62 = vpop.eup %13376  ;;  %v2049_v38 = vsub.f32 %v14763_v0, %v2017_v4  ;;  %v2220_v13 = vadd.f32 1e-06, %v2188_v35  ;;  %v2112_v15 = vmul.f32 %v14928_v20, %v14928_v20 }
 0x3dd   : > { %v2135_v30 = vpop.xlane.xlu1 %2134  ;;  %v1985_v2 = vpop.xlane.xlu0 %1984  ;;  %v2281_v48 = vmul.f32 %v13377_v62, %v14705_v8  ;;  %v2352_v34 = vadd.f32 %v14890_v40, %v2316_v32 }
 0x3de   : > { %v14937_v5 = vmul.f32 %v2049_v38, %v14292_v41  ;;  %13382 = vrsqrt.f32 %v2220_v13  ;;  %v2189_v59 = vmul.f32 0.0625, %v2135_v30  ;;  %v2018_v29 = vmul.f32 0.0625, %v1985_v2  ;;  %2172 = vadd.xlane.f32.xlu0 %v2112_v15 }
 0x3df   : > { %v2317_v27 = vmul.f32 %v14880_v61, %v2281_v48 }
 0x3e0   : > { %v13379_v45 = vpop.eup %13378  ;;  %v2221_v52 = vadd.f32 1e-06, %v2189_v59  ;;  %v2050_v4 = vsub.f32 %v14781_v60, %v2018_v29  ;;  %v2113_v35 = vmul.f32 %v14937_v5, %v14937_v5 }
 0x3e1   : > { %v1987_v0 = vpop.xlane.xlu1 %1986  ;;  %v2137_v8 = vpop.xlane.xlu0 %2136  ;;  %v2353_v62 = vadd.f32 %v14890_v40, %v2317_v27  ;;  %v2282_v38 = vmul.f32 %v13379_v45, %v14714_v22 }
 0x3e2   : > { %13384 = vrsqrt.f32 %v2221_v52  ;;  %v14947_v13 = vmul.f32 %v2050_v4, %v14292_v41  ;;  %v2019_v15 = vmul.f32 0.0625, %v1987_v0  ;;  %v2190_v30 = vmul.f32 0.0625, %v2137_v8  ;;  %2174 = vadd.xlane.f32.xlu1 %v2113_v35 }
 0x3e3   : > { %v2382_v2 = vpack.c.bf16 %v2353_v62, %v2352_v34  ;;  %v2318_v45 = vmul.f32 %v14880_v61, %v2282_v38 }
 0x3e4   : > { %v13381_v48 = vpop.eup %13380  ;;  %v2051_v59 = vsub.f32 %v14799_v46, %v2019_v15  ;;  %v2222_v29 = vadd.f32 1e-06, %v2190_v30  ;;  %v2114_v60 = vmul.f32 %v14947_v13, %v14947_v13 }
 0x3e5   : > { %v2139_v32 = vpop.xlane.xlu1 %2138  ;;  %2609 = vmatmul.mubr.bf16.gmra.mrb[8].mxu1 %v2382_v2  ;;  %12190 = vmatprep.mubr.bf16.mxu0 %v2382_v2  ;;  %v2141_v27 = vpop.xlane.xlu0 %2140  ;;  %v2283_v22 = vmul.f32 %v13381_v48, %v14729_v53  ;;  %v2354_v38 = vadd.f32 %v14890_v40, %v2318_v45 }
 0x3e6   : > { %v14955_v0 = vmul.f32 %v2051_v59, %v14292_v41  ;;  %13386 = vrsqrt.f32 %v2222_v29  ;;  %v2191_v52 = vmul.f32 0.0625, %v2139_v32  ;;  %v2192_v4 = vmul.f32 0.0625, %v2141_v27  ;;  %2176 = vadd.xlane.f32.xlu0 %v2114_v60  ;;  %2618 = vmatprep.mubr.bf16.mxu1 %v17871_v49 }
 0x3e7   : > { %v2319_v35 = vmul.f32 %v14880_v61, %v2283_v22 }
 0x3e8   : > { %v13383_v8 = vpop.eup %13382  ;;  %v2223_v34 = vadd.f32 1e-06, %v2191_v52  ;;  %v2224_v62 = vadd.f32 1e-06, %v2192_v4  ;;  %v2115_v15 = vmul.f32 %v14955_v0, %v14955_v0 }
 0x3e9   : > { %v2143_v53 = vpop.xlane.xlu1 %2142  ;;  %v2145_v30 = vpop.xlane.xlu0 %2144  ;;  %v2355_v2 = vadd.f32 %v14890_v40, %v2319_v35  ;;  %v2284_v48 = vmul.f32 %v13383_v8, %v14747_v10 }
 0x3ea   : > { %13388 = vrsqrt.f32 %v2223_v34  ;;  %v2193_v60 = vmul.f32 0.0625, %v2143_v53  ;;  %v2194_v59 = vmul.f32 0.0625, %v2145_v30  ;;  %2178 = vadd.xlane.f32.xlu1 %v2115_v15 }
 0x3eb   : > { %13390 = vrsqrt.f32 %v2224_v62  ;;  %v2383_v29 = vpack.c.bf16 %v2355_v2, %v2354_v38  ;;  %v2320_v45 = vmul.f32 %v14880_v61, %v2284_v48 }
 0x3ec   : > { %v13385_v32 = vpop.eup %13384  ;;  %v2225_v27 = vadd.f32 1e-06, %v2193_v60  ;;  %v2226_v22 = vadd.f32 1e-06, %v2194_v59 }
 0x3ed   : > { %v2147_v52 = vpop.xlane.xlu1 %2146  ;;  %2619 = vmatmul.mubr.bf16.gmra.mrb[12].mxu1 %v2383_v29  ;;  %12191 = vmatmul.mubr.bf16.gmra.mrb[36].mxu0 %v2383_v29  ;;  %v2149_v4 = vpop.xlane.xlu0 %2148  ;;  %v2285_v41 = vmul.f32 %v13385_v32, %v14759_v63  ;;  %v2356_v38 = vadd.f32 %v14890_v40, %v2320_v45 }
 0x3ee   : > { %13392 = vrsqrt.f32 %v2225_v27  ;;  %v2195_v35 = vmul.f32 0.0625, %v2147_v52  ;;  %v2196_v10 = vmul.f32 0.0625, %v2149_v4  ;;  %2628 = vmatprep.mubr.bf16.mxu1 %v17871_v49 }
 0x3ef   : > { %13394 = vrsqrt.f32 %v2226_v22  ;;  %v2321_v8 = vmul.f32 %v14880_v61, %v2285_v41 }
 0x3f0   : > { %v13387_v34 = vpop.eup %13386  ;;  %v2227_v62 = vadd.f32 1e-06, %v2195_v35  ;;  %v2228_v15 = vadd.f32 1e-06, %v2196_v10 }
 0x3f1   : > { %v2151_v53 = vpop.xlane.xlu1 %2150  ;;  %v2153_v30 = vpop.xlane.xlu0 %2152  ;;  %v2357_v2 = vadd.f32 %v14890_v40, %v2321_v8  ;;  %v2286_v63 = vmul.f32 %v13387_v34, %v14774_v16 }
 0x3f2   : > { %13396 = vrsqrt.f32 %v2227_v62  ;;  %v2197_v48 = vmul.f32 0.0625, %v2151_v53  ;;  %v2198_v60 = vmul.f32 0.0625, %v2153_v30 }
 0x3f3   : > { %13398 = vrsqrt.f32 %v2228_v15  ;;  %v2384_v59 = vpack.c.bf16 %v2357_v2, %v2356_v38  ;;  %v2322_v45 = vmul.f32 %v14880_v61, %v2286_v63 }
 0x3f4   : > { %v13389_v29 = vpop.eup %13388  ;;  %v2229_v32 = vadd.f32 1e-06, %v2197_v48  ;;  %v2230_v27 = vadd.f32 1e-06, %v2198_v60 }
 0x3f5   : > { %v13391_v41 = vpop.eup %13390  ;;  %v2155_v22 = vpop.xlane.xlu1 %2154  ;;  %2629 = vmatmul.mubr.bf16.gmra.mrb[16].mxu1 %v2384_v59  ;;  %12194 = vmatprep.mubr.bf16.mxu0 %v2384_v59  ;;  %v2287_v4 = vmul.f32 %v13389_v29, %v14788_v7  ;;  %v2358_v7 = vadd.f32 %v14890_v40, %v2322_v45 }
 0x3f6   : > { %v2157_v52 = vpop.xlane.xlu0 %2156  ;;  %13400 = vrsqrt.f32 %v2229_v32  ;;  %v2199_v35 = vmul.f32 0.0625, %v2155_v22  ;;  %2638 = vmatprep.mubr.bf16.mxu1 %v17871_v49  ;;  %v2288_v10 = vmul.f32 %v13391_v41, %v14794_v6 }
 0x3f7   : > { %v2200_v16 = vmul.f32 0.0625, %v2157_v52  ;;  %13402 = vrsqrt.f32 %v2230_v27  ;;  %v2323_v8 = vmul.f32 %v14880_v61, %v2287_v4 }
 0x3f8   : > { %v13393_v34 = vpop.eup %13392  ;;  %v2231_v62 = vadd.f32 1e-06, %v2199_v35  ;;  %v2324_v53 = vmul.f32 %v14880_v61, %v2288_v10 }
 0x3f9   : > { %v2232_v15 = vadd.f32 1e-06, %v2200_v16  ;;  %v13395_v30 = vpop.eup %13394  ;;  %v2159_v38 = vpop.xlane.xlu1 %2158  ;;  %v2359_v2 = vadd.f32 %v14890_v40, %v2323_v8  ;;  %v2289_v63 = vmul.f32 %v13393_v34, %v14807_v18 }
 0x3fa   : > { %13404 = vrsqrt.f32 %v2231_v62  ;;  %v2201_v48 = vmul.f32 0.0625, %v2159_v38  ;;  %v2290_v6 = vmul.f32 %v13395_v30, %v14810_v57  ;;  %v2360_v27 = vadd.f32 %v14890_v40, %v2324_v53 }
 0x3fb   : > { %13406 = vrsqrt.f32 %v2232_v15  ;;  %v2385_v60 = vpack.c.bf16 %v2359_v2, %v2358_v7  ;;  %v2325_v59 = vmul.f32 %v14880_v61, %v2289_v63 }
 0x3fc   : > { %v13397_v29 = vpop.eup %13396  ;;  %v2233_v32 = vadd.f32 1e-06, %v2201_v48  ;;  %v2326_v18 = vmul.f32 %v14880_v61, %v2290_v6 }
 0x3fd   : > { %v13399_v41 = vpop.eup %13398  ;;  %2639 = vmatmul.mubr.bf16.gmra.mrb[20].mxu1 %v2385_v60  ;;  %12195 = vmatmul.mubr.bf16.gmra.mrb[40].mxu0 %v2385_v60  ;;  %v2361_v22 = vadd.f32 %v14890_v40, %v2325_v59  ;;  %v2291_v52 = vmul.f32 %v13397_v29, %v14816_v50 }
 0x3fe   : > { %13408 = vrsqrt.f32 %v2233_v32  ;;  %2648 = vmatprep.mubr.bf16.mxu1 %v17871_v49  ;;  %v2292_v57 = vmul.f32 %v13399_v41, %v14820_v12  ;;  %v2362_v8 = vadd.f32 %v14890_v40, %v2326_v18 }
 0x3ff   : > { %v2386_v4 = vpack.c.bf16 %v2361_v22, %v2360_v27  ;;  %v2327_v45 = vmul.f32 %v14880_v61, %v2291_v52 }
 0x400   : > { %v13401_v35 = vpop.eup %13400  ;;  %v2328_v16 = vmul.f32 %v14880_v61, %v2292_v57 }
 0x401   : > { %v13403_v10 = vpop.eup %13402  ;;  %12198 = vmatprep.mubr.bf16.mxu0 %v2386_v4  ;;  %v2363_v34 = vadd.f32 %v14890_v40, %v2327_v45  ;;  %v2293_v50 = vmul.f32 %v13401_v35, %v14828_v11 }
 0x402   : > { %v2294_v62 = vmul.f32 %v13403_v10, %v14833_v19  ;;  %v2364_v30 = vadd.f32 %v14890_v40, %v2328_v16 }
 0x403   : > { %v2387_v15 = vpack.c.bf16 %v2363_v34, %v2362_v8  ;;  %v2329_v53 = vmul.f32 %v14880_v61, %v2293_v50 }
 0x404   : > { %v13405_v12 = vpop.eup %13404  ;;  %v2330_v63 = vmul.f32 %v14880_v61, %v2294_v62 }
 0x405   : > { %v13407_v38 = vpop.eup %13406  ;;  %2649 = vmatmul.mubr.bf16.gmra.mrb[24].mxu1 %v2386_v4  ;;  %12199 = vmatmul.mubr.bf16.gmra.mrb[44].mxu0 %v2387_v15  ;;  %v2365_v7 = vadd.f32 %v14890_v40, %v2329_v53  ;;  %v2295_v2 = vmul.f32 %v13405_v12, %v14842_v28 }
 0x406   : > { %2658 = vmatprep.mubr.bf16.mxu1 %v17871_v49  ;;  %v2296_v11 = vmul.f32 %v13407_v38, %v14845_v42  ;;  %v2366_v60 = vadd.f32 %v14890_v40, %v2330_v63 }
 0x407   : > { %v2388_v19 = vpack.c.bf16 %v2365_v7, %v2364_v30  ;;  %v2331_v48 = vmul.f32 %v14880_v61, %v2295_v2 }
 0x408   : > { %v13409_v6 = vpop.eup %13408  ;;  %v2332_v32 = vmul.f32 %v14880_v61, %v2296_v11 }
 0x409   : > { %12202 = vmatprep.mubr.bf16.mxu0 %v2388_v19  ;;  %v2367_v59 = vadd.f32 %v14890_v40, %v2331_v48  ;;  %v2297_v29 = vmul.f32 %v13409_v6, %v14851_v9 }
 0x40a   : > { %v2368_v42 = vadd.f32 %v14890_v40, %v2332_v32 }
 0x40b   : > { %v2389_v28 = vpack.c.bf16 %v2367_v59, %v2366_v60  ;;  %v2333_v27 = vmul.f32 %v14880_v61, %v2297_v29 }
 0x40d   : > { %2659 = vmatmul.mubr.bf16.gmra.mrb[28].mxu1 %v2387_v15  ;;  %12203 = vmatmul.mubr.bf16.gmra.mrb[48].mxu0 %v2389_v28  ;;  %v2369_v41 = vadd.f32 %v14890_v40, %v2333_v27 }
 0x40e   : > { %2668 = vmatprep.mubr.bf16.mxu1 %v17871_v49 }
 0x40f   : > { %v2390_v22 = vpack.c.bf16 %v2369_v41, %v2368_v42 }
 0x411   : > { %12206 = vmatprep.mubr.bf16.mxu0 %v2390_v22 }
 0x415   : > { %2669 = vmatmul.mubr.bf16.gmra.mrb[32].mxu1 %v2388_v19 }
 0x416   : > { %2678 = vmatprep.mubr.bf16.mxu1 %v17871_v49 }
 0x41d   : > { %2679 = vmatmul.mubr.bf16.gmra.mrb[36].mxu1 %v2389_v28 }
 0x41e   : > { %2688 = vmatprep.mubr.bf16.mxu1 %v17871_v49 }
 0x425   : > { %2689 = vmatmul.mubr.bf16.gmra.mrb[40].mxu1 %v2390_v22 }
 0x426   : > { %2698 = vmatprep.mubr.bf16.mxu1 %v17871_v49 }
 0x44f   : > { %v2161_v9 = vpop.xlane.xlu0 %2160 }
 0x450   : > { %v2202_v52 = vmul.f32 0.0625, %v2161_v9 }
 0x452   : > { %v2234_v18 = vadd.f32 1e-06, %v2202_v52  ;;  %v2163_v57 = vpop.xlane.xlu1 %2162 }
 0x453   : > { %v2203_v4 = vmul.f32 0.0625, %v2163_v57 }
 0x454   : > { %13410 = vrsqrt.f32 %v2234_v18 }
 0x455   : > { %v2235_v45 = vadd.f32 1e-06, %v2203_v4 }
 0x457   : > { %13412 = vrsqrt.f32 %v2235_v45 }
 0x45b   : > { %v2165_v35 = vpop.xlane.xlu0 %2164 }
 0x45c   : > { %v2204_v16 = vmul.f32 0.0625, %v2165_v35 }
 0x45e   : > { %v13411_v10 = vpop.eup %13410  ;;  %v2236_v8 = vadd.f32 1e-06, %v2204_v16 }
 0x45f   : > { %v2167_v34 = vpop.xlane.xlu1 %2166  ;;  %v2298_v50 = vmul.f32 %v13411_v10, %v14861_v14 }
 0x460   : > { %13414 = vrsqrt.f32 %v2236_v8  ;;  %v2205_v62 = vmul.f32 0.0625, %v2167_v34 }
 0x461   : > { %v13413_v15 = vpop.eup %13412  ;;  %v2334_v30 = vmul.f32 %v14880_v61, %v2298_v50 }
 0x462   : > { %v2237_v53 = vadd.f32 1e-06, %v2205_v62  ;;  %v2299_v12 = vmul.f32 %v13413_v15, %v14867_v21 }
 0x463   : > { %v2169_v38 = vpop.xlane.xlu0 %2168  ;;  %v2370_v11 = vadd.f32 %v14890_v40, %v2334_v30 }
 0x464   : > { %13416 = vrsqrt.f32 %v2237_v53  ;;  %v2206_v7 = vmul.f32 0.0625, %v2169_v38  ;;  %v2335_v2 = vmul.f32 %v14880_v61, %v2299_v12 }
 0x466   : > { %v2238_v63 = vadd.f32 1e-06, %v2206_v7  ;;  %v2371_v19 = vadd.f32 %v14890_v40, %v2335_v2 }
 0x467   : > { %v2171_v48 = vpop.xlane.xlu1 %2170 }
 0x468   : > { %13418 = vrsqrt.f32 %v2238_v63  ;;  %v2207_v14 = vmul.f32 0.0625, %v2171_v48  ;;  %v2391_v6 = vpack.c.bf16 %v2371_v19, %v2370_v11 }
 0x46a   : > { %v13415_v60 = vpop.eup %13414  ;;  %v2239_v59 = vadd.f32 1e-06, %v2207_v14  ;;  %2699 = vmatmul.mubr.bf16.gmra.mrb[44].mxu1 %v2391_v6  ;;  %12207 = vmatmul.mubr.bf16.gmra.mrb[52].mxu0 %v2391_v6 }
 0x46b   : > { %v2173_v21 = vpop.xlane.xlu0 %2172  ;;  %2708 = vmatprep.mubr.bf16.mxu1 %v17871_v49  ;;  %v2300_v29 = vmul.f32 %v13415_v60, %v14893_v1 }
 0x46c   : > { %13420 = vrsqrt.f32 %v2239_v59  ;;  %v2208_v32 = vmul.f32 0.0625, %v2173_v21 }
 0x46d   : > { %v2336_v22 = vmul.f32 %v14880_v61, %v2300_v29 }
 0x46e   : > { %v13417_v28 = vpop.eup %13416  ;;  %v2240_v27 = vadd.f32 1e-06, %v2208_v32 }
 0x46f   : > { %v2175_v42 = vpop.xlane.xlu1 %2174  ;;  %v2301_v41 = vmul.f32 %v13417_v28, %v14903_v56  ;;  %v2372_v45 = vadd.f32 %v14890_v40, %v2336_v22 }
 0x470   : > { %13422 = vrsqrt.f32 %v2240_v27  ;;  %v2209_v9 = vmul.f32 0.0625, %v2175_v42 }
 0x471   : > { %v2337_v52 = vmul.f32 %v14880_v61, %v2301_v41 }
 0x472   : > { %v13419_v18 = vpop.eup %13418  ;;  %v2241_v57 = vadd.f32 1e-06, %v2209_v9 }
 0x473   : > { %v2177_v4 = vpop.xlane.xlu0 %2176  ;;  %v2373_v1 = vadd.f32 %v14890_v40, %v2337_v52  ;;  %v2302_v35 = vmul.f32 %v13419_v18, %v14911_v54  ;;  %v1106_v18 = vld [vmem:[%s13930_s29 + $0x8] sm:$0x1f] }
 0x474   : > { %13424 = vrsqrt.f32 %v2241_v57  ;;  %v2210_v16 = vmul.f32 0.0625, %v2177_v4  ;;  %v15058_v57 = vrot.slane %v1106_v18, %v14288_v37 }
 0x475   : > { %v2392_v10 = vpack.c.bf16 %v2373_v1, %v2372_v45  ;;  %v2338_v62 = vmul.f32 %v14880_v61, %v2302_v35 }
 0x476   : > { %v13421_v8 = vpop.eup %13420  ;;  %v2242_v56 = vadd.f32 1e-06, %v2210_v16 }
 0x477   : > { %v2179_v34 = vpop.xlane.xlu1 %2178  ;;  %2709 = vmatmul.mubr.bf16.gmra.mrb[48].mxu1 %v2392_v10  ;;  %12210 = vmatprep.mubr.bf16.mxu0 %v2392_v10  ;;  %v2303_v50 = vmul.f32 %v13421_v8, %v14921_v47  ;;  %v2374_v30 = vadd.f32 %v14890_v40, %v2338_v62 }
 0x478   : > { %13426 = vrsqrt.f32 %v2242_v56  ;;  %v2211_v15 = vmul.f32 0.0625, %v2179_v34  ;;  %2718 = vmatprep.mubr.bf16.mxu1 %v17871_v49 }
 0x479   : > { %v2339_v53 = vmul.f32 %v14880_v61, %v2303_v50 }
 0x47a   : > { %v13423_v12 = vpop.eup %13422  ;;  %v2243_v54 = vadd.f32 1e-06, %v2211_v15 }
 0x47b   : > { %v2375_v38 = vadd.f32 %v14890_v40, %v2339_v53  ;;  %v2304_v7 = vmul.f32 %v13423_v12, %v14928_v20 }
 0x47c   : > { %13428 = vrsqrt.f32 %v2243_v54 }
 0x47d   : > { %v2393_v2 = vpack.c.bf16 %v2375_v38, %v2374_v30  ;;  %v2340_v11 = vmul.f32 %v14880_v61, %v2304_v7  ;;  %v15083_v38 = vsub.s32 7, %v14157_v25 }
 0x47e   : > { %v13425_v63 = vpop.eup %13424 }
 0x47f   : > { %2719 = vmatmul.mubr.bf16.gmra.mrb[52].mxu1 %v2393_v2  ;;  %12211 = vmatmul.mubr.bf16.gmra.mrb[56].mxu0 %v2393_v2  ;;  %v2305_v47 = vmul.f32 %v13425_v63, %v14937_v5  ;;  %v2376_v14 = vadd.f32 %v14890_v40, %v2340_v11  ;;  %17873 = vst [vmem:[#allocation73_spill] sm:$0xff] %v15083_v38 }
 0x480   : > { %2728 = vmatprep.mubr.bf16.mxu1 %v17871_v49  ;;  %v15089_v2 = vrot.slane %v14876_v58, %v15083_v38 }
 0x481   : > { %v2341_v19 = vmul.f32 %v14880_v61, %v2305_v47 }
 0x482   : > { %v13427_v48 = vpop.eup %13426 }
 0x483   : > { %v2377_v6 = vadd.f32 %v14890_v40, %v2341_v19  ;;  %v2306_v20 = vmul.f32 %v13427_v48, %v14947_v13  ;;  %v15048_v13 = vsub.s32 6, %v14157_v25 }
 0x485   : > { %v2394_v60 = vpack.c.bf16 %v2377_v6, %v2376_v14  ;;  %v2342_v5 = vmul.f32 %v14880_v61, %v2306_v20  ;;  %17872 = vst [vmem:[#allocation72_spill] sm:$0xff] %v15048_v13 }
 0x486   : > { %v13429_v59 = vpop.eup %13428 }
 0x487   : > { %2729 = vmatmul.mubr.bf16.gmra.mrb[56].mxu1 %v2394_v60  ;;  %12214 = vmatprep.mubr.bf16.mxu0 %v2394_v60  ;;  %v2307_v21 = vmul.f32 %v13429_v59, %v14955_v0  ;;  %v2378_v32 = vadd.f32 %v14890_v40, %v2342_v5  ;;  %v15052_v0 = vrot.slane %v14876_v58, %v15048_v13 }
 0x488   : > { %2738 = vmatprep.mubr.bf16.mxu1 %v17871_v49 }
 0x489   : > { %v2343_v29 = vmul.f32 %v14880_v61, %v2307_v21 }
 0x48b   : > { %v2379_v28 = vadd.f32 %v14890_v40, %v2343_v29 }
 0x48d   : > { %v2395_v27 = vpack.c.bf16 %v2379_v28, %v2378_v32 }
 0x48f   : > { %2739 = vmatmul.mubr.bf16.gmra.mrb[60].mxu1 %v2395_v27  ;;  %12215 = vmatmul.mubr.bf16.gmra.mrb[60].mxu0 %v2395_v27 }
 0x4a4   : > { %v2590_v42 = vpop.f32.mrb[0].mxu1 }
 0x4a5   : > { %v2592_v41 = vpop.f32.mrb[1].mxu1  ;;  %v2914_v9 = vadd.f32 %v15052_v0, %v2590_v42 }
 0x4a6   : > { %v2594_v22 = vpop.f32.mrb[2].mxu1  ;;  %v15092_v11 = vadd.f32 %v15089_v2, %v2592_v41 }
 0x4a7   : > { %v2915_v61 = vadd.f32 %v15052_v0, %v2594_v22  ;;  %v2596_v52 = vpop.f32.mrb[3].mxu1 }
 0x4a8   : > { %v15104_v20 = vadd.f32 %v15089_v2, %v2596_v52 }
 0x4a9   : > { %v3382_v40 = vpack.c.bf16 %v2915_v61, %v2914_v9 }
 0x4ab   : > { %12234 = vmatprep.mubr.bf16.mxu1 %v3382_v40 }
 0x4ac   : > { %v2600_v4 = vpop.f32.mrb[4].mxu1  ;;  %v12188_v45 = vpop.f32.mrb[32].mxu0 }
 0x4ad   : > { %v2602_v1 = vpop.f32.mrb[5].mxu1  ;;  %v2783_v35 = vpop.f32.mrb[33].mxu0  ;;  %v15061_v8 = vadd.f32 %v15052_v0, %v2600_v4  ;;  %v15064_v56 = vadd.f32 %v12188_v45, %v15058_v57 }
 0x4ae   : > { %v2604_v16 = vpop.f32.mrb[6].mxu1  ;;  %v12189_v10 = vpop.f32.mrb[34].mxu0  ;;  %v15073_v53 = vadd.f32 %v15058_v57, %v2783_v35  ;;  %v15116_v27 = vadd.f32 %v15089_v2, %v2602_v1 }
 0x4af   : > { %v15067_v34 = vadd.f32 %v15052_v0, %v2604_v16  ;;  %v15070_v50 = vadd.f32 %v12189_v10, %v15058_v57  ;;  %v2606_v62 = vpop.f32.mrb[7].mxu1  ;;  %v2786_v15 = vpop.f32.mrb[35].mxu0 }
 0x4b0   : > { %v15076_v12 = vadd.f32 %v15058_v57, %v2786_v15  ;;  %v15119_v42 = vadd.f32 %v15089_v2, %v2606_v62 }
 0x4b8   : > { %v2610_v63 = vpop.f32.mrb[8].mxu1 }
 0x4b9   : > { %v2612_v47 = vpop.f32.mrb[9].mxu1  ;;  %v15098_v14 = vadd.f32 %v15052_v0, %v2610_v63 }
 0x4ba   : > { %v15095_v19 = vadd.f32 %v15089_v2, %v2612_v47  ;;  %v2614_v48 = vpop.f32.mrb[10].mxu1 }
 0x4bb   : > { %v15101_v25 = vadd.f32 %v15052_v0, %v2614_v48  ;;  %v2616_v6 = vpop.f32.mrb[11].mxu1 }
 0x4bc   : > { %v15107_v58 = vadd.f32 %v15089_v2, %v2616_v6  ;;  %v3018_v60 = vmax.f32 %v15092_v11, %v15095_v19 }
 0x4be   : > { %v3019_v21 = vmax.f32 %v15104_v20, %v15107_v58 }
 0x4c0   : > { %v2620_v5 = vpop.f32.mrb[12].mxu1  ;;  %v12192_v29 = vpop.f32.mrb[36].mxu0 }
 0x4c1   : > { %v2622_v32 = vpop.f32.mrb[13].mxu1  ;;  %v2799_v28 = vpop.f32.mrb[37].mxu0  ;;  %v15125_v61 = vadd.f32 %v15052_v0, %v2620_v5  ;;  %v15128_v52 = vadd.f32 %v12192_v29, %v15058_v57 }
 0x4c2   : > { %v15122_v41 = vadd.f32 %v15089_v2, %v2622_v32  ;;  %v2624_v22 = vpop.f32.mrb[14].mxu1  ;;  %v12193_v9 = vpop.f32.mrb[38].mxu0  ;;  %v15137_v1 = vadd.f32 %v15058_v57, %v2799_v28 }
 0x4c3   : > { %17874 = vst [vmem:[#allocation74_spill] sm:$0xff] %v15125_v61  ;;  %v15131_v18 = vadd.f32 %v15052_v0, %v2624_v22  ;;  %v15134_v40 = vadd.f32 %v12193_v9, %v15058_v57  ;;  %v2626_v4 = vpop.f32.mrb[15].mxu1  ;;  %v2802_v45 = vpop.f32.mrb[39].mxu0 }
 0x4c4   : > { %v15140_v35 = vadd.f32 %v15089_v2, %v2626_v4  ;;  %v15143_v16 = vadd.f32 %v15058_v57, %v2802_v45  ;;  %v3020_v10 = vmax.f32 %v15116_v27, %v15122_v41 }
 0x4c6   : > { %v3021_v47 = vmax.f32 %v15119_v42, %v15140_v35 }
 0x4c8   : > { %v2630_v48 = vpop.f32.mrb[16].mxu1 }
 0x4c9   : > { %v2632_v6 = vpop.f32.mrb[17].mxu1  ;;  %v15159_v32 = vadd.f32 %v15052_v0, %v2630_v48 }
 0x4ca   : > { %v15156_v5 = vadd.f32 %v15089_v2, %v2632_v6  ;;  %v2634_v29 = vpop.f32.mrb[18].mxu1 }
 0x4cb   : > { %17875 = vst [vmem:[#allocation75_spill] sm:$0xff] %v15159_v32  ;;  %v15162_v28 = vadd.f32 %v15052_v0, %v2634_v29  ;;  %v2636_v22 = vpop.f32.mrb[19].mxu1 }
 0x4cc   : > { %v15165_v9 = vmax.f32 %v3018_v60, %v15156_v5  ;;  %v15168_v4 = vadd.f32 %v15089_v2, %v2636_v22 }
 0x4cd   : > { %17876 = vst [vmem:[#allocation76_spill] sm:$0xff] %v15162_v28  ;;  %v17893_v28 = vpack.c.bf16 %v15143_v16, %v15137_v1 }
 0x4ce   : > { %v15173_v6 = vmax.f32 %v3019_v21, %v15168_v4 }
 0x4d0   : > { %v2640_v15 = vpop.f32.mrb[20].mxu1  ;;  %v12196_v59 = vpop.f32.mrb[40].mxu0 }
 0x4d1   : > { %v2642_v48 = vpop.f32.mrb[21].mxu1  ;;  %v2815_v54 = vpop.f32.mrb[41].mxu0  ;;  %v15179_v60 = vadd.f32 %v15052_v0, %v2640_v15  ;;  %v15182_v22 = vadd.f32 %v12196_v59, %v15058_v57 }
 0x4d2   : > { %v15176_v29 = vadd.f32 %v15089_v2, %v2642_v48  ;;  %v2644_v62 = vpop.f32.mrb[22].mxu1  ;;  %v12197_v63 = vpop.f32.mrb[42].mxu0  ;;  %v15194_v48 = vadd.f32 %v15058_v57, %v2815_v54 }
 0x4d3   : > { %17877 = vst [vmem:[#allocation77_spill] sm:$0xff] %v15179_v60  ;;  %v15185_v45 = vadd.f32 %v15052_v0, %v2644_v62  ;;  %v15188_v21 = vadd.f32 %v12197_v63, %v15058_v57  ;;  %v2646_v30 = vpop.f32.mrb[23].mxu1  ;;  %v2818_v7 = vpop.f32.mrb[43].mxu0 }
 0x4d4   : > { %v15191_v38 = vmax.f32 %v3020_v10, %v15176_v29  ;;  %v15197_v15 = vadd.f32 %v15089_v2, %v2646_v30  ;;  %v15200_v59 = vadd.f32 %v15058_v57, %v2818_v7 }
 0x4d5   : > { %17878 = vst [vmem:[#allocation78_spill] sm:$0xff] %v15185_v45 }
 0x4d6   : > { %v15207_v13 = vmax.f32 %v3021_v47, %v15197_v15 }
 0x4d8   : > { %v2650_v54 = vpop.f32.mrb[24].mxu1  ;;  %v12200_v37 = vpop.f32.mrb[44].mxu0 }
 0x4d9   : > { %v2652_v49 = vpop.f32.mrb[25].mxu1  ;;  %v2831_v30 = vpop.f32.mrb[45].mxu0  ;;  %v15215_v62 = vadd.f32 %v15052_v0, %v2650_v54  ;;  %v15218_v63 = vadd.f32 %v12200_v37, %v15058_v57 }
 0x4da   : > { %v15212_v46 = vadd.f32 %v15089_v2, %v2652_v49  ;;  %v2654_v7 = vpop.f32.mrb[26].mxu1  ;;  %v12201_v51 = vpop.f32.mrb[46].mxu0  ;;  %v15229_v3 = vadd.f32 %v15058_v57, %v2831_v30 }
 0x4db   : > { %17879 = vst [vmem:[#allocation79_spill] sm:$0xff] %v15215_v62  ;;  %v15221_v47 = vadd.f32 %v15052_v0, %v2654_v7  ;;  %v15224_v10 = vadd.f32 %v12201_v51, %v15058_v57  ;;  %v2656_v44 = vpop.f32.mrb[27].mxu1  ;;  %v2834_v17 = vpop.f32.mrb[47].mxu0 }
 0x4dc   : > { %v3026_v49 = vmax.f32 %v15165_v9, %v15212_v46  ;;  %v15232_v54 = vadd.f32 %v15089_v2, %v2656_v44  ;;  %v15235_v37 = vadd.f32 %v15058_v57, %v2834_v17 }
 0x4dd   : > { %17880 = vst [vmem:[#allocation80_spill] sm:$0xff] %v15221_v47 }
 0x4de   : > { %v3027_v31 = vmax.f32 %v15173_v6, %v15232_v54 }
 0x4e0   : > { %v2660_v30 = vpop.f32.mrb[28].mxu1  ;;  %v12204_v24 = vpop.f32.mrb[48].mxu0 }
 0x4e1   : > { %v2662_v55 = vpop.f32.mrb[29].mxu1  ;;  %v2847_v44 = vpop.f32.mrb[49].mxu0  ;;  %v15249_v7 = vadd.f32 %v15052_v0, %v2660_v30  ;;  %v3004_v51 = vadd.f32 %v12204_v24, %v15058_v57 }
 0x4e2   : > { %v15246_v43 = vadd.f32 %v15089_v2, %v2662_v55  ;;  %v2664_v17 = vpop.f32.mrb[30].mxu1  ;;  %v12205_v23 = vpop.f32.mrb[50].mxu0  ;;  %v3002_v55 = vadd.f32 %v15058_v57, %v2847_v44 }
 0x4e3   : > { %17881 = vst [vmem:[#allocation81_spill] sm:$0xff] %v15249_v7  ;;  %v15253_v33 = vadd.f32 %v15052_v0, %v2664_v17  ;;  %v3005_v6 = vadd.f32 %v12205_v23, %v15058_v57  ;;  %v2666_v9 = vpop.f32.mrb[31].mxu1  ;;  %v2850_v39 = vpop.f32.mrb[51].mxu0 }
 0x4e4   : > { %v3028_v36 = vmax.f32 %v15191_v38, %v15246_v43  ;;  %v15260_v26 = vadd.f32 %v15089_v2, %v2666_v9  ;;  %v3003_v30 = vadd.f32 %v15058_v57, %v2850_v39  ;;  %v17883_v38 = vpack.c.bf16 %v15076_v12, %v15073_v53 }
 0x4e5   : > { %17882 = vst [vmem:[#allocation82_spill] sm:$0xff] %v15253_v33  ;;  %v3246_v62 = vpack.c.bf16 %v3005_v6, %v3004_v51  ;;  %v17886_v12 = vpack.c.bf16 %v15070_v50, %v15064_v56 }
 0x4e6   : > { %v3029_v17 = vmax.f32 %v15207_v13, %v15260_v26  ;;  %v3245_v23 = vpack.c.bf16 %v3003_v30, %v3002_v55 }
 0x4e8   : > { %v2670_v47 = vpop.f32.mrb[32].mxu1  ;;  %11462 = vmatprep.subr.bf16.mxu0 %v3245_v23 }
 0x4e9   : > { %v2672_v60 = vpop.f32.mrb[33].mxu1  ;;  %11463 = vmatpush3.bf16.msra.mxu0 %v17883_v38  ;;  %v15274_v39 = vadd.f32 %v15052_v0, %v2670_v47 }
 0x4ea   : > { %v15271_v9 = vadd.f32 %v15089_v2, %v2672_v60  ;;  %v2674_v44 = vpop.f32.mrb[34].mxu1  ;;  %11464 = vmatprep.subr.bf16.mxu0 %v3246_v62 }
 0x4eb   : > { %17884 = vst [vmem:[#allocation83_spill] sm:$0xff] %v15274_v39  ;;  %v15277_v51 = vadd.f32 %v15052_v0, %v2674_v44  ;;  %v2676_v13 = vpop.f32.mrb[35].mxu1 }
 0x4ec   : > { %v3030_v6 = vmax.f32 %v3026_v49, %v15271_v9  ;;  %v15281_v55 = vadd.f32 %v15089_v2, %v2676_v13 }
 0x4ed   : > { %17885 = vst [vmem:[#allocation84_spill] sm:$0xff] %v15277_v51  ;;  %11465 = vmatpush3.bf16.msra.mxu0 %v17886_v12 }
 0x4ee   : > { %v3031_v60 = vmax.f32 %v3027_v31, %v15281_v55 }
 0x4f0   : > { %v2680_v62 = vpop.f32.mrb[36].mxu1 }
 0x4f1   : > { %v2682_v47 = vpop.f32.mrb[37].mxu1  ;;  %v15293_v49 = vadd.f32 %v15052_v0, %v2680_v62 }
 0x4f2   : > { %v15290_v30 = vadd.f32 %v15089_v2, %v2682_v47  ;;  %v2684_v23 = vpop.f32.mrb[38].mxu1 }
 0x4f3   : > { %17887 = vst [vmem:[#allocation85_spill] sm:$0xff] %v15293_v49  ;;  %v15296_v38 = vadd.f32 %v15052_v0, %v2684_v23  ;;  %v2686_v44 = vpop.f32.mrb[39].mxu1 }
 0x4f4   : > { %v15299_v13 = vmax.f32 %v3028_v36, %v15290_v30  ;;  %v15302_v56 = vadd.f32 %v15089_v2, %v2686_v44 }
 0x4f5   : > { %17888 = vst [vmem:[#allocation86_spill] sm:$0xff] %v15296_v38 }
 0x4f6   : > { %v15307_v50 = vmax.f32 %v3029_v17, %v15302_v56 }
 0x4f8   : > { %v2690_v12 = vpop.f32.mrb[40].mxu1 }
 0x4f9   : > { %v2692_v47 = vpop.f32.mrb[41].mxu1  ;;  %v15313_v53 = vadd.f32 %v15052_v0, %v2690_v12 }
 0x4fa   : > { %v15310_v62 = vadd.f32 %v15089_v2, %v2692_v47  ;;  %v2694_v23 = vpop.f32.mrb[42].mxu1 }
 0x4fb   : > { %17889 = vst [vmem:[#allocation87_spill] sm:$0xff] %v15313_v53  ;;  %v15316_v36 = vadd.f32 %v15052_v0, %v2694_v23  ;;  %v2696_v44 = vpop.f32.mrb[43].mxu1 }
 0x4fc   : > { %v3034_v24 = vmax.f32 %v3030_v6, %v15310_v62  ;;  %v15320_v31 = vadd.f32 %v15089_v2, %v2696_v44 }
 0x4fd   : > { %17890 = vst [vmem:[#allocation88_spill] sm:$0xff] %v15316_v36 }
 0x4fe   : > { %v3035_v49 = vmax.f32 %v3031_v60, %v15320_v31 }
 0x53d   : > { %v2700_v47 = vpop.f32.mrb[44].mxu1  ;;  %v12208_v38 = vpop.f32.mrb[52].mxu0 }
 0x53e   : > { %v2702_v39 = vpop.f32.mrb[45].mxu1  ;;  %v2863_v51 = vpop.f32.mrb[53].mxu0  ;;  %v15329_v33 = vadd.f32 %v15052_v0, %v2700_v47  ;;  %v3008_v6 = vadd.f32 %v12208_v38, %v15058_v57 }
 0x53f   : > { %v15326_v12 = vadd.f32 %v15089_v2, %v2702_v39  ;;  %v2704_v23 = vpop.f32.mrb[46].mxu1  ;;  %v12209_v7 = vpop.f32.mrb[54].mxu0  ;;  %v3006_v39 = vadd.f32 %v15058_v57, %v2863_v51 }
 0x540   : > { %17891 = vst [vmem:[#allocation89_spill] sm:$0xff] %v15329_v33  ;;  %v15333_v44 = vadd.f32 %v15052_v0, %v2704_v23  ;;  %v3009_v17 = vadd.f32 %v12209_v7, %v15058_v57  ;;  %v2706_v60 = vpop.f32.mrb[47].mxu1  ;;  %v2866_v53 = vpop.f32.mrb[55].mxu0 }
 0x541   : > { %v3036_v36 = vmax.f32 %v15299_v13, %v15326_v12  ;;  %v15340_v45 = vadd.f32 %v15089_v2, %v2706_v60  ;;  %v3007_v47 = vadd.f32 %v15058_v57, %v2866_v53  ;;  %v17894_v13 = vpack.c.bf16 %v15134_v40, %v15128_v52 }
 0x542   : > { %17892 = vst [vmem:[#allocation90_spill] sm:$0xff] %v15333_v44  ;;  %v3248_v32 = vpack.c.bf16 %v3009_v17, %v3008_v6 }
 0x543   : > { %v3037_v23 = vmax.f32 %v15307_v50, %v15340_v45  ;;  %v3247_v7 = vpack.c.bf16 %v3007_v47, %v3006_v39 }
 0x545   : > { %11466 = vmatprep.subr.bf16.mxu0 %v3247_v7 }
 0x546   : > { %11467 = vmatpush3.bf16.msra.mxu0 %v17893_v28 }
 0x547   : > { %11468 = vmatprep.subr.bf16.mxu0 %v3248_v32 }
 0x54a   : > { %v2710_v51 = vpop.f32.mrb[48].mxu1  ;;  %11469 = vmatpush3.bf16.msra.mxu0 %v17894_v13 }
 0x54b   : > { %v2712_v53 = vpop.f32.mrb[49].mxu1  ;;  %v15357_v6 = vadd.f32 %v15052_v0, %v2710_v51 }
 0x54c   : > { %v15354_v60 = vadd.f32 %v15089_v2, %v2712_v53  ;;  %v2714_v17 = vpop.f32.mrb[50].mxu1 }
 0x54d   : > { %17895 = vst [vmem:[#allocation91_spill] sm:$0xff] %v15357_v6  ;;  %v15360_v50 = vadd.f32 %v15052_v0, %v2714_v17  ;;  %v2716_v39 = vpop.f32.mrb[51].mxu1 }
 0x54e   : > { %v3038_v1 = vmax.f32 %v3034_v24, %v15354_v60  ;;  %v15364_v16 = vadd.f32 %v15089_v2, %v2716_v39 }
 0x54f   : > { %17896 = vst [vmem:[#allocation92_spill] sm:$0xff] %v15360_v50 }
 0x550   : > { %v3039_v40 = vmax.f32 %v3035_v49, %v15364_v16 }
 0x552   : > { %v2720_v32 = vpop.f32.mrb[52].mxu1  ;;  %v12212_v28 = vpop.f32.mrb[56].mxu0 }
 0x553   : > { %v2722_v47 = vpop.f32.mrb[53].mxu1  ;;  %v2879_v7 = vpop.f32.mrb[57].mxu0  ;;  %v15373_v17 = vadd.f32 %v15052_v0, %v2720_v32  ;;  %v3012_v24 = vadd.f32 %v12212_v28, %v15058_v57 }
 0x554   : > { %v15370_v51 = vadd.f32 %v15089_v2, %v2722_v47  ;;  %v2724_v13 = vpop.f32.mrb[54].mxu1  ;;  %v12213_v53 = vpop.f32.mrb[58].mxu0  ;;  %v3010_v50 = vadd.f32 %v15058_v57, %v2879_v7 }
 0x555   : > { %v15377_v39 = vadd.f32 %v15052_v0, %v2724_v13  ;;  %v3013_v52 = vadd.f32 %v12213_v53, %v15058_v57  ;;  %v2726_v49 = vpop.f32.mrb[55].mxu1  ;;  %v2882_v38 = vpop.f32.mrb[59].mxu0 }
 0x556   : > { %v3040_v6 = vmax.f32 %v3036_v36, %v15370_v51  ;;  %v15383_v47 = vadd.f32 %v15089_v2, %v2726_v49  ;;  %v3011_v33 = vadd.f32 %v15058_v57, %v2882_v38  ;;  %v17897_v36 = vpack.c.bf16 %v15200_v59, %v15194_v48 }
 0x557   : > { %v3250_v28 = vpack.c.bf16 %v3013_v52, %v3012_v24  ;;  %v17900_v59 = vpack.c.bf16 %v15188_v21, %v15182_v22 }
 0x558   : > { %v3041_v13 = vmax.f32 %v3037_v23, %v15383_v47  ;;  %v3249_v44 = vpack.c.bf16 %v3011_v33, %v3010_v50 }
 0x55a   : > { %v2730_v61 = vpop.f32.mrb[56].mxu1  ;;  %11470 = vmatprep.subr.bf16.mxu0 %v3249_v44 }
 0x55b   : > { %v2732_v53 = vpop.f32.mrb[57].mxu1  ;;  %11471 = vmatpush3.bf16.msra.mxu0 %v17897_v36  ;;  %v15396_v38 = vadd.f32 %v15052_v0, %v2730_v61 }
 0x55c   : > { %v15393_v7 = vadd.f32 %v15089_v2, %v2732_v53  ;;  %v2734_v49 = vpop.f32.mrb[58].mxu1  ;;  %11472 = vmatprep.subr.bf16.mxu0 %v3250_v28 }
 0x55d   : > { %17898 = vst [vmem:[#allocation93_spill] sm:$0xff] %v15396_v38  ;;  %v15399_v52 = vadd.f32 %v15052_v0, %v2734_v49  ;;  %v2736_v23 = vpop.f32.mrb[59].mxu1 }
 0x55e   : > { %v3042_v33 = vmax.f32 %v3038_v1, %v15393_v7  ;;  %v15403_v44 = vadd.f32 %v15089_v2, %v2736_v23 }
 0x55f   : > { %17899 = vst [vmem:[#allocation94_spill] sm:$0xff] %v15399_v52  ;;  %11473 = vmatpush3.bf16.msra.mxu0 %v17900_v59 }
 0x560   : > { %v3043_v50 = vmax.f32 %v3039_v40, %v15403_v44 }
 0x562   : > { %v3046_v61 = vmax.f32 %v3042_v33, %v3043_v50  ;;  %v2740_v24 = vpop.f32.mrb[60].mxu1  ;;  %v12216_v28 = vpop.f32.mrb[60].mxu0 }
 0x563   : > { %v2742_v53 = vpop.f32.mrb[61].mxu1  ;;  %v2895_v36 = vpop.f32.mrb[61].mxu0  ;;  %v15415_v32 = vadd.f32 %v15052_v0, %v2740_v24  ;;  %v3016_v48 = vadd.f32 %v12216_v28, %v15058_v57 }
 0x564   : > { %v15412_v49 = vadd.f32 %v15089_v2, %v2742_v53  ;;  %v2744_v1 = vpop.f32.mrb[62].mxu1  ;;  %v12217_v23 = vpop.f32.mrb[62].mxu0  ;;  %v3014_v50 = vadd.f32 %v15058_v57, %v2895_v36 }
 0x565   : > { %v15419_v22 = vadd.f32 %v15052_v0, %v2744_v1  ;;  %v3017_v21 = vadd.f32 %v12217_v23, %v15058_v57  ;;  %v2746_v40 = vpop.f32.mrb[63].mxu1  ;;  %v2898_v33 = vpop.f32.mrb[63].mxu0  ;;  %v17901_v23 = vpack.c.bf16 %v15235_v37, %v15229_v3 }
 0x566   : > { %v3044_v59 = vmax.f32 %v3040_v6, %v15412_v49  ;;  %v15425_v53 = vadd.f32 %v15089_v2, %v2746_v40  ;;  %v3015_v38 = vadd.f32 %v15058_v57, %v2898_v33  ;;  %v17902_v2 = vpack.c.bf16 %v15224_v10, %v15218_v63 }
 0x567   : > { %v3252_v28 = vpack.c.bf16 %v3017_v21, %v3016_v48 }
 0x568   : > { %v3045_v0 = vmax.f32 %v3041_v13, %v15425_v53  ;;  %v3251_v1 = vpack.c.bf16 %v3015_v38, %v3014_v50 }
 0x56a   : > { %v3047_v52 = vmax.f32 %v3044_v59, %v3045_v0  ;;  %11474 = vmatprep.subr.bf16.mxu0 %v3251_v1 }
 0x56b   : > { %11475 = vmatpush3.bf16.msra.mxu0 %v17901_v23 }
 0x56c   : > { %v3048_v6 = vmax.f32 %v3046_v61, %v3047_v52  ;;  %11476 = vmatprep.subr.bf16.mxu0 %v3252_v28 }
 0x56e   : > { %v3049_v36 = vrot.slane %v3048_v6, 4 }
 0x56f   : > { %11477 = vmatpush3.bf16.msra.mxu0 %v17902_v2 }
 0x570   : > { %v3050_v57 = vmax.f32 %v3048_v6, %v3049_v36 }
 0x572   : > { %v3051_v40 = vrot.slane %v3050_v57, 2 }
 0x574   : > { %v3052_v33 = vmax.f32 %v3050_v57, %v3051_v40 }
 0x576   : > { %v3053_v48 = vrot.slane %v3052_v33, 1 }
 0x578   : > { %v15437_v21 = vmax.f32 %v3052_v33, %v3053_v48 }
 0x57a   : > { %v3055_v13 = vsub.f32 %v15092_v11, %v15437_v21  ;;  %v3056_v3 = vsub.f32 %v15104_v20, %v15437_v21  ;;  %v3057_v37 = vsub.f32 %v15116_v27, %v15437_v21  ;;  %v3058_v38 = vsub.f32 %v15119_v42, %v15437_v21 }
 0x57b   : > { %v3059_v63 = vsub.f32 %v15095_v19, %v15437_v21  ;;  %v3060_v10 = vsub.f32 %v15107_v58, %v15437_v21  ;;  %v3061_v52 = vsub.f32 %v15122_v41, %v15437_v21  ;;  %v3062_v11 = vsub.f32 %v15140_v35, %v15437_v21 }
 0x57c   : > { %v3063_v20 = vsub.f32 %v15156_v5, %v15437_v21  ;;  %v3064_v27 = vsub.f32 %v15168_v4, %v15437_v21  ;;  %v3065_v42 = vsub.f32 %v15176_v29, %v15437_v21  ;;  %v3066_v19 = vsub.f32 %v15197_v15, %v15437_v21 }
 0x57d   : > { %v3067_v58 = vsub.f32 %v15212_v46, %v15437_v21  ;;  %v3068_v41 = vsub.f32 %v15232_v54, %v15437_v21  ;;  %v3069_v35 = vsub.f32 %v15246_v43, %v15437_v21  ;;  %v3070_v5 = vsub.f32 %v15260_v26, %v15437_v21 }
 0x57e   : > { %v3071_v4 = vsub.f32 %v15271_v9, %v15437_v21  ;;  %v3072_v29 = vsub.f32 %v15281_v55, %v15437_v21  ;;  %v3073_v15 = vsub.f32 %v15290_v30, %v15437_v21  ;;  %v3074_v46 = vsub.f32 %v15302_v56, %v15437_v21 }
 0x57f   : > { %v3075_v54 = vsub.f32 %v15310_v62, %v15437_v21  ;;  %v3076_v43 = vsub.f32 %v15320_v31, %v15437_v21  ;;  %v3077_v26 = vsub.f32 %v15326_v12, %v15437_v21  ;;  %v3078_v61 = vsub.f32 %v15340_v45, %v15437_v21 }
 0x580   : > { %v3079_v59 = vsub.f32 %v15354_v60, %v15437_v21  ;;  %v3080_v50 = vsub.f32 %v15364_v16, %v15437_v21  ;;  %v3081_v28 = vsub.f32 %v15370_v51, %v15437_v21  ;;  %v3087_v2 = vmul.f32 1.442695, %v3055_v13 }
 0x581   : > { %v3089_v57 = vmul.f32 1.442695, %v3056_v3  ;;  %v3091_v40 = vmul.f32 1.442695, %v3057_v37  ;;  %v3093_v33 = vmul.f32 1.442695, %v3058_v38  ;;  %v17903_v60 = vsub.f32 %v15383_v47, %v15437_v21 }
 0x582   : > { %13430 = vpow2.f32 %v3087_v2  ;;  %v3095_v48 = vmul.f32 1.442695, %v3059_v63  ;;  %v3097_v24 = vmul.f32 1.442695, %v3060_v10  ;;  %v3099_v1 = vmul.f32 1.442695, %v3061_v52 }
 0x583   : > { %13432 = vpow2.f32 %v3089_v57  ;;  %v3101_v23 = vmul.f32 1.442695, %v3062_v11  ;;  %v3103_v36 = vmul.f32 1.442695, %v3063_v20  ;;  %v3105_v37 = vmul.f32 1.442695, %v3064_v27 }
 0x584   : > { %13434 = vpow2.f32 %v3091_v40  ;;  %v3109_v11 = vmul.f32 1.442695, %v3066_v19  ;;  %v3111_v2 = vmul.f32 1.442695, %v3067_v58  ;;  %v3113_v57 = vmul.f32 1.442695, %v3068_v41 }
 0x585   : > { %13436 = vpow2.f32 %v3093_v33  ;;  %v3115_v40 = vmul.f32 1.442695, %v3069_v35  ;;  %v3119_v41 = vmul.f32 1.442695, %v3071_v4  ;;  %v3121_v35 = vmul.f32 1.442695, %v3072_v29 }
 0x586   : > { %13438 = vpow2.f32 %v3095_v48  ;;  %v3117_v48 = vmul.f32 1.442695, %v3070_v5  ;;  %v3137_v12 = vmul.f32 1.442695, %v3080_v50  ;;  %v3139_v45 = vmul.f32 1.442695, %v3081_v28 }
 0x587   : > { %13440 = vpow2.f32 %v3097_v24  ;;  %v3107_v24 = vmul.f32 1.442695, %v3065_v42  ;;  %v17904_v16 = vsub.f32 %v15393_v7, %v15437_v21  ;;  %v17905_v51 = vsub.f32 %v15403_v44, %v15437_v21 }
 0x588   : > { %13442 = vpow2.f32 %v3099_v1  ;;  %v17906_v47 = vsub.f32 %v15412_v49, %v15437_v21  ;;  %v17907_v7 = vsub.f32 %v15425_v53, %v15437_v21 }
 0x589   : > { %13444 = vpow2.f32 %v3101_v23  ;;  %v3143_v50 = vmul.f32 1.442695, %v17904_v16  ;;  %v3145_v28 = vmul.f32 1.442695, %v17905_v51 }
 0x58a   : > { %13446 = vpow2.f32 %v3103_v36 }
 0x58b   : > { %13448 = vpow2.f32 %v3105_v37 }
 0x58c   : > { %v15503_v0 = vpop.eup %13430  ;;  %13450 = vpow2.f32 %v3107_v24 }
 0x58d   : > { %v15505_v6 = vpop.eup %13432  ;;  %13452 = vpow2.f32 %v3109_v11  ;;  %v3125_v11 = vmul.f32 1.442695, %v3074_v46 }
 0x58e   : > { %v3151_v13 = vadd.f32 %v15505_v6, %v15503_v0  ;;  %v15509_v3 = vpop.eup %13434  ;;  %13454 = vpow2.f32 %v3111_v2  ;;  %v3129_v2 = vmul.f32 1.442695, %v3076_v43  ;;  %v3135_v43 = vmul.f32 1.442695, %v3079_v59 }
 0x58f   : > { %v15512_v63 = vpop.eup %13436  ;;  %13456 = vpow2.f32 %v3113_v57  ;;  %v3133_v57 = vmul.f32 1.442695, %v3078_v61  ;;  %v3141_v59 = vmul.f32 1.442695, %v17903_v60 }
 0x590   : > { %v3152_v38 = vadd.f32 %v15509_v3, %v3151_v13  ;;  %v15515_v52 = vpop.eup %13438  ;;  %13458 = vpow2.f32 %v3115_v40 }
 0x591   : > { %v15518_v1 = vpop.eup %13440  ;;  %13460 = vpow2.f32 %v3117_v48 }
 0x592   : > { %v3153_v10 = vadd.f32 %v15512_v63, %v3152_v38  ;;  %v15521_v23 = vpop.eup %13442  ;;  %13462 = vpow2.f32 %v3119_v41 }
 0x593   : > { %v15524_v36 = vpop.eup %13444  ;;  %13464 = vpow2.f32 %v3121_v35 }
 0x594   : > { %v3154_v20 = vadd.f32 %v15515_v52, %v3153_v10  ;;  %v15527_v33 = vpop.eup %13446  ;;  %v3123_v10 = vmul.f32 1.442695, %v3073_v15 }
 0x595   : > { %v15530_v13 = vpop.eup %13448 }
 0x596   : > { %v3155_v27 = vadd.f32 %v15518_v1, %v3154_v20  ;;  %v15536_v38 = vpop.eup %13450  ;;  %13466 = vpow2.f32 %v3123_v10  ;;  %v3127_v20 = vmul.f32 1.442695, %v3075_v54 }
 0x597   : > { %v15542_v24 = vpop.eup %13452  ;;  %13468 = vpow2.f32 %v3125_v11  ;;  %v3147_v11 = vmul.f32 1.442695, %v17906_v47 }
 0x598   : > { %v3156_v42 = vadd.f32 %v15521_v23, %v3155_v27  ;;  %v15548_v4 = vpop.eup %13454  ;;  %13470 = vpow2.f32 %v3127_v20  ;;  %v3131_v27 = vmul.f32 1.442695, %v3077_v26 }
 0x599   : > { %v15554_v29 = vpop.eup %13456  ;;  %13472 = vpow2.f32 %v3129_v2 }
 0x59a   : > { %v3157_v19 = vadd.f32 %v15524_v36, %v3156_v42  ;;  %v15560_v15 = vpop.eup %13458  ;;  %13474 = vpow2.f32 %v3131_v27 }
 0x59b   : > { %v15566_v46 = vpop.eup %13460  ;;  %13476 = vpow2.f32 %v3133_v57 }
 0x59c   : > { %v3158_v58 = vadd.f32 %v15527_v33, %v3157_v19  ;;  %v13463_v54 = vpop.eup %13462  ;;  %13478 = vpow2.f32 %v3135_v43 }
 0x59d   : > { %v13465_v31 = vpop.eup %13464  ;;  %13480 = vpow2.f32 %v3137_v12 }
 0x59e   : > { %v3159_v37 = vadd.f32 %v15530_v13, %v3158_v58  ;;  %13482 = vpow2.f32 %v3139_v45 }
 0x59f   : > { %13484 = vpow2.f32 %v3141_v59 }
 0x5a0   : > { %v3160_v5 = vadd.f32 %v15536_v38, %v3159_v37  ;;  %v13467_v19 = vpop.eup %13466  ;;  %13486 = vpow2.f32 %v3143_v50 }
 0x5a1   : > { %v13469_v48 = vpop.eup %13468  ;;  %13488 = vpow2.f32 %v3145_v28 }
 0x5a2   : > { %v3161_v9 = vadd.f32 %v15542_v24, %v3160_v5  ;;  %v13471_v58 = vpop.eup %13470  ;;  %13490 = vpow2.f32 %v3147_v11 }
 0x5a3   : > { %v13473_v37 = vpop.eup %13472 }
 0x5a4   : > { %v3162_v55 = vadd.f32 %v15548_v4, %v3161_v9  ;;  %v13475_v5 = vpop.eup %13474 }
 0x5a5   : > { %v13477_v9 = vpop.eup %13476 }
 0x5a6   : > { %v3163_v30 = vadd.f32 %v15554_v29, %v3162_v55  ;;  %v13479_v20 = vpop.eup %13478 }
 0x5a8   : > { %v3164_v56 = vadd.f32 %v15560_v15, %v3163_v30  ;;  %v3149_v30 = vmul.f32 1.442695, %v17907_v7 }
 0x5aa   : > { %v3165_v62 = vadd.f32 %v15566_v46, %v3164_v56  ;;  %v13481_v56 = vpop.eup %13480  ;;  %13492 = vpow2.f32 %v3149_v30 }
 0x5ab   : > { %v13483_v44 = vpop.eup %13482 }
 0x5ac   : > { %v3166_v42 = vadd.f32 %v13463_v54, %v3165_v62  ;;  %v13485_v57 = vpop.eup %13484 }
 0x5ad   : > { %v13487_v43 = vpop.eup %13486 }
 0x5ae   : > { %v3167_v40 = vadd.f32 %v13465_v31, %v3166_v42  ;;  %v13489_v49 = vpop.eup %13488 }
 0x5b0   : > { %v3168_v26 = vadd.f32 %v13467_v19, %v3167_v40 }
 0x5b2   : > { %v3169_v61 = vadd.f32 %v13469_v48, %v3168_v26  ;;  %v13491_v26 = vpop.eup %13490 }
 0x5b4   : > { %v3170_v41 = vadd.f32 %v13471_v58, %v3169_v61  ;;  %v13493_v61 = vpop.eup %13492 }
 0x5b6   : > { %v3171_v35 = vadd.f32 %v13473_v37, %v3170_v41 }
 0x5b8   : > { %v3172_v10 = vadd.f32 %v13475_v5, %v3171_v35 }
 0x5ba   : > { %v3173_v55 = vadd.f32 %v13477_v9, %v3172_v10 }
 0x5bc   : > { %v3174_v2 = vadd.f32 %v13479_v20, %v3173_v55 }
 0x5be   : > { %v3175_v27 = vadd.f32 %v13481_v56, %v3174_v2 }
 0x5c0   : > { %v3176_v62 = vadd.f32 %v13483_v44, %v3175_v27 }
 0x5c2   : > { %v3177_v42 = vadd.f32 %v13485_v57, %v3176_v62 }
 0x5c4   : > { %v3178_v40 = vadd.f32 %v13487_v43, %v3177_v42 }
 0x5c6   : > { %v3179_v12 = vadd.f32 %v13489_v49, %v3178_v40 }
 0x5c8   : > { %v3180_v45 = vadd.f32 %v13491_v26, %v3179_v12 }
 0x5ca   : > { %v3181_v60 = vadd.f32 %v13493_v61, %v3180_v45 }
 0x5cc   : > { %v3182_v59 = vrot.slane %v3181_v60, 4 }
 0x5ce   : > { %v3183_v53 = vadd.f32 %v3182_v59, %v3181_v60 }
 0x5d0   : > { %v3184_v21 = vrot.slane %v3183_v53, 2 }
 0x5d2   : > { %v3185_v41 = vadd.f32 %v3184_v21, %v3183_v53 }
 0x5d4   : > { %v3186_v16 = vrot.slane %v3185_v41, 1 }
 0x5d6   : > { %v3187_v50 = vadd.f32 %v3186_v16, %v3185_v41 }
 0x5d8   : > { %13494 = vrcp.f32 %v3187_v50 }
 0x5e2   : > { %v13495_v35 = vpop.eup %13494 }
 0x5e3   : > { %v3205_v51 = vmul.f32 %v13495_v35, %v13463_v54  ;;  %v3206_v28 = vmul.f32 %v13495_v35, %v13465_v31  ;;  %v3189_v10 = vmul.f32 %v13495_v35, %v15503_v0  ;;  %v3190_v47 = vmul.f32 %v13495_v35, %v15505_v6 }
 0x5e4   : > { %v3207_v11 = vmul.f32 %v13495_v35, %v13467_v19  ;;  %v3208_v55 = vmul.f32 %v13495_v35, %v13469_v48  ;;  %v3191_v7 = vmul.f32 %v13495_v35, %v15509_v3  ;;  %v3192_v30 = vmul.f32 %v13495_v35, %v15512_v63 }
 0x5e5   : > { %v3229_v2 = vpack.c.bf16 %v3206_v28, %v3205_v51  ;;  %v3221_v27 = vpack.c.bf16 %v3190_v47, %v3189_v10  ;;  %v3209_v62 = vmul.f32 %v13495_v35, %v13471_v58  ;;  %v3210_v42 = vmul.f32 %v13495_v35, %v13473_v37 }
 0x5e6   : > { %v3230_v40 = vpack.c.bf16 %v3208_v55, %v3207_v11  ;;  %v3211_v54 = vmul.f32 %v13495_v35, %v13475_v5  ;;  %v3212_v31 = vmul.f32 %v13495_v35, %v13477_v9  ;;  %v3193_v0 = vmul.f32 %v13495_v35, %v15515_v52 }
 0x5e7   : > { %3269 = vxpose.xlu0.c.b16.start [1/8] %v3229_v2, 128  ;;  %3253 = vxpose.xlu1.c.b16.start [1/8] %v3221_v27, 128  ;;  %v3231_v12 = vpack.c.bf16 %v3210_v42, %v3209_v62  ;;  %v3194_v6 = vmul.f32 %v13495_v35, %v15518_v1  ;;  %v3213_v19 = vmul.f32 %v13495_v35, %v13479_v20  ;;  %v12873_v27 = vld [vmem:[%s13915_s17] sm:$0xff]   ;;  %v12874_v62 = vld [vmem:[%s13915_s17 + $0x8] sm:$0xff]  }
 0x5e8   : > { %v3222_v48 = vpack.c.bf16 %v3192_v30, %v3191_v7  ;;  %v3232_v45 = vpack.c.bf16 %v3212_v31, %v3211_v54  ;;  %v3214_v3 = vmul.f32 %v13495_v35, %v13481_v56  ;;  %v3215_v60 = vmul.f32 %v13495_v35, %v13483_v44  ;;  %12266 = vmatprep.subr.bf16.mxu0 %v12873_v27 }
 0x5e9   : > { %v3216_v63 = vmul.f32 %v13495_v35, %v13485_v57  ;;  %v3223_v37 = vpack.c.bf16 %v3194_v6, %v3193_v0  ;;  %v3217_v53 = vmul.f32 %v13495_v35, %v13487_v43  ;;  %v3218_v21 = vmul.f32 %v13495_v35, %v13489_v49 }
 0x5ea   : > { %v3233_v58 = vpack.c.bf16 %v3214_v3, %v3213_v19  ;;  %v3195_v5 = vmul.f32 %v13495_v35, %v15521_v23  ;;  %v3196_v9 = vmul.f32 %v13495_v35, %v15524_v36  ;;  %v3219_v52 = vmul.f32 %v13495_v35, %v13491_v26  ;;  %v12876_v19 = vld [vmem:[%s13915_s17 + $0x18] sm:$0xff]   ;;  %v12877_v3 = vld [vmem:[%s13915_s17 + $0x20] sm:$0xff]  }
 0x5eb   : > { %3270 = vxpose.xlu0.c.b16.cont [2/8] %v3230_v40, 128  ;;  %3254 = vxpose.xlu1.c.b16.cont [2/8] %v3222_v48, 128  ;;  %v3234_v59 = vpack.c.bf16 %v3216_v63, %v3215_v60  ;;  %v3220_v41 = vmul.f32 %v13495_v35, %v13493_v61  ;;  %v3235_v1 = vpack.c.bf16 %v3218_v21, %v3217_v53  ;;  %v12875_v40 = vld [vmem:[%s13915_s17 + $0x10] sm:$0xff]   ;;  %v12878_v53 = vld [vmem:[%s13915_s17 + $0x28] sm:$0xff]  }
 0x5ec   : > { %v3224_v56 = vpack.c.bf16 %v3196_v9, %v3195_v5  ;;  %v3197_v44 = vmul.f32 %v13495_v35, %v15527_v33  ;;  %v3198_v57 = vmul.f32 %v13495_v35, %v15530_v13  ;;  %v3199_v43 = vmul.f32 %v13495_v35, %v15536_v38 }
 0x5ed   : > { %v3236_v20 = vpack.c.bf16 %v3220_v41, %v3219_v52  ;;  %v3200_v23 = vmul.f32 %v13495_v35, %v15542_v24  ;;  %v3201_v49 = vmul.f32 %v13495_v35, %v15548_v4  ;;  %v3202_v26 = vmul.f32 %v13495_v35, %v15554_v29 }
 0x5ee   : > { %v3225_v16 = vpack.c.bf16 %v3198_v57, %v3197_v44  ;;  %v3203_v33 = vmul.f32 %v13495_v35, %v15560_v15  ;;  %v3204_v13 = vmul.f32 %v13495_v35, %v15566_v46 }
 0x5ef   : > { %3271 = vxpose.xlu0.c.b16.cont [3/8] %v3231_v12, 128  ;;  %3255 = vxpose.xlu1.c.b16.cont [3/8] %v3223_v37, 128  ;;  %v3226_v36 = vpack.c.bf16 %v3200_v23, %v3199_v43  ;;  %v3227_v61 = vpack.c.bf16 %v3202_v26, %v3201_v49 }
 0x5f0   : > { %v3228_v50 = vpack.c.bf16 %v3204_v13, %v3203_v33 }
 0x5f3   : > { %3272 = vxpose.xlu0.c.b16.cont [4/8] %v3232_v45, 128  ;;  %3256 = vxpose.xlu1.c.b16.cont [4/8] %v3224_v56, 128 }
 0x5f7   : > { %3273 = vxpose.xlu0.c.b16.cont [5/8] %v3233_v58, 128  ;;  %3257 = vxpose.xlu1.c.b16.cont [5/8] %v3225_v16, 128 }
 0x5fb   : > { %3274 = vxpose.xlu0.c.b16.cont [6/8] %v3234_v59, 128  ;;  %3258 = vxpose.xlu1.c.b16.cont [6/8] %v3226_v36, 128 }
 0x5ff   : > { %3275 = vxpose.xlu0.c.b16.cont [7/8] %v3235_v1, 128  ;;  %3259 = vxpose.xlu1.c.b16.cont [7/8] %v3227_v61, 128 }
 0x603   : > { %3276 = vxpose.xlu0.c.b16.end [8/8] %v3236_v20, 128  ;;  %3260 = vxpose.xlu1.c.b16.end [8/8] %v3228_v50, 128 }
 0x64d   : > { %v3277_v38 = vpop.trf.xlu0  ;;  %v3261_v24 = vpop.trf.xlu1 }
 0x64e   : > { %3317 = vmatprep.mubr.bf16.mxu0 %v3277_v38 }
 0x64f   : > { %3318 = vmatmul.mubr.bf16.vlgmr.msra.gmra.mrb[64].mxu0 %v3261_v24 }
 0x650   : > { %12267 = vmatpush3.bf16.msra.mxu0 %v12873_v27 }
 0x651   : > { %v3278_v51 = vpop.trf.xlu0  ;;  %v3262_v4 = vpop.trf.xlu1  ;;  %12268 = vmatprep.subr.bf16.mxu0 %v12874_v62 }
 0x652   : > { %3325 = vmatprep.mubr.bf16.mxu0 %v3278_v51 }
 0x654   : > { %12269 = vmatpush3.bf16.msra.mxu0 %v12874_v62 }
 0x655   : > { %v3279_v29 = vpop.trf.xlu0  ;;  %v3263_v28 = vpop.trf.xlu1  ;;  %12270 = vmatprep.subr.bf16.mxu0 %v12875_v40 }
 0x657   : > { %3326 = vmatmul.mubr.bf16.gmra.mrb[68].mxu0 %v3262_v4 }
 0x658   : > { %3333 = vmatprep.mubr.bf16.mxu0 %v3279_v29  ;;  %12271 = vmatpush3.bf16.msra.mxu0 %v12875_v40 }
 0x659   : > { %v3280_v10 = vpop.trf.xlu0  ;;  %v3264_v15 = vpop.trf.xlu1  ;;  %12272 = vmatprep.subr.bf16.mxu0 %v12876_v19 }
 0x65c   : > { %12273 = vmatpush3.bf16.msra.mxu0 %v12876_v19  ;;  %v17910_v19 = vld [vmem:[#allocation74_spill] sm:$0xff] }
 0x65d   : > { %v3281_v46 = vpop.trf.xlu0  ;;  %v3265_v35 = vpop.trf.xlu1  ;;  %12274 = vmatprep.subr.bf16.mxu0 %v12877_v3 }
 0x65f   : > { %3334 = vmatmul.mubr.bf16.gmra.mrb[72].mxu0 %v3263_v28 }
 0x660   : > { %3341 = vmatprep.mubr.bf16.mxu0 %v3280_v10  ;;  %12275 = vmatpush3.bf16.msra.mxu0 %v12877_v3  ;;  %v17913_v3 = vld [vmem:[#allocation75_spill] sm:$0xff] }
 0x661   : > { %v3282_v47 = vpop.trf.xlu0  ;;  %v3266_v11 = vpop.trf.xlu1  ;;  %12276 = vmatprep.subr.bf16.mxu0 %v12878_v53 }
 0x664   : > { %12277 = vmatpush3.bf16.msra.mxu0 %v12878_v53  ;;  %v17921_v53 = vld [vmem:[#allocation82_spill] sm:$0xff] }
 0x665   : > { %v3283_v55 = vpop.trf.xlu0  ;;  %v3267_v7 = vpop.trf.xlu1 }
 0x667   : > { %3342 = vmatmul.mubr.bf16.gmra.mrb[76].mxu0 %v3264_v15 }
 0x668   : > { %3349 = vmatprep.mubr.bf16.mxu0 %v3281_v46 }
 0x669   : > { %v3284_v30 = vpop.trf.xlu0  ;;  %v3268_v2 = vpop.trf.xlu1 }
 0x66f   : > { %3350 = vmatmul.mubr.bf16.gmra.mrb[80].mxu0 %v3265_v35 }
 0x670   : > { %3357 = vmatprep.mubr.bf16.mxu0 %v3282_v47 }
 0x677   : > { %3358 = vmatmul.mubr.bf16.gmra.mrb[84].mxu0 %v3266_v11 }
 0x678   : > { %3365 = vmatprep.mubr.bf16.mxu0 %v3283_v55 }
 0x67f   : > { %3366 = vmatmul.mubr.bf16.gmra.mrb[88].mxu0 %v3267_v7 }
 0x680   : > { %3373 = vmatprep.mubr.bf16.mxu0 %v3284_v30 }
 0x687   : > { %3374 = vmatmul.mubr.bf16.gmra.mrb[92].mxu0 %v3268_v2 }
 0x722   : > { %v11478_v42 = vpop.f32.mrb[64].mxu0 }
 0x723   : > { %v11479_v12 = vpop.f32.mrb[65].mxu0 }
 0x724   : > { %v11480_v54 = vadd.f32 %v11479_v12, %v11478_v42  ;;  %v11481_v31 = vpop.f32.mrb[66].mxu0 }
 0x725   : > { %v11482_v0 = vpop.f32.mrb[67].mxu0 }
 0x726   : > { %v11483_v6 = vadd.f32 %v11482_v0, %v11481_v31  ;;  %v17908_v0 = vpack.c.bf16 %v15067_v34, %v15061_v8  ;;  %v17918_v8 = vld [vmem:[#allocation80_spill] sm:$0xff]  ;;  %v17919_v34 = vld [vmem:[#allocation79_spill] sm:$0xff] }
 0x728   : > { %v3398_v48 = vpack.c.bf16 %v11483_v6, %v11480_v54  ;;  %v17909_v6 = vpack.c.bf16 %v15101_v25, %v15098_v14  ;;  %v17922_v14 = vld [vmem:[#allocation81_spill] sm:$0xff] }
 0x729   : > { %v17923_v25 = vpack.c.bf16 %v17921_v53, %v17922_v14 }
 0x72a   : > { %12218 = vmatprep.subr.bf16.mxu1 %v3398_v48  ;;  %v11484_v45 = vpop.f32.mrb[68].mxu0 }
 0x72b   : > { %12219 = vmatpush3.bf16.msra.mxu1 %v3398_v48  ;;  %v11485_v60 = vpop.f32.mrb[69].mxu0  ;;  %v17911_v48 = vpack.c.bf16 %v15131_v18, %v17910_v19  ;;  %v17925_v18 = vld [vmem:[#allocation83_spill] sm:$0xff] }
 0x72c   : > { %v11486_v63 = vadd.f32 %v11485_v60, %v11484_v45  ;;  %v11487_v58 = vpop.f32.mrb[70].mxu0  ;;  %v17912_v45 = vld [vmem:[#allocation76_spill] sm:$0xff] }
 0x72d   : > { %v11488_v37 = vpop.f32.mrb[71].mxu0  ;;  %v17914_v60 = vpack.c.bf16 %v17912_v45, %v17913_v3 }
 0x72e   : > { %v11489_v59 = vadd.f32 %v11488_v37, %v11487_v58  ;;  %v17916_v58 = vld [vmem:[#allocation77_spill] sm:$0xff] }
 0x730   : > { %v3399_v21 = vpack.c.bf16 %v11489_v59, %v11486_v63  ;;  %v17915_v63 = vld [vmem:[#allocation78_spill] sm:$0xff]  ;;  %v17920_v59 = vpack.c.bf16 %v17918_v8, %v17919_v34 }
 0x731   : > { %v17917_v37 = vpack.c.bf16 %v17915_v63, %v17916_v58 }
 0x732   : > { %12220 = vmatprep.subr.bf16.mxu1 %v3399_v21  ;;  %v11490_v5 = vpop.f32.mrb[72].mxu0 }
 0x733   : > { %12221 = vmatpush3.bf16.msra.mxu1 %v3399_v21  ;;  %v11491_v9 = vpop.f32.mrb[73].mxu0  ;;  %v17924_v21 = vld [vmem:[#allocation84_spill] sm:$0xff] }
 0x734   : > { %v11492_v52 = vadd.f32 %v11491_v9, %v11490_v5  ;;  %v11493_v41 = vpop.f32.mrb[74].mxu0  ;;  %v17926_v5 = vpack.c.bf16 %v17924_v21, %v17925_v18  ;;  %v17927_v9 = vld [vmem:[#allocation86_spill] sm:$0xff] }
 0x735   : > { %v11494_v1 = vpop.f32.mrb[75].mxu0 }
 0x736   : > { %v11495_v20 = vadd.f32 %v11494_v1, %v11493_v41  ;;  %v17930_v1 = vld [vmem:[#allocation88_spill] sm:$0xff] }
 0x738   : > { %v3400_v56 = vpack.c.bf16 %v11495_v20, %v11492_v52  ;;  %v17928_v52 = vld [vmem:[#allocation85_spill] sm:$0xff]  ;;  %v17931_v20 = vld [vmem:[#allocation87_spill] sm:$0xff] }
 0x739   : > { %v17929_v41 = vpack.c.bf16 %v17927_v9, %v17928_v52 }
 0x73a   : > { %12222 = vmatprep.subr.bf16.mxu1 %v3400_v56  ;;  %v11496_v44 = vpop.f32.mrb[76].mxu0 }
 0x73b   : > { %12223 = vmatpush3.bf16.msra.mxu1 %v3400_v56  ;;  %v11497_v57 = vpop.f32.mrb[77].mxu0  ;;  %v17932_v56 = vpack.c.bf16 %v17930_v1, %v17931_v20 }
 0x73c   : > { %v11498_v16 = vadd.f32 %v11497_v57, %v11496_v44  ;;  %v11499_v43 = vpop.f32.mrb[78].mxu0  ;;  %v17933_v44 = vld [vmem:[#allocation90_spill] sm:$0xff]  ;;  %v17934_v57 = vld [vmem:[#allocation89_spill] sm:$0xff] }
 0x73d   : > { %v11500_v23 = vpop.f32.mrb[79].mxu0 }
 0x73e   : > { %v11501_v36 = vadd.f32 %v11500_v23, %v11499_v43  ;;  %v17936_v43 = vld [vmem:[#allocation92_spill] sm:$0xff]  ;;  %v17937_v23 = vld [vmem:[#allocation91_spill] sm:$0xff] }
 0x740   : > { %v3401_v49 = vpack.c.bf16 %v11501_v36, %v11498_v16  ;;  %v17935_v16 = vpack.c.bf16 %v17933_v44, %v17934_v57  ;;  %v17938_v36 = vpack.c.bf16 %v17936_v43, %v17937_v23 }
 0x742   : > { %v11502_v26 = vpop.f32.mrb[80].mxu0  ;;  %12224 = vmatprep.subr.bf16.mxu1 %v3401_v49 }
 0x743   : > { %v11503_v61 = vpop.f32.mrb[81].mxu0  ;;  %12225 = vmatpush3.bf16.msra.mxu1 %v3401_v49  ;;  %v17939_v49 = vpack.c.bf16 %v15377_v39, %v15373_v17 }
 0x744   : > { %v11504_v33 = vadd.f32 %v11503_v61, %v11502_v26  ;;  %v11505_v13 = vpop.f32.mrb[82].mxu0  ;;  %v17940_v26 = vld [vmem:[#allocation94_spill] sm:$0xff]  ;;  %v17941_v61 = vld [vmem:[#allocation93_spill] sm:$0xff] }
 0x745   : > { %v11506_v50 = vpop.f32.mrb[83].mxu0 }
 0x746   : > { %v11507_v38 = vadd.f32 %v11506_v50, %v11505_v13  ;;  %v17943_v13 = vpack.c.bf16 %v15419_v22, %v15415_v32  ;;  %v12879_v50 = vld [vmem:[%s13915_s17 + $0x30] sm:$0xff]  }
 0x747   : > { %12278 = vmatprep.subr.bf16.mxu0 %v12879_v50 }
 0x748   : > { %v3402_v24 = vpack.c.bf16 %v11507_v38, %v11504_v33  ;;  %v17942_v33 = vpack.c.bf16 %v17940_v26, %v17941_v61  ;;  %12279 = vmatpush3.bf16.msra.mxu0 %v12879_v50  ;;  %v12880_v38 = vld [vmem:[%s13915_s17 + $0x38] sm:$0xff]  }
 0x749   : > { %12280 = vmatprep.subr.bf16.mxu0 %v12880_v38 }
 0x74a   : > { %v11508_v51 = vpop.f32.mrb[84].mxu0  ;;  %12226 = vmatprep.subr.bf16.mxu1 %v3402_v24 }
 0x74b   : > { %v11509_v4 = vpop.f32.mrb[85].mxu0  ;;  %12227 = vmatpush3.bf16.msra.mxu1 %v3402_v24 }
 0x74c   : > { %v11510_v29 = vadd.f32 %v11509_v4, %v11508_v51  ;;  %v11511_v28 = vpop.f32.mrb[86].mxu0  ;;  %12281 = vmatpush3.bf16.msra.mxu0 %v12880_v38 }
 0x74d   : > { %v11512_v10 = vpop.f32.mrb[87].mxu0 }
 0x74e   : > { %v11513_v15 = vadd.f32 %v11512_v10, %v11511_v28 }
 0x750   : > { %v3403_v46 = vpack.c.bf16 %v11513_v15, %v11510_v29 }
 0x752   : > { %v11514_v35 = vpop.f32.mrb[88].mxu0  ;;  %12228 = vmatprep.subr.bf16.mxu1 %v3403_v46 }
 0x753   : > { %v11515_v47 = vpop.f32.mrb[89].mxu0  ;;  %12229 = vmatpush3.bf16.msra.mxu1 %v3403_v46 }
 0x754   : > { %v11516_v11 = vadd.f32 %v11515_v47, %v11514_v35  ;;  %v11517_v55 = vpop.f32.mrb[90].mxu0 }
 0x755   : > { %v11518_v7 = vpop.f32.mrb[91].mxu0 }
 0x756   : > { %v11519_v30 = vadd.f32 %v11518_v7, %v11517_v55 }
 0x758   : > { %v3404_v2 = vpack.c.bf16 %v11519_v30, %v11516_v11 }
 0x75a   : > { %v11520_v27 = vpop.f32.mrb[92].mxu0  ;;  %12230 = vmatprep.subr.bf16.mxu1 %v3404_v2 }
 0x75b   : > { %v11521_v62 = vpop.f32.mrb[93].mxu0  ;;  %12231 = vmatpush3.bf16.msra.mxu1 %v3404_v2 }
 0x75c   : > { %v11522_v42 = vadd.f32 %v11521_v62, %v11520_v27  ;;  %v11523_v40 = vpop.f32.mrb[94].mxu0 }
 0x75d   : > { %v11524_v12 = vpop.f32.mrb[95].mxu0 }
 0x75e   : > { %v11525_v54 = vadd.f32 %v11524_v12, %v11523_v40 }
 0x760   : > { %v3405_v31 = vpack.c.bf16 %v11525_v54, %v11522_v42 }
 0x762   : > { %12232 = vmatprep.subr.bf16.mxu1 %v3405_v31 }
 0x763   : > { %12233 = vmatpush3.bf16.msra.mxu1 %v3405_v31 }
 0x766   : > { %12235 = vmatmul.mubr.bf16.vlgmr.msra.gmra.mrb[64].mxu1 %v17908_v0 }
 0x767   : > { %12238 = vmatprep.mubr.bf16.mxu1 %v17909_v6 }
 0x76e   : > { %12239 = vmatmul.mubr.bf16.gmra.mrb[68].mxu1 %v17911_v48 }
 0x76f   : > { %12242 = vmatprep.mubr.bf16.mxu1 %v17914_v60 }
 0x776   : > { %12243 = vmatmul.mubr.bf16.gmra.mrb[72].mxu1 %v17917_v37 }
 0x777   : > { %12246 = vmatprep.mubr.bf16.mxu1 %v17920_v59 }
 0x77e   : > { %12247 = vmatmul.mubr.bf16.gmra.mrb[76].mxu1 %v17923_v25 }
 0x77f   : > { %12250 = vmatprep.mubr.bf16.mxu1 %v17926_v5 }
 0x786   : > { %12251 = vmatmul.mubr.bf16.gmra.mrb[80].mxu1 %v17929_v41 }
 0x787   : > { %12254 = vmatprep.mubr.bf16.mxu1 %v17932_v56 }
 0x78e   : > { %12255 = vmatmul.mubr.bf16.gmra.mrb[84].mxu1 %v17935_v16 }
 0x78f   : > { %12258 = vmatprep.mubr.bf16.mxu1 %v17938_v36 }
 0x796   : > { %12259 = vmatmul.mubr.bf16.gmra.mrb[88].mxu1 %v17939_v49 }
 0x797   : > { %12262 = vmatprep.mubr.bf16.mxu1 %v17942_v33 }
 0x79e   : > { %12263 = vmatmul.mubr.bf16.gmra.mrb[92].mxu1 %v17943_v13 }
 0x839   : > { %v12236_v24 = vpop.f32.mrb[64].mxu1 }
 0x83a   : > { %v3440_v51 = vpop.f32.mrb[65].mxu1  ;;  %v3569_v29 = vmul.f32 0.25, %v12236_v24 }
 0x83b   : > { %v12237_v4 = vpop.f32.mrb[66].mxu1  ;;  %v3567_v28 = vmul.f32 0.25, %v3440_v51 }
 0x83c   : > { %v3570_v17 = vmul.f32 0.25, %v12237_v4  ;;  %v3443_v39 = vpop.f32.mrb[67].mxu1 }
 0x83d   : > { %v3568_v10 = vmul.f32 0.25, %v3443_v39 }
 0x83e   : > { %v3600_v15 = vpack.c.bf16 %v3570_v17, %v3569_v29 }
 0x83f   : > { %v3599_v46 = vpack.c.bf16 %v3568_v10, %v3567_v28 }
 0x841   : > { %v12240_v35 = vpop.f32.mrb[68].mxu1  ;;  %12282 = vmatprep.mubr.bf16.mxu0 %v3599_v46 }
 0x842   : > { %v3456_v32 = vpop.f32.mrb[69].mxu1  ;;  %12283 = vmatmul.mubr.bf16.vlgmr.msra.gmra.mrb[96].mxu0 %v3600_v15  ;;  %v3573_v47 = vmul.f32 0.25, %v12240_v35 }
 0x843   : > { %v12241_v22 = vpop.f32.mrb[70].mxu1  ;;  %v3571_v7 = vmul.f32 0.25, %v3456_v32 }
 0x844   : > { %v3574_v11 = vmul.f32 0.25, %v12241_v22  ;;  %v3459_v55 = vpop.f32.mrb[71].mxu1 }
 0x845   : > { %v3572_v30 = vmul.f32 0.25, %v3459_v55 }
 0x846   : > { %v3602_v2 = vpack.c.bf16 %v3574_v11, %v3573_v47 }
 0x847   : > { %v3601_v27 = vpack.c.bf16 %v3572_v30, %v3571_v7  ;;  %v15669_v7 = vld [vmem:[%s13930_s29 + $0x8] sm:$0x1f] }
 0x848   : > { %v17944_v30 = vld [vmem:[#allocation33_spill] sm:$0xff] }
 0x849   : > { %v12244_v62 = vpop.f32.mrb[72].mxu1  ;;  %12286 = vmatprep.mubr.bf16.mxu0 %v3601_v27 }
 0x84a   : > { %v3472_v42 = vpop.f32.mrb[73].mxu1  ;;  %12287 = vmatmul.mubr.bf16.gmra.mrb[100].mxu0 %v3602_v2  ;;  %v3577_v12 = vmul.f32 0.25, %v12244_v62  ;;  %v15673_v2 = vrot.slane %v15669_v7, %v17944_v30 }
 0x84b   : > { %v12245_v40 = vpop.f32.mrb[74].mxu1  ;;  %v3575_v0 = vmul.f32 0.25, %v3472_v42 }
 0x84c   : > { %v3578_v54 = vmul.f32 0.25, %v12245_v40  ;;  %v3475_v31 = vpop.f32.mrb[75].mxu1 }
 0x84d   : > { %v3576_v6 = vmul.f32 0.25, %v3475_v31  ;;  %v17945_v31 = vld [vmem:[#allocation38_spill] sm:$0xff] }
 0x84e   : > { %v3604_v19 = vpack.c.bf16 %v3578_v54, %v3577_v12 }
 0x84f   : > { %v3603_v48 = vpack.c.bf16 %v3576_v6, %v3575_v0 }
 0x851   : > { %v12248_v45 = vpop.f32.mrb[76].mxu1  ;;  %12290 = vmatprep.mubr.bf16.mxu0 %v3603_v48  ;;  %v17946_v48 = vld [vmem:[#allocation39_spill] sm:$0xff] }
 0x852   : > { %v3488_v3 = vpop.f32.mrb[77].mxu1  ;;  %12291 = vmatmul.mubr.bf16.gmra.mrb[104].mxu0 %v3604_v19  ;;  %v3581_v63 = vmul.f32 0.25, %v12248_v45 }
 0x853   : > { %v12249_v60 = vpop.f32.mrb[78].mxu1  ;;  %v3579_v8 = vmul.f32 0.25, %v3488_v3  ;;  %v17947_v3 = vld [vmem:[#allocation40_spill] sm:$0xff] }
 0x854   : > { %v3582_v58 = vmul.f32 0.25, %v12249_v60  ;;  %v3491_v37 = vpop.f32.mrb[79].mxu1 }
 0x855   : > { %v3580_v34 = vmul.f32 0.25, %v3491_v37  ;;  %v17948_v37 = vld [vmem:[#allocation41_spill] sm:$0xff] }
 0x856   : > { %v3606_v59 = vpack.c.bf16 %v3582_v58, %v3581_v63 }
 0x857   : > { %v3605_v53 = vpack.c.bf16 %v3580_v34, %v3579_v8 }
 0x859   : > { %v12252_v14 = vpop.f32.mrb[80].mxu1  ;;  %12294 = vmatprep.mubr.bf16.mxu0 %v3605_v53 }
 0x85a   : > { %v3504_v25 = vpop.f32.mrb[81].mxu1  ;;  %12295 = vmatmul.mubr.bf16.gmra.mrb[108].mxu0 %v3606_v59  ;;  %v3585_v18 = vmul.f32 0.25, %v12252_v14 }
 0x85b   : > { %v12253_v21 = vpop.f32.mrb[82].mxu1  ;;  %v3583_v52 = vmul.f32 0.25, %v3504_v25  ;;  %v17949_v25 = vld [vmem:[#allocation42_spill] sm:$0xff] }
 0x85c   : > { %v3586_v5 = vmul.f32 0.25, %v12253_v21  ;;  %v3507_v9 = vpop.f32.mrb[83].mxu1 }
 0x85d   : > { %v3584_v41 = vmul.f32 0.25, %v3507_v9  ;;  %v17950_v9 = vld [vmem:[#allocation43_spill] sm:$0xff] }
 0x85e   : > { %v3608_v1 = vpack.c.bf16 %v3586_v5, %v3585_v18 }
 0x85f   : > { %v3607_v20 = vpack.c.bf16 %v3584_v41, %v3583_v52  ;;  %v17951_v41 = vld [vmem:[#allocation44_spill] sm:$0xff] }
 0x861   : > { %v12256_v56 = vpop.f32.mrb[84].mxu1  ;;  %12298 = vmatprep.mubr.bf16.mxu0 %v3607_v20 }
 0x862   : > { %v3520_v44 = vpop.f32.mrb[85].mxu1  ;;  %12299 = vmatmul.mubr.bf16.gmra.mrb[112].mxu0 %v3608_v1  ;;  %v3589_v16 = vmul.f32 0.25, %v12256_v56 }
 0x863   : > { %v12257_v57 = vpop.f32.mrb[86].mxu1  ;;  %v3587_v36 = vmul.f32 0.25, %v3520_v44  ;;  %v17952_v44 = vld [vmem:[#allocation45_spill] sm:$0xff] }
 0x864   : > { %v3590_v43 = vmul.f32 0.25, %v12257_v57  ;;  %v3523_v23 = vpop.f32.mrb[87].mxu1 }
 0x865   : > { %v3588_v49 = vmul.f32 0.25, %v3523_v23 }
 0x866   : > { %v3610_v26 = vpack.c.bf16 %v3590_v43, %v3589_v16 }
 0x867   : > { %v3609_v61 = vpack.c.bf16 %v3588_v49, %v3587_v36  ;;  %v17953_v49 = vld [vmem:[#allocation46_spill] sm:$0xff] }
 0x869   : > { %v12260_v33 = vpop.f32.mrb[88].mxu1  ;;  %12302 = vmatprep.mubr.bf16.mxu0 %v3609_v61 }
 0x86a   : > { %v3536_v13 = vpop.f32.mrb[89].mxu1  ;;  %12303 = vmatmul.mubr.bf16.gmra.mrb[116].mxu0 %v3610_v26  ;;  %v3593_v38 = vmul.f32 0.25, %v12260_v33 }
 0x86b   : > { %v12261_v50 = vpop.f32.mrb[90].mxu1  ;;  %v3591_v4 = vmul.f32 0.25, %v3536_v13  ;;  %v17954_v13 = vld [vmem:[#allocation47_spill] sm:$0xff] }
 0x86c   : > { %v3594_v24 = vmul.f32 0.25, %v12261_v50  ;;  %v3539_v51 = vpop.f32.mrb[91].mxu1 }
 0x86d   : > { %v3592_v29 = vmul.f32 0.25, %v3539_v51 }
 0x86e   : > { %v3612_v17 = vpack.c.bf16 %v3594_v24, %v3593_v38  ;;  %v17956_v38 = vld [vmem:[#allocation48_spill] sm:$0xff] }
 0x86f   : > { %v3611_v39 = vpack.c.bf16 %v3592_v29, %v3591_v4  ;;  %v17957_v29 = vld [vmem:[#allocation49_spill] sm:$0xff] }
 0x871   : > { %v12264_v28 = vpop.f32.mrb[92].mxu1  ;;  %12306 = vmatprep.mubr.bf16.mxu0 %v3611_v39 }
 0x872   : > { %v3552_v10 = vpop.f32.mrb[93].mxu1  ;;  %12307 = vmatmul.mubr.bf16.gmra.mrb[120].mxu0 %v3612_v17  ;;  %v3597_v46 = vmul.f32 0.25, %v12264_v28 }
 0x873   : > { %v12265_v15 = vpop.f32.mrb[94].mxu1  ;;  %v3595_v22 = vmul.f32 0.25, %v3552_v10 }
 0x874   : > { %v3598_v35 = vmul.f32 0.25, %v12265_v15  ;;  %v3555_v32 = vpop.f32.mrb[95].mxu1 }
 0x875   : > { %v3596_v47 = vmul.f32 0.25, %v3555_v32 }
 0x876   : > { %v3614_v11 = vpack.c.bf16 %v3598_v35, %v3597_v46  ;;  %v17959_v46 = vld [vmem:[#allocation50_spill] sm:$0xff] }
 0x877   : > { %v3613_v55 = vpack.c.bf16 %v3596_v47, %v3595_v22  ;;  %v17961_v47 = vld [vmem:[#allocation51_spill] sm:$0xff] }
 0x879   : > { %12310 = vmatprep.mubr.bf16.mxu0 %v3613_v55  ;;  %v17963_v55 = vld [vmem:[#allocation52_spill] sm:$0xff] }
 0x87a   : > { %12311 = vmatmul.mubr.bf16.gmra.mrb[124].mxu0 %v3614_v11 }
 0x915   : > { %v12284_v27 = vpop.f32.mrb[96].mxu0 }
 0x916   : > { %v3717_v62 = vpop.f32.mrb[97].mxu0  ;;  %v3726_v54 = vadd.f32 %v12284_v27, %v15673_v2 }
 0x917   : > { %v3718_v42 = vadd.f32 %v3717_v62, %v15673_v2  ;;  %v12285_v40 = vpop.f32.mrb[98].mxu0 }
 0x918   : > { %v3720_v12 = vpop.f32.mrb[99].mxu0  ;;  %v3729_v19 = vadd.f32 %v12285_v40, %v15673_v2  ;;  %v15687_v60 = vadd.f32 %v3726_v54, %v17947_v3  ;;  %v17965_v40 = vld [vmem:[#allocation53_spill] sm:$0xff] }
 0x919   : > { %v15678_v0 = vadd.f32 %v3718_v42, %v17945_v31  ;;  %v3721_v6 = vadd.f32 %v3720_v12, %v15673_v2 }
 0x91a   : > { %v15691_v8 = vadd.f32 %v3729_v19, %v17948_v37  ;;  %v17969_v37 = vld [vmem:[#allocation55_spill] sm:$0xff] }
 0x91b   : > { %v15683_v45 = vadd.f32 %v3721_v6, %v17946_v48  ;;  %3876 = vadd.xlane.f32.xlu0 %v15678_v0  ;;  %v17967_v48 = vld [vmem:[#allocation54_spill] sm:$0xff] }
 0x91d   : > { %3878 = vadd.xlane.f32.xlu1 %v15683_v45  ;;  %v12288_v63 = vpop.f32.mrb[100].mxu0 }
 0x91e   : > { %v3733_v58 = vpop.f32.mrb[101].mxu0  ;;  %v3742_v14 = vadd.f32 %v12288_v63, %v15673_v2 }
 0x91f   : > { %v3734_v34 = vadd.f32 %v3733_v58, %v15673_v2  ;;  %3880 = vadd.xlane.f32.xlu0 %v15687_v60  ;;  %v12289_v59 = vpop.f32.mrb[102].mxu0 }
 0x920   : > { %v3736_v53 = vpop.f32.mrb[103].mxu0  ;;  %v3745_v5 = vadd.f32 %v12289_v59, %v15673_v2  ;;  %v15707_v1 = vadd.f32 %v3742_v14, %v17951_v41  ;;  %v17971_v59 = vld [vmem:[#allocation56_spill] sm:$0xff] }
 0x921   : > { %v15697_v21 = vadd.f32 %v3734_v34, %v17949_v25  ;;  %v3737_v18 = vadd.f32 %v3736_v53, %v15673_v2  ;;  %3882 = vadd.xlane.f32.xlu1 %v15691_v8 }
 0x922   : > { %v15711_v57 = vadd.f32 %v3745_v5, %v17952_v44  ;;  %v17975_v44 = vld [vmem:[#allocation58_spill] sm:$0xff] }
 0x923   : > { %v15703_v52 = vadd.f32 %v3737_v18, %v17950_v9  ;;  %3884 = vadd.xlane.f32.xlu0 %v15697_v21  ;;  %v17973_v18 = vld [vmem:[#allocation57_spill] sm:$0xff] }
 0x925   : > { %3886 = vadd.xlane.f32.xlu1 %v15703_v52  ;;  %v12292_v20 = vpop.f32.mrb[104].mxu0 }
 0x926   : > { %v3749_v56 = vpop.f32.mrb[105].mxu0  ;;  %v3758_v36 = vadd.f32 %v12292_v20, %v15673_v2 }
 0x927   : > { %v3750_v16 = vadd.f32 %v3749_v56, %v15673_v2  ;;  %3888 = vadd.xlane.f32.xlu0 %v15707_v1  ;;  %v12293_v43 = vpop.f32.mrb[106].mxu0 }
 0x928   : > { %v3752_v23 = vpop.f32.mrb[107].mxu0  ;;  %v3761_v33 = vadd.f32 %v12293_v43, %v15673_v2  ;;  %v15727_v24 = vadd.f32 %v3758_v36, %v17956_v38  ;;  %v17977_v36 = vld [vmem:[#allocation59_spill] sm:$0xff] }
 0x929   : > { %v15717_v26 = vadd.f32 %v3750_v16, %v17953_v49  ;;  %v3753_v61 = vadd.f32 %v3752_v23, %v15673_v2  ;;  %3890 = vadd.xlane.f32.xlu1 %v15711_v57 }
 0x92a   : > { %v15731_v17 = vadd.f32 %v3761_v33, %v17957_v29 }
 0x92b   : > { %v15723_v50 = vadd.f32 %v3753_v61, %v17954_v13  ;;  %3892 = vadd.xlane.f32.xlu0 %v15717_v26  ;;  %v17979_v61 = vld [vmem:[#allocation60_spill] sm:$0xff] }
 0x92c   : > { %17958 = vst [vmem:[#allocation76_spill] sm:$0xff] %v15731_v17 }
 0x92d   : > { %17955 = vst [vmem:[#allocation74_spill] sm:$0xff] %v15723_v50  ;;  %3894 = vadd.xlane.f32.xlu1 %v15723_v50  ;;  %v12296_v51 = vpop.f32.mrb[108].mxu0 }
 0x92e   : > { %v3765_v4 = vpop.f32.mrb[109].mxu0  ;;  %v3774_v15 = vadd.f32 %v12296_v51, %v15673_v2  ;;  %v17981_v51 = vld [vmem:[#allocation61_spill] sm:$0xff] }
 0x92f   : > { %v3766_v39 = vadd.f32 %v3765_v4, %v15673_v2  ;;  %3896 = vadd.xlane.f32.xlu0 %v15727_v24  ;;  %v12297_v28 = vpop.f32.mrb[110].mxu0 }
 0x930   : > { %v3768_v10 = vpop.f32.mrb[111].mxu0  ;;  %v3777_v22 = vadd.f32 %v12297_v28, %v15673_v2  ;;  %v15747_v27 = vadd.f32 %v3774_v15, %v17963_v55  ;;  %v17983_v15 = vld [vmem:[#allocation62_spill] sm:$0xff] }
 0x931   : > { %v15737_v35 = vadd.f32 %v3766_v39, %v17959_v46  ;;  %v3769_v32 = vadd.f32 %v3768_v10, %v15673_v2  ;;  %3898 = vadd.xlane.f32.xlu1 %v15731_v17 }
 0x932   : > { %17964 = vst [vmem:[#allocation77_spill] sm:$0xff] %v15747_v27  ;;  %v15751_v12 = vadd.f32 %v3777_v22, %v17965_v40 }
 0x933   : > { %17960 = vst [vmem:[#allocation75_spill] sm:$0xff] %v15737_v35  ;;  %v15743_v11 = vadd.f32 %v3769_v32, %v17961_v47  ;;  %3900 = vadd.xlane.f32.xlu0 %v15737_v35  ;;  %v17985_v47 = vld [vmem:[#allocation63_spill] sm:$0xff] }
 0x934   : > { %17966 = vst [vmem:[#allocation80_spill] sm:$0xff] %v15751_v12 }
 0x935   : > { %17962 = vst [vmem:[#allocation78_spill] sm:$0xff] %v15743_v11  ;;  %3902 = vadd.xlane.f32.xlu1 %v15743_v11  ;;  %v12300_v62 = vpop.f32.mrb[112].mxu0 }
 0x936   : > { %v3781_v42 = vpop.f32.mrb[113].mxu0  ;;  %v3790_v19 = vadd.f32 %v12300_v62, %v15673_v2  ;;  %v17987_v62 = vld [vmem:[#allocation64_spill] sm:$0xff] }
 0x937   : > { %v3782_v54 = vadd.f32 %v3781_v42, %v15673_v2  ;;  %3904 = vadd.xlane.f32.xlu0 %v15747_v27  ;;  %v12301_v31 = vpop.f32.mrb[114].mxu0 }
 0x938   : > { %v3784_v6 = vpop.f32.mrb[115].mxu0  ;;  %v3793_v58 = vadd.f32 %v12301_v31, %v15673_v2  ;;  %v15767_v53 = vadd.f32 %v3790_v19, %v17971_v59  ;;  %v17989_v31 = vld [vmem:[#allocation65_spill] sm:$0xff] }
 0x939   : > { %v15757_v3 = vadd.f32 %v3782_v54, %v17967_v48  ;;  %v3785_v63 = vadd.f32 %v3784_v6, %v15673_v2  ;;  %3906 = vadd.xlane.f32.xlu1 %v15751_v12 }
 0x93a   : > { %17972 = vst [vmem:[#allocation81_spill] sm:$0xff] %v15767_v53  ;;  %v15771_v5 = vadd.f32 %v3793_v58, %v17973_v18  ;;  %v17993_v18 = vld [vmem:[#allocation67_spill] sm:$0xff] }
 0x93b   : > { %17968 = vst [vmem:[#allocation79_spill] sm:$0xff] %v15757_v3  ;;  %v15763_v34 = vadd.f32 %v3785_v63, %v17969_v37  ;;  %3908 = vadd.xlane.f32.xlu0 %v15757_v3  ;;  %v17991_v37 = vld [vmem:[#allocation66_spill] sm:$0xff] }
 0x93c   : > { %17974 = vst [vmem:[#allocation84_spill] sm:$0xff] %v15771_v5 }
 0x93d   : > { %17970 = vst [vmem:[#allocation82_spill] sm:$0xff] %v15763_v34  ;;  %3910 = vadd.xlane.f32.xlu1 %v15763_v34  ;;  %v12304_v14 = vpop.f32.mrb[116].mxu0 }
 0x93e   : > { %v3797_v25 = vpop.f32.mrb[117].mxu0  ;;  %v3806_v56 = vadd.f32 %v12304_v14, %v15673_v2 }
 0x93f   : > { %v3798_v9 = vadd.f32 %v3797_v25, %v15673_v2  ;;  %3912 = vadd.xlane.f32.xlu0 %v15767_v53  ;;  %v12305_v41 = vpop.f32.mrb[118].mxu0 }
 0x940   : > { %v3800_v20 = vpop.f32.mrb[119].mxu0  ;;  %v3809_v23 = vadd.f32 %v12305_v41, %v15673_v2  ;;  %v15787_v33 = vadd.f32 %v3806_v56, %v17979_v61  ;;  %v17995_v41 = vld [vmem:[#allocation68_spill] sm:$0xff]  ;;  %v17997_v56 = vld [vmem:[#allocation69_spill] sm:$0xff] }
 0x941   : > { %v15777_v16 = vadd.f32 %v3798_v9, %v17975_v44  ;;  %v3801_v43 = vadd.f32 %v3800_v20, %v15673_v2  ;;  %3914 = vadd.xlane.f32.xlu1 %v15771_v5 }
 0x942   : > { %17980 = vst [vmem:[#allocation85_spill] sm:$0xff] %v15787_v33  ;;  %v15791_v4 = vadd.f32 %v3809_v23, %v17981_v51  ;;  %v17999_v51 = vld [vmem:[#allocation35_spill] sm:$0xff] }
 0x943   : > { %17976 = vst [vmem:[#allocation83_spill] sm:$0xff] %v15777_v16  ;;  %v15783_v49 = vadd.f32 %v3801_v43, %v17977_v36  ;;  %3916 = vadd.xlane.f32.xlu0 %v15777_v16  ;;  %v12881_v43 = vld [vmem:[%s13920_s21] sm:$0xff]  }
 0x944   : > { %17982 = vst [vmem:[#allocation88_spill] sm:$0xff] %v15791_v4  ;;  %12314 = vmatprep.subr.bf16.mxu1 %v12881_v43 }
 0x945   : > { %17978 = vst [vmem:[#allocation86_spill] sm:$0xff] %v15783_v49  ;;  %3918 = vadd.xlane.f32.xlu1 %v15783_v49  ;;  %v12308_v13 = vpop.f32.mrb[120].mxu0  ;;  %12315 = vmatpush3.bf16.msra.mxu1 %v12881_v43 }
 0x946   : > { %v3813_v38 = vpop.f32.mrb[121].mxu0  ;;  %v3822_v10 = vadd.f32 %v12308_v13, %v15673_v2 }
 0x947   : > { %v3814_v29 = vadd.f32 %v3813_v38, %v15673_v2  ;;  %3920 = vadd.xlane.f32.xlu0 %v15787_v33  ;;  %v12309_v39 = vpop.f32.mrb[122].mxu0 }
 0x948   : > { %v3816_v28 = vpop.f32.mrb[123].mxu0  ;;  %v3825_v22 = vadd.f32 %v12309_v39, %v15673_v2  ;;  %v15807_v42 = vadd.f32 %v3822_v10, %v17987_v62 }
 0x949   : > { %v15797_v46 = vadd.f32 %v3814_v29, %v17983_v15  ;;  %v3817_v32 = vadd.f32 %v3816_v28, %v15673_v2  ;;  %3922 = vadd.xlane.f32.xlu1 %v15791_v4 }
 0x94a   : > { %17988 = vst [vmem:[#allocation89_spill] sm:$0xff] %v15807_v42  ;;  %v15811_v6 = vadd.f32 %v3825_v22, %v17989_v31 }
 0x94b   : > { %17984 = vst [vmem:[#allocation87_spill] sm:$0xff] %v15797_v46  ;;  %v15803_v55 = vadd.f32 %v3817_v32, %v17985_v47  ;;  %3924 = vadd.xlane.f32.xlu0 %v15797_v46 }
 0x94c   : > { %17990 = vst [vmem:[#allocation92_spill] sm:$0xff] %v15811_v6 }
 0x94d   : > { %17986 = vst [vmem:[#allocation90_spill] sm:$0xff] %v15803_v55  ;;  %3926 = vadd.xlane.f32.xlu1 %v15803_v55  ;;  %v12312_v40 = vpop.f32.mrb[124].mxu0 }
 0x94e   : > { %v3829_v54 = vpop.f32.mrb[125].mxu0  ;;  %v3838_v58 = vadd.f32 %v12312_v40, %v15673_v2 }
 0x94f   : > { %v3830_v19 = vadd.f32 %v3829_v54, %v15673_v2  ;;  %3928 = vadd.xlane.f32.xlu0 %v15807_v42  ;;  %v12313_v48 = vpop.f32.mrb[126].mxu0 }
 0x950   : > { %v3832_v63 = vpop.f32.mrb[127].mxu0  ;;  %v3841_v25 = vadd.f32 %v12313_v48, %v15673_v2  ;;  %v15827_v20 = vadd.f32 %v3838_v58, %v17995_v41 }
 0x951   : > { %v15817_v59 = vadd.f32 %v3830_v19, %v17991_v37  ;;  %v3833_v14 = vadd.f32 %v3832_v63, %v15673_v2  ;;  %3930 = vadd.xlane.f32.xlu1 %v15811_v6 }
 0x952   : > { %17996 = vst [vmem:[#allocation93_spill] sm:$0xff] %v15827_v20  ;;  %v15831_v44 = vadd.f32 %v3841_v25, %v17997_v56 }
 0x953   : > { %17992 = vst [vmem:[#allocation91_spill] sm:$0xff] %v15817_v59  ;;  %v15823_v9 = vadd.f32 %v3833_v14, %v17993_v18  ;;  %3932 = vadd.xlane.f32.xlu0 %v15817_v59 }
 0x954   : > { %17998 = vst [vmem:[#allocation38_spill] sm:$0xff] %v15831_v44 }
 0x955   : > { %17994 = vst [vmem:[#allocation94_spill] sm:$0xff] %v15823_v9  ;;  %3934 = vadd.xlane.f32.xlu1 %v15823_v9 }
 0x957   : > { %3936 = vadd.xlane.f32.xlu0 %v15827_v20 }
 0x959   : > { %3938 = vadd.xlane.f32.xlu1 %v15831_v44 }
 0x9a8   : > { %v3877_v2 = vpop.xlane.xlu0 %3876 }
 0x9a9   : > { %v3940_v23 = vmul.f32 0.0625, %v3877_v2 }
 0x9aa   : > { %v3879_v36 = vpop.xlane.xlu1 %3878 }
 0x9ab   : > { %v3972_v61 = vsub.f32 %v15678_v0, %v3940_v23  ;;  %v3941_v13 = vmul.f32 0.0625, %v3879_v36 }
 0x9ac   : > { %v3881_v38 = vpop.xlane.xlu0 %3880 }
 0x9ad   : > { %v15838_v29 = vmul.f32 %v3972_v61, %v17999_v51  ;;  %v3973_v39 = vsub.f32 %v15683_v45, %v3941_v13  ;;  %v3942_v28 = vmul.f32 0.0625, %v3881_v38 }
 0x9ae   : > { %v3883_v10 = vpop.xlane.xlu1 %3882 }
 0x9af   : > { %v15842_v15 = vmul.f32 %v3973_v39, %v17999_v51  ;;  %v3974_v32 = vsub.f32 %v15687_v60, %v3942_v28  ;;  %v3943_v22 = vmul.f32 0.0625, %v3883_v10  ;;  %v4036_v47 = vmul.f32 %v15838_v29, %v15838_v29 }
 0x9b0   : > { %v3885_v62 = vpop.xlane.xlu0 %3884 }
 0x9b1   : > { %v15848_v40 = vmul.f32 %v3974_v32, %v17999_v51  ;;  %v3975_v54 = vsub.f32 %v15691_v8, %v3943_v22  ;;  %v3944_v31 = vmul.f32 0.0625, %v3885_v62  ;;  %4068 = vadd.xlane.f32.xlu0 %v4036_v47  ;;  %v4037_v19 = vmul.f32 %v15842_v15, %v15842_v15 }
 0x9b2   : > { %v3887_v48 = vpop.xlane.xlu1 %3886 }
 0x9b3   : > { %v15854_v63 = vmul.f32 %v3975_v54, %v17999_v51  ;;  %v3976_v58 = vsub.f32 %v15697_v21, %v3944_v31  ;;  %v3945_v37 = vmul.f32 0.0625, %v3887_v48  ;;  %4070 = vadd.xlane.f32.xlu1 %v4037_v19  ;;  %v4038_v14 = vmul.f32 %v15848_v40, %v15848_v40 }
 0x9b4   : > { %v3889_v25 = vpop.xlane.xlu0 %3888 }
 0x9b5   : > { %v15860_v18 = vmul.f32 %v3976_v58, %v17999_v51  ;;  %v3977_v41 = vsub.f32 %v15703_v52, %v3945_v37  ;;  %v3946_v56 = vmul.f32 0.0625, %v3889_v25  ;;  %4072 = vadd.xlane.f32.xlu0 %v4038_v14  ;;  %v4039_v43 = vmul.f32 %v15854_v63, %v15854_v63 }
 0x9b6   : > { %v3891_v2 = vpop.xlane.xlu1 %3890 }
 0x9b7   : > { %v15866_v23 = vmul.f32 %v3977_v41, %v17999_v51  ;;  %v3978_v36 = vsub.f32 %v15707_v1, %v3946_v56  ;;  %v3947_v61 = vmul.f32 0.0625, %v3891_v2  ;;  %4074 = vadd.xlane.f32.xlu1 %v4039_v43  ;;  %v4040_v13 = vmul.f32 %v15860_v18, %v15860_v18 }
 0x9b8   : > { %v3893_v38 = vpop.xlane.xlu0 %3892 }
 0x9b9   : > { %v15872_v39 = vmul.f32 %v3978_v36, %v17999_v51  ;;  %v3979_v28 = vsub.f32 %v15711_v57, %v3947_v61  ;;  %v3948_v10 = vmul.f32 0.0625, %v3893_v38  ;;  %4076 = vadd.xlane.f32.xlu0 %v4040_v13  ;;  %v4041_v32 = vmul.f32 %v15866_v23, %v15866_v23 }
 0x9ba   : > { %v3895_v22 = vpop.xlane.xlu1 %3894 }
 0x9bb   : > { %v15878_v47 = vmul.f32 %v3979_v28, %v17999_v51  ;;  %v3980_v62 = vsub.f32 %v15717_v26, %v3948_v10  ;;  %v3949_v54 = vmul.f32 0.0625, %v3895_v22  ;;  %4078 = vadd.xlane.f32.xlu1 %v4041_v32  ;;  %v4042_v31 = vmul.f32 %v15872_v39, %v15872_v39 }
 0x9bc   : > { %v3897_v19 = vpop.xlane.xlu0 %3896 }
 0x9bd   : > { %v15884_v48 = vmul.f32 %v3980_v62, %v17999_v51  ;;  %v3981_v58 = vsub.f32 %v15723_v50, %v3949_v54  ;;  %v3950_v37 = vmul.f32 0.0625, %v3897_v19  ;;  %4080 = vadd.xlane.f32.xlu0 %v4042_v31  ;;  %v4043_v14 = vmul.f32 %v15878_v47, %v15878_v47  ;;  %v12882_v31 = vld [vmem:[%s13920_s21 + $0x8] sm:$0xff]  }
 0x9be   : > { %v3899_v25 = vpop.xlane.xlu1 %3898  ;;  %12316 = vmatprep.subr.bf16.mxu1 %v12882_v31 }
 0x9bf   : > { %v15890_v41 = vmul.f32 %v3981_v58, %v17999_v51  ;;  %v3982_v56 = vsub.f32 %v15727_v24, %v3950_v37  ;;  %v3951_v43 = vmul.f32 0.0625, %v3899_v25  ;;  %4082 = vadd.xlane.f32.xlu1 %v4043_v14  ;;  %v4044_v2 = vmul.f32 %v15884_v48, %v15884_v48  ;;  %12317 = vmatpush3.bf16.msra.mxu1 %v12882_v31 }
 0x9c0   : > { %v3901_v36 = vpop.xlane.xlu0 %3900 }
 0x9c1   : > { %v15896_v61 = vmul.f32 %v3982_v56, %v17999_v51  ;;  %v3983_v13 = vsub.f32 %v15731_v17, %v3951_v43  ;;  %v3952_v38 = vmul.f32 0.0625, %v3901_v36  ;;  %4084 = vadd.xlane.f32.xlu0 %v4044_v2  ;;  %v4045_v28 = vmul.f32 %v15890_v41, %v15890_v41 }
 0x9c2   : > { %v3903_v10 = vpop.xlane.xlu1 %3902 }
 0x9c3   : > { %v15902_v32 = vmul.f32 %v3983_v13, %v17999_v51  ;;  %v3984_v22 = vsub.f32 %v15737_v35, %v3952_v38  ;;  %v3953_v62 = vmul.f32 0.0625, %v3903_v10  ;;  %4086 = vadd.xlane.f32.xlu1 %v4045_v28  ;;  %v4046_v54 = vmul.f32 %v15896_v61, %v15896_v61  ;;  %v18000_v35 = vld [vmem:[#allocation36_spill] sm:$0xff] }
 0x9c4   : > { %v3905_v19 = vpop.xlane.xlu0 %3904 }
 0x9c5   : > { %v15909_v58 = vmul.f32 %v3984_v22, %v17999_v51  ;;  %v3985_v37 = vsub.f32 %v15743_v11, %v3953_v62  ;;  %v3954_v14 = vmul.f32 0.0625, %v3905_v19  ;;  %4088 = vadd.xlane.f32.xlu0 %v4046_v54  ;;  %v4047_v25 = vmul.f32 %v15902_v32, %v15902_v32 }
 0x9c6   : > { %v3907_v56 = vpop.xlane.xlu1 %3906 }
 0x9c7   : > { %v15915_v43 = vmul.f32 %v3985_v37, %v17999_v51  ;;  %v3986_v2 = vsub.f32 %v15747_v27, %v3954_v14  ;;  %v3955_v36 = vmul.f32 0.0625, %v3907_v56  ;;  %4090 = vadd.xlane.f32.xlu1 %v4047_v25  ;;  %v4048_v13 = vmul.f32 %v15909_v58, %v15909_v58 }
 0x9c8   : > { %v3909_v38 = vpop.xlane.xlu0 %3908 }
 0x9c9   : > { %v15921_v28 = vmul.f32 %v3986_v2, %v17999_v51  ;;  %v3987_v10 = vsub.f32 %v15751_v12, %v3955_v36  ;;  %v3956_v22 = vmul.f32 0.0625, %v3909_v38  ;;  %4092 = vadd.xlane.f32.xlu0 %v4048_v13  ;;  %v4049_v62 = vmul.f32 %v15915_v43, %v15915_v43 }
 0x9ca   : > { %v3911_v54 = vpop.xlane.xlu1 %3910 }
 0x9cb   : > { %v15927_v31 = vmul.f32 %v3987_v10, %v17999_v51  ;;  %v3988_v19 = vsub.f32 %v15757_v3, %v3956_v22  ;;  %v3957_v37 = vmul.f32 0.0625, %v3911_v54  ;;  %4094 = vadd.xlane.f32.xlu1 %v4049_v62  ;;  %v4050_v14 = vmul.f32 %v15921_v28, %v15921_v28  ;;  %v12883_v3 = vld [vmem:[%s13920_s21 + $0x10] sm:$0xff]  }
 0x9cc   : > { %v3913_v25 = vpop.xlane.xlu0 %3912  ;;  %12318 = vmatprep.subr.bf16.mxu1 %v12883_v3 }
 0x9cd   : > { %v15933_v56 = vmul.f32 %v3988_v19, %v17999_v51  ;;  %v3989_v2 = vsub.f32 %v15763_v34, %v3957_v37  ;;  %v3958_v36 = vmul.f32 0.0625, %v3913_v25  ;;  %4096 = vadd.xlane.f32.xlu0 %v4050_v14  ;;  %v4051_v13 = vmul.f32 %v15927_v31, %v15927_v31  ;;  %12319 = vmatpush3.bf16.msra.mxu1 %v12883_v3 }
 0x9ce   : > { %v3915_v38 = vpop.xlane.xlu1 %3914 }
 0x9cf   : > { %v15939_v10 = vmul.f32 %v3989_v2, %v17999_v51  ;;  %v3990_v22 = vsub.f32 %v15767_v53, %v3958_v36  ;;  %v3959_v62 = vmul.f32 0.0625, %v3915_v38  ;;  %4098 = vadd.xlane.f32.xlu1 %v4051_v13  ;;  %v4052_v54 = vmul.f32 %v15933_v56, %v15933_v56 }
 0x9d0   : > { %v3917_v19 = vpop.xlane.xlu0 %3916 }
 0x9d1   : > { %v15945_v37 = vmul.f32 %v3990_v22, %v17999_v51  ;;  %v3991_v14 = vsub.f32 %v15771_v5, %v3959_v62  ;;  %v3960_v25 = vmul.f32 0.0625, %v3917_v19  ;;  %4100 = vadd.xlane.f32.xlu0 %v4052_v54  ;;  %v4053_v2 = vmul.f32 %v15939_v10, %v15939_v10 }
 0x9d2   : > { %v3919_v30 = vpop.xlane.xlu1 %3918 }
 0x9d3   : > { %v15951_v36 = vmul.f32 %v3991_v14, %v17999_v51  ;;  %v3992_v13 = vsub.f32 %v15777_v16, %v3960_v25  ;;  %v3961_v38 = vmul.f32 0.0625, %v3919_v30  ;;  %4102 = vadd.xlane.f32.xlu1 %v4053_v2  ;;  %v4054_v22 = vmul.f32 %v15945_v37, %v15945_v37  ;;  %v12884_v30 = vld [vmem:[%s13920_s21 + $0x18] sm:$0xff]  }
 0x9d4   : > { %v3921_v34 = vpop.xlane.xlu0 %3920  ;;  %12320 = vmatprep.subr.bf16.mxu1 %v12884_v30 }
 0x9d5   : > { %v15958_v62 = vmul.f32 %v3992_v13, %v17999_v51  ;;  %v3993_v54 = vsub.f32 %v15783_v49, %v3961_v38  ;;  %v3962_v19 = vmul.f32 0.0625, %v3921_v34  ;;  %4104 = vadd.xlane.f32.xlu0 %v4054_v22  ;;  %v4055_v14 = vmul.f32 %v15951_v36, %v15951_v36  ;;  %v12885_v34 = vld [vmem:[%s13920_s21 + $0x20] sm:$0xff]   ;;  %12321 = vmatpush3.bf16.msra.mxu1 %v12884_v30 }
 0x9d6   : > { %v3923_v5 = vpop.xlane.xlu1 %3922  ;;  %12322 = vmatprep.subr.bf16.mxu1 %v12885_v34 }
 0x9d7   : > { %v15965_v25 = vmul.f32 %v3993_v54, %v17999_v51  ;;  %v3994_v2 = vsub.f32 %v15787_v33, %v3962_v19  ;;  %v3963_v16 = vmul.f32 0.0625, %v3923_v5  ;;  %4106 = vadd.xlane.f32.xlu1 %v4055_v14  ;;  %v4056_v13 = vmul.f32 %v15958_v62, %v15958_v62 }
 0x9d8   : > { %v3925_v38 = vpop.xlane.xlu0 %3924 }
 0x9d9   : > { %v15972_v22 = vmul.f32 %v3994_v2, %v17999_v51  ;;  %v3995_v49 = vsub.f32 %v15791_v4, %v3963_v16  ;;  %v3964_v53 = vmul.f32 0.0625, %v3925_v38  ;;  %4108 = vadd.xlane.f32.xlu0 %v4056_v13  ;;  %v4057_v54 = vmul.f32 %v15965_v25, %v15965_v25  ;;  %v12886_v16 = vld [vmem:[%s13920_s21 + $0x28] sm:$0xff]   ;;  %12323 = vmatpush3.bf16.msra.mxu1 %v12885_v34 }
 0x9da   : > { %v3927_v5 = vpop.xlane.xlu1 %3926  ;;  %12324 = vmatprep.subr.bf16.mxu1 %v12886_v16 }
 0x9db   : > { %v15978_v19 = vmul.f32 %v3995_v49, %v17999_v51  ;;  %v3996_v3 = vsub.f32 %v15797_v46, %v3964_v53  ;;  %v3965_v14 = vmul.f32 0.0625, %v3927_v5  ;;  %4110 = vadd.xlane.f32.xlu1 %v4057_v54  ;;  %v4058_v33 = vmul.f32 %v15972_v22, %v15972_v22 }
 0x9dc   : > { %v3929_v2 = vpop.xlane.xlu0 %3928 }
 0x9dd   : > { %v15985_v13 = vmul.f32 %v3996_v3, %v17999_v51  ;;  %v3997_v38 = vsub.f32 %v15803_v55, %v3965_v14  ;;  %v3966_v4 = vmul.f32 0.0625, %v3929_v2  ;;  %4112 = vadd.xlane.f32.xlu0 %v4058_v33  ;;  %v4059_v53 = vmul.f32 %v15978_v19, %v15978_v19  ;;  %v12887_v14 = vld [vmem:[%s13920_s21 + $0x30] sm:$0xff]   ;;  %12325 = vmatpush3.bf16.msra.mxu1 %v12886_v16 }
 0x9de   : > { %v3931_v49 = vpop.xlane.xlu1 %3930  ;;  %12326 = vmatprep.subr.bf16.mxu1 %v12887_v14 }
 0x9df   : > { %v15991_v54 = vmul.f32 %v3997_v38, %v17999_v51  ;;  %v3998_v30 = vsub.f32 %v15807_v42, %v3966_v4  ;;  %v3967_v5 = vmul.f32 0.0625, %v3931_v49  ;;  %4114 = vadd.xlane.f32.xlu1 %v4059_v53  ;;  %v4060_v46 = vmul.f32 %v15985_v13, %v15985_v13 }
 0x9e0   : > { %v3933_v3 = vpop.xlane.xlu0 %3932 }
 0x9e1   : > { %v15998_v33 = vmul.f32 %v3998_v30, %v17999_v51  ;;  %v3999_v2 = vsub.f32 %v15811_v6, %v3967_v5  ;;  %v3968_v55 = vmul.f32 0.0625, %v3933_v3  ;;  %4116 = vadd.xlane.f32.xlu0 %v4060_v46  ;;  %v4061_v4 = vmul.f32 %v15991_v54, %v15991_v54  ;;  %v12888_v5 = vld [vmem:[%s13920_s21 + $0x38] sm:$0xff]   ;;  %12327 = vmatpush3.bf16.msra.mxu1 %v12887_v14 }
 0x9e2   : > { %v3935_v38 = vpop.xlane.xlu1 %3934  ;;  %12328 = vmatprep.subr.bf16.mxu1 %v12888_v5 }
 0x9e3   : > { %v16004_v53 = vmul.f32 %v3999_v2, %v17999_v51  ;;  %v4000_v34 = vsub.f32 %v15817_v59, %v3968_v55  ;;  %v3969_v49 = vmul.f32 0.0625, %v3935_v38  ;;  %4118 = vadd.xlane.f32.xlu1 %v4061_v4  ;;  %v4062_v42 = vmul.f32 %v15998_v33, %v15998_v33 }
 0x9e4   : > { %v3937_v30 = vpop.xlane.xlu0 %3936 }
 0x9e5   : > { %v16011_v46 = vmul.f32 %v4000_v34, %v17999_v51  ;;  %v4001_v3 = vsub.f32 %v15823_v9, %v3969_v49  ;;  %v3970_v6 = vmul.f32 0.0625, %v3937_v30  ;;  %4120 = vadd.xlane.f32.xlu0 %v4062_v42  ;;  %v4063_v2 = vmul.f32 %v16004_v53, %v16004_v53  ;;  %12329 = vmatpush3.bf16.msra.mxu1 %v12888_v5 }
 0x9e6   : > { %v3939_v55 = vpop.xlane.xlu1 %3938 }
 0x9e7   : > { %v16017_v4 = vmul.f32 %v4001_v3, %v17999_v51  ;;  %v4002_v38 = vsub.f32 %v15827_v20, %v3970_v6  ;;  %v3971_v16 = vmul.f32 0.0625, %v3939_v55  ;;  %4122 = vadd.xlane.f32.xlu1 %v4063_v2  ;;  %v4064_v59 = vmul.f32 %v16011_v46, %v16011_v46 }
 0x9e9   : > { %v16023_v34 = vmul.f32 %v4002_v38, %v17999_v51  ;;  %v4003_v42 = vsub.f32 %v15831_v44, %v3971_v16  ;;  %4124 = vadd.xlane.f32.xlu0 %v4064_v59  ;;  %v4065_v49 = vmul.f32 %v16017_v4, %v16017_v4 }
 0x9eb   : > { %v16029_v30 = vmul.f32 %v4003_v42, %v17999_v51  ;;  %4126 = vadd.xlane.f32.xlu1 %v4065_v49  ;;  %v4066_v6 = vmul.f32 %v16023_v34, %v16023_v34 }
 0x9ed   : > { %4128 = vadd.xlane.f32.xlu0 %v4066_v6  ;;  %v4067_v14 = vmul.f32 %v16029_v30, %v16029_v30 }
 0x9ef   : > { %4130 = vadd.xlane.f32.xlu1 %v4067_v14 }
 0xa3e   : > { %v4069_v3 = vpop.xlane.xlu0 %4068 }
 0xa3f   : > { %v4132_v2 = vmul.f32 0.0625, %v4069_v3 }
 0xa40   : > { %v4071_v55 = vpop.xlane.xlu1 %4070 }
 0xa41   : > { %v4164_v59 = vadd.f32 1e-06, %v4132_v2  ;;  %v4133_v38 = vmul.f32 0.0625, %v4071_v55 }
 0xa42   : > { %v4073_v16 = vpop.xlane.xlu0 %4072 }
 0xa43   : > { %13496 = vrsqrt.f32 %v4164_v59  ;;  %v4165_v9 = vadd.f32 1e-06, %v4133_v38  ;;  %v4134_v51 = vmul.f32 0.0625, %v4073_v16  ;;  %v16037_v59 = vrot.slane %v15669_v7, %v18000_v35 }
 0xa44   : > { %v4075_v42 = vpop.xlane.xlu1 %4074 }
 0xa45   : > { %13498 = vrsqrt.f32 %v4165_v9  ;;  %v4166_v49 = vadd.f32 1e-06, %v4134_v51  ;;  %v4135_v44 = vmul.f32 0.0625, %v4075_v42 }
 0xa46   : > { %v4077_v20 = vpop.xlane.xlu0 %4076 }
 0xa47   : > { %13500 = vrsqrt.f32 %v4166_v49  ;;  %v4167_v5 = vadd.f32 1e-06, %v4135_v44  ;;  %v4136_v6 = vmul.f32 0.0625, %v4077_v20 }
 0xa48   : > { %v4079_v11 = vpop.xlane.xlu1 %4078 }
 0xa49   : > { %13502 = vrsqrt.f32 %v4167_v5  ;;  %v4168_v14 = vadd.f32 1e-06, %v4136_v6  ;;  %v4137_v12 = vmul.f32 0.0625, %v4079_v11 }
 0xa4a   : > { %v4081_v3 = vpop.xlane.xlu0 %4080 }
 0xa4b   : > { %13504 = vrsqrt.f32 %v4168_v14  ;;  %v4169_v2 = vadd.f32 1e-06, %v4137_v12  ;;  %v4138_v55 = vmul.f32 0.0625, %v4081_v3  ;;  %v18001_v14 = vld [vmem:[#allocation37_spill] sm:$0xff] }
 0xa4c   : > { %v4083_v38 = vpop.xlane.xlu1 %4082  ;;  %v16044_v3 = vrot.slane %v15669_v7, %v18001_v14 }
 0xa4d   : > { %v13497_v9 = vpop.eup %13496  ;;  %13506 = vrsqrt.f32 %v4169_v2  ;;  %v4170_v16 = vadd.f32 1e-06, %v4138_v55  ;;  %v4139_v51 = vmul.f32 0.0625, %v4083_v38 }
 0xa4e   : > { %v4085_v42 = vpop.xlane.xlu0 %4084  ;;  %v4228_v20 = vmul.f32 %v13497_v9, %v15838_v29 }
 0xa4f   : > { %v13499_v44 = vpop.eup %13498  ;;  %13508 = vrsqrt.f32 %v4170_v16  ;;  %v4171_v49 = vadd.f32 1e-06, %v4139_v51  ;;  %v4140_v11 = vmul.f32 0.0625, %v4085_v42 }
 0xa50   : > { %v4087_v5 = vpop.xlane.xlu1 %4086  ;;  %v4229_v12 = vmul.f32 %v13499_v44, %v15842_v15  ;;  %v4264_v6 = vmul.f32 %v16037_v59, %v4228_v20 }
 0xa51   : > { %v13501_v35 = vpop.eup %13500  ;;  %13510 = vrsqrt.f32 %v4171_v49  ;;  %v4172_v2 = vadd.f32 1e-06, %v4140_v11  ;;  %v4141_v55 = vmul.f32 0.0625, %v4087_v5 }
 0xa52   : > { %v4230_v38 = vmul.f32 %v13501_v35, %v15848_v40  ;;  %v4089_v29 = vpop.xlane.xlu0 %4088  ;;  %v4265_v9 = vmul.f32 %v16037_v59, %v4229_v12  ;;  %v4300_v7 = vadd.f32 %v16044_v3, %v4264_v6 }
 0xa53   : > { %v13503_v16 = vpop.eup %13502  ;;  %13512 = vrsqrt.f32 %v4172_v2  ;;  %v4173_v51 = vadd.f32 1e-06, %v4141_v55  ;;  %v4142_v42 = vmul.f32 0.0625, %v4089_v29 }
 0xa54   : > { %v4266_v15 = vmul.f32 %v16037_v59, %v4230_v38  ;;  %v4231_v20 = vmul.f32 %v13503_v16, %v15854_v63  ;;  %v4091_v44 = vpop.xlane.xlu1 %4090  ;;  %v4301_v49 = vadd.f32 %v16044_v3, %v4265_v9 }
 0xa55   : > { %v13505_v11 = vpop.eup %13504  ;;  %13514 = vrsqrt.f32 %v4173_v51  ;;  %v4174_v5 = vadd.f32 1e-06, %v4142_v42  ;;  %v4143_v35 = vmul.f32 0.0625, %v4091_v44 }
 0xa56   : > { %v4267_v40 = vmul.f32 %v16037_v59, %v4231_v20  ;;  %v4093_v12 = vpop.xlane.xlu0 %4092  ;;  %v4332_v14 = vpack.c.bf16 %v4301_v49, %v4300_v7  ;;  %v4232_v2 = vmul.f32 %v13505_v11, %v15860_v18  ;;  %v4302_v6 = vadd.f32 %v16044_v3, %v4266_v15 }
 0xa57   : > { %v13507_v55 = vpop.eup %13506  ;;  %13516 = vrsqrt.f32 %v4174_v5  ;;  %v4175_v38 = vadd.f32 1e-06, %v4143_v35  ;;  %v4144_v29 = vmul.f32 0.0625, %v4093_v12 }
 0xa58   : > { %v4095_v63 = vpop.xlane.xlu1 %4094  ;;  %12330 = vmatprep.mubr.bf16.mxu1 %v4332_v14  ;;  %v4303_v9 = vadd.f32 %v16044_v3, %v4267_v40  ;;  %v4233_v16 = vmul.f32 %v13507_v55, %v15866_v23  ;;  %v4268_v51 = vmul.f32 %v16037_v59, %v4232_v2 }
 0xa59   : > { %v13509_v42 = vpop.eup %13508  ;;  %13518 = vrsqrt.f32 %v4175_v38  ;;  %v4176_v20 = vadd.f32 1e-06, %v4144_v29  ;;  %v4145_v44 = vmul.f32 0.0625, %v4095_v63 }
 0xa5a   : > { %v4097_v7 = vpop.xlane.xlu0 %4096  ;;  %v4333_v18 = vpack.c.bf16 %v4303_v9, %v4302_v6  ;;  %v4269_v49 = vmul.f32 %v16037_v59, %v4233_v16  ;;  %v4234_v11 = vmul.f32 %v13509_v42, %v15872_v39  ;;  %v4304_v23 = vadd.f32 %v16044_v3, %v4268_v51 }
 0xa5b   : > { %v13511_v5 = vpop.eup %13510  ;;  %13520 = vrsqrt.f32 %v4176_v20  ;;  %v4177_v14 = vadd.f32 1e-06, %v4145_v44  ;;  %v4146_v15 = vmul.f32 0.0625, %v4097_v7 }
 0xa5c   : > { %v4099_v35 = vpop.xlane.xlu1 %4098  ;;  %12331 = vmatmul.mubr.bf16.vlgmr.msra.gmra.mrb[96].mxu1 %v4333_v18  ;;  %v4305_v40 = vadd.f32 %v16044_v3, %v4269_v49  ;;  %v4235_v12 = vmul.f32 %v13511_v5, %v15878_v47  ;;  %v4270_v2 = vmul.f32 %v16037_v59, %v4234_v11 }
 0xa5d   : > { %v13513_v55 = vpop.eup %13512  ;;  %13522 = vrsqrt.f32 %v4177_v14  ;;  %v4178_v38 = vadd.f32 1e-06, %v4146_v15  ;;  %v4147_v29 = vmul.f32 0.0625, %v4099_v35 }
 0xa5e   : > { %v4101_v63 = vpop.xlane.xlu0 %4100  ;;  %v4334_v39 = vpack.c.bf16 %v4305_v40, %v4304_v23  ;;  %v4271_v6 = vmul.f32 %v16037_v59, %v4235_v12  ;;  %v4236_v9 = vmul.f32 %v13513_v55, %v15884_v48  ;;  %v4306_v47 = vadd.f32 %v16044_v3, %v4270_v2 }
 0xa5f   : > { %v13515_v16 = vpop.eup %13514  ;;  %13524 = vrsqrt.f32 %v4178_v38  ;;  %v4179_v42 = vadd.f32 1e-06, %v4147_v29  ;;  %v4148_v51 = vmul.f32 0.0625, %v4101_v63 }
 0xa60   : > { %v4103_v20 = vpop.xlane.xlu1 %4102  ;;  %12334 = vmatprep.mubr.bf16.mxu1 %v4334_v39  ;;  %v4307_v44 = vadd.f32 %v16044_v3, %v4271_v6  ;;  %v4237_v7 = vmul.f32 %v13515_v16, %v15890_v41  ;;  %v4272_v18 = vmul.f32 %v16037_v59, %v4236_v9 }
 0xa61   : > { %v13517_v49 = vpop.eup %13516  ;;  %13526 = vrsqrt.f32 %v4179_v42  ;;  %v4180_v11 = vadd.f32 1e-06, %v4148_v51  ;;  %v4149_v5 = vmul.f32 0.0625, %v4103_v20 }
 0xa62   : > { %v4105_v14 = vpop.xlane.xlu0 %4104  ;;  %v4335_v48 = vpack.c.bf16 %v4307_v44, %v4306_v47  ;;  %v4273_v15 = vmul.f32 %v16037_v59, %v4237_v7  ;;  %v4238_v35 = vmul.f32 %v13517_v49, %v15896_v61  ;;  %v4308_v41 = vadd.f32 %v16044_v3, %v4272_v18 }
 0xa63   : > { %v13519_v23 = vpop.eup %13518  ;;  %13528 = vrsqrt.f32 %v4180_v11  ;;  %v4181_v40 = vadd.f32 1e-06, %v4149_v5  ;;  %v4150_v12 = vmul.f32 0.0625, %v4105_v14 }
 0xa64   : > { %v4107_v2 = vpop.xlane.xlu1 %4106  ;;  %12335 = vmatmul.mubr.bf16.gmra.mrb[100].mxu1 %v4335_v48  ;;  %v4309_v55 = vadd.f32 %v16044_v3, %v4273_v15  ;;  %v4239_v38 = vmul.f32 %v13519_v23, %v15902_v32  ;;  %v4274_v29 = vmul.f32 %v16037_v59, %v4238_v35 }
 0xa65   : > { %v13521_v63 = vpop.eup %13520  ;;  %13530 = vrsqrt.f32 %v4181_v40  ;;  %v4182_v39 = vadd.f32 1e-06, %v4150_v12  ;;  %v4151_v6 = vmul.f32 0.0625, %v4107_v2 }
 0xa66   : > { %v4109_v9 = vpop.xlane.xlu0 %4108  ;;  %v4336_v61 = vpack.c.bf16 %v4309_v55, %v4308_v41  ;;  %v4275_v16 = vmul.f32 %v16037_v59, %v4239_v38  ;;  %v4240_v42 = vmul.f32 %v13521_v63, %v15909_v58  ;;  %v4310_v32 = vadd.f32 %v16044_v3, %v4274_v29 }
 0xa67   : > { %v13523_v51 = vpop.eup %13522  ;;  %13532 = vrsqrt.f32 %v4182_v39  ;;  %v4183_v20 = vadd.f32 1e-06, %v4151_v6  ;;  %v4152_v47 = vmul.f32 0.0625, %v4109_v9 }
 0xa68   : > { %v4111_v44 = vpop.xlane.xlu1 %4110  ;;  %12338 = vmatprep.mubr.bf16.mxu1 %v4336_v61  ;;  %v4311_v7 = vadd.f32 %v16044_v3, %v4275_v16  ;;  %v4241_v18 = vmul.f32 %v13523_v51, %v15915_v43  ;;  %v4276_v49 = vmul.f32 %v16037_v59, %v4240_v42 }
 0xa69   : > { %v13525_v11 = vpop.eup %13524  ;;  %13534 = vrsqrt.f32 %v4183_v20  ;;  %v4184_v5 = vadd.f32 1e-06, %v4152_v47  ;;  %v4153_v14 = vmul.f32 0.0625, %v4111_v44 }
 0xa6a   : > { %v4113_v48 = vpop.xlane.xlu0 %4112  ;;  %v4337_v58 = vpack.c.bf16 %v4311_v7, %v4310_v32  ;;  %v4277_v15 = vmul.f32 %v16037_v59, %v4241_v18  ;;  %v4242_v35 = vmul.f32 %v13525_v11, %v15921_v28  ;;  %v4312_v43 = vadd.f32 %v16044_v3, %v4276_v49 }
 0xa6b   : > { %v13527_v23 = vpop.eup %13526  ;;  %13536 = vrsqrt.f32 %v4184_v5  ;;  %v4185_v40 = vadd.f32 1e-06, %v4153_v14  ;;  %v4154_v12 = vmul.f32 0.0625, %v4113_v48 }
 0xa6c   : > { %v4115_v2 = vpop.xlane.xlu1 %4114  ;;  %12339 = vmatmul.mubr.bf16.gmra.mrb[104].mxu1 %v4337_v58  ;;  %v4313_v41 = vadd.f32 %v16044_v3, %v4277_v15  ;;  %v4243_v55 = vmul.f32 %v13527_v23, %v15927_v31  ;;  %v4278_v38 = vmul.f32 %v16037_v59, %v4242_v35 }
 0xa6d   : > { %v13529_v29 = vpop.eup %13528  ;;  %13538 = vrsqrt.f32 %v4185_v40  ;;  %v4186_v63 = vadd.f32 1e-06, %v4154_v12  ;;  %v4155_v39 = vmul.f32 0.0625, %v4115_v2 }
 0xa6e   : > { %v4117_v6 = vpop.xlane.xlu0 %4116  ;;  %v4338_v28 = vpack.c.bf16 %v4313_v41, %v4312_v43  ;;  %v4279_v9 = vmul.f32 %v16037_v59, %v4243_v55  ;;  %v4244_v61 = vmul.f32 %v13529_v29, %v15933_v56  ;;  %v4314_v31 = vadd.f32 %v16044_v3, %v4278_v38 }
 0xa6f   : > { %v13531_v16 = vpop.eup %13530  ;;  %13540 = vrsqrt.f32 %v4186_v63  ;;  %v4187_v42 = vadd.f32 1e-06, %v4155_v39  ;;  %v4156_v51 = vmul.f32 0.0625, %v4117_v6 }
 0xa70   : > { %v4119_v20 = vpop.xlane.xlu1 %4118  ;;  %12342 = vmatprep.mubr.bf16.mxu1 %v4338_v28  ;;  %v4315_v47 = vadd.f32 %v16044_v3, %v4279_v9  ;;  %v4245_v44 = vmul.f32 %v13531_v16, %v15939_v10  ;;  %v4280_v32 = vmul.f32 %v16037_v59, %v4244_v61 }
 0xa71   : > { %v13533_v7 = vpop.eup %13532  ;;  %13542 = vrsqrt.f32 %v4187_v42  ;;  %v4188_v18 = vadd.f32 1e-06, %v4156_v51  ;;  %v4157_v49 = vmul.f32 0.0625, %v4119_v20 }
 0xa72   : > { %v4121_v11 = vpop.xlane.xlu0 %4120  ;;  %v4339_v56 = vpack.c.bf16 %v4315_v47, %v4314_v31  ;;  %v4281_v5 = vmul.f32 %v16037_v59, %v4245_v44  ;;  %v4246_v14 = vmul.f32 %v13533_v7, %v15945_v37  ;;  %v4316_v10 = vadd.f32 %v16044_v3, %v4280_v32 }
 0xa73   : > { %v13535_v48 = vpop.eup %13534  ;;  %13544 = vrsqrt.f32 %v4188_v18  ;;  %v4189_v58 = vadd.f32 1e-06, %v4157_v49  ;;  %v4158_v15 = vmul.f32 0.0625, %v4121_v11 }
 0xa74   : > { %v4123_v35 = vpop.xlane.xlu1 %4122  ;;  %12343 = vmatmul.mubr.bf16.gmra.mrb[108].mxu1 %v4339_v56  ;;  %v4317_v23 = vadd.f32 %v16044_v3, %v4281_v5  ;;  %v4247_v40 = vmul.f32 %v13535_v48, %v15951_v36  ;;  %v4282_v12 = vmul.f32 %v16037_v59, %v4246_v14 }
 0xa75   : > { %v13537_v2 = vpop.eup %13536  ;;  %13546 = vrsqrt.f32 %v4189_v58  ;;  %v4190_v43 = vadd.f32 1e-06, %v4158_v15  ;;  %v4159_v41 = vmul.f32 0.0625, %v4123_v35 }
 0xa76   : > { %v4125_v55 = vpop.xlane.xlu0 %4124  ;;  %v4340_v37 = vpack.c.bf16 %v4317_v23, %v4316_v10  ;;  %v4283_v38 = vmul.f32 %v16037_v59, %v4247_v40  ;;  %v4248_v29 = vmul.f32 %v13537_v2, %v15958_v62  ;;  %v4318_v36 = vadd.f32 %v16044_v3, %v4282_v12 }
 0xa77   : > { %v13539_v63 = vpop.eup %13538  ;;  %13548 = vrsqrt.f32 %v4190_v43  ;;  %v4191_v39 = vadd.f32 1e-06, %v4159_v41  ;;  %v4160_v6 = vmul.f32 0.0625, %v4125_v55 }
 0xa78   : > { %v4127_v28 = vpop.xlane.xlu1 %4126  ;;  %12346 = vmatprep.mubr.bf16.mxu1 %v4340_v37  ;;  %v4319_v9 = vadd.f32 %v16044_v3, %v4283_v38  ;;  %v4249_v61 = vmul.f32 %v13539_v63, %v15965_v25  ;;  %v4284_v16 = vmul.f32 %v16037_v59, %v4248_v29 }
 0xa79   : > { %v13541_v42 = vpop.eup %13540  ;;  %13550 = vrsqrt.f32 %v4191_v39  ;;  %v4192_v51 = vadd.f32 1e-06, %v4160_v6  ;;  %v4161_v20 = vmul.f32 0.0625, %v4127_v28 }
 0xa7a   : > { %v4129_v31 = vpop.xlane.xlu0 %4128  ;;  %v4341_v62 = vpack.c.bf16 %v4319_v9, %v4318_v36  ;;  %v4285_v47 = vmul.f32 %v16037_v59, %v4249_v61  ;;  %v4250_v44 = vmul.f32 %v13541_v42, %v15972_v22  ;;  %v4320_v25 = vadd.f32 %v16044_v3, %v4284_v16 }
 0xa7b   : > { %v13543_v32 = vpop.eup %13542  ;;  %13552 = vrsqrt.f32 %v4192_v51  ;;  %v4193_v7 = vadd.f32 1e-06, %v4161_v20  ;;  %v4162_v18 = vmul.f32 0.0625, %v4129_v31 }
 0xa7c   : > { %v4131_v49 = vpop.xlane.xlu1 %4130  ;;  %12347 = vmatmul.mubr.bf16.gmra.mrb[112].mxu1 %v4341_v62  ;;  %v4321_v11 = vadd.f32 %v16044_v3, %v4285_v47  ;;  %v4251_v56 = vmul.f32 %v13543_v32, %v15978_v19  ;;  %v4286_v5 = vmul.f32 %v16037_v59, %v4250_v44 }
 0xa7d   : > { %v13545_v14 = vpop.eup %13544  ;;  %13554 = vrsqrt.f32 %v4193_v7  ;;  %v4194_v48 = vadd.f32 1e-06, %v4162_v18  ;;  %v4163_v58 = vmul.f32 0.0625, %v4131_v49 }
 0xa7e   : > { %v4342_v15 = vpack.c.bf16 %v4321_v11, %v4320_v25  ;;  %v4287_v22 = vmul.f32 %v16037_v59, %v4251_v56  ;;  %v4252_v35 = vmul.f32 %v13545_v14, %v15985_v13  ;;  %v4322_v40 = vadd.f32 %v16044_v3, %v4286_v5  ;;  %v12889_v25 = vld [vmem:[%s13925_s25] sm:$0xff]   ;;  %v12890_v11 = vld [vmem:[%s13925_s25 + $0x8] sm:$0xff]   ;;  %v12895_v5 = vld [vmem:[%s13925_s25 + $0x30] sm:$0xff]  }
 0xa7f   : > { %v13547_v10 = vpop.eup %13546  ;;  %13556 = vrsqrt.f32 %v4194_v48  ;;  %v4195_v23 = vadd.f32 1e-06, %v4163_v58  ;;  %12362 = vmatprep.subr.bf16.mxu0 %v12889_v25  ;;  %v12893_v56 = vld [vmem:[%s13925_s25 + $0x20] sm:$0xff]   ;;  %v12896_v14 = vld [vmem:[%s13925_s25 + $0x38] sm:$0xff]  }
 0xa80   : > { %12350 = vmatprep.mubr.bf16.mxu1 %v4342_v15  ;;  %v4323_v12 = vadd.f32 %v16044_v3, %v4287_v22  ;;  %v4253_v19 = vmul.f32 %v13547_v10, %v15991_v54  ;;  %v4288_v2 = vmul.f32 %v16037_v59, %v4252_v35  ;;  %12363 = vmatpush3.bf16.msra.mxu0 %v12889_v25  ;;  %v16148_v48 = vld [vmem:[%s18002_s3] ss:$0 sm:$0xff]  ;;  %s11412_s3 = sshll.u32 %s14129_s18, 6  ;;  %s18041_s18 = sld [smem:[#allocation19_spill]] }
 0xa81   : > { %v13549_v43 = vpop.eup %13548  ;;  %13558 = vrsqrt.f32 %v4195_v23  ;;  %12364 = vmatprep.subr.bf16.mxu0 %v12890_v11  ;;  %s17128_s5 = scalar_lea.vmem %s18038_s4, %s11412_s3  ;;  %s18040_s3 = sld [smem:[#allocation18_spill]] }
 0xa82   : > { %v4343_v41 = vpack.c.bf16 %v4323_v12, %v4322_v40  ;;  %v4289_v55 = vmul.f32 %v16037_v59, %v4253_v19  ;;  %v4254_v37 = vmul.f32 %v13549_v43, %v15998_v33  ;;  %v4324_v38 = vadd.f32 %v16044_v3, %v4288_v2  ;;  %s18046_s4 = sld [smem:[#allocation24_spill]] }
 0xa83   : > { %v13551_v13 = vpop.eup %13550 }
 0xa84   : > { %12351 = vmatmul.mubr.bf16.gmra.mrb[116].mxu1 %v4343_v41  ;;  %v4325_v29 = vadd.f32 %v16044_v3, %v4289_v55  ;;  %v4255_v63 = vmul.f32 %v13551_v13, %v16004_v53  ;;  %v4290_v39 = vmul.f32 %v16037_v59, %v4254_v37  ;;  %12365 = vmatpush3.bf16.msra.mxu0 %v12890_v11 }
 0xa85   : > { %v13553_v54 = vpop.eup %13552 }
 0xa86   : > { %v4344_v6 = vpack.c.bf16 %v4325_v29, %v4324_v38  ;;  %v4291_v28 = vmul.f32 %v16037_v59, %v4255_v63  ;;  %v4256_v36 = vmul.f32 %v13553_v54, %v16011_v46  ;;  %v4326_v33 = vadd.f32 %v16044_v3, %v4290_v39 }
 0xa87   : > { %v13555_v9 = vpop.eup %13554 }
 0xa88   : > { %12354 = vmatprep.mubr.bf16.mxu1 %v4344_v6  ;;  %v4327_v61 = vadd.f32 %v16044_v3, %v4291_v28  ;;  %v4257_v16 = vmul.f32 %v13555_v9, %v16017_v4  ;;  %v4292_v42 = vmul.f32 %v16037_v59, %v4256_v36 }
 0xa89   : > { %v13557_v51 = vpop.eup %13556 }
 0xa8a   : > { %v4345_v53 = vpack.c.bf16 %v4327_v61, %v4326_v33  ;;  %v4293_v20 = vmul.f32 %v16037_v59, %v4257_v16  ;;  %v4258_v31 = vmul.f32 %v13557_v51, %v16023_v34  ;;  %v4328_v46 = vadd.f32 %v16044_v3, %v4292_v42 }
 0xa8b   : > { %v13559_v62 = vpop.eup %13558 }
 0xa8c   : > { %12355 = vmatmul.mubr.bf16.gmra.mrb[120].mxu1 %v4345_v53  ;;  %v4329_v47 = vadd.f32 %v16044_v3, %v4293_v20  ;;  %v4259_v44 = vmul.f32 %v13559_v62, %v16029_v30  ;;  %v4294_v4 = vmul.f32 %v16037_v59, %v4258_v31  ;;  %v12891_v30 = vld [vmem:[%s13925_s25 + $0x10] sm:$0xff]  }
 0xa8d   : > { %12366 = vmatprep.subr.bf16.mxu0 %v12891_v30 }
 0xa8e   : > { %v4346_v32 = vpack.c.bf16 %v4329_v47, %v4328_v46  ;;  %v4295_v7 = vmul.f32 %v16037_v59, %v4259_v44  ;;  %v4330_v18 = vadd.f32 %v16044_v3, %v4294_v4  ;;  %v12892_v59 = vld [vmem:[%s13925_s25 + $0x18] sm:$0xff]   ;;  %12367 = vmatpush3.bf16.msra.mxu0 %v12891_v30 }
 0xa8f   : > { %12368 = vmatprep.subr.bf16.mxu0 %v12892_v59 }
 0xa90   : > { %12358 = vmatprep.mubr.bf16.mxu1 %v4346_v32  ;;  %v4331_v34 = vadd.f32 %v16044_v3, %v4295_v7  ;;  %v12894_v3 = vld [vmem:[%s13925_s25 + $0x28] sm:$0xff]  }
 0xa92   : > { %v4347_v49 = vpack.c.bf16 %v4331_v34, %v4330_v18  ;;  %12369 = vmatpush3.bf16.msra.mxu0 %v12892_v59 }
 0xa93   : > { %12370 = vmatprep.subr.bf16.mxu0 %v12893_v56 }
 0xa94   : > { %12359 = vmatmul.mubr.bf16.gmra.mrb[124].mxu1 %v4347_v49 }
 0xa96   : > { %12371 = vmatpush3.bf16.msra.mxu0 %v12893_v56 }
 0xa97   : > { %12372 = vmatprep.subr.bf16.mxu0 %v12894_v3 }
 0xa9a   : > { %12373 = vmatpush3.bf16.msra.mxu0 %v12894_v3 }
 0xa9b   : > { %12374 = vmatprep.subr.bf16.mxu0 %v12895_v5 }
 0xa9e   : > { %12375 = vmatpush3.bf16.msra.mxu0 %v12895_v5 }
 0xa9f   : > { %12376 = vmatprep.subr.bf16.mxu0 %v12896_v14 }
 0xaa2   : > { %12377 = vmatpush3.bf16.msra.mxu0 %v12896_v14 }
 0xb2f   : > { %v12332_v58 = vpop.f32.mrb[96].mxu1 }
 0xb30   : > { %v16151_v15 = vadd.f32 %v12332_v58, %v16148_v48  ;;  %v4453_v22 = vpop.f32.mrb[97].mxu1 }
 0xb31   : > { %v16154_v35 = vadd.f32 %v16148_v48, %v4453_v22  ;;  %v12333_v10 = vpop.f32.mrb[98].mxu1 }
 0xb32   : > { %v4582_v23 = vmul.f32 %v16151_v15, %v16151_v15  ;;  %v16159_v40 = vadd.f32 %v12333_v10, %v16148_v48  ;;  %v4456_v12 = vpop.f32.mrb[99].mxu1 }
 0xb33   : > { %v4580_v19 = vmul.f32 %v16154_v35, %v16154_v35  ;;  %v16164_v2 = vadd.f32 %v16148_v48, %v4456_v12 }
 0xb34   : > { %v4614_v43 = vmul.f32 %v4582_v23, %v16151_v15  ;;  %v4583_v41 = vmul.f32 %v16159_v40, %v16159_v40 }
 0xb35   : > { %v4612_v55 = vmul.f32 %v4580_v19, %v16154_v35  ;;  %v4581_v37 = vmul.f32 %v16164_v2, %v16164_v2 }
 0xb36   : > { %v4646_v13 = vmul.f32 0.044715, %v4614_v43  ;;  %v4615_v38 = vmul.f32 %v4583_v41, %v16159_v40 }
 0xb37   : > { %v4644_v29 = vmul.f32 0.044715, %v4612_v55  ;;  %v4613_v63 = vmul.f32 %v4581_v37, %v16164_v2  ;;  %v12336_v39 = vpop.f32.mrb[100].mxu1 }
 0xb38   : > { %v4678_v54 = vadd.f32 %v4646_v13, %v16151_v15  ;;  %v4647_v6 = vmul.f32 0.044715, %v4615_v38  ;;  %v16176_v28 = vadd.f32 %v12336_v39, %v16148_v48  ;;  %v4469_v36 = vpop.f32.mrb[101].mxu1 }
 0xb39   : > { %v4676_v9 = vadd.f32 %v4644_v29, %v16154_v35  ;;  %v4645_v33 = vmul.f32 0.044715, %v4613_v63  ;;  %v16180_v61 = vadd.f32 %v16148_v48, %v4469_v36  ;;  %v12337_v16 = vpop.f32.mrb[102].mxu1 }
 0xb3a   : > { %v4710_v42 = vmul.f32 0.7978846, %v4678_v54  ;;  %v4679_v51 = vadd.f32 %v4647_v6, %v16159_v40  ;;  %v4586_v53 = vmul.f32 %v16176_v28, %v16176_v28  ;;  %v16186_v20 = vadd.f32 %v12337_v16, %v16148_v48  ;;  %v4472_v31 = vpop.f32.mrb[103].mxu1 }
 0xb3b   : > { %v4708_v62 = vmul.f32 0.7978846, %v4676_v9  ;;  %v4677_v46 = vadd.f32 %v4645_v33, %v16164_v2  ;;  %v4584_v47 = vmul.f32 %v16180_v61, %v16180_v61  ;;  %v16192_v44 = vadd.f32 %v16148_v48, %v4472_v31 }
 0xb3c   : > { %13560 = vtanh.f32 %v4710_v42  ;;  %v4711_v4 = vmul.f32 0.7978846, %v4679_v51  ;;  %v4618_v32 = vmul.f32 %v4586_v53, %v16176_v28  ;;  %v4587_v7 = vmul.f32 %v16186_v20, %v16186_v20 }
 0xb3d   : > { %13562 = vtanh.f32 %v4708_v62  ;;  %v4709_v18 = vmul.f32 0.7978846, %v4677_v46  ;;  %v4616_v34 = vmul.f32 %v4584_v47, %v16180_v61  ;;  %v4585_v49 = vmul.f32 %v16192_v44, %v16192_v44 }
 0xb3e   : > { %13564 = vtanh.f32 %v4711_v4  ;;  %v4650_v25 = vmul.f32 0.044715, %v4618_v32  ;;  %v4619_v11 = vmul.f32 %v4587_v7, %v16186_v20 }
 0xb3f   : > { %v4648_v30 = vmul.f32 0.044715, %v4616_v34  ;;  %v4617_v59 = vmul.f32 %v4585_v49, %v16192_v44  ;;  %v12340_v56 = vpop.f32.mrb[104].mxu1  ;;  %13566 = vtanh.f32 %v4709_v18 }
 0xb40   : > { %v4682_v3 = vadd.f32 %v4650_v25, %v16176_v28  ;;  %v4651_v5 = vmul.f32 0.044715, %v4619_v11  ;;  %v16204_v14 = vadd.f32 %v12340_v56, %v16148_v48  ;;  %v4485_v58 = vpop.f32.mrb[105].mxu1 }
 0xb41   : > { %v4680_v22 = vadd.f32 %v4648_v30, %v16180_v61  ;;  %v4649_v10 = vmul.f32 0.044715, %v4617_v59  ;;  %v16208_v23 = vadd.f32 %v16148_v48, %v4485_v58  ;;  %v12341_v12 = vpop.f32.mrb[106].mxu1 }
 0xb42   : > { %v4714_v19 = vmul.f32 0.7978846, %v4682_v3  ;;  %v4683_v43 = vadd.f32 %v4651_v5, %v16186_v20  ;;  %v4590_v41 = vmul.f32 %v16204_v14, %v16204_v14  ;;  %v16214_v55 = vadd.f32 %v12341_v12, %v16148_v48  ;;  %v4488_v37 = vpop.f32.mrb[107].mxu1 }
 0xb43   : > { %v4712_v13 = vmul.f32 0.7978846, %v4680_v22  ;;  %v4681_v38 = vadd.f32 %v4649_v10, %v16192_v44  ;;  %v4588_v29 = vmul.f32 %v16208_v23, %v16208_v23  ;;  %v16220_v63 = vadd.f32 %v16148_v48, %v4488_v37 }
 0xb44   : > { %13568 = vtanh.f32 %v4714_v19  ;;  %v4715_v39 = vmul.f32 0.7978846, %v4683_v43  ;;  %v4622_v54 = vmul.f32 %v4590_v41, %v16204_v14  ;;  %v4591_v6 = vmul.f32 %v16214_v55, %v16214_v55 }
 0xb45   : > { %13570 = vtanh.f32 %v4712_v13  ;;  %v4713_v36 = vmul.f32 0.7978846, %v4681_v38  ;;  %v4620_v9 = vmul.f32 %v4588_v29, %v16208_v23  ;;  %v4589_v33 = vmul.f32 %v16220_v63, %v16220_v63 }
 0xb46   : > { %v13561_v16 = vpop.eup %13560  ;;  %13572 = vtanh.f32 %v4715_v39  ;;  %v4654_v42 = vmul.f32 0.044715, %v4622_v54  ;;  %v4623_v51 = vmul.f32 %v4591_v6, %v16214_v55 }
 0xb47   : > { %v13563_v53 = vpop.eup %13562  ;;  %v4774_v31 = vadd.f32 1.0, %v13561_v16  ;;  %13574 = vtanh.f32 %v4713_v36  ;;  %v4652_v62 = vmul.f32 0.044715, %v4620_v9  ;;  %v4621_v46 = vmul.f32 %v4589_v33, %v16220_v63  ;;  %v12344_v47 = vpop.f32.mrb[108].mxu1 }
 0xb48   : > { %v13565_v4 = vpop.eup %13564  ;;  %v4686_v32 = vadd.f32 %v4654_v42, %v16204_v14  ;;  %v4655_v7 = vmul.f32 0.044715, %v4623_v51  ;;  %v16232_v18 = vadd.f32 %v12344_v47, %v16148_v48  ;;  %v4501_v34 = vpop.f32.mrb[109].mxu1  ;;  %v4772_v49 = vadd.f32 1.0, %v13563_v53 }
 0xb49   : > { %v4806_v25 = vmul.f32 0.5, %v4774_v31  ;;  %v4775_v11 = vadd.f32 1.0, %v13565_v4  ;;  %v4684_v30 = vadd.f32 %v4652_v62, %v16208_v23  ;;  %v4653_v59 = vmul.f32 0.044715, %v4621_v46  ;;  %v12345_v56 = vpop.f32.mrb[110].mxu1  ;;  %v13567_v12 = vpop.eup %13566 }
 0xb4a   : > { %v4718_v3 = vmul.f32 0.7978846, %v4686_v32  ;;  %v4687_v5 = vadd.f32 %v4655_v7, %v16214_v55  ;;  %v4594_v58 = vmul.f32 %v16232_v18, %v16232_v18  ;;  %v16239_v22 = vadd.f32 %v16148_v48, %v4501_v34  ;;  %v4504_v10 = vpop.f32.mrb[111].mxu1 }
 0xb4b   : > { %v16242_v19 = vmul.f32 %v4806_v25, %v16151_v15  ;;  %v4807_v43 = vmul.f32 0.5, %v4775_v11  ;;  %v4716_v41 = vmul.f32 0.7978846, %v4684_v30  ;;  %v4685_v37 = vadd.f32 %v4653_v59, %v16220_v63 }
 0xb4c   : > { %13576 = vtanh.f32 %v4718_v3  ;;  %v4719_v13 = vmul.f32 0.7978846, %v4687_v5  ;;  %v4626_v38 = vmul.f32 %v4594_v58, %v16232_v18  ;;  %v4592_v29 = vmul.f32 %v16239_v22, %v16239_v22 }
 0xb4d   : > { %v16249_v39 = vmul.f32 %v4807_v43, %v16159_v40  ;;  %13578 = vtanh.f32 %v4716_v41  ;;  %v4717_v54 = vmul.f32 0.7978846, %v4685_v37  ;;  %v16252_v6 = vadd.f32 %v12345_v56, %v16148_v48 }
 0xb4e   : > { %v16254_v15 = vpop.eup %13568  ;;  %13580 = vtanh.f32 %v4719_v13  ;;  %v4658_v36 = vmul.f32 0.044715, %v4626_v38  ;;  %v4624_v9 = vmul.f32 %v4592_v29, %v16239_v22  ;;  %v16258_v33 = vadd.f32 %v16148_v48, %v4504_v10 }
 0xb4f   : > { %v16260_v16 = vpop.eup %13570  ;;  %v4869_v40 = vpack.c.bf16 %v16249_v39, %v16242_v19  ;;  %13582 = vtanh.f32 %v4717_v54  ;;  %v4595_v42 = vmul.f32 %v16252_v6, %v16252_v6  ;;  %v12348_v51 = vpop.f32.mrb[112].mxu1  ;;  %v4773_v53 = vadd.f32 1.0, %v13567_v12 }
 0xb50   : > { %v16266_v31 = vpop.eup %13572  ;;  %v4690_v62 = vadd.f32 %v4658_v36, %v16232_v18  ;;  %v4656_v46 = vmul.f32 0.044715, %v4624_v9  ;;  %v4593_v47 = vmul.f32 %v16258_v33, %v16258_v33  ;;  %v16272_v4 = vadd.f32 %v12348_v51, %v16148_v48  ;;  %v4517_v32 = vpop.f32.mrb[113].mxu1 }
 0xb51   : > { %v16274_v7 = vpop.eup %13574  ;;  %v4627_v34 = vmul.f32 %v4595_v42, %v16252_v6  ;;  %v16278_v25 = vadd.f32 %v16148_v48, %v4517_v32  ;;  %v12349_v11 = vpop.f32.mrb[114].mxu1  ;;  %v4804_v30 = vmul.f32 0.5, %v4772_v49  ;;  %v4805_v59 = vmul.f32 0.5, %v4773_v53 }
 0xb52   : > { %v4722_v56 = vmul.f32 0.7978846, %v4690_v62  ;;  %v4688_v3 = vadd.f32 %v4656_v46, %v16239_v22  ;;  %v4625_v5 = vmul.f32 %v4593_v47, %v16258_v33  ;;  %v4598_v58 = vmul.f32 %v16272_v4, %v16272_v4  ;;  %v4520_v10 = vpop.f32.mrb[115].mxu1 }
 0xb53   : > { %v4659_v12 = vmul.f32 0.044715, %v4627_v34  ;;  %v4596_v43 = vmul.f32 %v16278_v25, %v16278_v25  ;;  %v16287_v41 = vadd.f32 %v12349_v11, %v16148_v48  ;;  %v16290_v37 = vadd.f32 %v16148_v48, %v4520_v10 }
 0xb54   : > { %13584 = vtanh.f32 %v4722_v56  ;;  %v4720_v49 = vmul.f32 0.7978846, %v4688_v3  ;;  %v4657_v13 = vmul.f32 0.044715, %v4625_v5  ;;  %v4630_v38 = vmul.f32 %v4598_v58, %v16272_v4 }
 0xb55   : > { %v4691_v29 = vadd.f32 %v4659_v12, %v16252_v6  ;;  %v4628_v54 = vmul.f32 %v4596_v43, %v16278_v25  ;;  %v4599_v36 = vmul.f32 %v16287_v41, %v16287_v41  ;;  %v4597_v9 = vmul.f32 %v16290_v37, %v16290_v37 }
 0xb56   : > { %v16299_v42 = vpop.eup %13576  ;;  %13586 = vtanh.f32 %v4720_v49  ;;  %v4689_v51 = vadd.f32 %v4657_v13, %v16258_v33  ;;  %v4662_v53 = vmul.f32 0.044715, %v4630_v38  ;;  %v4836_v62 = vmul.f32 %v4804_v30, %v16154_v35 }
 0xb57   : > { %v16303_v46 = vpop.eup %13578  ;;  %v4723_v47 = vmul.f32 0.7978846, %v4691_v29  ;;  %v4660_v32 = vmul.f32 0.044715, %v4628_v54  ;;  %v4631_v34 = vmul.f32 %v4599_v36, %v16287_v41  ;;  %v4629_v11 = vmul.f32 %v4597_v9, %v16290_v37  ;;  %v12352_v56 = vpop.f32.mrb[116].mxu1 }
 0xb58   : > { %v16307_v3 = vpop.eup %13580  ;;  %v4721_v5 = vmul.f32 0.7978846, %v4689_v51  ;;  %v4694_v58 = vadd.f32 %v4662_v53, %v16272_v4  ;;  %v4837_v10 = vmul.f32 %v4805_v59, %v16164_v2  ;;  %v16312_v12 = vadd.f32 %v12352_v56, %v16148_v48  ;;  %v4533_v35 = vpop.f32.mrb[117].mxu1 }
 0xb59   : > { %v16314_v30 = vpop.eup %13582  ;;  %13588 = vtanh.f32 %v4723_v47  ;;  %v4692_v43 = vadd.f32 %v4660_v32, %v16278_v25  ;;  %v4663_v49 = vmul.f32 0.044715, %v4631_v34  ;;  %v4661_v13 = vmul.f32 0.044715, %v4629_v11  ;;  %v12353_v38 = vpop.f32.mrb[118].mxu1 }
 0xb5a   : > { %13590 = vtanh.f32 %v4721_v5  ;;  %v4726_v29 = vmul.f32 0.7978846, %v4694_v58  ;;  %v4868_v54 = vpack.c.bf16 %v4837_v10, %v4836_v62  ;;  %v4602_v36 = vmul.f32 %v16312_v12, %v16312_v12  ;;  %v4536_v9 = vpop.f32.mrb[119].mxu1 }
 0xb5b   : > { %v4724_v2 = vmul.f32 0.7978846, %v4692_v43  ;;  %v4695_v59 = vadd.f32 %v4663_v49, %v16287_v41  ;;  %v4693_v51 = vadd.f32 %v4661_v13, %v16290_v37  ;;  %v16322_v53 = vadd.f32 %v16148_v48, %v4533_v35 }
 0xb5c   : > { %13592 = vtanh.f32 %v4726_v29  ;;  %12378 = vmatprep.mubr.bf16.mxu0 %v4868_v54  ;;  %v4634_v47 = vmul.f32 %v4602_v36, %v16312_v12  ;;  %v16326_v32 = vadd.f32 %v12353_v38, %v16148_v48  ;;  %v16329_v62 = vadd.f32 %v16148_v48, %v4536_v9 }
 0xb5d   : > { %13594 = vtanh.f32 %v4724_v2  ;;  %v4727_v34 = vmul.f32 0.7978846, %v4695_v59  ;;  %v4725_v11 = vmul.f32 0.7978846, %v4693_v51  ;;  %12379 = vmatmul.mubr.bf16.vlgmr.msra.gmra.mrb[128].mxu0 %v4869_v40  ;;  %v4600_v56 = vmul.f32 %v16322_v53, %v16322_v53 }
 0xb5e   : > { %v16336_v5 = vpop.eup %13584  ;;  %v4666_v58 = vmul.f32 0.044715, %v4634_v47  ;;  %v4603_v10 = vmul.f32 %v16326_v32, %v16326_v32  ;;  %v4601_v35 = vmul.f32 %v16329_v62, %v16329_v62  ;;  %v4776_v43 = vadd.f32 1.0, %v16260_v16 }
 0xb5f   : > { %13596 = vtanh.f32 %v4727_v34  ;;  %v4632_v49 = vmul.f32 %v4600_v56, %v16322_v53  ;;  %v4777_v19 = vadd.f32 1.0, %v16274_v7  ;;  %v4778_v39 = vadd.f32 1.0, %v16254_v15  ;;  %v12356_v40 = vpop.f32.mrb[120].mxu1 }
 0xb60   : > { %v16346_v13 = vpop.eup %13586  ;;  %13598 = vtanh.f32 %v4725_v11  ;;  %v4698_v38 = vadd.f32 %v4666_v58, %v16312_v12  ;;  %v4635_v29 = vmul.f32 %v4603_v10, %v16326_v32  ;;  %v4633_v54 = vmul.f32 %v4601_v35, %v16329_v62  ;;  %v4549_v36 = vpop.f32.mrb[121].mxu1 }
 0xb61   : > { %v4664_v9 = vmul.f32 0.044715, %v4632_v49  ;;  %v4808_v16 = vmul.f32 0.5, %v4776_v43  ;;  %v4809_v2 = vmul.f32 0.5, %v4777_v19  ;;  %v4779_v59 = vadd.f32 1.0, %v16266_v31  ;;  %v12357_v51 = vpop.f32.mrb[122].mxu1 }
 0xb62   : > { %v4730_v7 = vmul.f32 0.7978846, %v4698_v38  ;;  %v4667_v47 = vmul.f32 0.044715, %v4635_v29  ;;  %v4665_v15 = vmul.f32 0.044715, %v4633_v54  ;;  %v16353_v34 = vadd.f32 %v12356_v40, %v16148_v48 }
 0xb63   : > { %v16355_v11 = vpop.eup %13588  ;;  %v4696_v56 = vadd.f32 %v4664_v9, %v16322_v53  ;;  %v4840_v58 = vmul.f32 %v4808_v16, %v16180_v61  ;;  %v4841_v10 = vmul.f32 %v4809_v2, %v16192_v44  ;;  %v4810_v35 = vmul.f32 0.5, %v4778_v39  ;;  %v4552_v43 = vpop.f32.mrb[123].mxu1 }
 0xb64   : > { %v16360_v49 = vpop.eup %13590  ;;  %13600 = vtanh.f32 %v4730_v7  ;;  %v4699_v31 = vadd.f32 %v4667_v47, %v16326_v32  ;;  %v4697_v19 = vadd.f32 %v4665_v15, %v16329_v62  ;;  %v4811_v38 = vmul.f32 0.5, %v4779_v59 }
 0xb65   : > { %v4728_v40 = vmul.f32 0.7978846, %v4696_v56  ;;  %v4870_v29 = vpack.c.bf16 %v4841_v10, %v4840_v58  ;;  %v4842_v54 = vmul.f32 %v4810_v35, %v16176_v28  ;;  %v4606_v9 = vmul.f32 %v16353_v34, %v16353_v34 }
 0xb66   : > { %v16367_v61 = vpop.eup %13592  ;;  %v4731_v44 = vmul.f32 0.7978846, %v4699_v31  ;;  %v4729_v39 = vmul.f32 0.7978846, %v4697_v19  ;;  %v4843_v16 = vmul.f32 %v4811_v38, %v16186_v20  ;;  %v16371_v2 = vadd.f32 %v16148_v48, %v4549_v36 }
 0xb67   : > { %v16373_v7 = vpop.eup %13594  ;;  %13602 = vtanh.f32 %v4728_v40  ;;  %12382 = vmatprep.mubr.bf16.mxu0 %v4870_v29  ;;  %v4638_v59 = vmul.f32 %v4606_v9, %v16353_v34  ;;  %v16377_v28 = vadd.f32 %v12357_v51, %v16148_v48  ;;  %v16380_v47 = vadd.f32 %v16148_v48, %v4552_v43  ;;  %v12360_v15 = vpop.f32.mrb[124].mxu1 }
 0xb68   : > { %13604 = vtanh.f32 %v4731_v44  ;;  %v4871_v56 = vpack.c.bf16 %v4843_v16, %v4842_v54  ;;  %v4604_v20 = vmul.f32 %v16371_v2, %v16371_v2  ;;  %v4780_v36 = vadd.f32 1.0, %v16303_v46  ;;  %v4565_v58 = vpop.f32.mrb[125].mxu1 }
 0xb69   : > { %v16385_v10 = vpop.eup %13596  ;;  %13606 = vtanh.f32 %v4729_v39  ;;  %v4670_v35 = vmul.f32 0.044715, %v4638_v59  ;;  %v4607_v51 = vmul.f32 %v16377_v28, %v16377_v28  ;;  %v4605_v43 = vmul.f32 %v16380_v47, %v16380_v47  ;;  %v12361_v31 = vpop.f32.mrb[126].mxu1 }
 0xb6a   : > { %v16391_v19 = vpop.eup %13598  ;;  %12383 = vmatmul.mubr.bf16.gmra.mrb[132].mxu0 %v4871_v56  ;;  %v4636_v38 = vmul.f32 %v4604_v20, %v16371_v2  ;;  %v4781_v40 = vadd.f32 1.0, %v16314_v30  ;;  %v4812_v46 = vmul.f32 0.5, %v4780_v36  ;;  %v4782_v29 = vadd.f32 1.0, %v16299_v42  ;;  %v4568_v54 = vpop.f32.mrb[127].mxu1 }
 0xb6b   : > { %v4702_v9 = vadd.f32 %v4670_v35, %v16353_v34  ;;  %v4639_v44 = vmul.f32 %v4607_v51, %v16377_v28  ;;  %v4637_v39 = vmul.f32 %v4605_v43, %v16380_v47  ;;  %v4783_v16 = vadd.f32 1.0, %v16307_v3 }
 0xb6c   : > { %v4668_v59 = vmul.f32 0.044715, %v4636_v38  ;;  %v4813_v27 = vmul.f32 0.5, %v4781_v40  ;;  %v4844_v56 = vmul.f32 %v4812_v46, %v16208_v23  ;;  %v4814_v50 = vmul.f32 0.5, %v4782_v29 }
 0xb6d   : > { %v4734_v20 = vmul.f32 0.7978846, %v4702_v9  ;;  %v4671_v17 = vmul.f32 0.044715, %v4639_v44  ;;  %v4669_v30 = vmul.f32 0.044715, %v4637_v39  ;;  %v16402_v36 = vadd.f32 %v12360_v15, %v16148_v48 }
 0xb6e   : > { %v16404_v42 = vpop.eup %13600  ;;  %v4700_v35 = vadd.f32 %v4668_v59, %v16371_v2  ;;  %v4845_v51 = vmul.f32 %v4813_v27, %v16220_v63  ;;  %v4815_v43 = vmul.f32 0.5, %v4783_v16  ;;  %v4846_v3 = vmul.f32 %v4814_v50, %v16204_v14 }
 0xb6f   : > { %13608 = vtanh.f32 %v4734_v20  ;;  %v4703_v38 = vadd.f32 %v4671_v17, %v16377_v28  ;;  %v4701_v23 = vadd.f32 %v4669_v30, %v16380_v47  ;;  %v4610_v40 = vmul.f32 %v16402_v36, %v16402_v36 }
 0xb70   : > { %v4732_v46 = vmul.f32 0.7978846, %v4700_v35  ;;  %v4872_v15 = vpack.c.bf16 %v4845_v51, %v4844_v56  ;;  %v4847_v29 = vmul.f32 %v4815_v43, %v16214_v55  ;;  %v16415_v9 = vadd.f32 %v16148_v48, %v4565_v58 }
 0xb71   : > { %v16417_v44 = vpop.eup %13602  ;;  %v4735_v27 = vmul.f32 0.7978846, %v4703_v38  ;;  %v4733_v63 = vmul.f32 0.7978846, %v4701_v23  ;;  %v4642_v50 = vmul.f32 %v4610_v40, %v16402_v36  ;;  %v16421_v17 = vadd.f32 %v12361_v31, %v16148_v48 }
 0xb72   : > { %v16423_v14 = vpop.eup %13604  ;;  %13610 = vtanh.f32 %v4732_v46  ;;  %12386 = vmatprep.mubr.bf16.mxu0 %v4872_v15  ;;  %v4873_v39 = vpack.c.bf16 %v4847_v29, %v4846_v3  ;;  %v4608_v55 = vmul.f32 %v16415_v9, %v16415_v9  ;;  %v16428_v58 = vadd.f32 %v16148_v48, %v4568_v54 }
 0xb73   : > { %v13607_v16 = vpop.eup %13606  ;;  %13612 = vtanh.f32 %v4735_v27  ;;  %v4674_v59 = vmul.f32 0.044715, %v4642_v50  ;;  %v4611_v56 = vmul.f32 %v16421_v17, %v16421_v17  ;;  %v4784_v31 = vadd.f32 1.0, %v16346_v13 }
 0xb74   : > { %13614 = vtanh.f32 %v4733_v63  ;;  %12387 = vmatmul.mubr.bf16.gmra.mrb[136].mxu0 %v4873_v39  ;;  %v4640_v20 = vmul.f32 %v4608_v55, %v16415_v9  ;;  %v4609_v30 = vmul.f32 %v16428_v58, %v16428_v58  ;;  %v4785_v35 = vadd.f32 1.0, %v16360_v49 }
 0xb75   : > { %v4706_v48 = vadd.f32 %v4674_v59, %v16402_v36  ;;  %v4643_v54 = vmul.f32 %v4611_v56, %v16421_v17  ;;  %v4816_v51 = vmul.f32 0.5, %v4784_v31  ;;  %v4786_v43 = vadd.f32 1.0, %v16336_v5 }
 0xb76   : > { %v4672_v3 = vmul.f32 0.044715, %v4640_v20  ;;  %v4641_v38 = vmul.f32 %v4609_v30, %v16428_v58  ;;  %v4817_v13 = vmul.f32 0.5, %v4785_v35  ;;  %v4787_v23 = vadd.f32 1.0, %v16355_v11 }
 0xb77   : > { %v4738_v40 = vmul.f32 0.7978846, %v4706_v48  ;;  %v4675_v46 = vmul.f32 0.044715, %v4643_v54  ;;  %v4848_v15 = vmul.f32 %v4816_v51, %v16239_v22  ;;  %v4818_v29 = vmul.f32 0.5, %v4786_v43 }
 0xb78   : > { %v4704_v49 = vadd.f32 %v4672_v3, %v16415_v9  ;;  %v4673_v27 = vmul.f32 0.044715, %v4641_v38  ;;  %v4849_v63 = vmul.f32 %v4817_v13, %v16258_v33  ;;  %v4819_v50 = vmul.f32 0.5, %v4787_v23 }
 0xb79   : > { %v13609_v39 = vpop.eup %13608  ;;  %13616 = vtanh.f32 %v4738_v40  ;;  %v4707_v5 = vadd.f32 %v4675_v46, %v16421_v17  ;;  %v4850_v55 = vmul.f32 %v4818_v29, %v16232_v18  ;;  %v4788_v59 = vadd.f32 1.0, %v16373_v7 }
 0xb7a   : > { %v4736_v11 = vmul.f32 0.7978846, %v4704_v49  ;;  %v4705_v56 = vadd.f32 %v4673_v27, %v16428_v58  ;;  %v4874_v31 = vpack.c.bf16 %v4849_v63, %v4848_v15  ;;  %v4851_v22 = vmul.f32 %v4819_v50, %v16252_v6 }
 0xb7b   : > { %v4739_v20 = vmul.f32 0.7978846, %v4707_v5  ;;  %v4789_v30 = vadd.f32 1.0, %v16391_v19  ;;  %v4820_v35 = vmul.f32 0.5, %v4788_v59  ;;  %v4790_v33 = vadd.f32 1.0, %v16367_v61 }
 0xb7c   : > { %v13611_v48 = vpop.eup %13610  ;;  %13618 = vtanh.f32 %v4736_v11  ;;  %v4737_v54 = vmul.f32 0.7978846, %v4705_v56  ;;  %12390 = vmatprep.mubr.bf16.mxu0 %v4874_v31  ;;  %v4875_v51 = vpack.c.bf16 %v4851_v22, %v4850_v55  ;;  %v4791_v18 = vadd.f32 1.0, %v16385_v10 }
 0xb7d   : > { %v13613_v7 = vpop.eup %13612  ;;  %13620 = vtanh.f32 %v4739_v20  ;;  %v4821_v43 = vmul.f32 0.5, %v4789_v30  ;;  %v4852_v3 = vmul.f32 %v4820_v35, %v16278_v25  ;;  %v4822_v38 = vmul.f32 0.5, %v4790_v33 }
 0xb7e   : > { %v13615_v6 = vpop.eup %13614  ;;  %13622 = vtanh.f32 %v4737_v54  ;;  %12391 = vmatmul.mubr.bf16.gmra.mrb[140].mxu0 %v4875_v51  ;;  %v4823_v19 = vmul.f32 0.5, %v4791_v18  ;;  %v4792_v13 = vadd.f32 1.0, %v16417_v44  ;;  %v4793_v61 = vadd.f32 1.0, %v13607_v16 }
 0xb7f   : > { %v4853_v23 = vmul.f32 %v4821_v43, %v16290_v37  ;;  %v4854_v40 = vmul.f32 %v4822_v38, %v16272_v4  ;;  %v4794_v46 = vadd.f32 1.0, %v16404_v42  ;;  %v4795_v10 = vadd.f32 1.0, %v16423_v14 }
 0xb80   : > { %v4855_v15 = vmul.f32 %v4823_v19, %v16287_v41  ;;  %v4824_v29 = vmul.f32 0.5, %v4792_v13  ;;  %v4825_v25 = vmul.f32 0.5, %v4793_v61  ;;  %v4796_v49 = vadd.f32 1.0, %v13611_v48  ;;  %v12899_v61 = vld [vmem:[%s17828_s8 + $0x4] ss:$8 sps:$4 sm:$0xff]  }
 0xb81   : > { %v4876_v27 = vpack.c.bf16 %v4853_v23, %v4852_v3  ;;  %v4826_v63 = vmul.f32 0.5, %v4794_v46  ;;  %v4827_v50 = vmul.f32 0.5, %v4795_v10  ;;  %v4797_v5 = vadd.f32 1.0, %v13615_v6  ;;  %5419 = vmatprep.mubr.bf16.mxu1 %v12899_v61  ;;  %v13752_v23 = vld [vmem:[%s13930_s29 + $0x8] sm:$0x1f] }
 0xb82   : > { %v4877_v55 = vpack.c.bf16 %v4855_v15, %v4854_v40  ;;  %v4856_v44 = vmul.f32 %v4824_v29, %v16322_v53  ;;  %v4857_v37 = vmul.f32 %v4825_v25, %v16329_v62  ;;  %v4828_v16 = vmul.f32 0.5, %v4796_v49  ;;  %v18003_v40 = vld [vmem:[#allocation70_spill] sm:$0xff] }
 0xb83   : > { %v13617_v4 = vpop.eup %13616  ;;  %12394 = vmatprep.mubr.bf16.mxu0 %v4876_v27  ;;  %v4858_v42 = vmul.f32 %v4826_v63, %v16312_v12  ;;  %v4859_v14 = vmul.f32 %v4827_v50, %v16326_v32  ;;  %v4829_v41 = vmul.f32 0.5, %v4797_v5  ;;  %v4798_v59 = vadd.f32 1.0, %v13609_v39 }
 0xb84   : > { %v4878_v11 = vpack.c.bf16 %v4857_v37, %v4856_v44  ;;  %v4799_v56 = vadd.f32 1.0, %v13613_v7  ;;  %v4802_v31 = vadd.f32 1.0, %v13617_v4  ;;  %v4860_v20 = vmul.f32 %v4828_v16, %v16371_v2 }
 0xb85   : > { %v4879_v22 = vpack.c.bf16 %v4859_v14, %v4858_v42  ;;  %v4861_v30 = vmul.f32 %v4829_v41, %v16380_v47  ;;  %v4830_v53 = vmul.f32 0.5, %v4798_v59  ;;  %v16475_v46 = vrot.slane %v13752_v23, %v18003_v40 }
 0xb86   : > { %v13619_v35 = vpop.eup %13618  ;;  %12395 = vmatmul.mubr.bf16.gmra.mrb[144].mxu0 %v4877_v55  ;;  %v4831_v62 = vmul.f32 0.5, %v4799_v56  ;;  %v4834_v18 = vmul.f32 0.5, %v4802_v31 }
 0xb87   : > { %v13621_v33 = vpop.eup %13620  ;;  %12398 = vmatprep.mubr.bf16.mxu0 %v4878_v11  ;;  %v4880_v48 = vpack.c.bf16 %v4861_v30, %v4860_v20  ;;  %v4800_v12 = vadd.f32 1.0, %v13619_v35  ;;  %v4862_v32 = vmul.f32 %v4830_v53, %v16353_v34 }
 0xb88   : > { %v13623_v54 = vpop.eup %13622  ;;  %v4863_v39 = vmul.f32 %v4831_v62, %v16377_v28  ;;  %v4803_v51 = vadd.f32 1.0, %v13621_v33  ;;  %v4866_v38 = vmul.f32 %v4834_v18, %v16402_v36  ;;  %v18004_v62 = vld [vmem:[#allocation76_spill] sm:$0xff] }
 0xb89   : > { %v4801_v7 = vadd.f32 1.0, %v13623_v54  ;;  %v4832_v2 = vmul.f32 0.5, %v4800_v12 }
 0xb8a   : > { %v4881_v43 = vpack.c.bf16 %v4863_v39, %v4862_v32  ;;  %v4835_v47 = vmul.f32 0.5, %v4803_v51 }
 0xb8b   : > { %v4833_v3 = vmul.f32 0.5, %v4801_v7  ;;  %v4864_v19 = vmul.f32 %v4832_v2, %v16415_v9  ;;  %v18006_v7 = vld [vmem:[#allocation77_spill] sm:$0xff] }
 0xb8c   : > { %v4867_v6 = vmul.f32 %v4835_v47, %v16421_v17 }
 0xb8d   : > { %v4865_v34 = vmul.f32 %v4833_v3, %v16428_v58  ;;  %v18007_v3 = vld [vmem:[#allocation75_spill] sm:$0xff] }
 0xb8e   : > { %12399 = vmatmul.mubr.bf16.gmra.mrb[148].mxu0 %v4879_v22  ;;  %v4883_v28 = vpack.c.bf16 %v4867_v6, %v4866_v38 }
 0xb8f   : > { %12402 = vmatprep.mubr.bf16.mxu0 %v4880_v48  ;;  %v4882_v13 = vpack.c.bf16 %v4865_v34, %v4864_v19  ;;  %v18005_v48 = vld [vmem:[#allocation74_spill] sm:$0xff]  ;;  %v18008_v19 = vld [vmem:[#allocation80_spill] sm:$0xff] }
 0xb96   : > { %12403 = vmatmul.mubr.bf16.gmra.mrb[152].mxu0 %v4881_v43 }
 0xb97   : > { %12406 = vmatprep.mubr.bf16.mxu0 %v4882_v13 }
 0xb9e   : > { %12407 = vmatmul.mubr.bf16.gmra.mrb[156].mxu0 %v4883_v28  ;;  %v18009_v28 = vld [vmem:[#allocation78_spill] sm:$0xff] }
 0xc30   : > { %v12380_v36 = vpop.f32.mrb[128].mxu0 }
 0xc31   : > { %v4995_v9 = vadd.f32 %v12380_v36, %v16475_v46  ;;  %v4986_v17 = vpop.f32.mrb[129].mxu0 }
 0xc32   : > { %v4987_v58 = vadd.f32 %v4986_v17, %v16475_v46  ;;  %v12381_v10 = vpop.f32.mrb[130].mxu0 }
 0xc33   : > { %v16484_v15 = vadd.f32 %v4995_v9, %v15687_v60  ;;  %v4998_v29 = vadd.f32 %v12381_v10, %v16475_v46  ;;  %v4989_v25 = vpop.f32.mrb[131].mxu0 }
 0xc34   : > { %v16488_v49 = vadd.f32 %v4987_v58, %v15678_v0  ;;  %v4990_v27 = vadd.f32 %v4989_v25, %v16475_v46 }
 0xc35   : > { %5147 = vst [vmem:[%s16480_s1 + $0x10] sm:$0xff] %v16484_v15  ;;  %v16494_v63 = vadd.f32 %v4998_v29, %v15691_v8  ;;  %v18010_v29 = vld [vmem:[#allocation81_spill] sm:$0xff] }
 0xc36   : > { %5145 = vst [vmem:[%s16480_s1] sm:$0xff] %v16488_v49  ;;  %v16499_v50 = vadd.f32 %v4990_v27, %v15683_v45 }
 0xc37   : > { %5148 = vst [vmem:[%s16480_s1 + $0x18] sm:$0xff] %v16494_v63  ;;  %v5212_v0 = vpack.c.bf16 %v16494_v63, %v16484_v15 }
 0xc38   : > { %5146 = vst [vmem:[%s16480_s1 + $0x8] sm:$0xff] %v16499_v50  ;;  %v5211_v60 = vpack.c.bf16 %v16499_v50, %v16488_v49 }
 0xc3d   : > { %v12384_v8 = vpop.f32.mrb[132].mxu0 }
 0xc3e   : > { %v5011_v5 = vadd.f32 %v12384_v8, %v16475_v46  ;;  %v5002_v55 = vpop.f32.mrb[133].mxu0 }
 0xc3f   : > { %v5003_v45 = vadd.f32 %v5002_v55, %v16475_v46  ;;  %v12385_v44 = vpop.f32.mrb[134].mxu0 }
 0xc40   : > { %v16512_v37 = vadd.f32 %v5011_v5, %v15707_v1  ;;  %v5014_v16 = vadd.f32 %v12385_v44, %v16475_v46  ;;  %v5005_v4 = vpop.f32.mrb[135].mxu0  ;;  %v18011_v5 = vld [vmem:[#allocation79_spill] sm:$0xff]  ;;  %v18012_v44 = vld [vmem:[#allocation84_spill] sm:$0xff] }
 0xc41   : > { %v16516_v42 = vadd.f32 %v5003_v45, %v15697_v21  ;;  %v5006_v14 = vadd.f32 %v5005_v4, %v16475_v46  ;;  %v18013_v4 = vld [vmem:[#allocation82_spill] sm:$0xff] }
 0xc42   : > { %5151 = vst [vmem:[%s16480_s1 + $0x30] sm:$0xff] %v16512_v37  ;;  %v16522_v41 = vadd.f32 %v5014_v16, %v15711_v57 }
 0xc43   : > { %5149 = vst [vmem:[%s16480_s1 + $0x20] sm:$0xff] %v16516_v42  ;;  %v16527_v59 = vadd.f32 %v5006_v14, %v15703_v52 }
 0xc44   : > { %5152 = vst [vmem:[%s16480_s1 + $0x38] sm:$0xff] %v16522_v41  ;;  %v5214_v21 = vpack.c.bf16 %v16522_v41, %v16512_v37 }
 0xc45   : > { %5150 = vst [vmem:[%s16480_s1 + $0x28] sm:$0xff] %v16527_v59  ;;  %v5213_v1 = vpack.c.bf16 %v16527_v59, %v16516_v42 }
 0xc47   : > { %v12388_v57 = vpop.f32.mrb[136].mxu0 }
 0xc48   : > { %v5027_v11 = vadd.f32 %v12388_v57, %v16475_v46  ;;  %v5018_v56 = vpop.f32.mrb[137].mxu0 }
 0xc49   : > { %v5019_v52 = vadd.f32 %v5018_v56, %v16475_v46  ;;  %v12389_v31 = vpop.f32.mrb[138].mxu0 }
 0xc4a   : > { %v16540_v22 = vadd.f32 %v5027_v11, %v15727_v24  ;;  %v5030_v20 = vadd.f32 %v12389_v31, %v16475_v46  ;;  %v5021_v30 = vpop.f32.mrb[139].mxu0 }
 0xc4b   : > { %v16544_v53 = vadd.f32 %v5019_v52, %v15717_v26  ;;  %v5022_v35 = vadd.f32 %v5021_v30, %v16475_v46 }
 0xc4c   : > { %5155 = vst [vmem:[%s16480_s1 + $0x50] sm:$0xff] %v16540_v22  ;;  %v16550_v33 = vadd.f32 %v5030_v20, %v18004_v62 }
 0xc4d   : > { %5153 = vst [vmem:[%s16480_s1 + $0x40] sm:$0xff] %v16544_v53  ;;  %v16555_v12 = vadd.f32 %v5022_v35, %v18005_v48  ;;  %v18014_v35 = vld [vmem:[#allocation85_spill] sm:$0xff] }
 0xc4e   : > { %5156 = vst [vmem:[%s16480_s1 + $0x58] sm:$0xff] %v16550_v33  ;;  %v5216_v26 = vpack.c.bf16 %v16550_v33, %v16540_v22  ;;  %v12948_v22 = vld [vmem:[%s13945_s14 + $0x8] sm:$0xff]  }
 0xc4f   : > { %5154 = vst [vmem:[%s16480_s1 + $0x48] sm:$0xff] %v16555_v12  ;;  %v5215_v24 = vpack.c.bf16 %v16555_v12, %v16544_v53  ;;  %v12897_v33 = vld [vmem:[%s17828_s8] ss:$8 sps:$4 sm:$0xff]  }
 0xc51   : > { %v12392_v54 = vpop.f32.mrb[140].mxu0 }
 0xc52   : > { %v5043_v32 = vadd.f32 %v12392_v54, %v16475_v46  ;;  %v5034_v39 = vpop.f32.mrb[141].mxu0 }
 0xc53   : > { %v5035_v51 = vadd.f32 %v5034_v39, %v16475_v46  ;;  %v12393_v18 = vpop.f32.mrb[142].mxu0 }
 0xc54   : > { %v16568_v2 = vadd.f32 %v5043_v32, %v18006_v7  ;;  %v5046_v43 = vadd.f32 %v12393_v18, %v16475_v46  ;;  %v5037_v47 = vpop.f32.mrb[143].mxu0  ;;  %v18015_v32 = vld [vmem:[#allocation83_spill] sm:$0xff]  ;;  %v18016_v18 = vld [vmem:[#allocation88_spill] sm:$0xff] }
 0xc55   : > { %v16572_v38 = vadd.f32 %v5035_v51, %v18007_v3  ;;  %v5038_v6 = vadd.f32 %v5037_v47, %v16475_v46 }
 0xc56   : > { %5159 = vst [vmem:[%s16480_s1 + $0x70] sm:$0xff] %v16568_v2  ;;  %v16578_v34 = vadd.f32 %v5046_v43, %v18008_v19  ;;  %v18017_v43 = vld [vmem:[#allocation86_spill] sm:$0xff] }
 0xc57   : > { %5157 = vst [vmem:[%s16480_s1 + $0x60] sm:$0xff] %v16572_v38  ;;  %v16583_v13 = vadd.f32 %v5038_v6, %v18009_v28 }
 0xc58   : > { %5160 = vst [vmem:[%s16480_s1 + $0x78] sm:$0xff] %v16578_v34  ;;  %v5218_v61 = vpack.c.bf16 %v16578_v34, %v16568_v2  ;;  %v12908_v2 = vld [vmem:[%s17828_s8 + $0x30] ss:$8 sps:$4 sm:$0xff]   ;;  %v12909_v34 = vld [vmem:[%s17828_s8 + $0x44] ss:$8 sps:$4 sm:$0xff]  }
 0xc59   : > { %5158 = vst [vmem:[%s16480_s1 + $0x68] sm:$0xff] %v16583_v13  ;;  %v5217_v23 = vpack.c.bf16 %v16583_v13, %v16572_v38  ;;  %v12396_v36 = vpop.f32.mrb[144].mxu0  ;;  %v12902_v38 = vld [vmem:[%s17828_s8 + $0x10] ss:$8 sps:$4 sm:$0xff]   ;;  %v12903_v13 = vld [vmem:[%s17828_s8 + $0x24] ss:$8 sps:$4 sm:$0xff]  }
 0xc5a   : > { %v5059_v9 = vadd.f32 %v12396_v36, %v16475_v46  ;;  %v5050_v17 = vpop.f32.mrb[145].mxu0  ;;  %v18018_v36 = vld [vmem:[#allocation89_spill] sm:$0xff] }
 0xc5b   : > { %v5051_v58 = vadd.f32 %v5050_v17, %v16475_v46  ;;  %v12397_v10 = vpop.f32.mrb[146].mxu0 }
 0xc5c   : > { %v5131_v25 = vadd.f32 %v5059_v9, %v18010_v29  ;;  %v5062_v27 = vadd.f32 %v12397_v10, %v16475_v46  ;;  %v5053_v8 = vpop.f32.mrb[147].mxu0  ;;  %v18020_v10 = vld [vmem:[#allocation92_spill] sm:$0xff] }
 0xc5d   : > { %v5129_v55 = vadd.f32 %v5051_v58, %v18011_v5  ;;  %v5054_v45 = vadd.f32 %v5053_v8, %v16475_v46 }
 0xc5e   : > { %5163 = vst [vmem:[%s16480_s1 + $0x90] sm:$0xff] %v5131_v25  ;;  %v5132_v16 = vadd.f32 %v5062_v27, %v18012_v44  ;;  %v18022_v44 = vld [vmem:[#allocation93_spill] sm:$0xff] }
 0xc5f   : > { %5161 = vst [vmem:[%s16480_s1 + $0x80] sm:$0xff] %v5129_v55  ;;  %v5130_v14 = vadd.f32 %v5054_v45, %v18013_v4 }
 0xc60   : > { %5164 = vst [vmem:[%s16480_s1 + $0x98] sm:$0xff] %v5132_v16  ;;  %v5220_v57 = vpack.c.bf16 %v5132_v16, %v5131_v25  ;;  %v18021_v25 = vld [vmem:[#allocation90_spill] sm:$0xff] }
 0xc61   : > { %5162 = vst [vmem:[%s16480_s1 + $0x88] sm:$0xff] %v5130_v14  ;;  %v12400_v11 = vpop.f32.mrb[148].mxu0  ;;  %v5219_v56 = vpack.c.bf16 %v5130_v14, %v5129_v55 }
 0xc62   : > { %v5075_v52 = vadd.f32 %v12400_v11, %v16475_v46  ;;  %v5066_v31 = vpop.f32.mrb[149].mxu0 }
 0xc63   : > { %v5067_v20 = vadd.f32 %v5066_v31, %v16475_v46  ;;  %v12401_v30 = vpop.f32.mrb[150].mxu0  ;;  %11622 = vmatprep.subr.bf16.mxu1 %v5219_v56  ;;  %v18025_v56 = vld [vmem:[#allocation94_spill] sm:$0xff]  ;;  %v12947_v31 = vld [vmem:[%s13945_s14 + $0x48] sm:$0xff]  }
 0xc64   : > { %v5135_v62 = vadd.f32 %v5075_v52, %v18014_v35  ;;  %v5078_v48 = vadd.f32 %v12401_v30, %v16475_v46  ;;  %v5069_v54 = vpop.f32.mrb[151].mxu0  ;;  %11623 = vmatpush3.bf16.msra.mxu1 %v5211_v60  ;;  %v12912_v30 = vld [vmem:[%s17828_s8 + $0x54] ss:$8 sps:$4 sm:$0xff]   ;;  %v12914_v35 = vld [vmem:[%s17828_s8 + $0x50] ss:$8 sps:$4 sm:$0xff]  }
 0xc65   : > { %v5133_v39 = vadd.f32 %v5067_v20, %v18015_v32  ;;  %v5070_v51 = vadd.f32 %v5069_v54, %v16475_v46  ;;  %11624 = vmatprep.subr.bf16.mxu1 %v5220_v57  ;;  %v18024_v57 = vld [vmem:[#allocation38_spill] sm:$0xff] }
 0xc66   : > { %5167 = vst [vmem:[%s16480_s1 + $0xb0] sm:$0xff] %v5135_v62  ;;  %v5136_v7 = vadd.f32 %v5078_v48, %v18016_v18  ;;  %v12906_v20 = vld [vmem:[%s17828_s8 + $0x34] ss:$8 sps:$4 sm:$0xff]   ;;  %v12917_v48 = vld [vmem:[%s17828_s8 + $0x60] ss:$8 sps:$4 sm:$0xff]  }
 0xc67   : > { %5165 = vst [vmem:[%s16480_s1 + $0xa0] sm:$0xff] %v5133_v39  ;;  %v5134_v47 = vadd.f32 %v5070_v51, %v18017_v43  ;;  %v12918_v54 = vld [vmem:[%s17828_s8 + $0x74] ss:$8 sps:$4 sm:$0xff]   ;;  %v12920_v32 = vld [vmem:[%s17828_s8 + $0x70] ss:$8 sps:$4 sm:$0xff]  }
 0xc68   : > { %5168 = vst [vmem:[%s16480_s1 + $0xb8] sm:$0xff] %v5136_v7  ;;  %11625 = vmatpush3.bf16.msra.mxu1 %v5212_v0  ;;  %v5222_v3 = vpack.c.bf16 %v5136_v7, %v5135_v62  ;;  %v18019_v0 = vld [vmem:[#allocation87_spill] sm:$0xff]  ;;  %v12915_v62 = vld [vmem:[%s17828_s8 + $0x64] ss:$8 sps:$4 sm:$0xff]   ;;  %v12923_v51 = vld [vmem:[%s17828_s8 + $0x80] ss:$8 sps:$4 sm:$0xff]  }
 0xc69   : > { %5166 = vst [vmem:[%s16480_s1 + $0xa8] sm:$0xff] %v5134_v47  ;;  %v12404_v49 = vpop.f32.mrb[152].mxu0  ;;  %v5221_v50 = vpack.c.bf16 %v5134_v47, %v5133_v39  ;;  %v12921_v39 = vld [vmem:[%s17828_s8 + $0x84] ss:$8 sps:$4 sm:$0xff]   ;;  %v12924_v18 = vld [vmem:[%s17828_s8 + $0x94] ss:$8 sps:$4 sm:$0xff]  }
 0xc6a   : > { %v5091_v60 = vadd.f32 %v12404_v49, %v16475_v46  ;;  %v5082_v6 = vpop.f32.mrb[153].mxu0  ;;  %v12926_v7 = vld [vmem:[%s17828_s8 + $0x90] ss:$8 sps:$4 sm:$0xff]   ;;  %v12927_v43 = vld [vmem:[%s17828_s8 + $0xa4] ss:$8 sps:$4 sm:$0xff]  }
 0xc6b   : > { %v5083_v19 = vadd.f32 %v5082_v6, %v16475_v46  ;;  %v12405_v28 = vpop.f32.mrb[154].mxu0  ;;  %11626 = vmatprep.subr.bf16.mxu1 %v5221_v50  ;;  %v12929_v47 = vld [vmem:[%s17828_s8 + $0xa0] ss:$8 sps:$4 sm:$0xff]   ;;  %v12932_v49 = vld [vmem:[%s17828_s8 + $0xb0] ss:$8 sps:$4 sm:$0xff]  }
 0xc6c   : > { %v5139_v9 = vadd.f32 %v5091_v60, %v18018_v36  ;;  %v5094_v15 = vadd.f32 %v12405_v28, %v16475_v46  ;;  %v5085_v63 = vpop.f32.mrb[155].mxu0  ;;  %11627 = vmatpush3.bf16.msra.mxu1 %v5213_v1  ;;  %v12933_v50 = vld [vmem:[%s17828_s8 + $0xc4] ss:$8 sps:$4 sm:$0xff]   ;;  %v12949_v60 = vld [vmem:[%s13945_s14 + $0x50] sm:$0xff]   ;;  %v12951_v36 = vld [vmem:[%s13945_s14 + $0x58] sm:$0xff]  }
 0xc6d   : > { %v5137_v17 = vadd.f32 %v5083_v19, %v18019_v0  ;;  %v5086_v58 = vadd.f32 %v5085_v63, %v16475_v46  ;;  %11628 = vmatprep.subr.bf16.mxu1 %v5222_v3  ;;  %v12930_v3 = vld [vmem:[%s17828_s8 + $0xb4] ss:$8 sps:$4 sm:$0xff]   ;;  %v12935_v19 = vld [vmem:[%s17828_s8 + $0xc0] ss:$8 sps:$4 sm:$0xff]   ;;  %v12939_v63 = vld [vmem:[%s17828_s8 + $0xe4] ss:$8 sps:$4 sm:$0xff]  }
 0xc6e   : > { %5171 = vst [vmem:[%s16480_s1 + $0xd0] sm:$0xff] %v5139_v9  ;;  %v5140_v29 = vadd.f32 %v5094_v15, %v18020_v10  ;;  %v12950_v6 = vld [vmem:[%s13945_s14 + $0x10] sm:$0xff]   ;;  %v12953_v0 = vld [vmem:[%s13945_s14 + $0x60] sm:$0xff]  }
 0xc6f   : > { %5169 = vst [vmem:[%s16480_s1 + $0xc0] sm:$0xff] %v5137_v17  ;;  %v5138_v27 = vadd.f32 %v5086_v58, %v18021_v25  ;;  %v12936_v28 = vld [vmem:[%s17828_s8 + $0xd4] ss:$8 sps:$4 sm:$0xff]   ;;  %v12938_v15 = vld [vmem:[%s17828_s8 + $0xd0] ss:$8 sps:$4 sm:$0xff]   ;;  %v12956_v25 = vld [vmem:[%s13945_s14 + $0x28] sm:$0xff]  }
 0xc70   : > { %5172 = vst [vmem:[%s16480_s1 + $0xd8] sm:$0xff] %v5140_v29  ;;  %11629 = vmatpush3.bf16.msra.mxu1 %v5214_v21  ;;  %v5224_v8 = vpack.c.bf16 %v5140_v29, %v5139_v9  ;;  %v18023_v21 = vld [vmem:[#allocation91_spill] sm:$0xff]  ;;  %v12941_v58 = vld [vmem:[%s17828_s8 + $0xe0] ss:$8 sps:$4 sm:$0xff]  }
 0xc71   : > { %5170 = vst [vmem:[%s16480_s1 + $0xc8] sm:$0xff] %v5138_v27  ;;  %v12408_v42 = vpop.f32.mrb[156].mxu0  ;;  %v5223_v59 = vpack.c.bf16 %v5138_v27, %v5137_v17  ;;  %v12952_v9 = vld [vmem:[%s13945_s14 + $0x18] sm:$0xff]   ;;  %v12954_v17 = vld [vmem:[%s13945_s14 + $0x20] sm:$0xff]   ;;  %v12955_v29 = vld [vmem:[%s13945_s14 + $0x68] sm:$0xff]  }
 0xc72   : > { %v5107_v1 = vadd.f32 %v12408_v42, %v16475_v46  ;;  %v5098_v5 = vpop.f32.mrb[157].mxu0  ;;  %v12942_v10 = vld [vmem:[%s17828_s8 + $0xf4] ss:$8 sps:$4 sm:$0xff]   ;;  %v12944_v27 = vld [vmem:[%s17828_s8 + $0xf0] ss:$8 sps:$4 sm:$0xff]  }
 0xc73   : > { %v5099_v55 = vadd.f32 %v5098_v5, %v16475_v46  ;;  %v12409_v45 = vpop.f32.mrb[158].mxu0  ;;  %11630 = vmatprep.subr.bf16.mxu1 %v5223_v59  ;;  %v12958_v42 = vld [vmem:[%s13945_s14 + $0x30] sm:$0xff]   ;;  %v12959_v59 = vld [vmem:[%s13945_s14 + $0x78] sm:$0xff]   ;;  %v12961_v5 = vld [vmem:[%s13945_s14 + $0xc0] sm:$0xff]  }
 0xc74   : > { %v5143_v16 = vadd.f32 %v5107_v1, %v18022_v44  ;;  %v5110_v37 = vadd.f32 %v12409_v45, %v16475_v46  ;;  %v5101_v41 = vpop.f32.mrb[159].mxu0  ;;  %11631 = vmatpush3.bf16.msra.mxu1 %v5215_v24  ;;  %v12946_v24 = vld [vmem:[%s13945_s14] sm:$0xff]   ;;  %v12960_v1 = vld [vmem:[%s13945_s14 + $0x38] sm:$0xff]  }
 0xc75   : > { %v5141_v4 = vadd.f32 %v5099_v55, %v18023_v21  ;;  %v5102_v14 = vadd.f32 %v5101_v41, %v16475_v46  ;;  %11632 = vmatprep.subr.bf16.mxu1 %v5224_v8  ;;  %v12945_v46 = vld [vmem:[%s13945_s14 + $0x40] sm:$0xff]   ;;  %v12957_v8 = vld [vmem:[%s13945_s14 + $0x70] sm:$0xff]  }
 0xc76   : > { %5175 = vst [vmem:[%s16480_s1 + $0xf0] sm:$0xff] %v5143_v16  ;;  %v5144_v11 = vadd.f32 %v5110_v37, %v18024_v57  ;;  %11734 = vmatprep.subr.bf16.mxu0 %v12945_v46 }
 0xc77   : > { %5173 = vst [vmem:[%s16480_s1 + $0xe0] sm:$0xff] %v5141_v4  ;;  %v5142_v52 = vadd.f32 %v5102_v14, %v18025_v56  ;;  %11735 = vmatpush3.bf16.msra.mxu0 %v12946_v24 }
 0xc78   : > { %5176 = vst [vmem:[%s16480_s1 + $0xf8] sm:$0xff] %v5144_v11  ;;  %11633 = vmatpush3.bf16.msra.mxu1 %v5216_v26  ;;  %v5226_v53 = vpack.c.bf16 %v5144_v11, %v5143_v16  ;;  %11736 = vmatprep.subr.bf16.mxu0 %v12947_v31  ;;  %v12900_v26 = vld [vmem:[%s17828_s8 + $0x14] ss:$8 sps:$4 sm:$0xff]  }
 0xc79   : > { %5174 = vst [vmem:[%s16480_s1 + $0xe8] sm:$0xff] %v5142_v52  ;;  %v5225_v12 = vpack.c.bf16 %v5142_v52, %v5141_v4  ;;  %s18036_s1 = sld [smem:[#allocation16_spill]] }
 0xc7b   : > { %11634 = vmatprep.subr.bf16.mxu1 %v5225_v12  ;;  %11737 = vmatpush3.bf16.msra.mxu0 %v12948_v22 }
 0xc7c   : > { %11635 = vmatpush3.bf16.msra.mxu1 %v5217_v23  ;;  %v12905_v23 = vld [vmem:[%s17828_s8 + $0x20] ss:$8 sps:$4 sm:$0xff]   ;;  %11738 = vmatprep.subr.bf16.mxu0 %v12949_v60  ;;  %v12965_v60 = vld [vmem:[%s13945_s14 + $0xd0] sm:$0xff]  }
 0xc7d   : > { %11636 = vmatprep.subr.bf16.mxu1 %v5226_v53 }
 0xc7f   : > { %11739 = vmatpush3.bf16.msra.mxu0 %v12950_v6 }
 0xc80   : > { %11637 = vmatpush3.bf16.msra.mxu1 %v5218_v61  ;;  %v12911_v61 = vld [vmem:[%s17828_s8 + $0x40] ss:$8 sps:$4 sm:$0xff]   ;;  %11740 = vmatprep.subr.bf16.mxu0 %v12951_v36  ;;  %v12967_v36 = vld [vmem:[%s13945_s14 + $0xd8] sm:$0xff]  }
 0xc83   : > { %5420 = vmatmul.mubr.bf16.vlgmr.msra.gmra.mrb[128].mxu1 %v12897_v33  ;;  %11741 = vmatpush3.bf16.msra.mxu0 %v12952_v9 }
 0xc84   : > { %5427 = vmatprep.mubr.bf16.mxu1 %v12900_v26  ;;  %11742 = vmatprep.subr.bf16.mxu0 %v12953_v0 }
 0xc87   : > { %11743 = vmatpush3.bf16.msra.mxu0 %v12954_v17  ;;  %v12968_v17 = vld [vmem:[%s13945_s14 + $0x98] sm:$0xff]  }
 0xc88   : > { %11744 = vmatprep.subr.bf16.mxu0 %v12955_v29 }
 0xc8b   : > { %5428 = vmatmul.mubr.bf16.gmra.mrb[132].mxu1 %v12902_v38  ;;  %11745 = vmatpush3.bf16.msra.mxu0 %v12956_v25 }
 0xc8c   : > { %5435 = vmatprep.mubr.bf16.mxu1 %v12903_v13  ;;  %11746 = vmatprep.subr.bf16.mxu0 %v12957_v8  ;;  %v12971_v8 = vld [vmem:[%s13945_s14 + $0xe8] sm:$0xff]  }
 0xc8f   : > { %11747 = vmatpush3.bf16.msra.mxu0 %v12958_v42 }
 0xc90   : > { %11748 = vmatprep.subr.bf16.mxu0 %v12959_v59 }
 0xc93   : > { %5436 = vmatmul.mubr.bf16.gmra.mrb[136].mxu1 %v12905_v23  ;;  %11749 = vmatpush3.bf16.msra.mxu0 %v12960_v1 }
 0xc94   : > { %5443 = vmatprep.mubr.bf16.mxu1 %v12906_v20  ;;  %11774 = vmatprep.subr.bf16.mxu0 %v12961_v5 }
 0xc9b   : > { %5444 = vmatmul.mubr.bf16.gmra.mrb[140].mxu1 %v12908_v2 }
 0xc9c   : > { %5451 = vmatprep.mubr.bf16.mxu1 %v12909_v34 }
 0xca3   : > { %5452 = vmatmul.mubr.bf16.gmra.mrb[144].mxu1 %v12911_v61 }
 0xca4   : > { %5459 = vmatprep.mubr.bf16.mxu1 %v12912_v30 }
 0xcab   : > { %5460 = vmatmul.mubr.bf16.gmra.mrb[148].mxu1 %v12914_v35 }
 0xcac   : > { %5467 = vmatprep.mubr.bf16.mxu1 %v12915_v62 }
 0xcb3   : > { %5468 = vmatmul.mubr.bf16.gmra.mrb[152].mxu1 %v12917_v48 }
 0xcb4   : > { %5475 = vmatprep.mubr.bf16.mxu1 %v12918_v54 }
 0xcbb   : > { %5476 = vmatmul.mubr.bf16.gmra.mrb[156].mxu1 %v12920_v32 }
 0xcbc   : > { %5483 = vmatprep.mubr.bf16.mxu1 %v12921_v39 }
 0xcc3   : > { %5484 = vmatmul.mubr.bf16.gmra.mrb[160].mxu1 %v12923_v51  ;;  %v12962_v51 = vld [vmem:[%s13945_s14 + $0x80] sm:$0xff]  }
 0xcc4   : > { %5491 = vmatprep.mubr.bf16.mxu1 %v12924_v18  ;;  %v12963_v18 = vld [vmem:[%s13945_s14 + $0xc8] sm:$0xff]  }
 0xccb   : > { %5492 = vmatmul.mubr.bf16.gmra.mrb[164].mxu1 %v12926_v7 }
 0xccc   : > { %5499 = vmatprep.mubr.bf16.mxu1 %v12927_v43 }
 0xcd3   : > { %5500 = vmatmul.mubr.bf16.gmra.mrb[168].mxu1 %v12929_v47 }
 0xcd4   : > { %5507 = vmatprep.mubr.bf16.mxu1 %v12930_v3 }
 0xcdb   : > { %5508 = vmatmul.mubr.bf16.gmra.mrb[172].mxu1 %v12932_v49  ;;  %v12964_v49 = vld [vmem:[%s13945_s14 + $0x88] sm:$0xff]  }
 0xcdc   : > { %5515 = vmatprep.mubr.bf16.mxu1 %v12933_v50 }
 0xce3   : > { %5516 = vmatmul.mubr.bf16.gmra.mrb[176].mxu1 %v12935_v19 }
 0xce4   : > { %5523 = vmatprep.mubr.bf16.mxu1 %v12936_v28  ;;  %v12966_v28 = vld [vmem:[%s13945_s14 + $0x90] sm:$0xff]  }
 0xceb   : > { %5524 = vmatmul.mubr.bf16.gmra.mrb[180].mxu1 %v12938_v15 }
 0xcec   : > { %5531 = vmatprep.mubr.bf16.mxu1 %v12939_v63 }
 0xcf3   : > { %5532 = vmatmul.mubr.bf16.gmra.mrb[184].mxu1 %v12941_v58 }
 0xcf4   : > { %5539 = vmatprep.mubr.bf16.mxu1 %v12942_v10  ;;  %v12969_v10 = vld [vmem:[%s13945_s14 + $0xe0] sm:$0xff]  }
 0xcfb   : > { %5540 = vmatmul.mubr.bf16.gmra.mrb[188].mxu1 %v12944_v27  ;;  %v12970_v27 = vld [vmem:[%s13945_s14 + $0xa0] sm:$0xff]  }
 0xd56   : > { %v11638_v55 = vpop.f32.mrb[128].mxu1 }
 0xd57   : > { %v11639_v45 = vpop.f32.mrb[129].mxu1 }
 0xd58   : > { %v11640_v44 = vadd.f32 %v11639_v45, %v11638_v55  ;;  %v11641_v16 = vpop.f32.mrb[130].mxu1  ;;  %v12972_v55 = vld [vmem:[%s13945_s14 + $0xa8] sm:$0xff]  }
 0xd59   : > { %v11642_v37 = vpop.f32.mrb[131].mxu1 }
 0xd5a   : > { %v11643_v41 = vadd.f32 %v11642_v37, %v11641_v16 }
 0xd5c   : > { %v5548_v21 = vpack.c.bf16 %v11643_v41, %v11640_v44  ;;  %v12973_v44 = vld [vmem:[%s13945_s14 + $0xf0] sm:$0xff]  }
 0xd5d   : > { %v12974_v41 = vld [vmem:[%s13945_s14 + $0xb0] sm:$0xff]  }
 0xd5e   : > { %v11644_v4 = vpop.f32.mrb[132].mxu1 }
 0xd5f   : > { %v11645_v14 = vpop.f32.mrb[133].mxu1 }
 0xd60   : > { %v11646_v57 = vadd.f32 %v11645_v14, %v11644_v4  ;;  %v11647_v11 = vpop.f32.mrb[134].mxu1 }
 0xd61   : > { %v11648_v56 = vpop.f32.mrb[135].mxu1 }
 0xd62   : > { %v11649_v52 = vadd.f32 %v11648_v56, %v11647_v11  ;;  %v12976_v56 = vld [vmem:[%s13945_s14 + $0xb8] sm:$0xff]  }
 0xd64   : > { %v5549_v53 = vpack.c.bf16 %v11649_v52, %v11646_v57 }
 0xd66   : > { %v11650_v12 = vpop.f32.mrb[136].mxu1 }
 0xd67   : > { %v11651_v46 = vpop.f32.mrb[137].mxu1 }
 0xd68   : > { %v11652_v24 = vadd.f32 %v11651_v46, %v11650_v12  ;;  %v11653_v31 = vpop.f32.mrb[138].mxu1 }
 0xd69   : > { %v11654_v22 = vpop.f32.mrb[139].mxu1 }
 0xd6a   : > { %v11655_v33 = vadd.f32 %v11654_v22, %v11653_v31 }
 0xd6c   : > { %v5550_v26 = vpack.c.bf16 %v11655_v33, %v11652_v24 }
 0xd6e   : > { %v11656_v38 = vpop.f32.mrb[140].mxu1 }
 0xd6f   : > { %v11657_v13 = vpop.f32.mrb[141].mxu1 }
 0xd70   : > { %v16713_v23 = vadd.f32 %v11657_v13, %v11656_v38  ;;  %v11659_v20 = vpop.f32.mrb[142].mxu1 }
 0xd71   : > { %v11660_v2 = vpop.f32.mrb[143].mxu1 }
 0xd72   : > { %v16715_v34 = vadd.f32 %v11660_v2, %v11659_v20 }
 0xd74   : > { %v5551_v61 = vpack.c.bf16 %v16715_v34, %v16713_v23 }
 0xd76   : > { %v11662_v30 = vpop.f32.mrb[144].mxu1 }
 0xd77   : > { %v11663_v35 = vpop.f32.mrb[145].mxu1 }
 0xd78   : > { %v11664_v62 = vadd.f32 %v11663_v35, %v11662_v30  ;;  %v11665_v48 = vpop.f32.mrb[146].mxu1 }
 0xd79   : > { %v11666_v54 = vpop.f32.mrb[147].mxu1 }
 0xd7a   : > { %v11667_v32 = vadd.f32 %v11666_v54, %v11665_v48 }
 0xd7c   : > { %v5552_v39 = vpack.c.bf16 %v11667_v32, %v11664_v62 }
 0xd7e   : > { %v11668_v7 = vpop.f32.mrb[148].mxu1  ;;  %5856 = vmatprep.mubr.bf16.mxu0 %v5552_v39 }
 0xd7f   : > { %v11669_v43 = vpop.f32.mrb[149].mxu1  ;;  %5857 = vmatmul.mubr.bf16.vlgmr.msra.gmra.mrb[160].mxu0 %v5548_v21  ;;  %v12975_v21 = vld [vmem:[%s13945_s14 + $0xf8] sm:$0xff]  }
 0xd80   : > { %v11670_v47 = vadd.f32 %v11669_v43, %v11668_v7  ;;  %v11671_v3 = vpop.f32.mrb[150].mxu1  ;;  %11775 = vmatpush3.bf16.msra.mxu0 %v12962_v51 }
 0xd81   : > { %v11672_v50 = vpop.f32.mrb[151].mxu1  ;;  %11776 = vmatprep.subr.bf16.mxu0 %v12963_v18 }
 0xd82   : > { %v11673_v6 = vadd.f32 %v11672_v50, %v11671_v3 }
 0xd84   : > { %v5553_v19 = vpack.c.bf16 %v11673_v6, %v11670_v47  ;;  %11777 = vmatpush3.bf16.msra.mxu0 %v12964_v49 }
 0xd85   : > { %11778 = vmatprep.subr.bf16.mxu0 %v12965_v60 }
 0xd86   : > { %v11674_v9 = vpop.f32.mrb[152].mxu1  ;;  %5864 = vmatprep.mubr.bf16.mxu0 %v5553_v19 }
 0xd87   : > { %v11675_v15 = vpop.f32.mrb[153].mxu1  ;;  %5865 = vmatmul.mubr.bf16.gmra.mrb[164].mxu0 %v5549_v53 }
 0xd88   : > { %v11676_v63 = vadd.f32 %v11675_v15, %v11674_v9  ;;  %v11677_v0 = vpop.f32.mrb[154].mxu1  ;;  %11779 = vmatpush3.bf16.msra.mxu0 %v12966_v28 }
 0xd89   : > { %v11678_v58 = vpop.f32.mrb[155].mxu1  ;;  %11780 = vmatprep.subr.bf16.mxu0 %v12967_v36 }
 0xd8a   : > { %v11679_v29 = vadd.f32 %v11678_v58, %v11677_v0 }
 0xd8c   : > { %v5554_v25 = vpack.c.bf16 %v11679_v29, %v11676_v63  ;;  %11781 = vmatpush3.bf16.msra.mxu0 %v12968_v17 }
 0xd8d   : > { %11782 = vmatprep.subr.bf16.mxu0 %v12969_v10 }
 0xd8e   : > { %v11680_v42 = vpop.f32.mrb[156].mxu1  ;;  %5872 = vmatprep.mubr.bf16.mxu0 %v5554_v25 }
 0xd8f   : > { %v11681_v59 = vpop.f32.mrb[157].mxu1  ;;  %5873 = vmatmul.mubr.bf16.gmra.mrb[168].mxu0 %v5550_v26 }
 0xd90   : > { %v11682_v1 = vadd.f32 %v11681_v59, %v11680_v42  ;;  %v11683_v5 = vpop.f32.mrb[158].mxu1  ;;  %11783 = vmatpush3.bf16.msra.mxu0 %v12970_v27 }
 0xd91   : > { %v11684_v45 = vpop.f32.mrb[159].mxu1  ;;  %11784 = vmatprep.subr.bf16.mxu0 %v12971_v8 }
 0xd92   : > { %v11685_v16 = vadd.f32 %v11684_v45, %v11683_v5  ;;  %v18026_v45 = vmov 0  }
 0xd94   : > { %v5555_v37 = vpack.c.bf16 %v11685_v16, %v11682_v1  ;;  %11785 = vmatpush3.bf16.msra.mxu0 %v12972_v55 }
 0xd95   : > { %11786 = vmatprep.subr.bf16.mxu0 %v12973_v44 }
 0xd96   : > { %v11686_v4 = vpop.f32.mrb[160].mxu1  ;;  %5880 = vmatprep.mubr.bf16.mxu0 %v5555_v37 }
 0xd97   : > { %v11687_v14 = vpop.f32.mrb[161].mxu1  ;;  %5881 = vmatmul.mubr.bf16.gmra.mrb[172].mxu0 %v5551_v61 }
 0xd98   : > { %v11688_v57 = vadd.f32 %v11687_v14, %v11686_v4  ;;  %v11689_v11 = vpop.f32.mrb[162].mxu1  ;;  %11787 = vmatpush3.bf16.msra.mxu0 %v12974_v41 }
 0xd99   : > { %v11690_v52 = vpop.f32.mrb[163].mxu1  ;;  %11788 = vmatprep.subr.bf16.mxu0 %v12975_v21 }
 0xd9a   : > { %v11691_v53 = vadd.f32 %v11690_v52, %v11689_v11 }
 0xd9c   : > { %v5556_v12 = vpack.c.bf16 %v11691_v53, %v11688_v57  ;;  %11789 = vmatpush3.bf16.msra.mxu0 %v12976_v56 }
 0xd9e   : > { %v11692_v46 = vpop.f32.mrb[164].mxu1 }
 0xd9f   : > { %v11693_v24 = vpop.f32.mrb[165].mxu1 }
 0xda0   : > { %v11694_v31 = vadd.f32 %v11693_v24, %v11692_v46  ;;  %v11695_v22 = vpop.f32.mrb[166].mxu1 }
 0xda1   : > { %v11696_v33 = vpop.f32.mrb[167].mxu1 }
 0xda2   : > { %v11697_v26 = vadd.f32 %v11696_v33, %v11695_v22 }
 0xda4   : > { %v5557_v38 = vpack.c.bf16 %v11697_v26, %v11694_v31 }
 0xda6   : > { %v11698_v13 = vpop.f32.mrb[168].mxu1 }
 0xda7   : > { %v11699_v20 = vpop.f32.mrb[169].mxu1 }
 0xda8   : > { %v11700_v23 = vadd.f32 %v11699_v20, %v11698_v13  ;;  %v11701_v2 = vpop.f32.mrb[170].mxu1 }
 0xda9   : > { %v11702_v34 = vpop.f32.mrb[171].mxu1 }
 0xdaa   : > { %v11703_v61 = vadd.f32 %v11702_v34, %v11701_v2  ;;  %v16739_v34 = vld [vmem:[%s17826_s12] sm:$0xff] }
 0xdac   : > { %v5558_v30 = vpack.c.bf16 %v11703_v61, %v11700_v23  ;;  %v18027_v61 = vld [vmem:[#allocation33_spill] sm:$0xff] }
 0xdae   : > { %v11704_v35 = vpop.f32.mrb[172].mxu1 }
 0xdaf   : > { %v11705_v62 = vpop.f32.mrb[173].mxu1 }
 0xdb0   : > { %v11706_v48 = vadd.f32 %v11705_v62, %v11704_v35  ;;  %v11707_v54 = vpop.f32.mrb[174].mxu1 }
 0xdb1   : > { %v11708_v32 = vpop.f32.mrb[175].mxu1 }
 0xdb2   : > { %v11709_v39 = vadd.f32 %v11708_v32, %v11707_v54 }
 0xdb4   : > { %v5559_v51 = vpack.c.bf16 %v11709_v39, %v11706_v48 }
 0xdb6   : > { %v11710_v18 = vpop.f32.mrb[176].mxu1 }
 0xdb7   : > { %v11711_v7 = vpop.f32.mrb[177].mxu1 }
 0xdb8   : > { %v11712_v43 = vadd.f32 %v11711_v7, %v11710_v18  ;;  %v11713_v47 = vpop.f32.mrb[178].mxu1 }
 0xdb9   : > { %v11714_v3 = vpop.f32.mrb[179].mxu1 }
 0xdba   : > { %v11715_v49 = vadd.f32 %v11714_v3, %v11713_v47 }
 0xdbc   : > { %v5560_v50 = vpack.c.bf16 %v11715_v49, %v11712_v43 }
 0xdbe   : > { %v11716_v60 = vpop.f32.mrb[180].mxu1  ;;  %5921 = vmatprep.mubr.bf16.mxu0 %v5560_v50 }
 0xdbf   : > { %v11717_v6 = vpop.f32.mrb[181].mxu1  ;;  %5922 = vmatmul.mubr.bf16.vlgmr.msra.gmra.mrb[176].mxu0 %v5556_v12 }
 0xdc0   : > { %v11718_v19 = vadd.f32 %v11717_v6, %v11716_v60  ;;  %v11719_v28 = vpop.f32.mrb[182].mxu1 }
 0xdc1   : > { %v11720_v36 = vpop.f32.mrb[183].mxu1 }
 0xdc2   : > { %v11721_v9 = vadd.f32 %v11720_v36, %v11719_v28 }
 0xdc4   : > { %v5561_v15 = vpack.c.bf16 %v11721_v9, %v11718_v19 }
 0xdc6   : > { %v11722_v63 = vpop.f32.mrb[184].mxu1  ;;  %5929 = vmatprep.mubr.bf16.mxu0 %v5561_v15 }
 0xdc7   : > { %v11723_v0 = vpop.f32.mrb[185].mxu1  ;;  %5930 = vmatmul.mubr.bf16.gmra.mrb[180].mxu0 %v5557_v38 }
 0xdc8   : > { %v11724_v17 = vadd.f32 %v11723_v0, %v11722_v63  ;;  %v11725_v58 = vpop.f32.mrb[186].mxu1 }
 0xdc9   : > { %v11726_v10 = vpop.f32.mrb[187].mxu1 }
 0xdca   : > { %v11727_v29 = vadd.f32 %v11726_v10, %v11725_v58 }
 0xdcc   : > { %v5562_v25 = vpack.c.bf16 %v11727_v29, %v11724_v17 }
 0xdce   : > { %v11728_v27 = vpop.f32.mrb[188].mxu1  ;;  %5937 = vmatprep.mubr.bf16.mxu0 %v5562_v25 }
 0xdcf   : > { %v11729_v8 = vpop.f32.mrb[189].mxu1  ;;  %5938 = vmatmul.mubr.bf16.gmra.mrb[184].mxu0 %v5558_v30  ;;  %v5631_v30 = vrot.slane %v16739_v34, %v18027_v61 }
 0xdd0   : > { %v11730_v42 = vadd.f32 %v11729_v8, %v11728_v27  ;;  %v11731_v59 = vpop.f32.mrb[190].mxu1 }
 0xdd1   : > { %v11732_v1 = vpop.f32.mrb[191].mxu1 }
 0xdd2   : > { %v11733_v5 = vadd.f32 %v11732_v1, %v11731_v59 }
 0xdd4   : > { %v5563_v55 = vpack.c.bf16 %v11733_v5, %v11730_v42 }
 0xdd6   : > { %5945 = vmatprep.mubr.bf16.mxu0 %v5563_v55 }
 0xdd7   : > { %5946 = vmatmul.mubr.bf16.gmra.mrb[188].mxu0 %v5559_v51 }
 0xdd8   : > { %6394 = vmatprep.mubr.bf16.mxu0 %v18026_v45 }
 0xe52   : > { %v11750_v44 = vpop.f32.mrb[160].mxu0 }
 0xe53   : > { %v11751_v16 = vpop.f32.mrb[161].mxu0 }
 0xe54   : > { %v11752_v37 = vadd.f32 %v11751_v16, %v11750_v44  ;;  %v11753_v41 = vpop.f32.mrb[162].mxu0 }
 0xe55   : > { %v11754_v21 = vpop.f32.mrb[163].mxu0 }
 0xe56   : > { %v11755_v4 = vadd.f32 %v11754_v21, %v11753_v41  ;;  %v5859_v48 = vadd.f32 %v11752_v37, %v5631_v30 }
 0xe58   : > { %v5862_v51 = vadd.f32 %v11755_v4, %v5631_v30 }
 0xe5a   : > { %v11756_v14 = vpop.f32.mrb[164].mxu0 }
 0xe5b   : > { %v11757_v57 = vpop.f32.mrb[165].mxu0 }
 0xe5c   : > { %v11758_v11 = vadd.f32 %v11757_v57, %v11756_v14  ;;  %v11759_v56 = vpop.f32.mrb[166].mxu0  ;;  %v18028_v14 = vld [vmem:[#allocation34_spill] sm:$0xff] }
 0xe5d   : > { %v11760_v52 = vpop.f32.mrb[167].mxu0  ;;  %v16745_v57 = vrot.slane %v16739_v34, %v18028_v14 }
 0xe5e   : > { %v11761_v53 = vadd.f32 %v11760_v52, %v11759_v56  ;;  %v5867_v49 = vadd.f32 %v11758_v11, %v5631_v30 }
 0xe60   : > { %v5870_v19 = vadd.f32 %v11761_v53, %v5631_v30 }
 0xe62   : > { %v11762_v12 = vpop.f32.mrb[168].mxu0 }
 0xe63   : > { %v11763_v46 = vpop.f32.mrb[169].mxu0 }
 0xe64   : > { %v11764_v24 = vadd.f32 %v11763_v46, %v11762_v12  ;;  %v11765_v31 = vpop.f32.mrb[170].mxu0 }
 0xe65   : > { %v11766_v22 = vpop.f32.mrb[171].mxu0 }
 0xe66   : > { %v11767_v33 = vadd.f32 %v11766_v22, %v11765_v31  ;;  %v5875_v0 = vadd.f32 %v11764_v24, %v5631_v30 }
 0xe68   : > { %v5878_v29 = vadd.f32 %v11767_v33, %v5631_v30 }
 0xe6a   : > { %v11768_v26 = vpop.f32.mrb[172].mxu0 }
 0xe6b   : > { %v11769_v38 = vpop.f32.mrb[173].mxu0 }
 0xe6c   : > { %v11770_v13 = vadd.f32 %v11769_v38, %v11768_v26  ;;  %v11771_v20 = vpop.f32.mrb[174].mxu0 }
 0xe6d   : > { %v11772_v23 = vpop.f32.mrb[175].mxu0 }
 0xe6e   : > { %v11773_v2 = vadd.f32 %v11772_v23, %v11771_v20  ;;  %v5883_v1 = vadd.f32 %v11770_v13, %v5631_v30 }
 0xe70   : > { %v5886_v16 = vadd.f32 %v11773_v2, %v5631_v30 }
 0xe92   : > { %v11790_v35 = vpop.f32.mrb[176].mxu0 }
 0xe93   : > { %v11791_v62 = vpop.f32.mrb[177].mxu0 }
 0xe94   : > { %v11792_v54 = vadd.f32 %v11791_v62, %v11790_v35  ;;  %v11793_v32 = vpop.f32.mrb[178].mxu0 }
 0xe95   : > { %v11794_v39 = vpop.f32.mrb[179].mxu0 }
 0xe96   : > { %v5924_v18 = vadd.f32 %v11792_v54, %v5859_v48  ;;  %v11795_v7 = vadd.f32 %v11794_v39, %v11793_v32 }
 0xe98   : > { %v5927_v43 = vadd.f32 %v11795_v7, %v5862_v51  ;;  %5954 = vadd.xlane.f32.xlu0 %v5924_v18 }
 0xe9a   : > { %v11796_v47 = vpop.f32.mrb[180].mxu0  ;;  %5956 = vadd.xlane.f32.xlu1 %v5927_v43 }
 0xe9b   : > { %v11797_v3 = vpop.f32.mrb[181].mxu0 }
 0xe9c   : > { %v11798_v50 = vadd.f32 %v11797_v3, %v11796_v47  ;;  %v11799_v60 = vpop.f32.mrb[182].mxu0 }
 0xe9d   : > { %v11800_v6 = vpop.f32.mrb[183].mxu0 }
 0xe9e   : > { %v5932_v28 = vadd.f32 %v11798_v50, %v5867_v49  ;;  %v11801_v36 = vadd.f32 %v11800_v6, %v11799_v60 }
 0xea0   : > { %v5935_v9 = vadd.f32 %v11801_v36, %v5870_v19  ;;  %5958 = vadd.xlane.f32.xlu0 %v5932_v28 }
 0xea2   : > { %v11802_v15 = vpop.f32.mrb[184].mxu0  ;;  %5960 = vadd.xlane.f32.xlu1 %v5935_v9 }
 0xea3   : > { %v11803_v63 = vpop.f32.mrb[185].mxu0 }
 0xea4   : > { %v11804_v17 = vadd.f32 %v11803_v63, %v11802_v15  ;;  %v11805_v58 = vpop.f32.mrb[186].mxu0 }
 0xea5   : > { %v11806_v10 = vpop.f32.mrb[187].mxu0 }
 0xea6   : > { %v5940_v25 = vadd.f32 %v11804_v17, %v5875_v0  ;;  %v11807_v27 = vadd.f32 %v11806_v10, %v11805_v58 }
 0xea8   : > { %v5943_v8 = vadd.f32 %v11807_v27, %v5878_v29  ;;  %5962 = vadd.xlane.f32.xlu0 %v5940_v25 }
 0xeaa   : > { %v11808_v42 = vpop.f32.mrb[188].mxu0  ;;  %5964 = vadd.xlane.f32.xlu1 %v5943_v8 }
 0xeab   : > { %v11809_v59 = vpop.f32.mrb[189].mxu0 }
 0xeac   : > { %v11810_v5 = vadd.f32 %v11809_v59, %v11808_v42  ;;  %v11811_v55 = vpop.f32.mrb[190].mxu0 }
 0xead   : > { %v11812_v44 = vpop.f32.mrb[191].mxu0 }
 0xeae   : > { %v5948_v37 = vadd.f32 %v11810_v5, %v5883_v1  ;;  %v11813_v41 = vadd.f32 %v11812_v44, %v11811_v55  ;;  %v18029_v55 = vld [vmem:[#allocation36_spill] sm:$0xff] }
 0xeaf   : > { %v6057_v44 = vrot.slane %v16739_v34, %v18029_v55 }
 0xeb0   : > { %v5951_v21 = vadd.f32 %v11813_v41, %v5886_v16  ;;  %5966 = vadd.xlane.f32.xlu0 %v5948_v37 }
 0xeb2   : > { %5968 = vadd.xlane.f32.xlu1 %v5951_v21 }
 0xf25   : > { %v5955_v4 = vpop.xlane.xlu0 %5954 }
 0xf26   : > { %v5970_v11 = vmul.f32 0.03125, %v5955_v4 }
 0xf27   : > { %v5957_v56 = vpop.xlane.xlu1 %5956 }
 0xf28   : > { %v5978_v52 = vsub.f32 %v5924_v18, %v5970_v11  ;;  %v5971_v53 = vmul.f32 0.03125, %v5957_v56 }
 0xf2a   : > { %v5990_v12 = vmul.f32 %v16745_v57, %v5978_v52  ;;  %v5979_v46 = vsub.f32 %v5927_v43, %v5971_v53 }
 0xf2c   : > { %v16749_v24 = vmul.f32 %v16745_v57, %v5979_v46  ;;  %v5998_v31 = vmul.f32 %v5990_v12, %v5990_v12 }
 0xf2d   : > { %v5959_v22 = vpop.xlane.xlu0 %5958 }
 0xf2e   : > { %v5972_v33 = vmul.f32 0.03125, %v5959_v22  ;;  %6006 = vadd.xlane.f32.xlu0 %v5998_v31  ;;  %v5999_v26 = vmul.f32 %v16749_v24, %v16749_v24 }
 0xf2f   : > { %v5961_v38 = vpop.xlane.xlu1 %5960 }
 0xf30   : > { %v5980_v13 = vsub.f32 %v5932_v28, %v5972_v33  ;;  %v5973_v20 = vmul.f32 0.03125, %v5961_v38  ;;  %6008 = vadd.xlane.f32.xlu1 %v5999_v26 }
 0xf32   : > { %v16754_v23 = vmul.f32 %v16745_v57, %v5980_v13  ;;  %v5981_v2 = vsub.f32 %v5935_v9, %v5973_v20 }
 0xf34   : > { %v16757_v30 = vmul.f32 %v16745_v57, %v5981_v2  ;;  %v6000_v35 = vmul.f32 %v16754_v23, %v16754_v23 }
 0xf35   : > { %v5963_v62 = vpop.xlane.xlu0 %5962 }
 0xf36   : > { %v5974_v48 = vmul.f32 0.03125, %v5963_v62  ;;  %6010 = vadd.xlane.f32.xlu0 %v6000_v35  ;;  %v6001_v54 = vmul.f32 %v16757_v30, %v16757_v30 }
 0xf37   : > { %v5965_v32 = vpop.xlane.xlu1 %5964 }
 0xf38   : > { %v5982_v39 = vsub.f32 %v5940_v25, %v5974_v48  ;;  %v5975_v51 = vmul.f32 0.03125, %v5965_v32  ;;  %6012 = vadd.xlane.f32.xlu1 %v6001_v54 }
 0xf3a   : > { %v16764_v18 = vmul.f32 %v16745_v57, %v5982_v39  ;;  %v5983_v7 = vsub.f32 %v5943_v8, %v5975_v51 }
 0xf3c   : > { %v16767_v43 = vmul.f32 %v16745_v57, %v5983_v7  ;;  %v6002_v47 = vmul.f32 %v16764_v18, %v16764_v18 }
 0xf3d   : > { %v5967_v3 = vpop.xlane.xlu0 %5966 }
 0xf3e   : > { %v5976_v49 = vmul.f32 0.03125, %v5967_v3  ;;  %6014 = vadd.xlane.f32.xlu0 %v6002_v47  ;;  %v6003_v50 = vmul.f32 %v16767_v43, %v16767_v43 }
 0xf3f   : > { %v5969_v60 = vpop.xlane.xlu1 %5968 }
 0xf40   : > { %v5984_v6 = vsub.f32 %v5948_v37, %v5976_v49  ;;  %v5977_v19 = vmul.f32 0.03125, %v5969_v60  ;;  %6016 = vadd.xlane.f32.xlu1 %v6003_v50 }
 0xf42   : > { %v16774_v28 = vmul.f32 %v16745_v57, %v5984_v6  ;;  %v5985_v36 = vsub.f32 %v5951_v21, %v5977_v19  ;;  %v18030_v21 = vld [vmem:[#allocation37_spill] sm:$0xff] }
 0xf43   : > { %v6069_v4 = vrot.slane %v16739_v34, %v18030_v21 }
 0xf44   : > { %v16777_v9 = vmul.f32 %v16745_v57, %v5985_v36  ;;  %v6004_v15 = vmul.f32 %v16774_v28, %v16774_v28 }
 0xf46   : > { %6018 = vadd.xlane.f32.xlu0 %v6004_v15  ;;  %v6005_v63 = vmul.f32 %v16777_v9, %v16777_v9 }
 0xf48   : > { %6020 = vadd.xlane.f32.xlu1 %v6005_v63 }
 0xfbb   : > { %v6007_v0 = vpop.xlane.xlu0 %6006 }
 0xfbc   : > { %v6022_v17 = vmul.f32 0.03125, %v6007_v0 }
 0xfbd   : > { %v6009_v58 = vpop.xlane.xlu1 %6008 }
 0xfbe   : > { %v6030_v10 = vadd.f32 1e-06, %v6022_v17  ;;  %v6023_v29 = vmul.f32 0.03125, %v6009_v58 }
 0xfc0   : > { %13624 = vrsqrt.f32 %v6030_v10  ;;  %v6031_v25 = vadd.f32 1e-06, %v6023_v29  ;;  %v12977_v29 = vld [vmem:[%s13950_s19] ss:$12 sps:$4 sm:$0xff]  }
 0xfc2   : > { %13626 = vrsqrt.f32 %v6031_v25  ;;  %v12979_v25 = vld [vmem:[%s13950_s19 + $0x4] ss:$12 sps:$4 sm:$0xff]  }
 0xfc3   : > { %v6011_v27 = vpop.xlane.xlu0 %6010  ;;  %6362 = vmatprep.subr.bf16.mxu0 %v12979_v25  ;;  %v12987_v25 = vld [vmem:[%s13950_s19 + $0x48] ss:$12 sps:$4 sm:$0xff]  }
 0xfc4   : > { %v6024_v8 = vmul.f32 0.03125, %v6011_v27  ;;  %v12982_v27 = vld [vmem:[%s13950_s19 + $0x1c] ss:$12 sps:$4 sm:$0xff]   ;;  %6363 = vmatpush1.bf16.msra.mxu0 %v12977_v29  ;;  %v12990_v29 = vld [vmem:[%s13950_s19 + $0x20] ss:$12 sps:$4 sm:$0xff]  }
 0xfc5   : > { %v6013_v42 = vpop.xlane.xlu1 %6012  ;;  %6364 = vmatprep.subr.bf16.mxu0 %v12982_v27  ;;  %v12993_v27 = vld [vmem:[%s13950_s19 + $0x64] ss:$12 sps:$4 sm:$0xff]  }
 0xfc6   : > { %v6032_v59 = vadd.f32 1e-06, %v6024_v8  ;;  %v6025_v1 = vmul.f32 0.03125, %v6013_v42  ;;  %v12980_v8 = vld [vmem:[%s13950_s19 + $0x18] ss:$12 sps:$4 sm:$0xff]  }
 0xfc8   : > { %13628 = vrsqrt.f32 %v6032_v59  ;;  %v6033_v5 = vadd.f32 1e-06, %v6025_v1  ;;  %6365 = vmatpush1.bf16.msra.mxu0 %v12980_v8  ;;  %v12994_v8 = vld [vmem:[%s13950_s19 + $0x38] ss:$12 sps:$4 sm:$0xff]  }
 0xfca   : > { %v13625_v16 = vpop.eup %13624  ;;  %13630 = vrsqrt.f32 %v6033_v5 }
 0xfcb   : > { %v6015_v37 = vpop.xlane.xlu0 %6014  ;;  %v6046_v41 = vmul.f32 %v13625_v16, %v5990_v12 }
 0xfcc   : > { %v13627_v11 = vpop.eup %13626  ;;  %v6026_v56 = vmul.f32 0.03125, %v6015_v37 }
 0xfcd   : > { %v6017_v52 = vpop.xlane.xlu1 %6016  ;;  %v6058_v53 = vmul.f32 %v6057_v44, %v6046_v41  ;;  %v6047_v46 = vmul.f32 %v13627_v11, %v16749_v24 }
 0xfce   : > { %v6034_v31 = vadd.f32 1e-06, %v6026_v56  ;;  %v6027_v22 = vmul.f32 0.03125, %v6017_v52 }
 0xfcf   : > { %v16788_v33 = vadd.f32 %v6069_v4, %v6058_v53  ;;  %v6059_v26 = vmul.f32 %v6057_v44, %v6047_v46 }
 0xfd0   : > { %13632 = vrsqrt.f32 %v6034_v31  ;;  %v6035_v38 = vadd.f32 1e-06, %v6027_v22 }
 0xfd1   : > { %6078 = vadd.xlane.f32.xlu0 %v16788_v33  ;;  %v16791_v13 = vadd.f32 %v6069_v4, %v6059_v26 }
 0xfd2   : > { %v13629_v12 = vpop.eup %13628  ;;  %13634 = vrsqrt.f32 %v6035_v38 }
 0xfd3   : > { %6080 = vadd.xlane.f32.xlu1 %v16791_v13  ;;  %v6019_v20 = vpop.xlane.xlu0 %6018  ;;  %v6048_v2 = vmul.f32 %v13629_v12, %v16754_v23 }
 0xfd4   : > { %v13631_v35 = vpop.eup %13630  ;;  %v6028_v24 = vmul.f32 0.03125, %v6019_v20 }
 0xfd5   : > { %v6021_v62 = vpop.xlane.xlu1 %6020  ;;  %v6060_v48 = vmul.f32 %v6057_v44, %v6048_v2  ;;  %v6049_v54 = vmul.f32 %v13631_v35, %v16757_v30 }
 0xfd6   : > { %v6036_v32 = vadd.f32 1e-06, %v6028_v24  ;;  %v6029_v39 = vmul.f32 0.03125, %v6021_v62 }
 0xfd7   : > { %v16796_v51 = vadd.f32 %v6069_v4, %v6060_v48  ;;  %v6061_v7 = vmul.f32 %v6057_v44, %v6049_v54 }
 0xfd8   : > { %13636 = vrsqrt.f32 %v6036_v32  ;;  %v6037_v47 = vadd.f32 1e-06, %v6029_v39 }
 0xfd9   : > { %6082 = vadd.xlane.f32.xlu0 %v16796_v51  ;;  %v16799_v3 = vadd.f32 %v6069_v4, %v6061_v7 }
 0xfda   : > { %v13633_v49 = vpop.eup %13632  ;;  %13638 = vrsqrt.f32 %v6037_v47 }
 0xfdb   : > { %6084 = vadd.xlane.f32.xlu1 %v16799_v3  ;;  %v6050_v23 = vmul.f32 %v13633_v49, %v16764_v18 }
 0xfdc   : > { %v13635_v50 = vpop.eup %13634 }
 0xfdd   : > { %v6062_v60 = vmul.f32 %v6057_v44, %v6050_v23  ;;  %v6051_v30 = vmul.f32 %v13635_v50, %v16767_v43 }
 0xfdf   : > { %v16804_v6 = vadd.f32 %v6069_v4, %v6062_v60  ;;  %v6063_v19 = vmul.f32 %v6057_v44, %v6051_v30 }
 0xfe1   : > { %6086 = vadd.xlane.f32.xlu0 %v16804_v6  ;;  %v16807_v36 = vadd.f32 %v6069_v4, %v6063_v19 }
 0xfe2   : > { %v13637_v15 = vpop.eup %13636 }
 0xfe3   : > { %6088 = vadd.xlane.f32.xlu1 %v16807_v36  ;;  %v6052_v18 = vmul.f32 %v13637_v15, %v16774_v28 }
 0xfe4   : > { %v13639_v63 = vpop.eup %13638 }
 0xfe5   : > { %v6064_v0 = vmul.f32 %v6057_v44, %v6052_v18  ;;  %v6053_v43 = vmul.f32 %v13639_v63, %v16777_v9  ;;  %v12985_v63 = vld [vmem:[%s13950_s19 + $0x34] ss:$12 sps:$4 sm:$0xff]  }
 0xfe6   : > { %6366 = vmatprep.subr.bf16.mxu0 %v12985_v63 }
 0xfe7   : > { %v16812_v17 = vadd.f32 %v6069_v4, %v6064_v0  ;;  %v6065_v58 = vmul.f32 %v6057_v44, %v6053_v43  ;;  %v12986_v0 = vld [vmem:[%s13950_s19 + $0x8] ss:$12 sps:$4 sm:$0xff]   ;;  %v12983_v43 = vld [vmem:[%s13950_s19 + $0x30] ss:$12 sps:$4 sm:$0xff]  }
 0xfe8   : > { %12410 = vmatprep.subr.bf16.mxu1 %v12986_v0  ;;  %6367 = vmatpush1.bf16.msra.mxu0 %v12983_v43 }
 0xfe9   : > { %6090 = vadd.xlane.f32.xlu0 %v16812_v17  ;;  %v16815_v10 = vadd.f32 %v6069_v4, %v6065_v58  ;;  %12411 = vmatpush3.bf16.msra.mxu1 %v12986_v0  ;;  %v12989_v58 = vld [vmem:[%s13950_s19 + $0x4c] ss:$12 sps:$4 sm:$0xff]  }
 0xfea   : > { %6368 = vmatprep.subr.bf16.mxu0 %v12989_v58  ;;  %12412 = vmatprep.subr.bf16.mxu1 %v12990_v29  ;;  %v18031_v0 = vld [vmem:[#allocation71_spill] sm:$0xff] }
 0xfeb   : > { %6092 = vadd.xlane.f32.xlu1 %v16815_v10  ;;  %v6189_v43 = vrot.slane %v16739_v34, %v18031_v0 }
 0xfec   : > { %6369 = vmatpush1.bf16.msra.mxu0 %v12987_v25 }
 0xfed   : > { %12413 = vmatpush3.bf16.msra.mxu1 %v12990_v29  ;;  %6370 = vmatprep.subr.bf16.mxu0 %v12993_v27 }
 0xfee   : > { %12414 = vmatprep.subr.bf16.mxu1 %v12994_v8 }
 0xff1   : > { %12415 = vmatpush3.bf16.msra.mxu1 %v12994_v8 }
0x105e   : > { %v6079_v28 = vpop.xlane.xlu0 %6078 }
0x105f   : > { %v6094_v42 = vmul.f32 0.03125, %v6079_v28  ;;  %v12991_v28 = vld [vmem:[%s13950_s19 + $0x60] ss:$12 sps:$4 sm:$0xff]  }
0x1060   : > { %v6081_v9 = vpop.xlane.xlu1 %6080  ;;  %6371 = vmatpush1.bf16.msra.mxu0 %v12991_v28 }
0x1061   : > { %v6102_v59 = vsub.f32 %v16788_v33, %v6094_v42  ;;  %v6095_v1 = vmul.f32 0.03125, %v6081_v9  ;;  %v12997_v42 = vld [vmem:[%s13950_s19 + $0x7c] ss:$12 sps:$4 sm:$0xff]  }
0x1062   : > { %v12998_v9 = vld [vmem:[%s13950_s19 + $0x50] ss:$12 sps:$4 sm:$0xff]   ;;  %6372 = vmatprep.subr.bf16.mxu0 %v12997_v42 }
0x1063   : > { %v16824_v5 = vmul.f32 %v6102_v59, %v16745_v57  ;;  %v6103_v44 = vsub.f32 %v16791_v13, %v6095_v1  ;;  %v12995_v59 = vld [vmem:[%s13950_s19 + $0x78] ss:$12 sps:$4 sm:$0xff]   ;;  %v13001_v1 = vld [vmem:[%s13950_s19 + $0x94] ss:$12 sps:$4 sm:$0xff]   ;;  %12416 = vmatprep.subr.bf16.mxu1 %v12998_v9 }
0x1064   : > { %6373 = vmatpush1.bf16.msra.mxu0 %v12995_v59  ;;  %12417 = vmatpush3.bf16.msra.mxu1 %v12998_v9 }
0x1065   : > { %v16828_v16 = vmul.f32 %v6103_v44, %v16745_v57  ;;  %v6118_v37 = vmul.f32 %v16824_v5, %v16824_v5  ;;  %v13002_v44 = vld [vmem:[%s13950_s19 + $0x68] ss:$12 sps:$4 sm:$0xff]   ;;  %6374 = vmatprep.subr.bf16.mxu0 %v13001_v1 }
0x1066   : > { %v6083_v41 = vpop.xlane.xlu0 %6082  ;;  %12418 = vmatprep.subr.bf16.mxu1 %v13002_v44 }
0x1067   : > { %v6096_v4 = vmul.f32 0.03125, %v6083_v41  ;;  %6126 = vadd.xlane.f32.xlu0 %v6118_v37  ;;  %v6119_v11 = vmul.f32 %v16828_v16, %v16828_v16  ;;  %v12999_v37 = vld [vmem:[%s13950_s19 + $0x90] ss:$12 sps:$4 sm:$0xff]   ;;  %v13005_v41 = vld [vmem:[%s13950_s19 + $0xac] ss:$12 sps:$4 sm:$0xff]  }
0x1068   : > { %v6085_v56 = vpop.xlane.xlu1 %6084  ;;  %6375 = vmatpush1.bf16.msra.mxu0 %v12999_v37  ;;  %12419 = vmatpush3.bf16.msra.mxu1 %v13002_v44 }
0x1069   : > { %v6104_v52 = vsub.f32 %v16796_v51, %v6096_v4  ;;  %v6097_v53 = vmul.f32 0.03125, %v6085_v56  ;;  %6128 = vadd.xlane.f32.xlu1 %v6119_v11  ;;  %v13006_v4 = vld [vmem:[%s13950_s19 + $0x80] ss:$12 sps:$4 sm:$0xff]   ;;  %v13003_v11 = vld [vmem:[%s13950_s19 + $0xa8] ss:$12 sps:$4 sm:$0xff]   ;;  %6376 = vmatprep.subr.bf16.mxu0 %v13005_v41 }
0x106a   : > { %12420 = vmatprep.subr.bf16.mxu1 %v13006_v4  ;;  %v13007_v56 = vld [vmem:[%s13950_s19 + $0x98] ss:$12 sps:$4 sm:$0xff]  }
0x106b   : > { %v16836_v46 = vmul.f32 %v6104_v52, %v16745_v57  ;;  %v6105_v31 = vsub.f32 %v16799_v3, %v6097_v53  ;;  %v13008_v52 = vld [vmem:[%s13950_s19 + $0xb0] ss:$12 sps:$4 sm:$0xff]  }
0x106c   : > { %6377 = vmatpush1.bf16.msra.mxu0 %v13003_v11  ;;  %12421 = vmatpush3.bf16.msra.mxu1 %v13006_v4 }
0x106d   : > { %v16840_v22 = vmul.f32 %v6105_v31, %v16745_v57  ;;  %v6120_v26 = vmul.f32 %v16836_v46, %v16836_v46  ;;  %12422 = vmatprep.subr.bf16.mxu1 %v13007_v56 }
0x106e   : > { %v6087_v38 = vpop.xlane.xlu0 %6086 }
0x106f   : > { %v6098_v12 = vmul.f32 0.03125, %v6087_v38  ;;  %6130 = vadd.xlane.f32.xlu0 %v6120_v26  ;;  %v6121_v20 = vmul.f32 %v16840_v22, %v16840_v22 }
0x1070   : > { %v6089_v2 = vpop.xlane.xlu1 %6088  ;;  %12423 = vmatpush3.bf16.msra.mxu1 %v13007_v56 }
0x1071   : > { %v6106_v35 = vsub.f32 %v16804_v6, %v6098_v12  ;;  %v6099_v24 = vmul.f32 0.03125, %v6089_v2  ;;  %6132 = vadd.xlane.f32.xlu1 %v6121_v20  ;;  %12424 = vmatprep.subr.bf16.mxu1 %v13008_v52 }
0x1073   : > { %v16848_v62 = vmul.f32 %v6106_v35, %v16745_v57  ;;  %v6107_v48 = vsub.f32 %v16807_v36, %v6099_v24 }
0x1074   : > { %12425 = vmatpush3.bf16.msra.mxu1 %v13008_v52 }
0x1075   : > { %v16852_v54 = vmul.f32 %v6107_v48, %v16745_v57  ;;  %v6122_v32 = vmul.f32 %v16848_v62, %v16848_v62 }
0x1076   : > { %v6091_v39 = vpop.xlane.xlu0 %6090 }
0x1077   : > { %v6100_v7 = vmul.f32 0.03125, %v6091_v39  ;;  %6134 = vadd.xlane.f32.xlu0 %v6122_v32  ;;  %v6123_v47 = vmul.f32 %v16852_v54, %v16852_v54 }
0x1078   : > { %v6093_v49 = vpop.xlane.xlu1 %6092 }
0x1079   : > { %v6108_v23 = vsub.f32 %v16812_v17, %v6100_v7  ;;  %v6101_v50 = vmul.f32 0.03125, %v6093_v49  ;;  %6136 = vadd.xlane.f32.xlu1 %v6123_v47  ;;  %v6177_v7 = vrot.slane %v16739_v34, %v18003_v40 }
0x107b   : > { %v16860_v60 = vmul.f32 %v6108_v23, %v16745_v57  ;;  %v6109_v30 = vsub.f32 %v16815_v10, %v6101_v50 }
0x107d   : > { %v16864_v19 = vmul.f32 %v6109_v30, %v16745_v57  ;;  %v6124_v15 = vmul.f32 %v16860_v60, %v16860_v60 }
0x107f   : > { %6138 = vadd.xlane.f32.xlu0 %v6124_v15  ;;  %v6125_v18 = vmul.f32 %v16864_v19, %v16864_v19 }
0x1081   : > { %6140 = vadd.xlane.f32.xlu1 %v6125_v18 }
0x10f4   : > { %v6127_v53 = vpop.xlane.xlu0 %6126 }
0x10f5   : > { %v6142_v31 = vmul.f32 0.03125, %v6127_v53 }
0x10f6   : > { %v6129_v26 = vpop.xlane.xlu1 %6128 }
0x10f7   : > { %v6150_v38 = vadd.f32 1e-06, %v6142_v31  ;;  %v6143_v12 = vmul.f32 0.03125, %v6129_v26 }
0x10f9   : > { %13640 = vrsqrt.f32 %v6150_v38  ;;  %v6151_v20 = vadd.f32 1e-06, %v6143_v12 }
0x10fb   : > { %13642 = vrsqrt.f32 %v6151_v20 }
0x10fc   : > { %v6131_v2 = vpop.xlane.xlu0 %6130 }
0x10fd   : > { %v6144_v35 = vmul.f32 0.03125, %v6131_v2 }
0x10fe   : > { %v6133_v24 = vpop.xlane.xlu1 %6132 }
0x10ff   : > { %v6152_v48 = vadd.f32 1e-06, %v6144_v35  ;;  %v6145_v32 = vmul.f32 0.03125, %v6133_v24 }
0x1101   : > { %13644 = vrsqrt.f32 %v6152_v48  ;;  %v6153_v39 = vadd.f32 1e-06, %v6145_v32 }
0x1103   : > { %v13641_v47 = vpop.eup %13640  ;;  %13646 = vrsqrt.f32 %v6153_v39 }
0x1104   : > { %v6166_v49 = vmul.f32 %v13641_v47, %v16824_v5  ;;  %v6135_v23 = vpop.xlane.xlu0 %6134 }
0x1105   : > { %v13643_v50 = vpop.eup %13642  ;;  %v6146_v30 = vmul.f32 0.03125, %v6135_v23 }
0x1106   : > { %v6178_v15 = vmul.f32 %v6177_v7, %v6166_v49  ;;  %v6167_v18 = vmul.f32 %v13643_v50, %v16828_v16  ;;  %v6137_v63 = vpop.xlane.xlu1 %6136 }
0x1107   : > { %v6154_v58 = vadd.f32 1e-06, %v6146_v30  ;;  %v6147_v29 = vmul.f32 0.03125, %v6137_v63 }
0x1108   : > { %v6179_v25 = vmul.f32 %v6177_v7, %v6167_v18  ;;  %v6190_v8 = vadd.f32 %v6189_v43, %v6178_v15  ;;  %v18032_v15 = vld [vmem:[#allocation72_spill] sm:$0xff] }
0x1109   : > { %13648 = vrsqrt.f32 %v6154_v58  ;;  %v6155_v27 = vadd.f32 1e-06, %v6147_v29  ;;  %v6503_v18 = vrot.slane %v16739_v34, %v18032_v15 }
0x110a   : > { %v6191_v28 = vadd.f32 %v6189_v43, %v6179_v25 }
0x110b   : > { %v13645_v42 = vpop.eup %13644  ;;  %13650 = vrsqrt.f32 %v6155_v27 }
0x110c   : > { %v6139_v5 = vpop.xlane.xlu0 %6138  ;;  %v6198_v9 = vpack.c.bf16 %v6191_v28, %v6190_v8  ;;  %v6168_v59 = vmul.f32 %v13645_v42, %v16836_v46 }
0x110d   : > { %v13647_v1 = vpop.eup %13646  ;;  %v6148_v44 = vmul.f32 0.03125, %v6139_v5 }
0x110e   : > { %v6141_v16 = vpop.xlane.xlu1 %6140  ;;  %6395 = vmatmul.mubr.bf16.vlgmr.msra.gmra.mrb[192].mxu0 %v6198_v9  ;;  %12426 = vmatprep.mubr.bf16.mxu1 %v6198_v9  ;;  %v6169_v37 = vmul.f32 %v13647_v1, %v16840_v22  ;;  %v6180_v41 = vmul.f32 %v6177_v7, %v6168_v59 }
0x110f   : > { %v6156_v4 = vadd.f32 1e-06, %v6148_v44  ;;  %v6149_v11 = vmul.f32 0.03125, %v6141_v16  ;;  %6404 = vmatprep.mubr.bf16.mxu0 %v18026_v45 }
0x1110   : > { %v6181_v56 = vmul.f32 %v6177_v7, %v6169_v37  ;;  %v6192_v53 = vadd.f32 %v6189_v43, %v6180_v41 }
0x1111   : > { %13652 = vrsqrt.f32 %v6156_v4  ;;  %v6157_v52 = vadd.f32 1e-06, %v6149_v11 }
0x1112   : > { %v6193_v31 = vadd.f32 %v6189_v43, %v6181_v56 }
0x1113   : > { %v13649_v26 = vpop.eup %13648  ;;  %13654 = vrsqrt.f32 %v6157_v52 }
0x1114   : > { %v6199_v46 = vpack.c.bf16 %v6193_v31, %v6192_v53  ;;  %v6170_v38 = vmul.f32 %v13649_v26, %v16848_v62  ;;  %v18033_v31 = vld [vmem:[#allocation73_spill] sm:$0xff] }
0x1115   : > { %v13651_v12 = vpop.eup %13650  ;;  %v6515_v26 = vrot.slane %v16739_v34, %v18033_v31 }
0x1116   : > { %6405 = vmatmul.mubr.bf16.gmra.mrb[196].mxu0 %v6199_v46  ;;  %12427 = vmatmul.mubr.bf16.vlgmr.msra.gmra.mrb[192].mxu1 %v6199_v46  ;;  %v6171_v22 = vmul.f32 %v13651_v12, %v16852_v54  ;;  %v6182_v20 = vmul.f32 %v6177_v7, %v6170_v38 }
0x1117   : > { %6414 = vmatprep.mubr.bf16.mxu0 %v18026_v45 }
0x1118   : > { %v6183_v2 = vmul.f32 %v6177_v7, %v6171_v22  ;;  %v6194_v35 = vadd.f32 %v6189_v43, %v6182_v20 }
0x111a   : > { %v6195_v24 = vadd.f32 %v6189_v43, %v6183_v2 }
0x111b   : > { %v13653_v48 = vpop.eup %13652 }
0x111c   : > { %v6200_v32 = vpack.c.bf16 %v6195_v24, %v6194_v35  ;;  %v6172_v39 = vmul.f32 %v13653_v48, %v16860_v60 }
0x111d   : > { %v13655_v47 = vpop.eup %13654 }
0x111e   : > { %6415 = vmatmul.mubr.bf16.gmra.mrb[200].mxu0 %v6200_v32  ;;  %12430 = vmatprep.mubr.bf16.mxu1 %v6200_v32  ;;  %v6173_v62 = vmul.f32 %v13655_v47, %v16864_v19  ;;  %v6184_v49 = vmul.f32 %v6177_v7, %v6172_v39  ;;  %v16908_v19 = vld [vmem:[%s17826_s12 + $0x8] sm:$0x1f] }
0x111f   : > { %6424 = vmatprep.mubr.bf16.mxu0 %v18026_v45 }
0x1120   : > { %v6185_v54 = vmul.f32 %v6177_v7, %v6173_v62  ;;  %v6196_v23 = vadd.f32 %v6189_v43, %v6184_v49  ;;  %v6527_v7 = vrot.slane %v16908_v19, %v18028_v14 }
0x1122   : > { %v6197_v50 = vadd.f32 %v6189_v43, %v6185_v54 }
0x1124   : > { %v6201_v30 = vpack.c.bf16 %v6197_v50, %v6196_v23 }
0x1126   : > { %6425 = vmatmul.mubr.bf16.gmra.mrb[204].mxu0 %v6201_v30  ;;  %12431 = vmatmul.mubr.bf16.gmra.mrb[196].mxu1 %v6201_v30 }
0x11e1   : > { %v6396_v63 = vpop.f32.mrb[192].mxu0 }
0x11e2   : > { %v6398_v60 = vpop.f32.mrb[193].mxu0  ;;  %v6504_v29 = vadd.f32 %v6503_v18, %v6396_v63 }
0x11e3   : > { %v6400_v58 = vpop.f32.mrb[194].mxu0  ;;  %v6516_v20 = vadd.f32 %v6515_v26, %v6398_v60 }
0x11e4   : > { %v6505_v25 = vadd.f32 %v6503_v18, %v6400_v58  ;;  %v6402_v27 = vpop.f32.mrb[195].mxu0 }
0x11e5   : > { %v6517_v32 = vadd.f32 %v6515_v26, %v6402_v27 }
0x11e6   : > { %v6741_v8 = vpack.c.bf16 %v6505_v25, %v6504_v29 }
0x11e8   : > { %12474 = vmatprep.mubr.bf16.mxu0 %v6741_v8 }
0x11e9   : > { %v6406_v43 = vpop.f32.mrb[196].mxu0  ;;  %v12428_v28 = vpop.f32.mrb[192].mxu1 }
0x11ea   : > { %v16912_v42 = vadd.f32 %v6503_v18, %v6406_v43  ;;  %v6408_v5 = vpop.f32.mrb[197].mxu0  ;;  %v6469_v9 = vpop.f32.mrb[193].mxu1  ;;  %v6530_v44 = vadd.f32 %v12428_v28, %v6527_v7 }
0x11eb   : > { %v6410_v59 = vpop.f32.mrb[198].mxu0  ;;  %v12429_v1 = vpop.f32.mrb[194].mxu1  ;;  %v6528_v11 = vadd.f32 %v6527_v7, %v6469_v9  ;;  %v6518_v60 = vadd.f32 %v6515_v26, %v6408_v5 }
0x11ec   : > { %v16914_v16 = vadd.f32 %v6503_v18, %v6410_v59  ;;  %v6531_v37 = vadd.f32 %v12429_v1, %v6527_v7  ;;  %v6412_v41 = vpop.f32.mrb[199].mxu0  ;;  %v6472_v4 = vpop.f32.mrb[195].mxu1 }
0x11ed   : > { %v6529_v56 = vadd.f32 %v6527_v7, %v6472_v4  ;;  %v6519_v8 = vadd.f32 %v6515_v26, %v6412_v41 }
0x11ee   : > { %v6742_v52 = vpack.c.bf16 %v16914_v16, %v16912_v42  ;;  %v6600_v53 = vpack.c.bf16 %v6531_v37, %v6530_v44 }
0x11ef   : > { %v6599_v46 = vpack.c.bf16 %v6529_v56, %v6528_v11 }
0x11f1   : > { %v6416_v38 = vpop.f32.mrb[200].mxu0  ;;  %12434 = vmatprep.subr.bf16.mxu1 %v6599_v46 }
0x11f2   : > { %v16920_v12 = vadd.f32 %v6503_v18, %v6416_v38  ;;  %v6418_v22 = vpop.f32.mrb[201].mxu0  ;;  %12435 = vmatpush3.bf16.msra.mxu1 %v6599_v46 }
0x11f3   : > { %v6520_v2 = vadd.f32 %v6515_v26, %v6418_v22  ;;  %v6420_v35 = vpop.f32.mrb[202].mxu0  ;;  %12436 = vmatprep.subr.bf16.mxu1 %v6600_v53 }
0x11f4   : > { %v16922_v24 = vadd.f32 %v6503_v18, %v6420_v35  ;;  %v6422_v48 = vpop.f32.mrb[203].mxu0 }
0x11f5   : > { %v6536_v39 = vmax.f32 %v6516_v20, %v6520_v2  ;;  %v6521_v47 = vadd.f32 %v6515_v26, %v6422_v48 }
0x11f6   : > { %v6743_v34 = vpack.c.bf16 %v16922_v24, %v16920_v12  ;;  %12437 = vmatpush3.bf16.msra.mxu1 %v6600_v53 }
0x11f7   : > { %v6537_v62 = vmax.f32 %v6517_v32, %v6521_v47 }
0x11f9   : > { %v6540_v49 = vmax.f32 %v6536_v39, %v6537_v62  ;;  %v6426_v54 = vpop.f32.mrb[204].mxu0  ;;  %v12432_v23 = vpop.f32.mrb[196].mxu1 }
0x11fa   : > { %v16926_v50 = vadd.f32 %v6503_v18, %v6426_v54  ;;  %v6428_v30 = vpop.f32.mrb[205].mxu0  ;;  %v6485_v63 = vpop.f32.mrb[197].mxu1  ;;  %v6534_v27 = vadd.f32 %v12432_v23, %v6527_v7 }
0x11fb   : > { %v6522_v58 = vadd.f32 %v6515_v26, %v6428_v30  ;;  %v6430_v29 = vpop.f32.mrb[206].mxu0  ;;  %v12433_v25 = vpop.f32.mrb[198].mxu1  ;;  %v6532_v44 = vadd.f32 %v6527_v7, %v6485_v63 }
0x11fc   : > { %v16928_v43 = vadd.f32 %v6503_v18, %v6430_v29  ;;  %v6535_v28 = vadd.f32 %v12433_v25, %v6527_v7  ;;  %v6432_v9 = vpop.f32.mrb[207].mxu0  ;;  %v6488_v59 = vpop.f32.mrb[199].mxu1 }
0x11fd   : > { %v6538_v1 = vmax.f32 %v6518_v60, %v6522_v58  ;;  %v6523_v37 = vadd.f32 %v6515_v26, %v6432_v9  ;;  %v6533_v4 = vadd.f32 %v6527_v7, %v6488_v59 }
0x11fe   : > { %v6744_v11 = vpack.c.bf16 %v16928_v43, %v16926_v50  ;;  %v6602_v56 = vpack.c.bf16 %v6535_v28, %v6534_v27 }
0x11ff   : > { %v6539_v53 = vmax.f32 %v6519_v8, %v6523_v37  ;;  %v6601_v5 = vpack.c.bf16 %v6533_v4, %v6532_v44 }
0x1201   : > { %v6541_v46 = vmax.f32 %v6538_v1, %v6539_v53  ;;  %12438 = vmatprep.subr.bf16.mxu1 %v6601_v5 }
0x1202   : > { %12439 = vmatpush3.bf16.msra.mxu1 %v6601_v5 }
0x1203   : > { %v6542_v41 = vmax.f32 %v6540_v49, %v6541_v46  ;;  %12440 = vmatprep.subr.bf16.mxu1 %v6602_v56 }
0x1205   : > { %v6543_v18 = vrot.slane %v6542_v41, 4 }
0x1206   : > { %12441 = vmatpush3.bf16.msra.mxu1 %v6602_v56 }
0x1207   : > { %v6544_v38 = vmax.f32 %v6542_v41, %v6543_v18 }
0x1209   : > { %v6545_v22 = vrot.slane %v6544_v38, 2 }
0x120b   : > { %v6546_v35 = vmax.f32 %v6544_v38, %v6545_v22 }
0x120d   : > { %v6547_v48 = vrot.slane %v6546_v35, 1 }
0x120f   : > { %v6548_v39 = vmax.f32 %v6546_v35, %v6547_v48 }
0x1211   : > { %v6549_v26 = vsub.f32 %v6516_v20, %v6548_v39  ;;  %v6550_v7 = vsub.f32 %v6517_v32, %v6548_v39  ;;  %v6551_v62 = vsub.f32 %v6518_v60, %v6548_v39  ;;  %v6552_v54 = vsub.f32 %v6519_v8, %v6548_v39 }
0x1212   : > { %v6553_v23 = vsub.f32 %v6520_v2, %v6548_v39  ;;  %v6554_v30 = vsub.f32 %v6521_v47, %v6548_v39  ;;  %v6555_v63 = vsub.f32 %v6522_v58, %v6548_v39  ;;  %v6556_v29 = vsub.f32 %v6523_v37, %v6548_v39 }
0x1213   : > { %v6557_v25 = vmul.f32 1.442695, %v6549_v26  ;;  %v6559_v27 = vmul.f32 1.442695, %v6550_v7  ;;  %v6561_v28 = vmul.f32 1.442695, %v6551_v62 }
0x1214   : > { %v6563_v49 = vmul.f32 1.442695, %v6552_v54  ;;  %v6565_v9 = vmul.f32 1.442695, %v6553_v23  ;;  %v6567_v59 = vmul.f32 1.442695, %v6554_v30 }
0x1215   : > { %13656 = vpow2.f32 %v6557_v25  ;;  %v6569_v1 = vmul.f32 1.442695, %v6555_v63  ;;  %v6571_v20 = vmul.f32 1.442695, %v6556_v29 }
0x1216   : > { %13658 = vpow2.f32 %v6559_v27 }
0x1217   : > { %13660 = vpow2.f32 %v6561_v28 }
0x1218   : > { %13662 = vpow2.f32 %v6563_v49 }
0x1219   : > { %13664 = vpow2.f32 %v6565_v9 }
0x121a   : > { %13666 = vpow2.f32 %v6567_v59 }
0x121b   : > { %13668 = vpow2.f32 %v6569_v1 }
0x121c   : > { %13670 = vpow2.f32 %v6571_v20 }
0x121f   : > { %v13657_v32 = vpop.eup %13656 }
0x1220   : > { %v13659_v60 = vpop.eup %13658 }
0x1221   : > { %v6573_v2 = vadd.f32 %v13659_v60, %v13657_v32  ;;  %v13661_v47 = vpop.eup %13660 }
0x1222   : > { %v13663_v8 = vpop.eup %13662 }
0x1223   : > { %v6574_v58 = vadd.f32 %v13661_v47, %v6573_v2  ;;  %v13665_v37 = vpop.eup %13664 }
0x1224   : > { %v13667_v56 = vpop.eup %13666 }
0x1225   : > { %v6575_v44 = vadd.f32 %v13663_v8, %v6574_v58  ;;  %v13669_v5 = vpop.eup %13668 }
0x1226   : > { %v13671_v41 = vpop.eup %13670 }
0x1227   : > { %v6576_v4 = vadd.f32 %v13665_v37, %v6575_v44  ;;  %v13009_v44 = vld [vmem:[%s13955_s24] sm:$0xff]  }
0x1228   : > { %12482 = vmatprep.subr.bf16.mxu1 %v13009_v44 }
0x1229   : > { %v6577_v53 = vadd.f32 %v13667_v56, %v6576_v4  ;;  %v13011_v4 = vld [vmem:[%s13955_s24 + $0x10] sm:$0xff]  }
0x122b   : > { %v6578_v46 = vadd.f32 %v13669_v5, %v6577_v53  ;;  %v13013_v53 = vld [vmem:[%s13955_s24 + $0x20] sm:$0xff]  }
0x122d   : > { %v6579_v18 = vadd.f32 %v13671_v41, %v6578_v46 }
0x122f   : > { %v6580_v38 = vrot.slane %v6579_v18, 4 }
0x1231   : > { %v6581_v22 = vadd.f32 %v6580_v38, %v6579_v18 }
0x1233   : > { %v6582_v35 = vrot.slane %v6581_v22, 2 }
0x1235   : > { %v6583_v48 = vadd.f32 %v6582_v35, %v6581_v22 }
0x1237   : > { %v6584_v39 = vrot.slane %v6583_v48, 1 }
0x1239   : > { %v6585_v26 = vadd.f32 %v6584_v39, %v6583_v48 }
0x123b   : > { %13672 = vrcp.f32 %v6585_v26 }
0x1245   : > { %v13673_v7 = vpop.eup %13672 }
0x1246   : > { %v6587_v62 = vmul.f32 %v13673_v7, %v13657_v32  ;;  %v6588_v54 = vmul.f32 %v13673_v7, %v13659_v60  ;;  %v6589_v23 = vmul.f32 %v13673_v7, %v13661_v47  ;;  %v6590_v30 = vmul.f32 %v13673_v7, %v13663_v8 }
0x1247   : > { %v6591_v63 = vmul.f32 %v13673_v7, %v13665_v37  ;;  %v6592_v29 = vmul.f32 %v13673_v7, %v13667_v56  ;;  %v6593_v25 = vmul.f32 %v13673_v7, %v13669_v5  ;;  %v6594_v27 = vmul.f32 %v13673_v7, %v13671_v41  ;;  %v13010_v37 = vld [vmem:[%s13955_s24 + $0x8] sm:$0xff]   ;;  %v13012_v56 = vld [vmem:[%s13955_s24 + $0x18] sm:$0xff]  }
0x1248   : > { %v6595_v28 = vpack.c.bf16 %v6588_v54, %v6587_v62  ;;  %v6596_v49 = vpack.c.bf16 %v6590_v30, %v6589_v23  ;;  %v13014_v5 = vld [vmem:[%s13955_s24 + $0x28] sm:$0xff]  }
0x1249   : > { %v6597_v9 = vpack.c.bf16 %v6592_v29, %v6591_v63  ;;  %v6598_v59 = vpack.c.bf16 %v6594_v27, %v6593_v25 }
0x124a   : > { %6603 = vxpose.xlu0.c.b16.start [1/4] (short) %v6595_v28, 128 }
0x124e   : > { %6604 = vxpose.xlu0.c.b16.cont [2/4] (short) %v6596_v49, 128 }
0x1252   : > { %6605 = vxpose.xlu0.c.b16.cont [3/4] (short) %v6597_v9, 128 }
0x1256   : > { %6606 = vxpose.xlu0.c.b16.end [4/4] (short) %v6598_v59, 128 }
0x12b0   : > { %v6611_v1 = vpop.trf.xlu0 }
0x12b1   : > { %12442 = vmatprep.mubr.msk.bf16.mxu1 %vm6619_vm0, %v6611_v1 }
0x12b4   : > { %v6612_v20 = vpop.trf.xlu0 }
0x12b5   : > { %12443 = vmatmul.mubr.msk.bf16.vlgmr.msra.gmra.mrb[200].mxu1 %vm6619_vm0, %v6612_v20 }
0x12b6   : > { %12483 = vmatpush3.bf16.msra.mxu1 %v13009_v44 }
0x12b7   : > { %12484 = vmatprep.subr.bf16.mxu1 %v13010_v37 }
0x12b8   : > { %v6613_v32 = vpop.trf.xlu0 }
0x12b9   : > { %12446 = vmatprep.mubr.msk.bf16.mxu1 %vm6619_vm0, %v6613_v32  ;;  %v13015_v32 = vld [vmem:[%s13955_s24 + $0x30] sm:$0xff]  }
0x12ba   : > { %12485 = vmatpush3.bf16.msra.mxu1 %v13010_v37 }
0x12bb   : > { %12486 = vmatprep.subr.bf16.mxu1 %v13011_v4 }
0x12bc   : > { %v6614_v60 = vpop.trf.xlu0 }
0x12bd   : > { %12447 = vmatmul.mubr.msk.bf16.gmra.mrb[204].mxu1 %vm6619_vm0, %v6614_v60  ;;  %v13016_v60 = vld [vmem:[%s13955_s24 + $0x38] sm:$0xff]  }
0x12be   : > { %12487 = vmatpush3.bf16.msra.mxu1 %v13011_v4 }
0x12bf   : > { %12488 = vmatprep.subr.bf16.mxu1 %v13012_v56 }
0x12c0   : > { %v6615_v2 = vpop.trf.xlu0 }
0x12c1   : > { %12450 = vmatprep.mubr.msk.bf16.mxu1 %vm6619_vm0, %v6615_v2 }
0x12c2   : > { %12489 = vmatpush3.bf16.msra.mxu1 %v13012_v56 }
0x12c3   : > { %12490 = vmatprep.subr.bf16.mxu1 %v13013_v53 }
0x12c4   : > { %v6616_v47 = vpop.trf.xlu0 }
0x12c5   : > { %12451 = vmatmul.mubr.msk.bf16.gmra.mrb[208].mxu1 %vm6619_vm0, %v6616_v47 }
0x12c6   : > { %12491 = vmatpush3.bf16.msra.mxu1 %v13013_v53 }
0x12c7   : > { %12492 = vmatprep.subr.bf16.mxu1 %v13014_v5 }
0x12c8   : > { %v6617_v58 = vpop.trf.xlu0 }
0x12c9   : > { %12454 = vmatprep.mubr.msk.bf16.mxu1 %vm6619_vm0, %v6617_v58 }
0x12ca   : > { %12493 = vmatpush3.bf16.msra.mxu1 %v13014_v5 }
0x12cb   : > { %12494 = vmatprep.subr.bf16.mxu1 %v13015_v32 }
0x12cc   : > { %v6618_v8 = vpop.trf.xlu0 }
0x12cd   : > { %12455 = vmatmul.mubr.msk.bf16.gmra.mrb[212].mxu1 %vm6619_vm0, %v6618_v8 }
0x12ce   : > { %12495 = vmatpush3.bf16.msra.mxu1 %v13015_v32 }
0x12cf   : > { %12496 = vmatprep.subr.bf16.mxu1 %v13016_v60 }
0x12d2   : > { %12497 = vmatpush3.bf16.msra.mxu1 %v13016_v60 }
0x1388   : > { %v12444_v46 = vpop.f32.mrb[200].mxu1 }
0x1389   : > { %v6678_v41 = vpop.f32.mrb[201].mxu1 }
0x138a   : > { %v12445_v18 = vpop.f32.mrb[202].mxu1 }
0x138b   : > { %v6746_v38 = vpack.c.bf16 %v12445_v18, %v12444_v46  ;;  %v6681_v22 = vpop.f32.mrb[203].mxu1 }
0x138c   : > { %v6745_v35 = vpack.c.bf16 %v6681_v22, %v6678_v41  ;;  %v6849_v41 = vrot.slane %v16908_v19, %v18027_v61 }
0x138e   : > { %12458 = vmatprep.subr.bf16.mxu0 %v6745_v35 }
0x138f   : > { %12459 = vmatpush3.bf16.msra.mxu0 %v6745_v35 }
0x1390   : > { %v12448_v48 = vpop.f32.mrb[204].mxu1  ;;  %12460 = vmatprep.subr.bf16.mxu0 %v6746_v38 }
0x1391   : > { %v6694_v39 = vpop.f32.mrb[205].mxu1 }
0x1392   : > { %v12449_v26 = vpop.f32.mrb[206].mxu1 }
0x1393   : > { %v6748_v7 = vpack.c.bf16 %v12449_v26, %v12448_v48  ;;  %v6697_v62 = vpop.f32.mrb[207].mxu1  ;;  %12461 = vmatpush3.bf16.msra.mxu0 %v6746_v38 }
0x1394   : > { %v6747_v54 = vpack.c.bf16 %v6697_v62, %v6694_v39 }
0x1396   : > { %12462 = vmatprep.subr.bf16.mxu0 %v6747_v54 }
0x1397   : > { %12463 = vmatpush3.bf16.msra.mxu0 %v6747_v54 }
0x1398   : > { %v12452_v23 = vpop.f32.mrb[208].mxu1  ;;  %12464 = vmatprep.subr.bf16.mxu0 %v6748_v7 }
0x1399   : > { %v6710_v30 = vpop.f32.mrb[209].mxu1 }
0x139a   : > { %v12453_v63 = vpop.f32.mrb[210].mxu1 }
0x139b   : > { %v6750_v29 = vpack.c.bf16 %v12453_v63, %v12452_v23  ;;  %v6713_v25 = vpop.f32.mrb[211].mxu1  ;;  %12465 = vmatpush3.bf16.msra.mxu0 %v6748_v7 }
0x139c   : > { %v6749_v27 = vpack.c.bf16 %v6713_v25, %v6710_v30 }
0x139e   : > { %12466 = vmatprep.subr.bf16.mxu0 %v6749_v27 }
0x139f   : > { %12467 = vmatpush3.bf16.msra.mxu0 %v6749_v27 }
0x13a0   : > { %v12456_v28 = vpop.f32.mrb[212].mxu1  ;;  %12468 = vmatprep.subr.bf16.mxu0 %v6750_v29 }
0x13a1   : > { %v6726_v49 = vpop.f32.mrb[213].mxu1 }
0x13a2   : > { %v12457_v9 = vpop.f32.mrb[214].mxu1 }
0x13a3   : > { %v6752_v59 = vpack.c.bf16 %v12457_v9, %v12456_v28  ;;  %v6729_v1 = vpop.f32.mrb[215].mxu1  ;;  %12469 = vmatpush3.bf16.msra.mxu0 %v6750_v29 }
0x13a4   : > { %v6751_v20 = vpack.c.bf16 %v6729_v1, %v6726_v49 }
0x13a6   : > { %12470 = vmatprep.subr.bf16.mxu0 %v6751_v20 }
0x13a7   : > { %12471 = vmatpush3.bf16.msra.mxu0 %v6751_v20 }
0x13a8   : > { %12472 = vmatprep.subr.bf16.mxu0 %v6752_v59 }
0x13ab   : > { %12473 = vmatpush3.bf16.msra.mxu0 %v6752_v59 }
0x13ae   : > { %12475 = vmatmul.mubr.bf16.vlgmr.msra.gmra.mrb[208].mxu0 %v6742_v52 }
0x13af   : > { %12478 = vmatprep.mubr.bf16.mxu0 %v6743_v34 }
0x13b6   : > { %12479 = vmatmul.mubr.bf16.gmra.mrb[212].mxu0 %v6744_v11 }
0x1481   : > { %v12476_v2 = vpop.f32.mrb[208].mxu0 }
0x1482   : > { %v6787_v47 = vpop.f32.mrb[209].mxu0  ;;  %v6820_v8 = vmul.f32 0.17677669, %v12476_v2 }
0x1483   : > { %v12477_v58 = vpop.f32.mrb[210].mxu0  ;;  %v6818_v52 = vmul.f32 0.17677669, %v6787_v47 }
0x1484   : > { %v6821_v42 = vmul.f32 0.17677669, %v12477_v58  ;;  %v6790_v16 = vpop.f32.mrb[211].mxu0 }
0x1485   : > { %v6819_v44 = vmul.f32 0.17677669, %v6790_v16 }
0x1486   : > { %v6827_v12 = vpack.c.bf16 %v6821_v42, %v6820_v8 }
0x1487   : > { %v6826_v24 = vpack.c.bf16 %v6819_v44, %v6818_v52 }
0x1489   : > { %v12480_v34 = vpop.f32.mrb[212].mxu0  ;;  %12498 = vmatprep.mubr.bf16.mxu1 %v6826_v24 }
0x148a   : > { %v6803_v50 = vpop.f32.mrb[213].mxu0  ;;  %12499 = vmatmul.mubr.bf16.vlgmr.msra.gmra.mrb[216].mxu1 %v6827_v12  ;;  %v6824_v11 = vmul.f32 0.17677669, %v12480_v34 }
0x148b   : > { %v12481_v43 = vpop.f32.mrb[214].mxu0  ;;  %v6822_v56 = vmul.f32 0.17677669, %v6803_v50 }
0x148c   : > { %v6825_v37 = vmul.f32 0.17677669, %v12481_v43  ;;  %v6806_v4 = vpop.f32.mrb[215].mxu0 }
0x148d   : > { %v6823_v53 = vmul.f32 0.17677669, %v6806_v4 }
0x148e   : > { %v6829_v5 = vpack.c.bf16 %v6825_v37, %v6824_v11 }
0x148f   : > { %v6828_v46 = vpack.c.bf16 %v6823_v53, %v6822_v56 }
0x1491   : > { %12502 = vmatprep.mubr.bf16.mxu1 %v6828_v46 }
0x1492   : > { %12503 = vmatmul.mubr.bf16.gmra.mrb[220].mxu1 %v6829_v5 }
0x155d   : > { %v12500_v18 = vpop.f32.mrb[216].mxu1 }
0x155e   : > { %v6941_v38 = vadd.f32 %v12500_v18, %v6849_v41  ;;  %v6932_v22 = vpop.f32.mrb[217].mxu1 }
0x155f   : > { %v12501_v35 = vpop.f32.mrb[218].mxu1  ;;  %v6933_v39 = vadd.f32 %v6932_v22, %v6849_v41 }
0x1560   : > { %v16960_v48 = vadd.f32 %v6941_v38, %v16796_v51  ;;  %v6935_v26 = vpop.f32.mrb[219].mxu1  ;;  %v6944_v62 = vadd.f32 %v12501_v35, %v6849_v41 }
0x1561   : > { %v16964_v7 = vadd.f32 %v6933_v39, %v16788_v33  ;;  %v6936_v29 = vadd.f32 %v6935_v26, %v6849_v41 }
0x1562   : > { %6975 = vadd.xlane.f32.xlu1 %v16960_v48  ;;  %v16968_v63 = vadd.f32 %v6944_v62, %v16799_v3 }
0x1563   : > { %v16972_v51 = vadd.f32 %v6936_v29, %v16791_v13 }
0x1565   : > { %v12504_v54 = vpop.f32.mrb[220].mxu1 }
0x1566   : > { %6971 = vadd.xlane.f32.xlu1 %v16964_v7  ;;  %v6948_v23 = vpop.f32.mrb[221].mxu1  ;;  %v6957_v27 = vadd.f32 %v12504_v54, %v6849_v41 }
0x1567   : > { %v12505_v30 = vpop.f32.mrb[222].mxu1  ;;  %v6949_v28 = vadd.f32 %v6948_v23, %v6849_v41 }
0x1568   : > { %v6951_v25 = vpop.f32.mrb[223].mxu1  ;;  %v16976_v33 = vadd.f32 %v6957_v27, %v16812_v17  ;;  %v6960_v9 = vadd.f32 %v12505_v30, %v6849_v41  ;;  %v13018_v27 = vld [vmem:[%s13960_s30 + $0x8] sm:$0xff]  }
0x1569   : > { %v16980_v49 = vadd.f32 %v6949_v28, %v16804_v6  ;;  %v6952_v3 = vadd.f32 %v6951_v25, %v6849_v41  ;;  %v13017_v25 = vld [vmem:[%s13960_s30] sm:$0xff]   ;;  %v13020_v28 = vld [vmem:[%s13960_s30 + $0x18] sm:$0xff]  }
0x156a   : > { %6977 = vadd.xlane.f32.xlu1 %v16968_v63  ;;  %v16988_v13 = vadd.f32 %v6960_v9, %v16815_v10  ;;  %12506 = vmatprep.subr.bf16.mxu0 %v13017_v25  ;;  %v13022_v9 = vld [vmem:[%s13960_s30 + $0x28] sm:$0xff]  }
0x156b   : > { %v16984_v59 = vadd.f32 %v6952_v3, %v16807_v36  ;;  %12507 = vmatpush3.bf16.msra.mxu0 %v13017_v25  ;;  %v13021_v3 = vld [vmem:[%s13960_s30 + $0x20] sm:$0xff]  }
0x156c   : > { %12508 = vmatprep.subr.bf16.mxu0 %v13018_v27 }
0x156e   : > { %6973 = vadd.xlane.f32.xlu1 %v16972_v51 }
0x156f   : > { %12509 = vmatpush3.bf16.msra.mxu0 %v13018_v27 }
0x1572   : > { %6983 = vadd.xlane.f32.xlu1 %v16976_v33 }
0x1576   : > { %6979 = vadd.xlane.f32.xlu1 %v16980_v49 }
0x157a   : > { %6981 = vadd.xlane.f32.xlu1 %v16984_v59 }
0x157e   : > { %6985 = vadd.xlane.f32.xlu1 %v16988_v13 }
0x15ef   : > { %v6976_v17 = vpop.xlane.xlu1 %6975 }
0x15f0   : > { %v6989_v1 = vmul.f32 0.03125, %v6976_v17  ;;  %v13023_v17 = vld [vmem:[%s13960_s30 + $0x30] sm:$0xff]  }
0x15f2   : > { %v6997_v20 = vsub.f32 %v16960_v48, %v6989_v1  ;;  %v13024_v1 = vld [vmem:[%s13960_s30 + $0x38] sm:$0xff]  }
0x15f3   : > { %v6972_v6 = vpop.xlane.xlu1 %6971 }
0x15f4   : > { %v16993_v32 = vmul.f32 %v6997_v20, %v16745_v57  ;;  %v6987_v60 = vmul.f32 0.03125, %v6972_v6 }
0x15f6   : > { %v6995_v2 = vsub.f32 %v16964_v7, %v6987_v60  ;;  %v7013_v36 = vmul.f32 %v16993_v32, %v16993_v32 }
0x15f7   : > { %v6978_v47 = vpop.xlane.xlu1 %6977 }
0x15f8   : > { %v16999_v10 = vmul.f32 %v6995_v2, %v16745_v57  ;;  %v6990_v58 = vmul.f32 0.03125, %v6978_v47  ;;  %7023 = vadd.xlane.f32.xlu1 %v7013_v36 }
0x15fa   : > { %v6998_v8 = vsub.f32 %v16968_v63, %v6990_v58  ;;  %v7011_v42 = vmul.f32 %v16999_v10, %v16999_v10 }
0x15fb   : > { %v6974_v16 = vpop.xlane.xlu1 %6973 }
0x15fc   : > { %v17005_v52 = vmul.f32 %v6998_v8, %v16745_v57  ;;  %v6988_v44 = vmul.f32 0.03125, %v6974_v16  ;;  %7019 = vadd.xlane.f32.xlu1 %v7011_v42 }
0x15fe   : > { %v6996_v12 = vsub.f32 %v16972_v51, %v6988_v44  ;;  %v7014_v24 = vmul.f32 %v17005_v52, %v17005_v52 }
0x15ff   : > { %v6984_v34 = vpop.xlane.xlu1 %6983 }
0x1600   : > { %v17011_v50 = vmul.f32 %v6996_v12, %v16745_v57  ;;  %7025 = vadd.xlane.f32.xlu1 %v7014_v24  ;;  %v6993_v4 = vmul.f32 0.03125, %v6984_v34 }
0x1602   : > { %v7012_v43 = vmul.f32 %v17011_v50, %v17011_v50  ;;  %v7001_v41 = vsub.f32 %v16976_v33, %v6993_v4 }
0x1603   : > { %v6980_v11 = vpop.xlane.xlu1 %6979 }
0x1604   : > { %v6991_v37 = vmul.f32 0.03125, %v6980_v11  ;;  %7021 = vadd.xlane.f32.xlu1 %v7012_v43  ;;  %v17027_v26 = vmul.f32 %v7001_v41, %v16745_v57  ;;  %v7070_v41 = vrot.slane %v16908_v19, %v18029_v55 }
0x1606   : > { %v6999_v56 = vsub.f32 %v16980_v49, %v6991_v37  ;;  %v7017_v30 = vmul.f32 %v17027_v26, %v17027_v26 }
0x1607   : > { %v6982_v53 = vpop.xlane.xlu1 %6981 }
0x1608   : > { %v17017_v5 = vmul.f32 %v6999_v56, %v16745_v57  ;;  %v6992_v46 = vmul.f32 0.03125, %v6982_v53 }
0x160a   : > { %v7000_v18 = vsub.f32 %v16984_v59, %v6992_v46  ;;  %v7015_v38 = vmul.f32 %v17017_v5, %v17017_v5 }
0x160b   : > { %v6986_v22 = vpop.xlane.xlu1 %6985 }
0x160c   : > { %v17024_v35 = vmul.f32 %v7000_v18, %v16745_v57  ;;  %v6994_v39 = vmul.f32 0.03125, %v6986_v22  ;;  %7027 = vadd.xlane.f32.xlu1 %v7015_v38 }
0x160e   : > { %v7002_v62 = vsub.f32 %v16988_v13, %v6994_v39  ;;  %v7016_v54 = vmul.f32 %v17024_v35, %v17024_v35 }
0x1610   : > { %v17033_v23 = vmul.f32 %v7002_v62, %v16745_v57  ;;  %7029 = vadd.xlane.f32.xlu1 %v7016_v54  ;;  %v13019_v57 = vld [vmem:[%s13960_s30 + $0x10] sm:$0xff]  }
0x1611   : > { %12510 = vmatprep.subr.bf16.mxu0 %v13019_v57 }
0x1612   : > { %v7018_v29 = vmul.f32 %v17033_v23, %v17033_v23  ;;  %12511 = vmatpush3.bf16.msra.mxu0 %v13019_v57 }
0x1613   : > { %12512 = vmatprep.subr.bf16.mxu0 %v13020_v28 }
0x1614   : > { %7031 = vadd.xlane.f32.xlu1 %v7017_v30  ;;  %7033 = vadd.xlane.f32.xlu0 %v7018_v29 }
0x1616   : > { %12513 = vmatpush3.bf16.msra.mxu0 %v13020_v28 }
0x1617   : > { %12514 = vmatprep.subr.bf16.mxu0 %v13021_v3 }
0x161a   : > { %12515 = vmatpush3.bf16.msra.mxu0 %v13021_v3 }
0x161b   : > { %12516 = vmatprep.subr.bf16.mxu0 %v13022_v9 }
0x161e   : > { %12517 = vmatpush3.bf16.msra.mxu0 %v13022_v9 }
0x161f   : > { %12518 = vmatprep.subr.bf16.mxu0 %v13023_v17 }
0x1622   : > { %12519 = vmatpush3.bf16.msra.mxu0 %v13023_v17 }
0x1623   : > { %12520 = vmatprep.subr.bf16.mxu0 %v13024_v1 }
0x1626   : > { %12521 = vmatpush3.bf16.msra.mxu0 %v13024_v1 }
0x1685   : > { %v7024_v20 = vpop.xlane.xlu1 %7023 }
0x1686   : > { %v7037_v6 = vmul.f32 0.03125, %v7024_v20 }
0x1688   : > { %v7045_v47 = vadd.f32 1e-06, %v7037_v6 }
0x1689   : > { %v7020_v60 = vpop.xlane.xlu1 %7019 }
0x168a   : > { %v7035_v2 = vmul.f32 0.03125, %v7020_v60 }
0x168c   : > { %v7043_v36 = vadd.f32 1e-06, %v7035_v2 }
0x168d   : > { %v7026_v58 = vpop.xlane.xlu1 %7025 }
0x168e   : > { %v7038_v8 = vmul.f32 0.03125, %v7026_v58  ;;  %13674 = vrsqrt.f32 %v7043_v36 }
0x168f   : > { %13676 = vrsqrt.f32 %v7045_v47 }
0x1690   : > { %v7046_v42 = vadd.f32 1e-06, %v7038_v8 }
0x1691   : > { %v7022_v16 = vpop.xlane.xlu1 %7021 }
0x1692   : > { %13678 = vrsqrt.f32 %v7046_v42  ;;  %v7036_v44 = vmul.f32 0.03125, %v7022_v16 }
0x1694   : > { %v7044_v12 = vadd.f32 1e-06, %v7036_v44 }
0x1696   : > { %13680 = vrsqrt.f32 %v7044_v12 }
0x1698   : > { %v13675_v34 = vpop.eup %13674 }
0x1699   : > { %v7028_v24 = vpop.xlane.xlu1 %7027  ;;  %v13677_v11 = vpop.eup %13676  ;;  %v7059_v46 = vmul.f32 %v13675_v34, %v16999_v10 }
0x169a   : > { %v7039_v43 = vmul.f32 0.03125, %v7028_v24  ;;  %v7061_v18 = vmul.f32 %v13677_v11, %v16993_v32 }
0x169b   : > { %v7071_v25 = vmul.f32 %v7070_v41, %v7059_v46  ;;  %v13030_v46 = vld [vmem:[%s18034_s7 + $0x28] sm:$0xff]  }
0x169c   : > { %v13679_v37 = vpop.eup %13678  ;;  %v7047_v4 = vadd.f32 1e-06, %v7039_v43  ;;  %v7073_v27 = vmul.f32 %v7070_v41, %v7061_v18  ;;  %v13032_v18 = vld [vmem:[%s18034_s7 + $0x38] sm:$0xff]  }
0x169d   : > { %v7062_v56 = vmul.f32 %v13679_v37, %v17005_v52  ;;  %v7030_v53 = vpop.xlane.xlu1 %7029  ;;  %v7082_v52 = vrot.slane %v16908_v19, %v18030_v21 }
0x169e   : > { %13682 = vrsqrt.f32 %v7047_v4  ;;  %v7040_v38 = vmul.f32 0.03125, %v7030_v53  ;;  %v13025_v4 = vld [vmem:[%s18034_s7] sm:$0xff]  }
0x169f   : > { %v7074_v39 = vmul.f32 %v7070_v41, %v7062_v56  ;;  %v7083_v17 = vadd.f32 %v7082_v52, %v7071_v25  ;;  %v7085_v20 = vadd.f32 %v7082_v52, %v7073_v27  ;;  %12530 = vmatprep.subr.bf16.mxu1 %v13025_v4  ;;  %v13026_v56 = vld [vmem:[%s18034_s7 + $0x8] sm:$0xff]   ;;  %v13029_v53 = vld [vmem:[%s18034_s7 + $0x20] sm:$0xff]  }
0x16a0   : > { %v13681_v22 = vpop.eup %13680  ;;  %v7048_v62 = vadd.f32 1e-06, %v7040_v38  ;;  %12531 = vmatpush3.bf16.msra.mxu1 %v13025_v4  ;;  %v11136_v38 = vld [vmem:[%s18035_s10] ss:$0 sm:$0xff]  ;;  %s18037_s10 = sld [smem:[#allocation17_spill]] }
0x16a1   : > { %v7034_v54 = vpop.xlane.xlu0 %7033  ;;  %v7032_v30 = vpop.xlane.xlu1 %7031  ;;  %v7060_v29 = vmul.f32 %v13681_v22, %v17011_v50  ;;  %v7086_v9 = vadd.f32 %v7082_v52, %v7074_v39  ;;  %12532 = vmatprep.subr.bf16.mxu1 %v13026_v56 }
0x16a2   : > { %13684 = vrsqrt.f32 %v7048_v62  ;;  %v7042_v10 = vmul.f32 0.03125, %v7034_v54  ;;  %v7041_v57 = vmul.f32 0.03125, %v7032_v30 }
0x16a3   : > { %v7072_v28 = vmul.f32 %v7070_v41, %v7060_v29  ;;  %v7092_v50 = vpack.c.bf16 %v7086_v9, %v7085_v20 }
0x16a4   : > { %v7050_v3 = vadd.f32 1e-06, %v7042_v10  ;;  %v7049_v32 = vadd.f32 1e-06, %v7041_v57  ;;  %12533 = vmatpush3.bf16.msra.mxu1 %v13026_v56 }
0x16a5   : > { %v7084_v1 = vadd.f32 %v7082_v52, %v7072_v28 }
0x16a6   : > { %13686 = vrsqrt.f32 %v7050_v3 }
0x16a7   : > { %13688 = vrsqrt.f32 %v7049_v32  ;;  %v7091_v6 = vpack.c.bf16 %v7084_v1, %v7083_v17 }
0x16a8   : > { %v13683_v60 = vpop.eup %13682 }
0x16a9   : > { %12522 = vmatprep.mubr.bf16.mxu0 %v7091_v6  ;;  %v7063_v2 = vmul.f32 %v13683_v60, %v17017_v5 }
0x16aa   : > { %12523 = vmatmul.mubr.bf16.vlgmr.msra.gmra.mrb[216].mxu0 %v7092_v50 }
0x16ab   : > { %v7075_v47 = vmul.f32 %v7070_v41, %v7063_v2 }
0x16ac   : > { %v13685_v19 = vpop.eup %13684 }
0x16ad   : > { %v7064_v36 = vmul.f32 %v13685_v19, %v17024_v35  ;;  %v7087_v16 = vadd.f32 %v7082_v52, %v7075_v47 }
0x16af   : > { %v7076_v58 = vmul.f32 %v7070_v41, %v7064_v36 }
0x16b0   : > { %v13687_v8 = vpop.eup %13686 }
0x16b1   : > { %v13689_v42 = vpop.eup %13688  ;;  %v7088_v44 = vadd.f32 %v7082_v52, %v7076_v58  ;;  %v7066_v12 = vmul.f32 %v13687_v8, %v17033_v23  ;;  %v13028_v23 = vld [vmem:[%s18034_s7 + $0x18] sm:$0xff]  }
0x16b2   : > { %v7065_v24 = vmul.f32 %v13689_v42, %v17027_v26  ;;  %v13027_v26 = vld [vmem:[%s18034_s7 + $0x10] sm:$0xff]  }
0x16b3   : > { %v7093_v34 = vpack.c.bf16 %v7088_v44, %v7087_v16  ;;  %v7078_v43 = vmul.f32 %v7070_v41, %v7066_v12  ;;  %12534 = vmatprep.subr.bf16.mxu1 %v13027_v26 }
0x16b4   : > { %v7077_v5 = vmul.f32 %v7070_v41, %v7065_v24  ;;  %12535 = vmatpush3.bf16.msra.mxu1 %v13027_v26  ;;  %v13031_v41 = vld [vmem:[%s18034_s7 + $0x30] sm:$0xff]  }
0x16b5   : > { %12526 = vmatprep.mubr.bf16.mxu0 %v7093_v34  ;;  %v7090_v11 = vadd.f32 %v7082_v52, %v7078_v43  ;;  %12536 = vmatprep.subr.bf16.mxu1 %v13028_v23 }
0x16b6   : > { %v7089_v35 = vadd.f32 %v7082_v52, %v7077_v5 }
0x16b8   : > { %v7094_v37 = vpack.c.bf16 %v7090_v11, %v7089_v35  ;;  %12537 = vmatpush3.bf16.msra.mxu1 %v13028_v23 }
0x16b9   : > { %12538 = vmatprep.subr.bf16.mxu1 %v13029_v53 }
0x16ba   : > { %12527 = vmatmul.mubr.bf16.gmra.mrb[220].mxu0 %v7094_v37 }
0x16bc   : > { %12539 = vmatpush3.bf16.msra.mxu1 %v13029_v53 }
0x16bd   : > { %12540 = vmatprep.subr.bf16.mxu1 %v13030_v46 }
0x16c0   : > { %12541 = vmatpush3.bf16.msra.mxu1 %v13030_v46 }
0x16c1   : > { %12542 = vmatprep.subr.bf16.mxu1 %v13031_v41 }
0x16c4   : > { %12543 = vmatpush3.bf16.msra.mxu1 %v13031_v41 }
0x16c5   : > { %12544 = vmatprep.subr.bf16.mxu1 %v13032_v18 }
0x16c8   : > { %12545 = vmatpush3.bf16.msra.mxu1 %v13032_v18 }
0x177d   : > { %v12524_v22 = vpop.f32.mrb[216].mxu0 }
0x177e   : > { %v17068_v39 = vadd.f32 %v12524_v22, %v11136_v38  ;;  %v7200_v62 = vpop.f32.mrb[217].mxu0 }
0x177f   : > { %v17070_v54 = vadd.f32 %v11136_v38, %v7200_v62  ;;  %v12525_v30 = vpop.f32.mrb[218].mxu0 }
0x1780   : > { %v7233_v29 = vmul.f32 %v17068_v39, %v17068_v39  ;;  %v17074_v25 = vadd.f32 %v12525_v30, %v11136_v38  ;;  %v7203_v52 = vpop.f32.mrb[219].mxu0 }
0x1781   : > { %v7231_v27 = vmul.f32 %v17070_v54, %v17070_v54  ;;  %v17078_v10 = vadd.f32 %v11136_v38, %v7203_v52 }
0x1782   : > { %v7241_v57 = vmul.f32 %v7233_v29, %v17068_v39  ;;  %v7234_v28 = vmul.f32 %v17074_v25, %v17074_v25 }
0x1783   : > { %v7239_v3 = vmul.f32 %v7231_v27, %v17070_v54  ;;  %v7232_v32 = vmul.f32 %v17078_v10, %v17078_v10 }
0x1784   : > { %v7249_v9 = vmul.f32 0.044715, %v7241_v57  ;;  %v7242_v17 = vmul.f32 %v7234_v28, %v17074_v25 }
0x1785   : > { %v7247_v1 = vmul.f32 0.044715, %v7239_v3  ;;  %v7240_v20 = vmul.f32 %v7232_v32, %v17078_v10 }
0x1786   : > { %v7257_v6 = vadd.f32 %v7249_v9, %v17068_v39  ;;  %v7250_v60 = vmul.f32 0.044715, %v7242_v17 }
0x1787   : > { %v7255_v50 = vadd.f32 %v7247_v1, %v17070_v54  ;;  %v7248_v2 = vmul.f32 0.044715, %v7240_v20 }
0x1788   : > { %v7265_v19 = vmul.f32 0.7978846, %v7257_v6  ;;  %v7258_v36 = vadd.f32 %v7250_v60, %v17074_v25 }
0x1789   : > { %v7263_v47 = vmul.f32 0.7978846, %v7255_v50  ;;  %v7256_v58 = vadd.f32 %v7248_v2, %v17078_v10 }
0x178a   : > { %13690 = vtanh.f32 %v7265_v19  ;;  %v7266_v8 = vmul.f32 0.7978846, %v7258_v36 }
0x178b   : > { %13692 = vtanh.f32 %v7263_v47  ;;  %v7264_v42 = vmul.f32 0.7978846, %v7256_v58 }
0x178c   : > { %13694 = vtanh.f32 %v7266_v8 }
0x178d   : > { %13696 = vtanh.f32 %v7264_v42  ;;  %v12528_v16 = vpop.f32.mrb[220].mxu0 }
0x178e   : > { %v17092_v44 = vadd.f32 %v12528_v16, %v11136_v38  ;;  %v7216_v12 = vpop.f32.mrb[221].mxu0 }
0x178f   : > { %v17094_v24 = vadd.f32 %v11136_v38, %v7216_v12  ;;  %v12529_v34 = vpop.f32.mrb[222].mxu0 }
0x1790   : > { %v7237_v43 = vmul.f32 %v17092_v44, %v17092_v44  ;;  %v7228_v5 = vadd.f32 %v12529_v34, %v11136_v38  ;;  %v7219_v11 = vpop.f32.mrb[223].mxu0 }
0x1791   : > { %v7235_v35 = vmul.f32 %v17094_v24, %v17094_v24  ;;  %v7220_v37 = vadd.f32 %v11136_v38, %v7219_v11 }
0x1792   : > { %v7245_v4 = vmul.f32 %v7237_v43, %v17092_v44  ;;  %v7238_v56 = vmul.f32 %v7228_v5, %v7228_v5 }
0x1793   : > { %v7243_v26 = vmul.f32 %v7235_v35, %v17094_v24  ;;  %v7236_v23 = vmul.f32 %v7220_v37, %v7220_v37 }
0x1794   : > { %v13691_v53 = vpop.eup %13690  ;;  %v7253_v46 = vmul.f32 0.044715, %v7245_v4  ;;  %v7246_v41 = vmul.f32 %v7238_v56, %v7228_v5 }
0x1795   : > { %v13693_v18 = vpop.eup %13692  ;;  %v7281_v22 = vadd.f32 1.0, %v13691_v53  ;;  %v7251_v62 = vmul.f32 0.044715, %v7243_v26  ;;  %v7244_v30 = vmul.f32 %v7236_v23, %v7220_v37 }
0x1796   : > { %v13695_v29 = vpop.eup %13694  ;;  %v7261_v52 = vadd.f32 %v7253_v46, %v17092_v44  ;;  %v7254_v27 = vmul.f32 0.044715, %v7246_v41  ;;  %v7279_v57 = vadd.f32 1.0, %v13693_v18 }
0x1797   : > { %v13697_v28 = vpop.eup %13696  ;;  %v7289_v38 = vmul.f32 0.5, %v7281_v22  ;;  %v7282_v3 = vadd.f32 1.0, %v13695_v29  ;;  %v7259_v32 = vadd.f32 %v7251_v62, %v17094_v24  ;;  %v7252_v9 = vmul.f32 0.044715, %v7244_v30  ;;  %v13033_v29 = vld [vmem:[%s18036_s1] sm:$0xff]  }
0x1798   : > { %v7269_v17 = vmul.f32 0.7978846, %v7261_v52  ;;  %v7262_v1 = vadd.f32 %v7254_v27, %v7228_v5  ;;  %v7280_v20 = vadd.f32 1.0, %v13697_v28  ;;  %v7287_v6 = vmul.f32 0.5, %v7279_v57  ;;  %12562 = vmatprep.mubr.msk.bf16.mxu0 %vm6619_vm0, %v13033_v29  ;;  %v13039_v52 = vld [vmem:[%s18037_s10 + $0xc0] sm:$0xff]   ;;  %v13051_v57 = vld [vmem:[%s18037_s10 + $0xd8] sm:$0xff]  }
0x1799   : > { %v7290_v60 = vmul.f32 0.5, %v7282_v3  ;;  %v7267_v50 = vmul.f32 0.7978846, %v7259_v32  ;;  %v7260_v2 = vadd.f32 %v7252_v9, %v7220_v37  ;;  %v7297_v47 = vmul.f32 %v7289_v38, %v17068_v39  ;;  %v13040_v27 = vld [vmem:[%s18037_s10 + $0x80] sm:$0xff]   ;;  %11916 = vmatprep.subr.bf16.mxu1 %v13039_v52  ;;  %v13052_v28 = vld [vmem:[%s18037_s10 + $0x98] sm:$0xff]   ;;  %v13059_v32 = vld [vmem:[%s18037_s10 + $0xe8] sm:$0xff]  }
0x179a   : > { %13698 = vtanh.f32 %v7269_v17  ;;  %v7270_v19 = vmul.f32 0.7978846, %v7262_v1  ;;  %v7288_v36 = vmul.f32 0.5, %v7280_v20  ;;  %v7295_v42 = vmul.f32 %v7287_v6, %v17070_v54  ;;  %v13055_v38 = vld [vmem:[%s18037_s10 + $0xe0] sm:$0xff]   ;;  %v13060_v9 = vld [vmem:[%s18037_s10 + $0xa8] sm:$0xff]  }
0x179b   : > { %v7298_v58 = vmul.f32 %v7290_v60, %v17074_v25  ;;  %13700 = vtanh.f32 %v7267_v50  ;;  %v7268_v8 = vmul.f32 0.7978846, %v7260_v2  ;;  %v13056_v3 = vld [vmem:[%s18037_s10 + $0xa0] sm:$0xff]   ;;  %v13753_v17 = vld [vmem:[%s17826_s12 + $0x8] sm:$0x1f] }
0x179c   : > { %13702 = vtanh.f32 %v7270_v19  ;;  %v7296_v16 = vmul.f32 %v7288_v36, %v17078_v10  ;;  %v7326_v1 = vrot.slane %v13753_v17, %v18003_v40  ;;  %v13054_v29 = vld [vmem:[%s18037_s10 + $0x20] sm:$0xff]   ;;  %v13057_v52 = vld [vmem:[%s18037_s10 + $0x68] sm:$0xff]  }
0x179d   : > { %v7304_v12 = vpack.c.bf16 %v7298_v58, %v7297_v47  ;;  %13704 = vtanh.f32 %v7268_v8 }
0x179e   : > { %v7303_v34 = vpack.c.bf16 %v7296_v16, %v7295_v42 }
0x17a0   : > { %12546 = vmatprep.mubr.bf16.mxu1 %v7303_v34 }
0x17a1   : > { %12547 = vmatmul.mubr.bf16.vlgmr.msra.gmra.mrb[224].mxu1 %v7304_v12 }
0x17a2   : > { %11917 = vmatpush3.bf16.msra.mxu1 %v13040_v27  ;;  %v13058_v27 = vld [vmem:[%s18037_s10 + $0x28] sm:$0xff]  }
0x17a4   : > { %v13699_v43 = vpop.eup %13698 }
0x17a5   : > { %v13701_v11 = vpop.eup %13700  ;;  %v7285_v35 = vadd.f32 1.0, %v13699_v43 }
0x17a6   : > { %v13703_v4 = vpop.eup %13702  ;;  %v7283_v56 = vadd.f32 1.0, %v13701_v11 }
0x17a7   : > { %v13705_v39 = vpop.eup %13704  ;;  %v7286_v25 = vadd.f32 1.0, %v13703_v4  ;;  %v7293_v26 = vmul.f32 0.5, %v7285_v35 }
0x17a8   : > { %v7284_v23 = vadd.f32 1.0, %v13705_v39  ;;  %v7291_v54 = vmul.f32 0.5, %v7283_v56 }
0x17a9   : > { %v7294_v10 = vmul.f32 0.5, %v7286_v25  ;;  %v7301_v46 = vmul.f32 %v7293_v26, %v17092_v44  ;;  %v13043_v44 = vld [vmem:[%s18037_s10 + $0xc8] sm:$0xff]  }
0x17aa   : > { %v7292_v53 = vmul.f32 0.5, %v7284_v23  ;;  %v7299_v18 = vmul.f32 %v7291_v54, %v17094_v24  ;;  %v13044_v24 = vld [vmem:[%s18037_s10 + $0x88] sm:$0xff]   ;;  %11918 = vmatprep.subr.bf16.mxu1 %v13043_v44  ;;  %v13061_v44 = vld [vmem:[%s18037_s10 + $0x70] sm:$0xff]  }
0x17ab   : > { %v7302_v41 = vmul.f32 %v7294_v10, %v7228_v5  ;;  %v13047_v5 = vld [vmem:[%s18037_s10 + $0xd0] sm:$0xff]   ;;  %11919 = vmatpush3.bf16.msra.mxu1 %v13044_v24  ;;  %v13034_v54 = vld [vmem:[%s18036_s1 + $0x8] sm:$0xff]   ;;  %v13038_v10 = vld [vmem:[%s18037_s10] sm:$0xff]  }
0x17ac   : > { %v7300_v22 = vmul.f32 %v7292_v53, %v7220_v37  ;;  %v13048_v37 = vld [vmem:[%s18037_s10 + $0x90] sm:$0xff]   ;;  %11920 = vmatprep.subr.bf16.mxu1 %v13047_v5  ;;  %v13042_v53 = vld [vmem:[%s18037_s10 + $0x8] sm:$0xff]  }
0x17ad   : > { %v7306_v62 = vpack.c.bf16 %v7302_v41, %v7301_v46  ;;  %v13045_v46 = vld [vmem:[%s18037_s10 + $0x50] sm:$0xff]   ;;  %v13036_v41 = vld [vmem:[%s18036_s1 + $0x18] sm:$0xff]  }
0x17ae   : > { %v7305_v30 = vpack.c.bf16 %v7300_v22, %v7299_v18  ;;  %v13046_v18 = vld [vmem:[%s18037_s10 + $0x10] sm:$0xff]   ;;  %v13049_v22 = vld [vmem:[%s18037_s10 + $0x58] sm:$0xff]  }
0x17af   : > { %11921 = vmatpush3.bf16.msra.mxu1 %v13048_v37  ;;  %v13062_v24 = vld [vmem:[%s18037_s10 + $0x30] sm:$0xff]  }
0x17b0   : > { %12550 = vmatprep.mubr.bf16.mxu1 %v7305_v30  ;;  %11922 = vmatprep.subr.bf16.mxu1 %v13051_v57  ;;  %v13053_v30 = vld [vmem:[%s18037_s10 + $0x60] sm:$0xff]   ;;  %v13063_v5 = vld [vmem:[%s18037_s10 + $0xf0] sm:$0xff]   ;;  %v13065_v57 = vld [vmem:[%s18037_s10 + $0x78] sm:$0xff]  }
0x17b1   : > { %12551 = vmatmul.mubr.bf16.gmra.mrb[228].mxu1 %v7306_v62  ;;  %v13050_v62 = vld [vmem:[%s18037_s10 + $0x18] sm:$0xff]   ;;  %v13064_v37 = vld [vmem:[%s18037_s10 + $0xb0] sm:$0xff]  }
0x17b3   : > { %11923 = vmatpush3.bf16.msra.mxu1 %v13052_v28  ;;  %v13066_v28 = vld [vmem:[%s18037_s10 + $0x38] sm:$0xff]  }
0x17b4   : > { %11924 = vmatprep.subr.bf16.mxu1 %v13055_v38  ;;  %v13067_v38 = vld [vmem:[%s18037_s10 + $0xf8] sm:$0xff]  }
0x17b7   : > { %11925 = vmatpush3.bf16.msra.mxu1 %v13056_v3  ;;  %v13068_v3 = vld [vmem:[%s18037_s10 + $0xb8] sm:$0xff]  }
0x17b8   : > { %11926 = vmatprep.subr.bf16.mxu1 %v13059_v32 }
0x17bb   : > { %11927 = vmatpush3.bf16.msra.mxu1 %v13060_v9 }
0x17bc   : > { %11928 = vmatprep.subr.bf16.mxu1 %v13063_v5 }
0x17bf   : > { %11929 = vmatpush3.bf16.msra.mxu1 %v13064_v37 }
0x17c0   : > { %11930 = vmatprep.subr.bf16.mxu1 %v13067_v38 }
0x17c3   : > { %11931 = vmatpush3.bf16.msra.mxu1 %v13068_v3 }
0x1874   : > { %v12548_v20 = vpop.f32.mrb[224].mxu1 }
0x1875   : > { %v7418_v6 = vadd.f32 %v12548_v20, %v7326_v1  ;;  %v7409_v60 = vpop.f32.mrb[225].mxu1 }
0x1876   : > { %v7410_v50 = vadd.f32 %v7409_v60, %v7326_v1  ;;  %v12549_v2 = vpop.f32.mrb[226].mxu1 }
0x1877   : > { %v7442_v19 = vadd.f32 %v7418_v6, %v16960_v48  ;;  %v7421_v36 = vadd.f32 %v12549_v2, %v7326_v1  ;;  %v7412_v47 = vpop.f32.mrb[227].mxu1 }
0x1878   : > { %v7440_v58 = vadd.f32 %v7410_v50, %v16964_v7  ;;  %v7413_v8 = vadd.f32 %v7412_v47, %v7326_v1 }
0x1879   : > { %7450 = vst [vmem:[%s17128_s5 + $0x10] sm:$0xff] %v7442_v19  ;;  %v7443_v42 = vadd.f32 %v7421_v36, %v16968_v63 }
0x187a   : > { %7448 = vst [vmem:[%s17128_s5] sm:$0xff] %v7440_v58  ;;  %v7441_v16 = vadd.f32 %v7413_v8, %v16972_v51 }
0x187b   : > { %7451 = vst [vmem:[%s17128_s5 + $0x18] sm:$0xff] %v7443_v42  ;;  %v7467_v12 = vpack.c.bf16 %v7443_v42, %v7442_v19 }
0x187c   : > { %7449 = vst [vmem:[%s17128_s5 + $0x8] sm:$0xff] %v7441_v16  ;;  %v7466_v34 = vpack.c.bf16 %v7441_v16, %v7440_v58 }
0x187e   : > { %12554 = vmatprep.subr.bf16.mxu0 %v7466_v34 }
0x187f   : > { %12555 = vmatpush3.bf16.msra.mxu0 %v7466_v34 }
0x1880   : > { %12556 = vmatprep.subr.bf16.mxu0 %v7467_v12 }
0x1883   : > { %12557 = vmatpush3.bf16.msra.mxu0 %v7467_v12 }
0x1884   : > { %v12552_v48 = vpop.f32.mrb[228].mxu1 }
0x1885   : > { %v7434_v7 = vadd.f32 %v12552_v48, %v7326_v1  ;;  %v7425_v43 = vpop.f32.mrb[229].mxu1 }
0x1886   : > { %v7426_v11 = vadd.f32 %v7425_v43, %v7326_v1  ;;  %v12553_v63 = vpop.f32.mrb[230].mxu1 }
0x1887   : > { %v7446_v35 = vadd.f32 %v7434_v7, %v16976_v33  ;;  %v7437_v51 = vadd.f32 %v12553_v63, %v7326_v1  ;;  %v7428_v4 = vpop.f32.mrb[231].mxu1 }
0x1888   : > { %v7444_v56 = vadd.f32 %v7426_v11, %v16980_v49  ;;  %v7429_v39 = vadd.f32 %v7428_v4, %v7326_v1  ;;  %v13037_v49 = vld [vmem:[%s18037_s10 + $0x40] sm:$0xff]  }
0x1889   : > { %7454 = vst [vmem:[%s17128_s5 + $0x30] sm:$0xff] %v7446_v35  ;;  %v7447_v25 = vadd.f32 %v7437_v51, %v16988_v13  ;;  %v13035_v13 = vld [vmem:[%s18036_s1 + $0x10] sm:$0xff]   ;;  %s18042_s1 = sld [smem:[#allocation20_spill]] }
0x188a   : > { %7452 = vst [vmem:[%s17128_s5 + $0x20] sm:$0xff] %v7444_v56  ;;  %v7445_v26 = vadd.f32 %v7429_v39, %v16984_v59  ;;  %v13041_v59 = vld [vmem:[%s18037_s10 + $0x48] sm:$0xff]   ;;  %s13888_s10 = smov [#allocation2]  }
0x188b   : > { %7455 = vst [vmem:[%s17128_s5 + $0x38] sm:$0xff] %v7447_v25  ;;  %v7469_v23 = vpack.c.bf16 %v7447_v25, %v7446_v35  ;;  %s13758_s12 = sshll.u32 %s13888_s10, 4  ;;  %s13759_s12 = int_to_ptr.vmem [resolvable:$false] %s13758_s12 }
0x188c   : > { %7453 = vst [vmem:[%s17128_s5 + $0x28] sm:$0xff] %v7445_v26  ;;  %v7468_v33 = vpack.c.bf16 %v7445_v26, %v7444_v56  ;;  %s18039_s5 = sld [smem:[#allocation22_spill]]  ;;  %s13760_s13 = scalar_lea.vmem %s13759_s12, 512 }
0x188e   : > { %12558 = vmatprep.subr.bf16.mxu0 %v7468_v33 }
0x188f   : > { %12559 = vmatpush3.bf16.msra.mxu0 %v7468_v33 }
0x1890   : > { %12560 = vmatprep.subr.bf16.mxu0 %v7469_v23 }
0x1892   : > { %v17174_v12 = vld [vmem:[%s18039_s5] sm:$0xff] }
0x1893   : > { %12561 = vmatpush3.bf16.msra.mxu0 %v7469_v23  ;;  %v7638_v7 = vrot.slane %v17174_v12, %v18027_v61  ;;  %v17180_v33 = vrot.slane %v17174_v12, %v18028_v14  ;;  %v7950_v37 = vrot.slane %v17174_v12, %v18030_v21 }
0x1894   : > { %11894 = vmatprep.subr.bf16.mxu0 %v13037_v49 }
0x1896   : > { %12563 = vmatmul.mubr.msk.bf16.vlgmr.msra.gmra.mrb[224].mxu0 %vm6619_vm0, %v13034_v54 }
0x1897   : > { %12566 = vmatprep.mubr.msk.bf16.mxu0 %vm6619_vm0, %v13035_v13  ;;  %11895 = vmatpush3.bf16.msra.mxu0 %v13038_v10 }
0x1898   : > { %11896 = vmatprep.subr.bf16.mxu0 %v13041_v59 }
0x189b   : > { %11897 = vmatpush3.bf16.msra.mxu0 %v13042_v53 }
0x189c   : > { %11898 = vmatprep.subr.bf16.mxu0 %v13045_v46 }
0x189e   : > { %12567 = vmatmul.mubr.msk.bf16.gmra.mrb[228].mxu0 %vm6619_vm0, %v13036_v41 }
0x189f   : > { %11899 = vmatpush3.bf16.msra.mxu0 %v13046_v18 }
0x18a0   : > { %11900 = vmatprep.subr.bf16.mxu0 %v13049_v22 }
0x18a3   : > { %11901 = vmatpush3.bf16.msra.mxu0 %v13050_v62 }
0x18a4   : > { %11902 = vmatprep.subr.bf16.mxu0 %v13053_v30 }
0x18a7   : > { %11903 = vmatpush3.bf16.msra.mxu0 %v13054_v29 }
0x18a8   : > { %11904 = vmatprep.subr.bf16.mxu0 %v13057_v52 }
0x18ab   : > { %11905 = vmatpush3.bf16.msra.mxu0 %v13058_v27 }
0x18ac   : > { %11906 = vmatprep.subr.bf16.mxu0 %v13061_v44  ;;  %v7944_v44 = vrot.slane %v17174_v12, %v18029_v55 }
0x18af   : > { %11907 = vmatpush3.bf16.msra.mxu0 %v13062_v24 }
0x18b0   : > { %11908 = vmatprep.subr.bf16.mxu0 %v13065_v57 }
0x18b3   : > { %11909 = vmatpush3.bf16.msra.mxu0 %v13066_v28 }
0x1969   : > { %v12564_v32 = vpop.f32.mrb[224].mxu0 }
0x196a   : > { %v7536_v9 = vpop.f32.mrb[225].mxu0 }
0x196b   : > { %v12565_v17 = vpop.f32.mrb[226].mxu0 }
0x196c   : > { %v7568_v1 = vpack.c.bf16 %v12565_v17, %v12564_v32  ;;  %v7539_v20 = vpop.f32.mrb[227].mxu0  ;;  %v13069_v17 = vld [vmem:[%s18040_s3] ss:$12 sps:$4 sm:$0xff]  }
0x196d   : > { %v7567_v6 = vpack.c.bf16 %v7539_v20, %v7536_v9  ;;  %v13886_v20 = vmov 0.0  }
0x196e   : > { %7863 = vmatprep.mubr.bf16.mxu0 %v7568_v1  ;;  %v13071_v1 = vld [vmem:[%s18040_s3 + $0x4] ss:$12 sps:$4 sm:$0xff]   ;;  %12570 = vmatprep.subr.bf16.mxu1 %v13886_v20 }
0x196f   : > { %7864 = vmatmul.mubr.bf16.vlgmr.msra.gmra.mrb[232].mxu0 %v7567_v6  ;;  %v13072_v6 = vld [vmem:[%s18040_s3 + $0x8] ss:$12 sps:$4 sm:$0xff]   ;;  %8150 = vmatprep.subr.bf16.mxu0 %v13071_v1 }
0x1970   : > { %8182 = vmatprep.mubr.bf16.mxu0 %v18026_v45  ;;  %8151 = vmatpush1.bf16.msra.mxu0 %v13069_v17  ;;  %v17250_v1 = vld [vmem:[%s18039_s5 + $0x8] sm:$0x1f] }
0x1971   : > { %v12568_v60 = vpop.f32.mrb[228].mxu0 }
0x1972   : > { %v7552_v50 = vpop.f32.mrb[229].mxu0 }
0x1973   : > { %v12569_v2 = vpop.f32.mrb[230].mxu0 }
0x1974   : > { %v7570_v19 = vpack.c.bf16 %v12569_v2, %v12568_v60  ;;  %v7555_v36 = vpop.f32.mrb[231].mxu0  ;;  %v13075_v60 = vld [vmem:[%s18040_s3 + $0x1c] ss:$12 sps:$4 sm:$0xff]  }
0x1975   : > { %v7569_v47 = vpack.c.bf16 %v7555_v36, %v7552_v50  ;;  %v13073_v50 = vld [vmem:[%s18040_s3 + $0x18] ss:$12 sps:$4 sm:$0xff]   ;;  %8152 = vmatprep.subr.bf16.mxu0 %v13075_v60  ;;  %v8249_v60 = vrot.slane %v17250_v1, %v18028_v14 }
0x1976   : > { %7904 = vmatprep.mubr.bf16.mxu1 %v7570_v19  ;;  %8153 = vmatpush1.bf16.msra.mxu0 %v13073_v50 }
0x1977   : > { %7905 = vmatmul.mubr.bf16.vlgmr.msra.gmra.mrb[232].mxu1 %v7569_v47 }
0x1978   : > { %12571 = vmatpush3.bf16.msra.mxu1 %v13072_v6  ;;  %12586 = vmatprep.mubr.msk.bf16.mxu1 %vm13887_vm1, %v13886_v20  ;;  %v8237_v6 = vrot.slane %v17174_v12, %v18032_v15 }
0x1979   : > { %12572 = vmatprep.subr.bf16.mxu1 %v13886_v20 }
0x1a42   : > { %v11910_v58 = vpop.f32.mrb[232].mxu0 }
0x1a43   : > { %v11911_v8 = vpop.f32.mrb[233].mxu0 }
0x1a44   : > { %v11912_v42 = vadd.f32 %v11911_v8, %v11910_v58  ;;  %v11913_v16 = vpop.f32.mrb[234].mxu0 }
0x1a45   : > { %v11914_v34 = vpop.f32.mrb[235].mxu0 }
0x1a46   : > { %v11915_v48 = vadd.f32 %v11914_v34, %v11913_v16  ;;  %v7866_v63 = vadd.f32 %v11912_v42, %v7638_v7 }
0x1a48   : > { %v7869_v39 = vadd.f32 %v11915_v48, %v7638_v7  ;;  %v13076_v7 = vld [vmem:[%s18040_s3 + $0x20] ss:$12 sps:$4 sm:$0xff]  }
0x1a49   : > { %12573 = vmatpush3.bf16.msra.mxu1 %v13076_v7 }
0x1a4a   : > { %v11932_v43 = vpop.f32.mrb[232].mxu1  ;;  %12574 = vmatprep.subr.bf16.mxu1 %v13886_v20 }
0x1a4b   : > { %v11933_v11 = vpop.f32.mrb[233].mxu1 }
0x1a4c   : > { %v11934_v35 = vadd.f32 %v11933_v11, %v11932_v43  ;;  %v11935_v51 = vpop.f32.mrb[234].mxu1  ;;  %v13079_v43 = vld [vmem:[%s18040_s3 + $0x34] ss:$12 sps:$4 sm:$0xff]   ;;  %v13077_v11 = vld [vmem:[%s18040_s3 + $0x30] ss:$12 sps:$4 sm:$0xff]  }
0x1a4d   : > { %v11936_v4 = vpop.f32.mrb[235].mxu1  ;;  %8154 = vmatprep.subr.bf16.mxu0 %v13079_v43 }
0x1a4e   : > { %v7907_v56 = vadd.f32 %v11934_v35, %v7866_v63  ;;  %v11937_v25 = vadd.f32 %v11936_v4, %v11935_v51  ;;  %v13080_v63 = vld [vmem:[%s18040_s3 + $0x38] ss:$12 sps:$4 sm:$0xff]   ;;  %8155 = vmatpush1.bf16.msra.mxu0 %v13077_v11  ;;  %v13081_v51 = vld [vmem:[%s18040_s3 + $0x48] ss:$12 sps:$4 sm:$0xff]   ;;  %v13084_v4 = vld [vmem:[%s18040_s3 + $0x50] ss:$12 sps:$4 sm:$0xff]  }
0x1a4f   : > { %12575 = vmatpush3.bf16.msra.mxu1 %v13080_v63  ;;  %v13083_v35 = vld [vmem:[%s18040_s3 + $0x4c] ss:$12 sps:$4 sm:$0xff]  }
0x1a50   : > { %v7910_v26 = vadd.f32 %v11937_v25, %v7869_v39  ;;  %7913 = vadd.xlane.f32.xlu1 %v7907_v56  ;;  %12576 = vmatprep.subr.bf16.mxu1 %v13886_v20  ;;  %v13085_v39 = vld [vmem:[%s18040_s3 + $0x60] ss:$12 sps:$4 sm:$0xff]   ;;  %v13088_v25 = vld [vmem:[%s18040_s3 + $0x68] ss:$12 sps:$4 sm:$0xff]  }
0x1a51   : > { %8156 = vmatprep.subr.bf16.mxu0 %v13083_v35 }
0x1a52   : > { %8157 = vmatpush1.bf16.msra.mxu0 %v13081_v51 }
0x1a53   : > { %12577 = vmatpush3.bf16.msra.mxu1 %v13084_v4 }
0x1a54   : > { %7915 = vadd.xlane.f32.xlu1 %v7910_v26  ;;  %12578 = vmatprep.subr.bf16.mxu1 %v13886_v20 }
0x1a57   : > { %12579 = vmatpush3.bf16.msra.mxu1 %v13088_v25 }
0x1a58   : > { %12580 = vmatprep.subr.bf16.mxu1 %v13886_v20 }
0x1add   : > { %v7914_v23 = vpop.xlane.xlu1 %7913 }
0x1ade   : > { %v7917_v49 = vmul.f32 0.015625, %v7914_v23  ;;  %v13089_v23 = vld [vmem:[%s18040_s3 + $0x78] ss:$12 sps:$4 sm:$0xff]  }
0x1ae0   : > { %v7919_v54 = vsub.f32 %v7907_v56, %v7917_v49  ;;  %v13087_v56 = vld [vmem:[%s18040_s3 + $0x64] ss:$12 sps:$4 sm:$0xff]   ;;  %v13092_v49 = vld [vmem:[%s18040_s3 + $0x80] ss:$12 sps:$4 sm:$0xff]  }
0x1ae1   : > { %v7916_v13 = vpop.xlane.xlu1 %7915  ;;  %8158 = vmatprep.subr.bf16.mxu0 %v13087_v56  ;;  %12581 = vmatpush3.bf16.msra.mxu1 %v13092_v49 }
0x1ae2   : > { %v7925_v10 = vmul.f32 %v17180_v33, %v7919_v54  ;;  %v7918_v59 = vmul.f32 0.015625, %v7916_v13  ;;  %8159 = vmatpush1.bf16.msra.mxu0 %v13085_v39  ;;  %v13095_v54 = vld [vmem:[%s18040_s3 + $0x94] ss:$12 sps:$4 sm:$0xff]   ;;  %v13093_v13 = vld [vmem:[%s18040_s3 + $0x90] ss:$12 sps:$4 sm:$0xff]   ;;  %12582 = vmatprep.subr.bf16.mxu1 %v13886_v20 }
0x1ae4   : > { %v7920_v53 = vsub.f32 %v7910_v26, %v7918_v59  ;;  %v7927_v46 = vmul.f32 %v7925_v10, %v7925_v10  ;;  %v13091_v26 = vld [vmem:[%s18040_s3 + $0x7c] ss:$12 sps:$4 sm:$0xff]   ;;  %v13099_v59 = vld [vmem:[%s18040_s3 + $0xac] ss:$12 sps:$4 sm:$0xff]  }
0x1ae5   : > { %8160 = vmatprep.subr.bf16.mxu0 %v13091_v26 }
0x1ae6   : > { %v7926_v41 = vmul.f32 %v17180_v33, %v7920_v53  ;;  %7929 = vadd.xlane.f32.xlu1 %v7927_v46  ;;  %8161 = vmatpush1.bf16.msra.mxu0 %v13089_v23  ;;  %v13097_v53 = vld [vmem:[%s18040_s3 + $0xa8] ss:$12 sps:$4 sm:$0xff]   ;;  %v13100_v46 = vld [vmem:[%s18040_s3 + $0xb0] ss:$12 sps:$4 sm:$0xff]  }
0x1ae7   : > { %8162 = vmatprep.subr.bf16.mxu0 %v13095_v54 }
0x1ae8   : > { %v7928_v18 = vmul.f32 %v7926_v41, %v7926_v41 }
0x1aea   : > { %7931 = vadd.xlane.f32.xlu1 %v7928_v18  ;;  %8163 = vmatpush1.bf16.msra.mxu0 %v13093_v13 }
0x1aeb   : > { %8164 = vmatprep.subr.bf16.mxu0 %v13099_v59 }
0x1aee   : > { %8165 = vmatpush1.bf16.msra.mxu0 %v13097_v53 }
0x1b73   : > { %v7930_v22 = vpop.xlane.xlu1 %7929 }
0x1b74   : > { %v7933_v62 = vmul.f32 0.015625, %v7930_v22 }
0x1b76   : > { %v7935_v30 = vadd.f32 1e-06, %v7933_v62 }
0x1b77   : > { %v7932_v29 = vpop.xlane.xlu1 %7931 }
0x1b78   : > { %13706 = vrsqrt.f32 %v7935_v30  ;;  %v7934_v52 = vmul.f32 0.015625, %v7932_v29 }
0x1b7a   : > { %v7936_v27 = vadd.f32 1e-06, %v7934_v52 }
0x1b7c   : > { %13708 = vrsqrt.f32 %v7936_v27 }
0x1b82   : > { %v13707_v24 = vpop.eup %13706 }
0x1b83   : > { %v7939_v5 = vmul.f32 %v13707_v24, %v7925_v10  ;;  %v13096_v10 = vld [vmem:[%s18040_s3 + $0x98] ss:$12 sps:$4 sm:$0xff]   ;;  %s18043_s3 = sld [smem:[#allocation21_spill]] }
0x1b84   : > { %12583 = vmatpush3.bf16.msra.mxu1 %v13096_v10 }
0x1b85   : > { %v7945_v57 = vmul.f32 %v7944_v44, %v7939_v5  ;;  %12584 = vmatprep.subr.bf16.mxu1 %v13886_v20 }
0x1b86   : > { %v13709_v28 = vpop.eup %13708 }
0x1b87   : > { %v17188_v38 = vadd.f32 %v7950_v37, %v7945_v57  ;;  %v7940_v3 = vmul.f32 %v13709_v28, %v7926_v41  ;;  %v7986_v57 = vrot.slane %v17174_v12, %v18031_v0 }
0x1b88   : > { %12585 = vmatpush3.bf16.msra.mxu1 %v13100_v46 }
0x1b89   : > { %7953 = vadd.xlane.f32.xlu1 %v17188_v38  ;;  %v7946_v32 = vmul.f32 %v7944_v44, %v7940_v3  ;;  %12608 = vmatprep.subr.bf16.mxu1 %v13886_v20  ;;  %v7980_v44 = vrot.slane %v17174_v12, %v18003_v40 }
0x1b8b   : > { %v17191_v9 = vadd.f32 %v7950_v37, %v7946_v32 }
0x1b8d   : > { %7955 = vadd.xlane.f32.xlu1 %v17191_v9 }
0x1c16   : > { %v7954_v2 = vpop.xlane.xlu1 %7953 }
0x1c17   : > { %v7957_v19 = vmul.f32 0.015625, %v7954_v2 }
0x1c19   : > { %v7959_v36 = vsub.f32 %v17188_v38, %v7957_v19  ;;  %v8243_v19 = vrot.slane %v17174_v12, %v18033_v31 }
0x1c1a   : > { %v7956_v47 = vpop.xlane.xlu1 %7955 }
0x1c1b   : > { %v17203_v58 = vmul.f32 %v7959_v36, %v17180_v33  ;;  %v7958_v8 = vmul.f32 0.015625, %v7956_v47 }
0x1c1d   : > { %v7960_v42 = vsub.f32 %v17191_v9, %v7958_v8  ;;  %v7963_v16 = vmul.f32 %v17203_v58, %v17203_v58 }
0x1c1f   : > { %v17209_v34 = vmul.f32 %v7960_v42, %v17180_v33  ;;  %7965 = vadd.xlane.f32.xlu1 %v7963_v16 }
0x1c21   : > { %v7964_v48 = vmul.f32 %v17209_v34, %v17209_v34 }
0x1c23   : > { %7967 = vadd.xlane.f32.xlu0 %v7964_v48 }
0x1cac   : > { %v7966_v41 = vpop.xlane.xlu1 %7965 }
0x1cad   : > { %v7969_v18 = vmul.f32 0.015625, %v7966_v41 }
0x1caf   : > { %v7971_v22 = vadd.f32 1e-06, %v7969_v18 }
0x1cb0   : > { %v7968_v62 = vpop.xlane.xlu0 %7967 }
0x1cb1   : > { %13710 = vrsqrt.f32 %v7971_v22  ;;  %v7970_v30 = vmul.f32 0.015625, %v7968_v62 }
0x1cb3   : > { %v7972_v29 = vadd.f32 1e-06, %v7970_v30 }
0x1cb5   : > { %13712 = vrsqrt.f32 %v7972_v29 }
0x1cbb   : > { %v13711_v52 = vpop.eup %13710 }
0x1cbc   : > { %v7975_v27 = vmul.f32 %v13711_v52, %v17203_v58 }
0x1cbe   : > { %v7981_v37 = vmul.f32 %v7980_v44, %v7975_v27 }
0x1cbf   : > { %v13713_v24 = vpop.eup %13712 }
0x1cc0   : > { %v7976_v5 = vmul.f32 %v13713_v24, %v17209_v34  ;;  %v7987_v3 = vadd.f32 %v7986_v57, %v7981_v37 }
0x1cc2   : > { %v7982_v28 = vmul.f32 %v7980_v44, %v7976_v5 }
0x1cc4   : > { %v7988_v32 = vadd.f32 %v7986_v57, %v7982_v28 }
0x1cc6   : > { %v7989_v17 = vpack.c.bf16 %v7988_v32, %v7987_v3 }
0x1cc8   : > { %8183 = vmatmul.mubr.bf16.vlgmr.msra.gmra.mrb[236].mxu0 %v7989_v17  ;;  %12587 = vmatmul.mubr.bf16.vlgmr.msra.gmra.mrb[236].mxu1 %v7989_v17 }
0x1cc9   : > { %12624 = vmatprep.mubr.msk.bf16.mxu1 %vm13887_vm1, %v13886_v20 }
0x1d9b   : > { %v8184_v50 = vpop.f32.mrb[236].mxu0  ;;  %v8227_v2 = vpop.f32.mrb[236].mxu1 }
0x1d9c   : > { %v8186_v36 = vpop.f32.mrb[237].mxu0  ;;  %v12588_v47 = vpop.f32.mrb[237].mxu1  ;;  %v17258_v42 = vadd.f32 %v8237_v6, %v8184_v50  ;;  %v8250_v16 = vadd.f32 %v8249_v60, %v8227_v2  ;;  %v13102_v50 = vld [vmem:[%s18041_s18 + $0x8] sm:$0xff]   ;;  %v13103_v2 = vld [vmem:[%s18041_s18 + $0x10] sm:$0xff]  }
0x1d9d   : > { %v8188_v58 = vpop.f32.mrb[238].mxu0  ;;  %v8230_v8 = vpop.f32.mrb[238].mxu1  ;;  %v8244_v11 = vadd.f32 %v8243_v19, %v8186_v36  ;;  %v13105_v36 = vld [vmem:[%s18041_s18 + $0x20] sm:$0xff]   ;;  %v13106_v47 = vld [vmem:[%s18041_s18 + $0x28] sm:$0xff]  }
0x1d9e   : > { %v17260_v34 = vadd.f32 %v8237_v6, %v8188_v58  ;;  %v8251_v48 = vadd.f32 %v8249_v60, %v8230_v8  ;;  %v8190_v7 = vpop.f32.mrb[239].mxu0  ;;  %v12589_v43 = vpop.f32.mrb[239].mxu1  ;;  %v13101_v60 = vld [vmem:[%s18041_s18] sm:$0xff]  }
0x1d9f   : > { %v8245_v63 = vadd.f32 %v8243_v19, %v8190_v7  ;;  %v13104_v19 = vld [vmem:[%s18041_s18 + $0x18] sm:$0xff]  }
0x1da0   : > { %v8415_v35 = vpack.c.bf16 %v17260_v34, %v17258_v42  ;;  %v8276_v51 = vpack.c.bf16 %v8251_v48, %v8250_v16  ;;  %v8487_v42 = vrot.slane %v17250_v1, %v18027_v61 }
0x1da1   : > { %v8252_v4 = vmax.f32 %v8244_v11, %v8245_v63 }
0x1da2   : > { %12590 = vmatprep.subr.bf16.mxu0 %v8276_v51 }
0x1da3   : > { %v8253_v12 = vrot.slane %v8252_v4, 4  ;;  %12591 = vmatpush3.bf16.msra.mxu0 %v8276_v51 }
0x1da4   : > { %12628 = vmatprep.subr.bf16.mxu0 %v13886_v20 }
0x1da5   : > { %v8254_v56 = vmax.f32 %v8252_v4, %v8253_v12 }
0x1da7   : > { %v8255_v39 = vrot.slane %v8254_v56, 2 }
0x1da9   : > { %v8256_v25 = vmax.f32 %v8254_v56, %v8255_v39 }
0x1dab   : > { %v8257_v26 = vrot.slane %v8256_v25, 1 }
0x1dad   : > { %v8258_v23 = vmax.f32 %v8256_v25, %v8257_v26 }
0x1daf   : > { %v8259_v49 = vsub.f32 %v8244_v11, %v8258_v23  ;;  %v8260_v54 = vsub.f32 %v8245_v63, %v8258_v23 }
0x1db1   : > { %v8261_v13 = vmul.f32 1.442695, %v8259_v49  ;;  %v8263_v10 = vmul.f32 1.442695, %v8260_v54 }
0x1db3   : > { %13714 = vpow2.f32 %v8261_v13 }
0x1db4   : > { %13716 = vpow2.f32 %v8263_v10 }
0x1dbd   : > { %v13715_v59 = vpop.eup %13714 }
0x1dbe   : > { %v13717_v53 = vpop.eup %13716 }
0x1dbf   : > { %v8265_v46 = vadd.f32 %v13717_v53, %v13715_v59 }
0x1dc1   : > { %v8266_v41 = vrot.slane %v8265_v46, 4 }
0x1dc3   : > { %v8267_v18 = vadd.f32 %v8266_v41, %v8265_v46 }
0x1dc5   : > { %v8268_v22 = vrot.slane %v8267_v18, 2 }
0x1dc7   : > { %v8269_v62 = vadd.f32 %v8268_v22, %v8267_v18  ;;  %v13107_v18 = vld [vmem:[%s18041_s18 + $0x30] sm:$0xff]   ;;  %v13108_v22 = vld [vmem:[%s18041_s18 + $0x38] sm:$0xff]  }
0x1dc9   : > { %v8270_v30 = vrot.slane %v8269_v62, 1 }
0x1dcb   : > { %v8271_v29 = vadd.f32 %v8270_v30, %v8269_v62 }
0x1dcd   : > { %13718 = vrcp.f32 %v8271_v29 }
0x1dd7   : > { %v13719_v52 = vpop.eup %13718 }
0x1dd8   : > { %v8273_v27 = vmul.f32 %v13719_v52, %v13715_v59  ;;  %v8274_v44 = vmul.f32 %v13719_v52, %v13717_v53 }
0x1dda   : > { %v8275_v24 = vpack.c.bf16 %v8274_v44, %v8273_v27 }
0x1ddc   : > { %8277 = vxpose.xlu1.c.b16.start.end [1/1] (short) %v8275_v24, 128 }
0x1e42   : > { %v8285_v5 = vpop.trf.xlu1 }
0x1e43   : > { %12592 = vmatprep.mubr.msk.bf16.mxu0 %vm8293_vm2, %v8285_v5 }
0x1e46   : > { %v8286_v37 = vpop.trf.xlu1 }
0x1e47   : > { %12593 = vmatmul.mubr.msk.bf16.vlgmr.msra.gmra.mrb[240].mxu0 %vm8293_vm2, %v8286_v37 }
0x1e48   : > { %12629 = vmatpush3.bf16.msra.mxu0 %v13101_v60  ;;  %v13114_v60 = vld [vmem:[%s18042_s1 + $0x14] ss:$8 sps:$4 sm:$0xff]  }
0x1e49   : > { %12630 = vmatprep.subr.bf16.mxu0 %v13886_v20 }
0x1e4a   : > { %v8287_v57 = vpop.trf.xlu1 }
0x1e4b   : > { %12596 = vmatprep.mubr.msk.bf16.mxu0 %vm8293_vm2, %v8287_v57 }
0x1e4c   : > { %12631 = vmatpush3.bf16.msra.mxu0 %v13102_v50  ;;  %v13112_v50 = vld [vmem:[%s18042_s1 + $0x10] ss:$8 sps:$4 sm:$0xff]  }
0x1e4d   : > { %12632 = vmatprep.subr.bf16.mxu0 %v13886_v20 }
0x1e4e   : > { %v8288_v28 = vpop.trf.xlu1 }
0x1e4f   : > { %12597 = vmatmul.mubr.msk.bf16.gmra.mrb[244].mxu0 %vm8293_vm2, %v8288_v28 }
0x1e50   : > { %12633 = vmatpush3.bf16.msra.mxu0 %v13103_v2 }
0x1e51   : > { %12634 = vmatprep.subr.bf16.mxu0 %v13886_v20 }
0x1e52   : > { %v8289_v3 = vpop.trf.xlu1 }
0x1e53   : > { %12600 = vmatprep.mubr.msk.bf16.mxu0 %vm8293_vm2, %v8289_v3 }
0x1e54   : > { %12635 = vmatpush3.bf16.msra.mxu0 %v13104_v19 }
0x1e55   : > { %12636 = vmatprep.subr.bf16.mxu0 %v13886_v20 }
0x1e56   : > { %v8290_v32 = vpop.trf.xlu1 }
0x1e57   : > { %12601 = vmatmul.mubr.msk.bf16.gmra.mrb[248].mxu0 %vm8293_vm2, %v8290_v32 }
0x1e58   : > { %12637 = vmatpush3.bf16.msra.mxu0 %v13105_v36 }
0x1e59   : > { %12638 = vmatprep.subr.bf16.mxu0 %v13886_v20 }
0x1e5a   : > { %v8291_v17 = vpop.trf.xlu1 }
0x1e5b   : > { %12604 = vmatprep.mubr.msk.bf16.mxu0 %vm8293_vm2, %v8291_v17  ;;  %v13109_v17 = vld [vmem:[%s18042_s1] ss:$8 sps:$4 sm:$0xff]  }
0x1e5c   : > { %12639 = vmatpush3.bf16.msra.mxu0 %v13106_v47 }
0x1e5d   : > { %12640 = vmatprep.subr.bf16.mxu0 %v13886_v20 }
0x1e5e   : > { %v8292_v6 = vpop.trf.xlu1 }
0x1e5f   : > { %12605 = vmatmul.mubr.msk.bf16.gmra.mrb[252].mxu0 %vm8293_vm2, %v8292_v6  ;;  %v13111_v6 = vld [vmem:[%s18042_s1 + $0x4] ss:$8 sps:$4 sm:$0xff]  }
0x1e60   : > { %12644 = vmatprep.mubr.msk.bf16.mxu0 %vm13887_vm1, %v13886_v20  ;;  %12641 = vmatpush3.bf16.msra.mxu0 %v13107_v18 }
0x1e61   : > { %12642 = vmatprep.subr.bf16.mxu0 %v13886_v20 }
0x1e64   : > { %12643 = vmatpush3.bf16.msra.mxu0 %v13108_v22 }
0x1f1a   : > { %v12594_v58 = vpop.f32.mrb[240].mxu0 }
0x1f1b   : > { %v8352_v8 = vpop.f32.mrb[241].mxu0 }
0x1f1c   : > { %v12595_v16 = vpop.f32.mrb[242].mxu0 }
0x1f1d   : > { %v8417_v48 = vpack.c.bf16 %v12595_v16, %v12594_v58  ;;  %v8355_v7 = vpop.f32.mrb[243].mxu0 }
0x1f1e   : > { %v8416_v43 = vpack.c.bf16 %v8355_v7, %v8352_v8  ;;  %v13117_v7 = vld [vmem:[%s18042_s1 + $0x24] ss:$8 sps:$4 sm:$0xff]  }
0x1f20   : > { %12609 = vmatpush3.bf16.msra.mxu1 %v8416_v43  ;;  %v13115_v43 = vld [vmem:[%s18042_s1 + $0x20] ss:$8 sps:$4 sm:$0xff]  }
0x1f21   : > { %12610 = vmatprep.subr.bf16.mxu1 %v13886_v20 }
0x1f22   : > { %v12598_v11 = vpop.f32.mrb[244].mxu0 }
0x1f23   : > { %v8368_v63 = vpop.f32.mrb[245].mxu0 }
0x1f24   : > { %v12599_v51 = vpop.f32.mrb[246].mxu0  ;;  %12611 = vmatpush3.bf16.msra.mxu1 %v8417_v48 }
0x1f25   : > { %v8419_v4 = vpack.c.bf16 %v12599_v51, %v12598_v11  ;;  %v8371_v12 = vpop.f32.mrb[247].mxu0  ;;  %12612 = vmatprep.subr.bf16.mxu1 %v13886_v20  ;;  %v13120_v11 = vld [vmem:[%s18042_s1 + $0x34] ss:$8 sps:$4 sm:$0xff]   ;;  %v13123_v51 = vld [vmem:[%s18042_s1 + $0x44] ss:$8 sps:$4 sm:$0xff]  }
0x1f26   : > { %v8418_v56 = vpack.c.bf16 %v8371_v12, %v8368_v63  ;;  %v13118_v63 = vld [vmem:[%s18042_s1 + $0x30] ss:$8 sps:$4 sm:$0xff]  }
0x1f27   : > { %v13124_v12 = vld [vmem:[%s18042_s1 + $0x50] ss:$8 sps:$4 sm:$0xff]  }
0x1f28   : > { %12613 = vmatpush3.bf16.msra.mxu1 %v8418_v56  ;;  %v13129_v56 = vld [vmem:[%s18042_s1 + $0x64] ss:$8 sps:$4 sm:$0xff]  }
0x1f29   : > { %12614 = vmatprep.subr.bf16.mxu1 %v13886_v20 }
0x1f2a   : > { %v12602_v39 = vpop.f32.mrb[248].mxu0 }
0x1f2b   : > { %v8384_v25 = vpop.f32.mrb[249].mxu0 }
0x1f2c   : > { %v12603_v26 = vpop.f32.mrb[250].mxu0  ;;  %12615 = vmatpush3.bf16.msra.mxu1 %v8419_v4  ;;  %v13121_v4 = vld [vmem:[%s18042_s1 + $0x40] ss:$8 sps:$4 sm:$0xff]  }
0x1f2d   : > { %v8421_v23 = vpack.c.bf16 %v12603_v26, %v12602_v39  ;;  %v8387_v49 = vpop.f32.mrb[251].mxu0  ;;  %12616 = vmatprep.subr.bf16.mxu1 %v13886_v20  ;;  %v13127_v39 = vld [vmem:[%s18042_s1 + $0x60] ss:$8 sps:$4 sm:$0xff]   ;;  %v13130_v26 = vld [vmem:[%s18042_s1 + $0x70] ss:$8 sps:$4 sm:$0xff]  }
0x1f2e   : > { %v8420_v54 = vpack.c.bf16 %v8387_v49, %v8384_v25  ;;  %v13132_v25 = vld [vmem:[%s18042_s1 + $0x74] ss:$8 sps:$4 sm:$0xff]  }
0x1f30   : > { %12617 = vmatpush3.bf16.msra.mxu1 %v8420_v54 }
0x1f31   : > { %12618 = vmatprep.subr.bf16.mxu1 %v13886_v20 }
0x1f32   : > { %v12606_v13 = vpop.f32.mrb[252].mxu0 }
0x1f33   : > { %v8400_v10 = vpop.f32.mrb[253].mxu0 }
0x1f34   : > { %v12607_v59 = vpop.f32.mrb[254].mxu0  ;;  %12619 = vmatpush3.bf16.msra.mxu1 %v8421_v23 }
0x1f35   : > { %v8423_v53 = vpack.c.bf16 %v12607_v59, %v12606_v13  ;;  %v8403_v46 = vpop.f32.mrb[255].mxu0  ;;  %12620 = vmatprep.subr.bf16.mxu1 %v13886_v20 }
0x1f36   : > { %v8422_v41 = vpack.c.bf16 %v8403_v46, %v8400_v10 }
0x1f38   : > { %12621 = vmatpush3.bf16.msra.mxu1 %v8422_v41  ;;  %v8606_v41 = vrot.slane %v17250_v1, %v18029_v55 }
0x1f39   : > { %12622 = vmatprep.subr.bf16.mxu1 %v13886_v20 }
0x1f3c   : > { %12623 = vmatpush3.bf16.msra.mxu1 %v8423_v53 }
0x1f3d   : > { %8724 = vmatprep.subr.bf16.mxu1 %v13111_v6  ;;  %v13142_v6 = vld [vmem:[%s18043_s3 + $0x20] sm:$0xff]  }
0x1f3f   : > { %12625 = vmatmul.mubr.bf16.vlgmr.msra.gmra.mrb[240].mxu1 %v8415_v35 }
0x1f40   : > { %8756 = vmatprep.mubr.bf16.mxu1 %v18026_v45  ;;  %8725 = vmatpush1.bf16.msra.mxu1 %v13109_v17  ;;  %v13141_v17 = vld [vmem:[%s18043_s3 + $0x60] sm:$0xff]  }
0x1f41   : > { %8726 = vmatprep.subr.bf16.mxu1 %v13114_v60  ;;  %v13143_v60 = vld [vmem:[%s18043_s3 + $0x68] sm:$0xff]  }
0x1f44   : > { %8727 = vmatpush1.bf16.msra.mxu1 %v13112_v50  ;;  %v13144_v50 = vld [vmem:[%s18043_s3 + $0x28] sm:$0xff]  }
0x1f45   : > { %8728 = vmatprep.subr.bf16.mxu1 %v13117_v7 }
0x1f48   : > { %8729 = vmatpush1.bf16.msra.mxu1 %v13115_v43 }
0x1f49   : > { %8730 = vmatprep.subr.bf16.mxu1 %v13120_v11 }
0x1f4c   : > { %8731 = vmatpush1.bf16.msra.mxu1 %v13118_v63 }
0x1f4d   : > { %8732 = vmatprep.subr.bf16.mxu1 %v13123_v51 }
0x1f50   : > { %8733 = vmatpush1.bf16.msra.mxu1 %v13121_v4 }
0x2012   : > { %v8458_v62 = vpop.f32.mrb[240].mxu1 }
0x2013   : > { %v12626_v30 = vpop.f32.mrb[241].mxu1  ;;  %v8465_v52 = vmul.f32 0.125, %v8458_v62 }
0x2014   : > { %v8461_v29 = vpop.f32.mrb[242].mxu1  ;;  %v8612_v30 = vrot.slane %v17250_v1, %v18030_v21 }
0x2015   : > { %v8466_v27 = vmul.f32 0.125, %v8461_v29  ;;  %v12627_v44 = vpop.f32.mrb[243].mxu1 }
0x2017   : > { %v8467_v24 = vpack.c.bf16 %v8466_v27, %v8465_v52 }
0x2019   : > { %12645 = vmatmul.mubr.bf16.vlgmr.msra.gmra.mrb[0].mxu0 %v8467_v24  ;;  %v13133_v24 = vld [vmem:[%s18043_s3 + $0x40] sm:$0xff]  }
0x201a   : > { %11974 = vmatprep.subr.bf16.mxu0 %v13133_v24 }
0x20ec   : > { %v8570_v34 = vpop.f32.mrb[0].mxu0 }
0x20ed   : > { %v8571_v35 = vadd.f32 %v8570_v34, %v8487_v42  ;;  %v12646_v5 = vpop.f32.mrb[1].mxu0  ;;  %v13135_v34 = vld [vmem:[%s18043_s3 + $0x48] sm:$0xff]  }
0x20ee   : > { %v8573_v37 = vpop.f32.mrb[2].mxu0  ;;  %v13137_v5 = vld [vmem:[%s18043_s3 + $0x50] sm:$0xff]  }
0x20ef   : > { %v17304_v57 = vadd.f32 %v8571_v35, %v17188_v38  ;;  %v8574_v28 = vadd.f32 %v8573_v37, %v8487_v42  ;;  %v12647_v3 = vpop.f32.mrb[3].mxu0  ;;  %v13134_v42 = vld [vmem:[%s18043_s3] sm:$0xff]   ;;  %v13136_v35 = vld [vmem:[%s18043_s3 + $0x8] sm:$0xff]   ;;  %v13138_v37 = vld [vmem:[%s18043_s3 + $0x10] sm:$0xff]  }
0x20f0   : > { %11975 = vmatpush3.bf16.msra.mxu0 %v13134_v42  ;;  %v13140_v3 = vld [vmem:[%s18043_s3 + $0x18] sm:$0xff]  }
0x20f1   : > { %8579 = vadd.xlane.f32.xlu0 %v17304_v57  ;;  %v17308_v32 = vadd.f32 %v8574_v28, %v17191_v9  ;;  %11976 = vmatprep.subr.bf16.mxu0 %v13135_v34  ;;  %v13139_v28 = vld [vmem:[%s18043_s3 + $0x58] sm:$0xff]  }
0x20f4   : > { %11977 = vmatpush3.bf16.msra.mxu0 %v13136_v35 }
0x20f5   : > { %8581 = vadd.xlane.f32.xlu0 %v17308_v32  ;;  %11978 = vmatprep.subr.bf16.mxu0 %v13137_v5 }
0x20f8   : > { %11979 = vmatpush3.bf16.msra.mxu0 %v13138_v37 }
0x20f9   : > { %11980 = vmatprep.subr.bf16.mxu0 %v13139_v28 }
0x20fc   : > { %11981 = vmatpush3.bf16.msra.mxu0 %v13140_v3 }
0x20fd   : > { %11982 = vmatprep.subr.bf16.mxu0 %v13141_v17 }
0x2100   : > { %11983 = vmatpush3.bf16.msra.mxu0 %v13142_v6 }
0x2101   : > { %11984 = vmatprep.subr.bf16.mxu0 %v13143_v60 }
0x2104   : > { %11985 = vmatpush3.bf16.msra.mxu0 %v13144_v50 }
0x217e   : > { %v8580_v38 = vpop.xlane.xlu0 %8579 }
0x217f   : > { %v8583_v2 = vmul.f32 0.015625, %v8580_v38  ;;  %v13145_v38 = vld [vmem:[%s18043_s3 + $0x70] sm:$0xff]  }
0x2180   : > { %11986 = vmatprep.subr.bf16.mxu0 %v13145_v38 }
0x2181   : > { %v8585_v19 = vsub.f32 %v17304_v57, %v8583_v2  ;;  %v13146_v2 = vld [vmem:[%s18043_s3 + $0x30] sm:$0xff]  }
0x2182   : > { %v8582_v9 = vpop.xlane.xlu0 %8581  ;;  %11987 = vmatpush3.bf16.msra.mxu0 %v13146_v2 }
0x2183   : > { %v8587_v36 = vmul.f32 %v8585_v19, %v17180_v33  ;;  %v8584_v47 = vmul.f32 0.015625, %v8582_v9  ;;  %v13147_v19 = vld [vmem:[%s18043_s3 + $0x78] sm:$0xff]  }
0x2184   : > { %v13148_v9 = vld [vmem:[%s18043_s3 + $0x38] sm:$0xff]   ;;  %11988 = vmatprep.subr.bf16.mxu0 %v13147_v19  ;;  %s17372_s3 = sand.u32 1, %s13840_s23  }
0x2185   : > { %v8586_v58 = vsub.f32 %v17308_v32, %v8584_v47  ;;  %v8589_v8 = vmul.f32 %v8587_v36, %v8587_v36  ;;  %s10951_s5 = sshll.u32 %s17372_s3, 4  ;;  %s10731_s8 = scalar_lea.sflag [#allocation3], %s17372_s3 }
0x2186   : > { %11989 = vmatpush3.bf16.msra.mxu0 %v13148_v9  ;;  %s17378_s7 = scalar_lea.vmem [#allocation2], %s10951_s5  ;;  %s18048_s5 = sld [smem:[#allocation26_spill]] }
0x2187   : > { %v8588_v16 = vmul.f32 %v8586_v58, %v17180_v33  ;;  %8591 = vadd.xlane.f32.xlu0 %v8589_v8  ;;  %v13126_v33 = vld [vmem:[%s18042_s1 + $0x54] ss:$8 sps:$4 sm:$0xff]   ;;  %s18044_s1 = sld [smem:[#allocation23_spill]] }
0x2188   : > { %8734 = vmatprep.subr.bf16.mxu1 %v13126_v33 }
0x2189   : > { %v8590_v48 = vmul.f32 %v8588_v16, %v8588_v16  ;;  %8735 = vmatpush1.bf16.msra.mxu1 %v13124_v12 }
0x218a   : > { %8736 = vmatprep.subr.bf16.mxu1 %v13129_v56 }
0x218b   : > { %8593 = vadd.xlane.f32.xlu0 %v8590_v48 }
0x218d   : > { %8737 = vmatpush1.bf16.msra.mxu1 %v13127_v39 }
0x218e   : > { %8738 = vmatprep.subr.bf16.mxu1 %v13132_v25 }
0x2191   : > { %8739 = vmatpush1.bf16.msra.mxu1 %v13130_v26 }
0x2192   : > { %12648 = vmatprep.subr.bf16.mxu1 %v13886_v20 }
0x2214   : > { %v8592_v23 = vpop.xlane.xlu0 %8591 }
0x2215   : > { %v8595_v49 = vmul.f32 0.015625, %v8592_v23 }
0x2217   : > { %v8597_v54 = vadd.f32 1e-06, %v8595_v49 }
0x2218   : > { %v8594_v13 = vpop.xlane.xlu0 %8593 }
0x2219   : > { %13720 = vrsqrt.f32 %v8597_v54  ;;  %v8596_v10 = vmul.f32 0.015625, %v8594_v13 }
0x221b   : > { %v8598_v59 = vadd.f32 1e-06, %v8596_v10 }
0x221d   : > { %13722 = vrsqrt.f32 %v8598_v59 }
0x2223   : > { %v13721_v53 = vpop.eup %13720 }
0x2224   : > { %v8601_v46 = vmul.f32 %v13721_v53, %v8587_v36  ;;  %v8632_v36 = vld [vmem:[%s18044_s1] sm:$0x3]  ;;  %s18045_s1 = sld [smem:[#allocation25_spill]] }
0x2225   : > { %v8637_v47 = vrot.slane %v8632_v36, %v18028_v14  ;;  %v8641_v58 = vrot.slane %v8632_v36, %v18027_v61 }
0x2226   : > { %v8607_v62 = vmul.f32 %v8606_v41, %v8601_v46 }
0x2227   : > { %v13723_v18 = vpop.eup %13722 }
0x2228   : > { %v8602_v22 = vmul.f32 %v13723_v18, %v8588_v16  ;;  %v8613_v52 = vadd.f32 %v8612_v30, %v8607_v62 }
0x222a   : > { %v8608_v29 = vmul.f32 %v8606_v41, %v8602_v22  ;;  %v13150_v19 = vld [vmem:[%s18045_s1 + $0x40] sm:$0xff]   ;;  %v13154_v36 = vld [vmem:[%s18045_s1 + $0x48] sm:$0xff]  }
0x222b   : > { %v13151_v9 = vld [vmem:[%s18045_s1] sm:$0xff]   ;;  %11998 = vmatprep.subr.bf16.mxu0 %v13150_v19 }
0x222c   : > { %v8614_v27 = vadd.f32 %v8612_v30, %v8608_v29 }
0x222e   : > { %v8615_v44 = vpack.c.bf16 %v8614_v27, %v8613_v52 }
0x2230   : > { %8757 = vmatmul.mubr.bf16.vlgmr.msra.gmra.mrb[244].mxu1 %v8615_v44 }
0x2231   : > { %12650 = vmatprep.mubr.msk.bf16.mxu1 %vm13887_vm1, %v13886_v20 }
0x2303   : > { %v8758_v8 = vpop.f32.mrb[244].mxu1 }
0x2304   : > { %v8759_v16 = vadd.f32 %v8758_v8, %v8637_v47  ;;  %v8760_v48 = vpop.f32.mrb[245].mxu1  ;;  %v13159_v8 = vld [vmem:[%s18045_s1 + $0x10] sm:$0xff]  }
0x2305   : > { %v8761_v7 = vadd.f32 %v8760_v48, %v8641_v58  ;;  %v8762_v43 = vpop.f32.mrb[246].mxu1  ;;  %v13163_v48 = vld [vmem:[%s18045_s1 + $0x18] sm:$0xff]  }
0x2306   : > { %v8767_v11 = vmul.f32 %v8759_v16, %v8759_v16  ;;  %v8763_v63 = vadd.f32 %v8762_v43, %v8637_v47  ;;  %v8764_v51 = vpop.f32.mrb[247].mxu1  ;;  %v13155_v47 = vld [vmem:[%s18045_s1 + $0x8] sm:$0xff]   ;;  %v13167_v43 = vld [vmem:[%s18045_s1 + $0x20] sm:$0xff]  }
0x2307   : > { %v8768_v4 = vmul.f32 %v8761_v7, %v8761_v7  ;;  %v8765_v33 = vadd.f32 %v8764_v51, %v8641_v58  ;;  %v13158_v58 = vld [vmem:[%s18045_s1 + $0x50] sm:$0xff]  }
0x2308   : > { %v8771_v12 = vmul.f32 %v8767_v11, %v8759_v16  ;;  %v8769_v56 = vmul.f32 %v8763_v63, %v8763_v63  ;;  %v13170_v11 = vld [vmem:[%s18045_s1 + $0x68] sm:$0xff]   ;;  %v13174_v51 = vld [vmem:[%s18045_s1 + $0x70] sm:$0xff]  }
0x2309   : > { %v8772_v39 = vmul.f32 %v8768_v4, %v8761_v7  ;;  %v8770_v25 = vmul.f32 %v8765_v33, %v8765_v33  ;;  %v13175_v4 = vld [vmem:[%s18045_s1 + $0x30] sm:$0xff]  }
0x230a   : > { %v8775_v26 = vmul.f32 0.044715, %v8771_v12  ;;  %v8773_v23 = vmul.f32 %v8769_v56, %v8763_v63  ;;  %v8840_v12 = vrot.slane %v17250_v1, %v18003_v40 }
0x230b   : > { %v8776_v49 = vmul.f32 0.044715, %v8772_v39  ;;  %v8774_v54 = vmul.f32 %v8770_v25, %v8765_v33 }
0x230c   : > { %v8779_v13 = vadd.f32 %v8775_v26, %v8759_v16  ;;  %v8777_v10 = vmul.f32 0.044715, %v8773_v23 }
0x230d   : > { %v8780_v59 = vadd.f32 %v8776_v49, %v8761_v7  ;;  %v8778_v53 = vmul.f32 0.044715, %v8774_v54 }
0x230e   : > { %v8783_v46 = vmul.f32 0.7978846, %v8779_v13  ;;  %v8781_v41 = vadd.f32 %v8777_v10, %v8763_v63  ;;  %v13152_v10 = vld [vmem:[%s18045_s1 + $0xc0] sm:$0xff]  }
0x230f   : > { %v8784_v18 = vmul.f32 0.7978846, %v8780_v59  ;;  %v8782_v22 = vadd.f32 %v8778_v53, %v8765_v33  ;;  %v13149_v53 = vld [vmem:[%s18046_s4] sm:$0xff]   ;;  %s18047_s4 = sld [smem:[#allocation30_spill]] }
0x2310   : > { %13724 = vtanh.f32 %v8783_v46  ;;  %v8785_v62 = vmul.f32 0.7978846, %v8781_v41  ;;  %v13153_v46 = vld [vmem:[%s18045_s1 + $0x80] sm:$0xff]   ;;  %v13157_v41 = vld [vmem:[%s18045_s1 + $0x88] sm:$0xff]  }
0x2311   : > { %13726 = vtanh.f32 %v8784_v18  ;;  %v8786_v30 = vmul.f32 0.7978846, %v8782_v22  ;;  %v13161_v18 = vld [vmem:[%s18045_s1 + $0x90] sm:$0xff]   ;;  %v13164_v22 = vld [vmem:[%s18045_s1 + $0xd8] sm:$0xff]  }
0x2312   : > { %13728 = vtanh.f32 %v8785_v62  ;;  %v13165_v62 = vld [vmem:[%s18045_s1 + $0x98] sm:$0xff]  }
0x2313   : > { %13730 = vtanh.f32 %v8786_v30  ;;  %v13168_v30 = vld [vmem:[%s18045_s1 + $0xe0] sm:$0xff]  }
0x231a   : > { %v13725_v29 = vpop.eup %13724 }
0x231b   : > { %v13727_v52 = vpop.eup %13726  ;;  %v8791_v27 = vadd.f32 1.0, %v13725_v29  ;;  %v13169_v29 = vld [vmem:[%s18045_s1 + $0xa0] sm:$0xff]  }
0x231c   : > { %v13729_v44 = vpop.eup %13728  ;;  %v8792_v24 = vadd.f32 1.0, %v13727_v52  ;;  %v13172_v52 = vld [vmem:[%s18045_s1 + $0xe8] sm:$0xff]  }
0x231d   : > { %v13731_v42 = vpop.eup %13730  ;;  %v8795_v34 = vmul.f32 0.5, %v8791_v27  ;;  %v8793_v35 = vadd.f32 1.0, %v13729_v44  ;;  %v13173_v27 = vld [vmem:[%s18045_s1 + $0xa8] sm:$0xff]   ;;  %v13176_v44 = vld [vmem:[%s18045_s1 + $0xf0] sm:$0xff]  }
0x231e   : > { %v8794_v5 = vadd.f32 1.0, %v13731_v42  ;;  %v8796_v37 = vmul.f32 0.5, %v8792_v24  ;;  %v13177_v24 = vld [vmem:[%s18045_s1 + $0xb0] sm:$0xff]   ;;  %v13178_v42 = vld [vmem:[%s18045_s1 + $0x78] sm:$0xff]  }
0x231f   : > { %v8797_v28 = vmul.f32 0.5, %v8793_v35  ;;  %v8799_v17 = vmul.f32 %v8795_v34, %v8759_v16  ;;  %v13162_v16 = vld [vmem:[%s18045_s1 + $0x58] sm:$0xff]  }
0x2320   : > { %v8798_v3 = vmul.f32 0.5, %v8794_v5  ;;  %v8800_v60 = vmul.f32 %v8796_v37, %v8761_v7  ;;  %v13166_v7 = vld [vmem:[%s18045_s1 + $0x60] sm:$0xff]   ;;  %v13179_v34 = vld [vmem:[%s18045_s1 + $0x38] sm:$0xff]  }
0x2321   : > { %v8801_v6 = vmul.f32 %v8797_v28, %v8763_v63  ;;  %v13171_v63 = vld [vmem:[%s18045_s1 + $0x28] sm:$0xff]   ;;  %v13180_v35 = vld [vmem:[%s18045_s1 + $0xf8] sm:$0xff]  }
0x2322   : > { %v8802_v50 = vmul.f32 %v8798_v3, %v8765_v33  ;;  %v13181_v5 = vld [vmem:[%s18045_s1 + $0xb8] sm:$0xff]  }
0x2323   : > { %v8803_v38 = vpack.c.bf16 %v8801_v6, %v8799_v17 }
0x2324   : > { %v8804_v2 = vpack.c.bf16 %v8802_v50, %v8800_v60 }
0x2326   : > { %8969 = vmatprep.mubr.bf16.mxu0 %v8804_v2  ;;  %v17408_v2 = vld [vmem:[%s18047_s4] sm:$0xff] }
0x2327   : > { %8970 = vmatmul.mubr.bf16.vlgmr.msra.gmra.mrb[4].mxu0 %v8803_v38 }
0x2328   : > { %11999 = vmatpush3.bf16.msra.mxu0 %v13151_v9  ;;  %v9111_v9 = vrot.slane %v17408_v2, %v18027_v61 }
0x2329   : > { %12000 = vmatprep.subr.bf16.mxu0 %v13154_v36 }
0x232c   : > { %12001 = vmatpush3.bf16.msra.mxu0 %v13155_v47 }
0x232d   : > { %12002 = vmatprep.subr.bf16.mxu0 %v13158_v58 }
0x2330   : > { %12003 = vmatpush3.bf16.msra.mxu0 %v13159_v8 }
0x2331   : > { %12004 = vmatprep.subr.bf16.mxu0 %v13162_v16 }
0x2334   : > { %12005 = vmatpush3.bf16.msra.mxu0 %v13163_v48 }
0x2335   : > { %12006 = vmatprep.subr.bf16.mxu0 %v13166_v7 }
0x2338   : > { %12007 = vmatpush3.bf16.msra.mxu0 %v13167_v43 }
0x2339   : > { %12008 = vmatprep.subr.bf16.mxu0 %v13170_v11 }
0x233c   : > { %12009 = vmatpush3.bf16.msra.mxu0 %v13171_v63 }
0x233d   : > { %12010 = vmatprep.subr.bf16.mxu0 %v13174_v51 }
0x2340   : > { %12011 = vmatpush3.bf16.msra.mxu0 %v13175_v4 }
0x2341   : > { %12012 = vmatprep.subr.bf16.mxu0 %v13178_v42 }
0x2344   : > { %12013 = vmatpush3.bf16.msra.mxu0 %v13179_v34 }
0x23fa   : > { %v11990_v33 = vpop.f32.mrb[4].mxu0 }
0x23fb   : > { %v11991_v56 = vpop.f32.mrb[5].mxu0 }
0x23fc   : > { %v11992_v39 = vadd.f32 %v11991_v56, %v11990_v33  ;;  %v11993_v25 = vpop.f32.mrb[6].mxu0 }
0x23fd   : > { %v11994_v26 = vpop.f32.mrb[7].mxu0 }
0x23fe   : > { %v8972_v23 = vadd.f32 %v11992_v39, %v8840_v12  ;;  %v11995_v49 = vadd.f32 %v11994_v26, %v11993_v25 }
0x2400   : > { %v8978_v54 = vadd.f32 %v8972_v23, %v17304_v57  ;;  %v8975_v13 = vadd.f32 %v11995_v49, %v8840_v12  ;;  %v13156_v57 = vld [vmem:[%s18045_s1 + $0xc8] sm:$0xff]   ;;  %v17415_v12 = vrot.slane %v17408_v2, %v18028_v14 }
0x2402   : > { %8980 = vst [vmem:[%s17378_s7] sm:$0xff] %v8978_v54  ;;  %v8979_v1 = vadd.f32 %v8975_v13, %v17308_v32  ;;  %v13160_v32 = vld [vmem:[%s18045_s1 + $0xd0] sm:$0xff]   ;;  %s18049_s1 = sld [smem:[#allocation27_spill]] }
0x2404   : > { %8981 = vst [vmem:[%s17378_s7 + $0x8] sm:$0xff] %v8979_v1  ;;  %v8986_v59 = vpack.c.bf16 %v8979_v1, %v8978_v54  ;;  %v9406_v1 = vrot.slane %v17408_v2, %v18029_v55 }
0x2406   : > { %12649 = vmatpush3.bf16.msra.mxu1 %v8986_v59 }
0x2407   : > { %12020 = vmatprep.subr.bf16.mxu1 %v13152_v10 }
0x2409   : > { %12651 = vmatmul.mubr.msk.bf16.vlgmr.msra.gmra.mrb[248].mxu1 %vm8293_vm2, %v13149_v53  ;;  %v9411_v53 = vrot.slane %v17408_v2, %v18030_v21 }
0x240a   : > { %12021 = vmatpush3.bf16.msra.mxu1 %v13153_v46 }
0x240b   : > { %12022 = vmatprep.subr.bf16.mxu1 %v13156_v57 }
0x240e   : > { %12023 = vmatpush3.bf16.msra.mxu1 %v13157_v41 }
0x240f   : > { %12024 = vmatprep.subr.bf16.mxu1 %v13160_v32  ;;  %v13182_v32 = vld [vmem:[%s18048_s5] ss:$12 sps:$4 sm:$0xff]  }
0x2412   : > { %12025 = vmatpush3.bf16.msra.mxu1 %v13161_v18  ;;  %v13184_v18 = vld [vmem:[%s18048_s5 + $0x4] ss:$12 sps:$4 sm:$0xff]  }
0x2413   : > { %12026 = vmatprep.subr.bf16.mxu1 %v13164_v22  ;;  %v13185_v22 = vld [vmem:[%s18048_s5 + $0x8] ss:$12 sps:$4 sm:$0xff]   ;;  %9598 = vmatprep.subr.bf16.mxu0 %v13184_v18 }
0x2416   : > { %12027 = vmatpush3.bf16.msra.mxu1 %v13165_v62  ;;  %v13188_v62 = vld [vmem:[%s18048_s5 + $0x1c] ss:$12 sps:$4 sm:$0xff]  }
0x2417   : > { %12028 = vmatprep.subr.bf16.mxu1 %v13168_v30  ;;  %v13189_v30 = vld [vmem:[%s18048_s5 + $0x20] ss:$12 sps:$4 sm:$0xff]  }
0x241a   : > { %12029 = vmatpush3.bf16.msra.mxu1 %v13169_v29  ;;  %v13186_v29 = vld [vmem:[%s18048_s5 + $0x18] ss:$12 sps:$4 sm:$0xff]  }
0x241b   : > { %12030 = vmatprep.subr.bf16.mxu1 %v13172_v52  ;;  %v13192_v52 = vld [vmem:[%s18048_s5 + $0x34] ss:$12 sps:$4 sm:$0xff]  }
0x241e   : > { %12031 = vmatpush3.bf16.msra.mxu1 %v13173_v27  ;;  %v13190_v27 = vld [vmem:[%s18048_s5 + $0x30] ss:$12 sps:$4 sm:$0xff]  }
0x241f   : > { %12032 = vmatprep.subr.bf16.mxu1 %v13176_v44 }
0x2422   : > { %12033 = vmatpush3.bf16.msra.mxu1 %v13177_v24 }
0x2423   : > { %12034 = vmatprep.subr.bf16.mxu1 %v13180_v35 }
0x2426   : > { %12035 = vmatpush3.bf16.msra.mxu1 %v13181_v5 }
0x2427   : > { %12654 = vmatprep.subr.bf16.mxu1 %v13886_v20 }
0x24dc   : > { %v9029_v37 = vpop.f32.mrb[248].mxu1 }
0x24dd   : > { %v9036_v28 = vpack.c.bf16 %v9029_v37, %v9029_v37  ;;  %v12652_v3 = vpop.f32.mrb[249].mxu1  ;;  %v13193_v37 = vld [vmem:[%s18048_s5 + $0x38] ss:$12 sps:$4 sm:$0xff]  }
0x24de   : > { %v9032_v17 = vpop.f32.mrb[250].mxu1  ;;  %v13194_v3 = vld [vmem:[%s18048_s5 + $0x48] ss:$12 sps:$4 sm:$0xff]  }
0x24df   : > { %v9039_v6 = vrot.slane %v9036_v28, 2  ;;  %v9037_v60 = vpack.c.bf16 %v9032_v17, %v9032_v17  ;;  %v12653_v50 = vpop.f32.mrb[251].mxu1  ;;  %v13197_v17 = vld [vmem:[%s18048_s5 + $0x50] ss:$12 sps:$4 sm:$0xff]  }
0x24e0   : > { %v13201_v50 = vld [vmem:[%s18048_s5 + $0x68] ss:$12 sps:$4 sm:$0xff]  }
0x24e1   : > { %v9042_v38 = vrot.slane %v9037_v60, 2  ;;  %9336 = vmatprep.mubr.bf16.mxu0 %v9039_v6  ;;  %v13200_v6 = vld [vmem:[%s18048_s5 + $0x64] ss:$12 sps:$4 sm:$0xff]  }
0x24e2   : > { %9337 = vmatmul.mubr.bf16.vlgmr.msra.gmra.mrb[8].mxu0 %v9036_v28  ;;  %v13196_v28 = vld [vmem:[%s18048_s5 + $0x4c] ss:$12 sps:$4 sm:$0xff]  }
0x24e3   : > { %9376 = vmatprep.mubr.bf16.mxu1 %v9042_v38  ;;  %9630 = vmatprep.mubr.bf16.mxu0 %v18026_v45  ;;  %v13204_v38 = vld [vmem:[%s18048_s5 + $0x7c] ss:$12 sps:$4 sm:$0xff]  }
0x24e4   : > { %9377 = vmatmul.mubr.bf16.vlgmr.msra.gmra.mrb[252].mxu1 %v9037_v60  ;;  %9599 = vmatpush1.bf16.msra.mxu0 %v13182_v32  ;;  %v13198_v60 = vld [vmem:[%s18048_s5 + $0x60] ss:$12 sps:$4 sm:$0xff]  }
0x24e5   : > { %12670 = vmatprep.mubr.msk.bf16.mxu1 %vm13887_vm1, %v13886_v20  ;;  %12655 = vmatpush3.bf16.msra.mxu1 %v13185_v22 }
0x24e6   : > { %12656 = vmatprep.subr.bf16.mxu1 %v13886_v20  ;;  %9600 = vmatprep.subr.bf16.mxu0 %v13188_v62 }
0x24e8   : > { %9601 = vmatpush1.bf16.msra.mxu0 %v13186_v29 }
0x24e9   : > { %12657 = vmatpush3.bf16.msra.mxu1 %v13189_v30  ;;  %9602 = vmatprep.subr.bf16.mxu0 %v13192_v52 }
0x24ea   : > { %12658 = vmatprep.subr.bf16.mxu1 %v13886_v20 }
0x24ec   : > { %9603 = vmatpush1.bf16.msra.mxu0 %v13190_v27 }
0x24ed   : > { %12659 = vmatpush3.bf16.msra.mxu1 %v13193_v37  ;;  %9604 = vmatprep.subr.bf16.mxu0 %v13196_v28 }
0x24ee   : > { %12660 = vmatprep.subr.bf16.mxu1 %v13886_v20 }
0x24f0   : > { %9605 = vmatpush1.bf16.msra.mxu0 %v13194_v3 }
0x24f1   : > { %12661 = vmatpush3.bf16.msra.mxu1 %v13197_v17  ;;  %9606 = vmatprep.subr.bf16.mxu0 %v13200_v6 }
0x24f2   : > { %12662 = vmatprep.subr.bf16.mxu1 %v13886_v20 }
0x24f4   : > { %9607 = vmatpush1.bf16.msra.mxu0 %v13198_v60 }
0x24f5   : > { %12663 = vmatpush3.bf16.msra.mxu1 %v13201_v50  ;;  %9608 = vmatprep.subr.bf16.mxu0 %v13204_v38 }
0x24f6   : > { %12664 = vmatprep.subr.bf16.mxu1 %v13886_v20 }
0x25b5   : > { %v12014_v19 = vpop.f32.mrb[8].mxu0 }
0x25b6   : > { %v12015_v36 = vpop.f32.mrb[9].mxu0 }
0x25b7   : > { %v12016_v47 = vadd.f32 %v12015_v36, %v12014_v19  ;;  %v12036_v58 = vpop.f32.mrb[252].mxu1  ;;  %v12017_v8 = vpop.f32.mrb[10].mxu0  ;;  %v13202_v19 = vld [vmem:[%s18048_s5 + $0x78] ss:$12 sps:$4 sm:$0xff]   ;;  %v13206_v36 = vld [vmem:[%s18048_s5 + $0x90] ss:$12 sps:$4 sm:$0xff]  }
0x25b8   : > { %v12037_v16 = vpop.f32.mrb[253].mxu1  ;;  %v12018_v48 = vpop.f32.mrb[11].mxu0  ;;  %9609 = vmatpush1.bf16.msra.mxu0 %v13202_v19  ;;  %v13212_v8 = vld [vmem:[%s18048_s5 + $0xac] ss:$12 sps:$4 sm:$0xff]  }
0x25b9   : > { %v9339_v7 = vadd.f32 %v12016_v47, %v9111_v9  ;;  %v12038_v43 = vadd.f32 %v12037_v16, %v12036_v58  ;;  %v12039_v11 = vpop.f32.mrb[254].mxu1  ;;  %v13205_v9 = vld [vmem:[%s18048_s5 + $0x80] ss:$12 sps:$4 sm:$0xff]   ;;  %v13209_v58 = vld [vmem:[%s18048_s5 + $0x98] ss:$12 sps:$4 sm:$0xff]  }
0x25ba   : > { %v12040_v63 = vpop.f32.mrb[255].mxu1  ;;  %12665 = vmatpush3.bf16.msra.mxu1 %v13205_v9  ;;  %v13208_v47 = vld [vmem:[%s18048_s5 + $0x94] ss:$12 sps:$4 sm:$0xff]   ;;  %v13213_v48 = vld [vmem:[%s18048_s5 + $0xb0] ss:$12 sps:$4 sm:$0xff]  }
0x25bb   : > { %v9379_v51 = vadd.f32 %v12038_v43, %v9339_v7  ;;  %12666 = vmatprep.subr.bf16.mxu1 %v13886_v20  ;;  %9610 = vmatprep.subr.bf16.mxu0 %v13208_v47  ;;  %v13210_v16 = vld [vmem:[%s18048_s5 + $0xa8] ss:$12 sps:$4 sm:$0xff]   ;;  %v9430_v63 = vrot.slane %v17408_v2, %v18003_v40 }
0x25bc   : > { %9611 = vmatpush1.bf16.msra.mxu0 %v13206_v36 }
0x25bd   : > { %v9385_v4 = vsel %vm9384_vm3, %v9379_v51, 0.0  ;;  %9612 = vmatprep.subr.bf16.mxu0 %v13212_v8 }
0x25be   : > { %9386 = vadd.xlane.f32.xlu0 %v9385_v4  ;;  %12667 = vmatpush3.bf16.msra.mxu1 %v13209_v58  ;;  %v9435_v4 = vrot.slane %v17408_v2, %v18031_v0 }
0x25bf   : > { %12668 = vmatprep.subr.bf16.mxu1 %v13886_v20 }
0x25c0   : > { %9613 = vmatpush1.bf16.msra.mxu0 %v13210_v16 }
0x25c2   : > { %12669 = vmatpush3.bf16.msra.mxu1 %v13213_v48 }
0x25c3   : > { %12692 = vmatprep.subr.bf16.mxu1 %v13886_v20 }
0x264b   : > { %v9387_v33 = vpop.xlane.xlu0 %9386 }
0x264c   : > { %v9388_v56 = vmul.f32 0.0078125, %v9387_v33 }
0x264e   : > { %v9389_v39 = vsub.f32 %v9379_v51, %v9388_v56 }
0x2650   : > { %v9394_v25 = vmul.f32 %v17415_v12, %v9389_v39 }
0x2652   : > { %v9395_v26 = vmul.f32 %v9394_v25, %v9394_v25 }
0x2654   : > { %v9396_v23 = vsel %vm9384_vm3, %v9395_v26, 0.0  ;;  %v17469_v26 = vld [vmem:[%s18047_s4 + $0x8] sm:$0x1f]  ;;  %s18050_s4 = sld [smem:[#allocation28_spill]] }
0x2655   : > { %9397 = vadd.xlane.f32.xlu0 %v9396_v23  ;;  %v9692_v23 = vrot.slane %v17469_v26, %v18028_v14 }
0x26e2   : > { %v9398_v49 = vpop.xlane.xlu0 %9397 }
0x26e3   : > { %v9399_v54 = vmul.f32 0.0078125, %v9398_v49  ;;  %v9687_v49 = vrot.slane %v17408_v2, %v18033_v31 }
0x26e5   : > { %v9400_v13 = vadd.f32 1e-06, %v9399_v54 }
0x26e7   : > { %13732 = vrsqrt.f32 %v9400_v13 }
0x26f1   : > { %v13733_v10 = vpop.eup %13732 }
0x26f2   : > { %v9402_v59 = vmul.f32 %v13733_v10, %v9394_v25 }
0x26f4   : > { %v9407_v46 = vmul.f32 %v9406_v1, %v9402_v59 }
0x26f6   : > { %v17423_v57 = vadd.f32 %v9411_v53, %v9407_v46 }
0x26f8   : > { %v9413_v41 = vsel %vm9384_vm3, %v17423_v57, 0.0 }
0x26f9   : > { %9414 = vadd.xlane.f32.xlu0 %v9413_v41 }
0x2786   : > { %v9415_v44 = vpop.xlane.xlu0 %9414 }
0x2787   : > { %v9416_v24 = vmul.f32 0.0078125, %v9415_v44 }
0x2789   : > { %v9417_v42 = vsub.f32 %v17423_v57, %v9416_v24 }
0x278b   : > { %v9418_v34 = vmul.f32 %v9417_v42, %v17415_v12 }
0x278d   : > { %v9419_v35 = vmul.f32 %v9418_v34, %v9418_v34 }
0x278f   : > { %v9420_v5 = vsel %vm9384_vm3, %v9419_v35, 0.0 }
0x2790   : > { %9421 = vadd.xlane.f32.xlu0 %v9420_v5 }
0x281d   : > { %v9422_v7 = vpop.xlane.xlu0 %9421 }
0x281e   : > { %v9423_v43 = vmul.f32 0.0078125, %v9422_v7  ;;  %v13214_v7 = vld [vmem:[%s18049_s1] sm:$0xff]  }
0x2820   : > { %v9424_v11 = vadd.f32 1e-06, %v9423_v43  ;;  %v13215_v43 = vld [vmem:[%s18049_s1 + $0x8] sm:$0xff]  }
0x2822   : > { %13734 = vrsqrt.f32 %v9424_v11  ;;  %v13216_v11 = vld [vmem:[%s18049_s1 + $0x10] sm:$0xff]  }
0x282c   : > { %v13735_v51 = vpop.eup %13734 }
0x282d   : > { %v9426_v33 = vmul.f32 %v13735_v51, %v9418_v34  ;;  %v13218_v51 = vld [vmem:[%s18049_s1 + $0x20] sm:$0xff]  }
0x282f   : > { %v9431_v56 = vmul.f32 %v9430_v63, %v9426_v33  ;;  %v13217_v63 = vld [vmem:[%s18049_s1 + $0x18] sm:$0xff]   ;;  %v13220_v33 = vld [vmem:[%s18049_s1 + $0x30] sm:$0xff]  }
0x2831   : > { %v9436_v39 = vadd.f32 %v9435_v4, %v9431_v56  ;;  %v13219_v4 = vld [vmem:[%s18049_s1 + $0x28] sm:$0xff]  }
0x2833   : > { %v9437_v25 = vpack.c.bf16 %v9436_v39, %v9436_v39 }
0x2835   : > { %9631 = vmatmul.mubr.bf16.vlgmr.msra.gmra.mrb[12].mxu0 %v9437_v25  ;;  %12671 = vmatmul.mubr.bf16.vlgmr.msra.gmra.mrb[0].mxu1 %v9437_v25 }
0x2836   : > { %12708 = vmatprep.mubr.msk.bf16.mxu1 %vm13887_vm1, %v13886_v20 }
0x2908   : > { %v17475_v54 = vpop.f32.mrb[12].mxu0  ;;  %v9673_v0 = vpop.f32.mrb[0].mxu1 }
0x2909   : > { %v9693_v13 = vadd.f32 %v9692_v23, %v9673_v0  ;;  %v9634_v1 = vpop.f32.mrb[13].mxu0  ;;  %v12672_v10 = vpop.f32.mrb[1].mxu1 }
0x290a   : > { %v9688_v59 = vadd.f32 %v9687_v49, %v9634_v1  ;;  %v9636_v53 = vpop.f32.mrb[14].mxu0  ;;  %v9676_v46 = vpop.f32.mrb[2].mxu1 }
0x290b   : > { %v9714_v41 = vpack.c.bf16 %v9693_v13, %v9693_v13  ;;  %v9637_v32 = vpop.f32.mrb[15].mxu0  ;;  %v12673_v18 = vpop.f32.mrb[3].mxu1 }
0x290c   : > { %v9694_v22 = vsel %vm9384_vm3, %v9688_v59, -inf }
0x290d   : > { %v9758_v62 = vsel %vm9756_vm4, %v9714_v41, 0  ;;  %v9695_v30 = vrot.slane %v9694_v22, 4  ;;  %12732 = vmatprep.subr.msk.bf16.mxu0 %vm9756_vm4, %v9714_v41 }
0x290e   : > { %12675 = vmatpush3.bf16.msra.mxu0 %v9758_v62 }
0x290f   : > { %v9696_v31 = vmax.f32 %v9694_v22, %v9695_v30  ;;  %12712 = vmatprep.subr.bf16.mxu0 %v13886_v20 }
0x2911   : > { %v9697_v29 = vrot.slane %v9696_v31, 2 }
0x2913   : > { %v9698_v52 = vmax.f32 %v9696_v31, %v9697_v29 }
0x2915   : > { %v9699_v27 = vrot.slane %v9698_v52, 1 }
0x2917   : > { %v9700_v44 = vmax.f32 %v9698_v52, %v9699_v27  ;;  %v9682_v27 = vrot.slane %v17408_v2, %v18032_v15 }
0x2919   : > { %v9701_v24 = vsub.f32 %v9688_v59, %v9700_v44 }
0x291b   : > { %v9702_v42 = vmul.f32 1.442695, %v9701_v24 }
0x291d   : > { %13736 = vpow2.f32 %v9702_v42 }
0x2927   : > { %v13737_v34 = vpop.eup %13736 }
0x2928   : > { %v9704_v35 = vsel %vm9384_vm3, %v13737_v34, 0.0 }
0x2929   : > { %v9705_v5 = vrot.slane %v9704_v35, 4 }
0x292b   : > { %v9706_v37 = vadd.f32 %v9705_v5, %v9704_v35  ;;  %v13221_v5 = vld [vmem:[%s18049_s1 + $0x38] sm:$0xff]   ;;  %s18051_s1 = sld [smem:[#allocation29_spill]] }
0x292d   : > { %v9707_v28 = vrot.slane %v9706_v37, 2 }
0x292f   : > { %v9708_v3 = vadd.f32 %v9707_v28, %v9706_v37 }
0x2931   : > { %v9709_v17 = vrot.slane %v9708_v3, 1 }
0x2933   : > { %v9710_v6 = vadd.f32 %v9709_v17, %v9708_v3 }
0x2935   : > { %13738 = vrcp.f32 %v9710_v6 }
0x293f   : > { %v13739_v60 = vpop.eup %13738 }
0x2940   : > { %v9712_v50 = vmul.f32 %v13739_v60, %v13737_v34  ;;  %v9683_v34 = vadd.f32 %v9682_v27, %v17475_v54  ;;  %v13267_v27 = vld [vmem:[%s18050_s4 + $0xe8] ss:$16 sps:$4 sm:$0xff]  }
0x2942   : > { %v9713_v38 = vpack.c.bf16 %v9712_v50, %v9712_v50  ;;  %v9857_v35 = vpack.c.bf16 %v9683_v34, %v9683_v34  ;;  %v10034_v34 = vrot.slane %v17469_v26, %v18029_v55 }
0x2944   : > { %9715 = vxpose.xlu0.c.b16.start.end [1/1] (short) %v9713_v38, 128 }
0x29aa   : > { %v9723_v19 = vpop.trf.xlu0 }
0x29ab   : > { %12676 = vmatprep.mubr.msk.bf16.mxu0 %vm9731_vm5, %v9723_v19 }
0x29ae   : > { %v9724_v9 = vpop.trf.xlu0 }
0x29af   : > { %12677 = vmatmul.mubr.msk.bf16.vlgmr.msra.gmra.mrb[16].mxu0 %vm9731_vm5, %v9724_v9 }
0x29b0   : > { %12713 = vmatpush3.bf16.msra.mxu0 %v13214_v7  ;;  %v13236_v7 = vld [vmem:[%s18050_s4 + $0x44] ss:$16 sps:$4 sm:$0xff]  }
0x29b1   : > { %12714 = vmatprep.subr.bf16.mxu0 %v13886_v20 }
0x29b2   : > { %v9725_v36 = vpop.trf.xlu0 }
0x29b3   : > { %12680 = vmatprep.mubr.msk.bf16.mxu0 %vm9731_vm5, %v9725_v36  ;;  %v13224_v36 = vld [vmem:[%s18050_s4 + $0x4] ss:$16 sps:$4 sm:$0xff]  }
0x29b4   : > { %12715 = vmatpush3.bf16.msra.mxu0 %v13215_v43  ;;  %v13239_v43 = vld [vmem:[%s18050_s4 + $0x4c] ss:$16 sps:$4 sm:$0xff]  }
0x29b5   : > { %12716 = vmatprep.subr.bf16.mxu0 %v13886_v20 }
0x29b6   : > { %v9726_v47 = vpop.trf.xlu0 }
0x29b7   : > { %12681 = vmatmul.mubr.msk.bf16.gmra.mrb[20].mxu0 %vm9731_vm5, %v9726_v47  ;;  %v13225_v47 = vld [vmem:[%s18050_s4 + $0x8] ss:$16 sps:$4 sm:$0xff]  }
0x29b8   : > { %12717 = vmatpush3.bf16.msra.mxu0 %v13216_v11  ;;  %v13234_v11 = vld [vmem:[%s18050_s4 + $0x40] ss:$16 sps:$4 sm:$0xff]  }
0x29b9   : > { %12718 = vmatprep.subr.bf16.mxu0 %v13886_v20 }
0x29ba   : > { %v9727_v58 = vpop.trf.xlu0 }
0x29bb   : > { %12684 = vmatprep.mubr.msk.bf16.mxu0 %vm9731_vm5, %v9727_v58  ;;  %v13227_v58 = vld [vmem:[%s18050_s4 + $0xc] ss:$16 sps:$4 sm:$0xff]  }
0x29bc   : > { %12719 = vmatpush3.bf16.msra.mxu0 %v13217_v63  ;;  %v13237_v63 = vld [vmem:[%s18050_s4 + $0x48] ss:$16 sps:$4 sm:$0xff]  }
0x29bd   : > { %12720 = vmatprep.subr.bf16.mxu0 %v13886_v20 }
0x29be   : > { %v9728_v8 = vpop.trf.xlu0 }
0x29bf   : > { %12685 = vmatmul.mubr.msk.bf16.gmra.mrb[24].mxu0 %vm9731_vm5, %v9728_v8  ;;  %v13230_v8 = vld [vmem:[%s18050_s4 + $0x24] ss:$16 sps:$4 sm:$0xff]  }
0x29c0   : > { %12721 = vmatpush3.bf16.msra.mxu0 %v13218_v51 }
0x29c1   : > { %12722 = vmatprep.subr.bf16.mxu0 %v13886_v20 }
0x29c2   : > { %v9729_v16 = vpop.trf.xlu0 }
0x29c3   : > { %12688 = vmatprep.mubr.msk.bf16.mxu0 %vm9731_vm5, %v9729_v16  ;;  %v13233_v16 = vld [vmem:[%s18050_s4 + $0x2c] ss:$16 sps:$4 sm:$0xff]  }
0x29c4   : > { %12723 = vmatpush3.bf16.msra.mxu0 %v13219_v4 }
0x29c5   : > { %12724 = vmatprep.subr.bf16.mxu0 %v13886_v20 }
0x29c6   : > { %v9730_v48 = vpop.trf.xlu0 }
0x29c7   : > { %12689 = vmatmul.mubr.msk.bf16.gmra.mrb[28].mxu0 %vm9731_vm5, %v9730_v48  ;;  %v13231_v48 = vld [vmem:[%s18050_s4 + $0x28] ss:$16 sps:$4 sm:$0xff]  }
0x29c8   : > { %12728 = vmatprep.mubr.msk.bf16.mxu0 %vm13887_vm1, %v13886_v20  ;;  %12725 = vmatpush3.bf16.msra.mxu0 %v13220_v33 }
0x29c9   : > { %12726 = vmatprep.subr.bf16.mxu0 %v13886_v20 }
0x29cc   : > { %12727 = vmatpush3.bf16.msra.mxu0 %v13221_v5  ;;  %v10039_v5 = vrot.slane %v17469_v26, %v18030_v21 }
0x29cd   : > { %10297 = vmatprep.subr.bf16.mxu0 %v13227_v58  ;;  %v13282_v58 = vld [vmem:[%s18051_s1 + $0x58] sm:$0xff]  }
0x2a82   : > { %v12678_v56 = vpop.f32.mrb[16].mxu0 }
0x2a83   : > { %v9794_v39 = vpop.f32.mrb[17].mxu0 }
0x2a84   : > { %v12679_v25 = vpop.f32.mrb[18].mxu0 }
0x2a85   : > { %v9859_v23 = vpack.c.bf16 %v12679_v25, %v12678_v56  ;;  %v9797_v49 = vpop.f32.mrb[19].mxu0 }
0x2a86   : > { %v9858_v0 = vpack.c.bf16 %v9797_v49, %v9794_v39  ;;  %v13245_v49 = vld [vmem:[%s18050_s4 + $0x6c] ss:$16 sps:$4 sm:$0xff]  }
0x2a88   : > { %12693 = vmatpush3.bf16.msra.mxu1 %v9858_v0  ;;  %v13240_v0 = vld [vmem:[%s18050_s4 + $0x60] ss:$16 sps:$4 sm:$0xff]  }
0x2a89   : > { %12694 = vmatprep.subr.bf16.mxu1 %v13886_v20 }
0x2a8a   : > { %v12682_v13 = vpop.f32.mrb[20].mxu0 }
0x2a8b   : > { %v9810_v1 = vpop.f32.mrb[21].mxu0 }
0x2a8c   : > { %v12683_v10 = vpop.f32.mrb[22].mxu0  ;;  %12695 = vmatpush3.bf16.msra.mxu1 %v9859_v23  ;;  %v13242_v23 = vld [vmem:[%s18050_s4 + $0x64] ss:$16 sps:$4 sm:$0xff]  }
0x2a8d   : > { %v9861_v59 = vpack.c.bf16 %v12683_v10, %v12682_v13  ;;  %v9813_v53 = vpop.f32.mrb[23].mxu0  ;;  %12696 = vmatprep.subr.bf16.mxu1 %v13886_v20  ;;  %v13243_v13 = vld [vmem:[%s18050_s4 + $0x68] ss:$16 sps:$4 sm:$0xff]   ;;  %v13251_v10 = vld [vmem:[%s18050_s4 + $0x8c] ss:$16 sps:$4 sm:$0xff]  }
0x2a8e   : > { %v9860_v46 = vpack.c.bf16 %v9813_v53, %v9810_v1  ;;  %v13248_v1 = vld [vmem:[%s18050_s4 + $0x84] ss:$16 sps:$4 sm:$0xff]  }
0x2a8f   : > { %v13254_v53 = vld [vmem:[%s18050_s4 + $0xa4] ss:$16 sps:$4 sm:$0xff]  }
0x2a90   : > { %12697 = vmatpush3.bf16.msra.mxu1 %v9860_v46  ;;  %v13257_v46 = vld [vmem:[%s18050_s4 + $0xac] ss:$16 sps:$4 sm:$0xff]  }
0x2a91   : > { %12698 = vmatprep.subr.bf16.mxu1 %v13886_v20 }
0x2a92   : > { %v12686_v41 = vpop.f32.mrb[24].mxu0 }
0x2a93   : > { %v9826_v32 = vpop.f32.mrb[25].mxu0 }
0x2a94   : > { %v12687_v18 = vpop.f32.mrb[26].mxu0  ;;  %12699 = vmatpush3.bf16.msra.mxu1 %v9861_v59  ;;  %v13249_v59 = vld [vmem:[%s18050_s4 + $0x88] ss:$16 sps:$4 sm:$0xff]  }
0x2a95   : > { %v9863_v22 = vpack.c.bf16 %v12687_v18, %v12686_v41  ;;  %v9829_v62 = vpop.f32.mrb[27].mxu0  ;;  %12700 = vmatprep.subr.bf16.mxu1 %v13886_v20  ;;  %v13252_v41 = vld [vmem:[%s18050_s4 + $0xa0] ss:$16 sps:$4 sm:$0xff]  }
0x2a96   : > { %v9862_v30 = vpack.c.bf16 %v9829_v62, %v9826_v32  ;;  %v13255_v32 = vld [vmem:[%s18050_s4 + $0xa8] ss:$16 sps:$4 sm:$0xff]   ;;  %v13258_v18 = vld [vmem:[%s18050_s4 + $0xc0] ss:$16 sps:$4 sm:$0xff]  }
0x2a97   : > { %v13261_v62 = vld [vmem:[%s18050_s4 + $0xc8] ss:$16 sps:$4 sm:$0xff]  }
0x2a98   : > { %12701 = vmatpush3.bf16.msra.mxu1 %v9862_v30  ;;  %v13263_v30 = vld [vmem:[%s18050_s4 + $0xcc] ss:$16 sps:$4 sm:$0xff]  }
0x2a99   : > { %12702 = vmatprep.subr.bf16.mxu1 %v13886_v20 }
0x2a9a   : > { %v12690_v31 = vpop.f32.mrb[28].mxu0 }
0x2a9b   : > { %v9842_v29 = vpop.f32.mrb[29].mxu0 }
0x2a9c   : > { %v12691_v52 = vpop.f32.mrb[30].mxu0  ;;  %12703 = vmatpush3.bf16.msra.mxu1 %v9863_v22  ;;  %v13260_v22 = vld [vmem:[%s18050_s4 + $0xc4] ss:$16 sps:$4 sm:$0xff]  }
0x2a9d   : > { %v9865_v44 = vpack.c.bf16 %v12691_v52, %v12690_v31  ;;  %v9845_v24 = vpop.f32.mrb[31].mxu0  ;;  %12704 = vmatprep.subr.bf16.mxu1 %v13886_v20  ;;  %v13266_v31 = vld [vmem:[%s18050_s4 + $0xe4] ss:$16 sps:$4 sm:$0xff]   ;;  %v13264_v52 = vld [vmem:[%s18050_s4 + $0xe0] ss:$16 sps:$4 sm:$0xff]  }
0x2a9e   : > { %v9864_v42 = vpack.c.bf16 %v9845_v24, %v9842_v29  ;;  %v13269_v29 = vld [vmem:[%s18050_s4 + $0xec] ss:$16 sps:$4 sm:$0xff]  }
0x2aa0   : > { %12705 = vmatpush3.bf16.msra.mxu1 %v9864_v42 }
0x2aa1   : > { %12706 = vmatprep.subr.bf16.mxu1 %v13886_v20  ;;  %v9927_v20 = vrot.slane %v17469_v26, %v18027_v61 }
0x2aa4   : > { %12707 = vmatpush3.bf16.msra.mxu1 %v9865_v44 }
0x2aa5   : > { %10256 = vmatprep.subr.bf16.mxu1 %v13224_v36  ;;  %v13280_v36 = vld [vmem:[%s18051_s1 + $0x10] sm:$0xff]  }
0x2aa7   : > { %12709 = vmatmul.mubr.bf16.vlgmr.msra.gmra.mrb[4].mxu1 %v9857_v35 }
0x2aa8   : > { %10288 = vmatprep.mubr.bf16.mxu1 %v18026_v45 }
0x2b7a   : > { %v9900_v37 = vpop.f32.mrb[4].mxu1 }
0x2b7b   : > { %v9906_v28 = vmul.f32 0.088388346, %v9900_v37  ;;  %v12710_v15 = vpop.f32.mrb[5].mxu1 }
0x2b7c   : > { %v9903_v2 = vpop.f32.mrb[6].mxu1 }
0x2b7d   : > { %v9907_v3 = vpack.c.bf16 %v9906_v28, %v9906_v28  ;;  %v12711_v17 = vpop.f32.mrb[7].mxu1 }
0x2b7e   : > { %v13271_v17 = vld [vmem:[%s18051_s1 + $0xc0] sm:$0xff]  }
0x2b7f   : > { %12729 = vmatmul.mubr.bf16.vlgmr.msra.gmra.mrb[32].mxu0 %v9907_v3  ;;  %v13270_v3 = vld [vmem:[%s18051_s1 + $0x40] sm:$0xff]  }
0x2b80   : > { %10329 = vmatprep.mubr.bf16.mxu0 %v18026_v45  ;;  %v13222_v45 = vld [vmem:[%s18050_s4] ss:$16 sps:$4 sm:$0xff]   ;;  %10298 = vmatpush1.bf16.msra.mxu0 %v13225_v47 }
0x2b81   : > { %10257 = vmatpush1.bf16.msra.mxu1 %v13222_v45  ;;  %10299 = vmatprep.subr.bf16.mxu0 %v13233_v16  ;;  %v13279_v45 = vld [vmem:[%s18051_s1 + $0xd0] sm:$0xff]   ;;  %v13284_v16 = vld [vmem:[%s18051_s1 + $0x18] sm:$0xff]  }
0x2b82   : > { %10258 = vmatprep.subr.bf16.mxu1 %v13230_v8  ;;  %v13281_v47 = vld [vmem:[%s18051_s1 + $0x90] sm:$0xff]   ;;  %v13283_v8 = vld [vmem:[%s18051_s1 + $0xd8] sm:$0xff]  }
0x2b84   : > { %10300 = vmatpush1.bf16.msra.mxu0 %v13231_v48  ;;  %v13286_v48 = vld [vmem:[%s18051_s1 + $0x60] sm:$0xff]  }
0x2b85   : > { %10301 = vmatprep.subr.bf16.mxu0 %v13239_v43  ;;  %v13288_v43 = vld [vmem:[%s18051_s1 + $0x20] sm:$0xff]  }
0x2b88   : > { %10302 = vmatpush1.bf16.msra.mxu0 %v13237_v63  ;;  %v13290_v63 = vld [vmem:[%s18051_s1 + $0x68] sm:$0xff]  }
0x2b89   : > { %10303 = vmatprep.subr.bf16.mxu0 %v13245_v49  ;;  %v13298_v49 = vld [vmem:[%s18051_s1 + $0x78] sm:$0xff]  }
0x2b8c   : > { %10304 = vmatpush1.bf16.msra.mxu0 %v13243_v13  ;;  %v13300_v13 = vld [vmem:[%s18051_s1 + $0x38] sm:$0xff]  }
0x2b8d   : > { %10305 = vmatprep.subr.bf16.mxu0 %v13251_v10 }
0x2b90   : > { %10306 = vmatpush1.bf16.msra.mxu0 %v13249_v59 }
0x2b91   : > { %10307 = vmatprep.subr.bf16.mxu0 %v13257_v46 }
0x2b94   : > { %10308 = vmatpush1.bf16.msra.mxu0 %v13255_v32 }
0x2b95   : > { %10309 = vmatprep.subr.bf16.mxu0 %v13263_v30 }
0x2b98   : > { %10310 = vmatpush1.bf16.msra.mxu0 %v13261_v62 }
0x2b99   : > { %10311 = vmatprep.subr.bf16.mxu0 %v13269_v29 }
0x2b9c   : > { %10312 = vmatpush1.bf16.msra.mxu0 %v13267_v27 }
0x2b9d   : > { %12100 = vmatprep.subr.bf16.mxu0 %v13271_v17 }
0x2c52   : > { %v10010_v54 = vpop.f32.mrb[32].mxu0 }
0x2c53   : > { %v10011_v6 = vadd.f32 %v10010_v54, %v9927_v20  ;;  %v12730_v60 = vpop.f32.mrb[33].mxu0  ;;  %v13272_v20 = vld [vmem:[%s18051_s1] sm:$0xff]  }
0x2c54   : > { %v10013_v50 = vpop.f32.mrb[34].mxu0  ;;  %v13273_v54 = vld [vmem:[%s18051_s1 + $0x80] sm:$0xff]   ;;  %v13275_v60 = vld [vmem:[%s18051_s1 + $0xc8] sm:$0xff]  }
0x2c55   : > { %v17520_v38 = vadd.f32 %v10011_v6, %v17423_v57  ;;  %v12731_v19 = vpop.f32.mrb[35].mxu0  ;;  %v13228_v57 = vld [vmem:[%s18050_s4 + $0x20] ss:$16 sps:$4 sm:$0xff]   ;;  %v13274_v6 = vld [vmem:[%s18051_s1 + $0x48] sm:$0xff]  }
0x2c56   : > { %10259 = vmatpush1.bf16.msra.mxu1 %v13228_v57  ;;  %v13276_v50 = vld [vmem:[%s18051_s1 + $0x8] sm:$0xff]   ;;  %v13285_v57 = vld [vmem:[%s18051_s1 + $0x98] sm:$0xff]  }
0x2c57   : > { %v10017_v9 = vsel %vm9384_vm3, %v17520_v38, 0.0  ;;  %10260 = vmatprep.subr.bf16.mxu1 %v13236_v7  ;;  %v13277_v19 = vld [vmem:[%s18051_s1 + $0x88] sm:$0xff]   ;;  %v13287_v7 = vld [vmem:[%s18051_s1 + $0xe0] sm:$0xff]  }
0x2c58   : > { %10018 = vadd.xlane.f32.xlu1 %v10017_v9  ;;  %v13278_v9 = vld [vmem:[%s18051_s1 + $0x50] sm:$0xff]  }
0x2c5a   : > { %10261 = vmatpush1.bf16.msra.mxu1 %v13234_v11  ;;  %v13289_v11 = vld [vmem:[%s18051_s1 + $0xa0] sm:$0xff]  }
0x2c5b   : > { %10262 = vmatprep.subr.bf16.mxu1 %v13242_v23  ;;  %v13297_v23 = vld [vmem:[%s18051_s1 + $0xb0] sm:$0xff]  }
0x2c5e   : > { %10263 = vmatpush1.bf16.msra.mxu1 %v13240_v0  ;;  %v13299_v0 = vld [vmem:[%s18051_s1 + $0xf8] sm:$0xff]  }
0x2c5f   : > { %10264 = vmatprep.subr.bf16.mxu1 %v13248_v1  ;;  %v13301_v1 = vld [vmem:[%s18051_s1 + $0xb8] sm:$0xff]  }
0x2ce5   : > { %v10019_v51 = vpop.xlane.xlu1 %10018 }
0x2ce6   : > { %v10020_v4 = vmul.f32 0.0078125, %v10019_v51  ;;  %v13291_v51 = vld [vmem:[%s18051_s1 + $0xe8] sm:$0xff]  }
0x2ce8   : > { %v10021_v33 = vsub.f32 %v17520_v38, %v10020_v4  ;;  %v13292_v4 = vld [vmem:[%s18051_s1 + $0x28] sm:$0xff]  }
0x2cea   : > { %v10022_v56 = vmul.f32 %v10021_v33, %v17415_v12  ;;  %v13246_v12 = vld [vmem:[%s18050_s4 + $0x80] ss:$16 sps:$4 sm:$0xff]   ;;  %v13293_v33 = vld [vmem:[%s18051_s1 + $0xa8] sm:$0xff]   ;;  %s18052_s4 = sld [smem:[#allocation31_spill]] }
0x2ceb   : > { %10265 = vmatpush1.bf16.msra.mxu1 %v13246_v12 }
0x2cec   : > { %v10023_v39 = vmul.f32 %v10022_v56, %v10022_v56  ;;  %10266 = vmatprep.subr.bf16.mxu1 %v13254_v53 }
0x2cee   : > { %v10024_v25 = vsel %vm9384_vm3, %v10023_v39, 0.0  ;;  %v13295_v39 = vld [vmem:[%s18051_s1 + $0xf0] sm:$0xff]  }
0x2cef   : > { %10025 = vadd.xlane.f32.xlu0 %v10024_v25  ;;  %10267 = vmatpush1.bf16.msra.mxu1 %v13252_v41  ;;  %v13296_v25 = vld [vmem:[%s18051_s1 + $0x30] sm:$0xff]  }
0x2cf0   : > { %10268 = vmatprep.subr.bf16.mxu1 %v13260_v22  ;;  %v10074_v10 = vld [vmem:[%s18052_s4] sm:$0xf]  ;;  %s10755_s4 = sshll.u32 %s17378_s7, 4  ;;  %s17601_s4 = int_to_ptr.vmem [resolvable:$true] %s10755_s4 }
0x2cf1   : > { %v10079_v12 = vrot.slane %v10074_v10, %v18028_v14  ;;  %v10087_v59 = vrot.slane %v10074_v10, %v18029_v55  ;;  %v10083_v53 = vrot.slane %v10074_v10, %v18027_v61  ;;  %v10091_v46 = vrot.slane %v10074_v10, %v18030_v21  ;;  %s13754_s9 = scalar_lea.vmem %s17601_s4, 256  ;;  %p13761_p0 = scmp.lt.s32.totalorder %s17601_s4, %s13759_s12 }
0x2cf2   : > { %p13755_p11 = scmp.ne.s32.totalorder %s17601_s4, %s13754_s9  ;;  %p13762_p1 = scmp.lt.s32.totalorder %s13760_s13, %s13754_s9 }
0x2cf3   : > { %10269 = vmatpush1.bf16.msra.mxu1 %v13258_v18 }
0x2cf4   : > { %10270 = vmatprep.subr.bf16.mxu1 %v13266_v31  ;;  %p13756_p12 = pnand %p13755_p11, %p14115_p5  ;;  %p13763_p2 = por %p13762_p1, %p13761_p0 }
0x2cf6   : > { %p13757_p13 = pneg %p13756_p12 }
0x2cf7   : > { %10271 = vmatpush1.bf16.msra.mxu1 %v13264_v52 }
0x2cf8   : > { %12078 = vmatprep.subr.bf16.mxu1 %v13270_v3  ;;  %p13764_p3 = pnand %p13763_p2, %p13757_p13 }
0x2d7c   : > { %v10026_v44 = vpop.xlane.xlu0 %10025 }
0x2d7d   : > { %v10027_v24 = vmul.f32 0.0078125, %v10026_v44 }
0x2d7f   : > { %v10028_v42 = vadd.f32 1e-06, %v10027_v24 }
0x2d81   : > { %13740 = vrsqrt.f32 %v10028_v42 }
0x2d8b   : > { %v13741_v35 = vpop.eup %13740 }
0x2d8c   : > { %v10030_v37 = vmul.f32 %v13741_v35, %v10022_v56  ;;  %v13294_v56 = vld [vmem:[%s18051_s1 + $0x70] sm:$0xff]   ;;  %s11413_s1 = sshll.u32 %s14098_s0, 8 }
0x2d8d   : > { %s17605_s5 = scalar_lea.hbm %s14070_s6, %s11413_s1 }
0x2d8e   : > { %v10035_v28 = vmul.f32 %v10034_v34, %v10030_v37 }
0x2d90   : > { %v10040_v15 = vadd.f32 %v10039_v5, %v10035_v28 }
0x2d92   : > { %v10041_v2 = vpack.c.bf16 %v10040_v15, %v10040_v15 }
0x2d94   : > { %10289 = vmatmul.mubr.bf16.vlgmr.msra.gmra.mrb[8].mxu1 %v10041_v2  ;;  %10330 = vmatmul.mubr.bf16.vlgmr.msra.gmra.mrb[36].mxu0 %v10041_v2 }
0x2d95   : > { %12079 = vmatpush3.bf16.msra.mxu1 %v13272_v20  ;;  %12101 = vmatpush3.bf16.msra.mxu0 %v13273_v54 }
0x2d96   : > { %12080 = vmatprep.subr.bf16.mxu1 %v13274_v6  ;;  %12102 = vmatprep.subr.bf16.mxu0 %v13275_v60 }
0x2d99   : > { %12081 = vmatpush3.bf16.msra.mxu1 %v13276_v50  ;;  %12103 = vmatpush3.bf16.msra.mxu0 %v13277_v19 }
0x2d9a   : > { %12082 = vmatprep.subr.bf16.mxu1 %v13278_v9  ;;  %12104 = vmatprep.subr.bf16.mxu0 %v13279_v45 }
0x2d9d   : > { %12083 = vmatpush3.bf16.msra.mxu1 %v13280_v36  ;;  %12105 = vmatpush3.bf16.msra.mxu0 %v13281_v47 }
0x2d9e   : > { %12084 = vmatprep.subr.bf16.mxu1 %v13282_v58  ;;  %12106 = vmatprep.subr.bf16.mxu0 %v13283_v8 }
0x2da1   : > { %12085 = vmatpush3.bf16.msra.mxu1 %v13284_v16  ;;  %12107 = vmatpush3.bf16.msra.mxu0 %v13285_v57 }
0x2da2   : > { %12086 = vmatprep.subr.bf16.mxu1 %v13286_v48  ;;  %12108 = vmatprep.subr.bf16.mxu0 %v13287_v7 }
0x2da5   : > { %12087 = vmatpush3.bf16.msra.mxu1 %v13288_v43  ;;  %12109 = vmatpush3.bf16.msra.mxu0 %v13289_v11 }
0x2da6   : > { %12088 = vmatprep.subr.bf16.mxu1 %v13290_v63  ;;  %12110 = vmatprep.subr.bf16.mxu0 %v13291_v51 }
0x2da9   : > { %12089 = vmatpush3.bf16.msra.mxu1 %v13292_v4  ;;  %12111 = vmatpush3.bf16.msra.mxu0 %v13293_v33 }
0x2daa   : > { %12090 = vmatprep.subr.bf16.mxu1 %v13294_v56  ;;  %12112 = vmatprep.subr.bf16.mxu0 %v13295_v39 }
0x2dad   : > { %12091 = vmatpush3.bf16.msra.mxu1 %v13296_v25  ;;  %12113 = vmatpush3.bf16.msra.mxu0 %v13297_v23 }
0x2dae   : > { %12092 = vmatprep.subr.bf16.mxu1 %v13298_v49  ;;  %12114 = vmatprep.subr.bf16.mxu0 %v13299_v0 }
0x2db1   : > { %12093 = vmatpush3.bf16.msra.mxu1 %v13300_v13  ;;  %12115 = vmatpush3.bf16.msra.mxu0 %v13301_v1 }
0x2e67   : > { %v10290_v41 = vpop.f32.mrb[8].mxu1  ;;  %v10331_v32 = vpop.f32.mrb[36].mxu0 }
0x2e68   : > { %v10291_v18 = vadd.f32 %v10290_v41, %v10079_v12  ;;  %v10332_v22 = vadd.f32 %v10331_v32, %v10087_v59  ;;  %v10292_v62 = vpop.f32.mrb[9].mxu1  ;;  %v10333_v30 = vpop.f32.mrb[37].mxu0 }
0x2e69   : > { %v10293_v31 = vadd.f32 %v10292_v62, %v10083_v53  ;;  %v10334_v29 = vadd.f32 %v10333_v30, %v10091_v46  ;;  %v10294_v52 = vpop.f32.mrb[10].mxu1  ;;  %v10335_v27 = vpop.f32.mrb[38].mxu0 }
0x2e6a   : > { %v10338_v44 = vmul.f32 %v10291_v18, %v10291_v18  ;;  %v10340_v24 = vmul.f32 %v10332_v22, %v10332_v22  ;;  %v10295_v42 = vpop.f32.mrb[11].mxu1  ;;  %v10336_v14 = vpop.f32.mrb[39].mxu0 }
0x2e6b   : > { %v10339_v34 = vmul.f32 %v10293_v31, %v10293_v31  ;;  %v10341_v55 = vmul.f32 %v10334_v29, %v10334_v29 }
0x2e6c   : > { %v10342_v35 = vmul.f32 %v10338_v44, %v10291_v18  ;;  %v10344_v61 = vmul.f32 %v10340_v24, %v10332_v22 }
0x2e6d   : > { %v10343_v5 = vmul.f32 %v10339_v34, %v10293_v31  ;;  %v10345_v21 = vmul.f32 %v10341_v55, %v10334_v29 }
0x2e6e   : > { %v10346_v37 = vmul.f32 0.044715, %v10342_v35  ;;  %v10348_v28 = vmul.f32 0.044715, %v10344_v61 }
0x2e6f   : > { %v10347_v15 = vmul.f32 0.044715, %v10343_v5  ;;  %v10349_v2 = vmul.f32 0.044715, %v10345_v21 }
0x2e70   : > { %v10350_v3 = vadd.f32 %v10346_v37, %v10291_v18  ;;  %v10352_v17 = vadd.f32 %v10348_v28, %v10332_v22 }
0x2e71   : > { %v10351_v20 = vadd.f32 %v10347_v15, %v10293_v31  ;;  %v10353_v54 = vadd.f32 %v10349_v2, %v10334_v29 }
0x2e72   : > { %v10354_v6 = vmul.f32 0.7978846, %v10350_v3  ;;  %v10356_v60 = vmul.f32 0.7978846, %v10352_v17 }
0x2e73   : > { %v10355_v50 = vmul.f32 0.7978846, %v10351_v20  ;;  %v10357_v19 = vmul.f32 0.7978846, %v10353_v54 }
0x2e74   : > { %13742 = vtanh.f32 %v10354_v6 }
0x2e75   : > { %13744 = vtanh.f32 %v10356_v60 }
0x2e76   : > { %13746 = vtanh.f32 %v10355_v50 }
0x2e77   : > { %13748 = vtanh.f32 %v10357_v19 }
0x2e7e   : > { %v13743_v9 = vpop.eup %13742 }
0x2e7f   : > { %v13745_v45 = vpop.eup %13744  ;;  %v10362_v36 = vadd.f32 1.0, %v13743_v9 }
0x2e80   : > { %v13747_v47 = vpop.eup %13746  ;;  %v10364_v58 = vadd.f32 1.0, %v13745_v45 }
0x2e81   : > { %v13749_v8 = vpop.eup %13748  ;;  %v10366_v16 = vmul.f32 0.5, %v10362_v36  ;;  %v10363_v57 = vadd.f32 1.0, %v13747_v47 }
0x2e82   : > { %v10368_v48 = vmul.f32 0.5, %v10364_v58  ;;  %v10365_v7 = vadd.f32 1.0, %v13749_v8 }
0x2e83   : > { %v10367_v43 = vmul.f32 0.5, %v10363_v57  ;;  %v10370_v11 = vmul.f32 %v10366_v16, %v10291_v18 }
0x2e84   : > { %v10369_v63 = vmul.f32 0.5, %v10365_v7  ;;  %v10372_v51 = vmul.f32 %v10368_v48, %v10332_v22 }
0x2e85   : > { %v10371_v4 = vmul.f32 %v10367_v43, %v10293_v31  ;;  %v10374_v39 = vpack.c.bf16 %v10370_v11, %v10370_v11 }
0x2e86   : > { %v10373_v33 = vmul.f32 %v10369_v63, %v10334_v29  ;;  %v10376_v23 = vpack.c.bf16 %v10372_v51, %v10372_v51 }
0x2e87   : > { %v10375_v56 = vpack.c.bf16 %v10371_v4, %v10371_v4 }
0x2e88   : > { %v10377_v25 = vpack.c.bf16 %v10373_v33, %v10373_v33 }
0x2e89   : > { %10670 = vmatprep.mubr.bf16.mxu1 %v10375_v56 }
0x2e8a   : > { %10710 = vmatprep.mubr.bf16.mxu0 %v10377_v25  ;;  %10671 = vmatmul.mubr.bf16.vlgmr.msra.gmra.mrb[12].mxu1 %v10374_v39 }
0x2e8b   : > { %10711 = vmatmul.mubr.bf16.vlgmr.msra.gmra.mrb[40].mxu0 %v10376_v23 }
0x2e8c   : > { %13767 = shalt.err (!%p13764_p3)
}
0x2e8d   : > { %s13768_s7 = scalar_lea.hbm %s17605_s5, 256  ;;  %s13772_s10 = scalar_lea.hbm %s14070_s6, 512 }
0x2e8e   : > { %p13769_p4 = scmp.ne.s32.totalorder %s17605_s5, %s13768_s7  ;;  %p13773_p9 = scmp.lt.u32.totalorder %s17605_s5, %s14070_s6 }
0x2e8f   : > { %p13774_p10 = scmp.lt.u32.totalorder %s13772_s10, %s13768_s7  ;;  %p13776_p12 = scmp.lt.u32.totalorder %s13768_s7, %s17605_s5 }
0x2e90   : > { %p13770_p7 = pnand %p13769_p4, %p14115_p5 }
0x2e91   : > { %p13775_p11 = por %p13774_p10, %p13773_p9 }
0x2e92   : > { %p13771_p8 = pneg %p13770_p7 }
0x2e93   : > { %p13777_p0 = por %p13776_p12, %p13775_p11 }
0x2e95   : > { %p13778_p13 = pnand %p13777_p0, %p13771_p8 }
0x2e97   : > { %13781 = shalt.err (!%p13778_p13)
}
0x2e98   : > { %s13889_s9 = smov 128   ;;  %s13890_s13 = smov 8   ;;  %v10445_v0 = vrot.slane %v17469_v26, %v18003_v40 }
0x2e99   : > { %12733 = dma.vmem_to_hbm [thread:$0]  (%p14115_p5), %s17601_s4, 256, %s17605_s5, %s10731_s8, %s13889_s9, %s13889_s9, %s13890_s13  }
0x2e9a   : > { %s10952_s12 = sshll.u32 %s17372_s3, 2  ;;  %s11407_s1 = sshll.u32 %s14098_s0, 6 }
0x2e9b   : > { %s1088_s8 = scalar_lea.vmem [#allocation4], %s10952_s12  ;;  %s17633_s4 = scalar_lea.hbm %s14075_s20, %s11407_s1 }
0x2e9c   : > { %s10771_s5 = sshll.u32 %s1088_s8, 4  ;;  %s10736_s7 = scalar_lea.sflag [#allocation5], %s17372_s3  ;;  %s17635_s5 = int_to_ptr.vmem [resolvable:$true] %s10771_s5 }
0x2e9d   : > { %s13782_s10 = scalar_lea.vmem %s17635_s5, 64  ;;  %s13891_s0 = smov [#allocation4]  }
0x2e9e   : > { %p13783_p1 = scmp.ne.s32.totalorder %s17635_s5, %s13782_s10  ;;  %s13786_s9 = sshll.u32 %s13891_s0, 4  ;;  %s13787_s9 = int_to_ptr.vmem [resolvable:$false] %s13786_s9 }
0x2e9f   : > { %s13788_s13 = scalar_lea.vmem %s13787_s9, 128  ;;  %p13789_p4 = scmp.lt.s32.totalorder %s17635_s5, %s13787_s9 }
0x2ea0   : > { %p13784_p2 = pnand %p13783_p1, %p14115_p5  ;;  %p13790_p7 = scmp.lt.s32.totalorder %s13788_s13, %s13782_s10 }
0x2ea2   : > { %p13785_p3 = pneg %p13784_p2  ;;  %p13791_p8 = por %p13790_p7, %p13789_p4 }
0x2ea4   : > { %p13792_p9 = pnand %p13791_p8, %p13785_p3 }
0x2f5d   : > { %v12094_v49 = vpop.f32.mrb[12].mxu1 }
0x2f5e   : > { %v12116_v13 = vpop.f32.mrb[40].mxu0  ;;  %v12095_v1 = vpop.f32.mrb[13].mxu1 }
0x2f5f   : > { %v12096_v10 = vadd.f32 %v12095_v1, %v12094_v49  ;;  %v12117_v12 = vpop.f32.mrb[41].mxu0  ;;  %v12097_v59 = vpop.f32.mrb[14].mxu1 }
0x2f60   : > { %v12118_v53 = vadd.f32 %v12117_v12, %v12116_v13  ;;  %v12119_v46 = vpop.f32.mrb[42].mxu0  ;;  %v12098_v41 = vpop.f32.mrb[15].mxu1 }
0x2f61   : > { %v10673_v32 = vadd.f32 %v12096_v10, %v10445_v0  ;;  %v12120_v18 = vpop.f32.mrb[43].mxu0 }
0x2f63   : > { %v10713_v22 = vadd.f32 %v12118_v53, %v10673_v32 }
0x2f65   : > { %v10718_v62 = vadd.f32 %v10713_v22, %v17520_v38 }
0x2f67   : > { %10719 = vst [vmem:[%s1088_s8] sm:$0xf] %v10718_v62 }
0x2f68   : > { %13795 = shalt.err (!%p13792_p9)
}
0x2f69   : > { %s13796_s3 = scalar_lea.hbm %s17633_s4, 64  ;;  %s13800_s12 = scalar_lea.hbm %s14075_s20, 128 }
0x2f6a   : > { %p13797_p10 = scmp.ne.s32.totalorder %s17633_s4, %s13796_s3  ;;  %p13801_p0 = scmp.lt.u32.totalorder %s17633_s4, %s14075_s20 }
0x2f6b   : > { %p13802_p13 = scmp.lt.u32.totalorder %s13800_s12, %s13796_s3  ;;  %p13804_p2 = scmp.lt.u32.totalorder %s13796_s3, %s17633_s4 }
0x2f6c   : > { %p13798_p11 = pnand %p13797_p10, %p14115_p5 }
0x2f6d   : > { %p13803_p1 = por %p13802_p13, %p13801_p0 }
0x2f6e   : > { %p13799_p12 = pneg %p13798_p11 }
0x2f6f   : > { %p13805_p4 = por %p13804_p2, %p13803_p1 }
0x2f71   : > { %p13806_p3 = pnand %p13805_p4, %p13799_p12 }
0x2f73   : > { %13809 = shalt.err (!%p13806_p3)
}
0x2f74   : > { %12734 = dma.vmem_to_hbm [thread:$0]  (%p14115_p5), %s17635_s5, 64, %s17633_s4, %s10736_s7  }
0x2f75 PF: > { %p12744_p7 = scmp.ge.s32.totalorder %s13848_s28, 2  ;;  %s10799_s1 = sand.u32 1, %s13836_s22  }
0x2f76   : > { %s10800_s8 = scalar_lea.sflag [#allocation3], %s10799_s1 }
0x2f77   : > { %p12738_p8 = pnand %p12744_p7, %p14119_p6 }
0x2f79   : > { %13827 = dma.done.wait (!%p12738_p8), %s10800_s8, 256  }
0x2f7a   : > { %13829 = vsyncadd (!%p12738_p8), %s10800_s8, 4294967040  ;;  %s10809_s10 = scalar_lea.sflag [#allocation5], %s10799_s1 }
0x2f7b   : > { %13831 = dma.done.wait (!%p12738_p8), %s10809_s10, 64  }
0x2f7c   : > { %13833 = vsyncadd (!%p12738_p8), %s10809_s10, 4294967232  ;;  %p85_p5 = scmp.ge.s32.totalorder %s14102_s2, 4   ;;  %s18053_s22 = smov %s13840_s23 }
0x2f7d   : > { %s18054_s23 = smov %s13844_s26  ;;  %s18055_s26 = smov %s14113_s11 }
0x2f7e   : > { %s18056_s28 = smov %s14102_s2  ;;  %87 = sbr.rel (!%p85_p5) target bundleno = 76 (0x4c), region = 259 }
0x2f85   :  { %10814 = vsyncpa [#allocation3], 1 }
0x2f86   :  { %10816 = vsyncpa [#allocation3 + $0x1], 1 }
0x2f87   :  { %10817 = vsyncpa [#allocation5], 1 }
0x2f88   :  { %10819 = vsyncpa [#allocation5 + $0x1], 1 }

</bundles_post_ra>
